<compile_context>
chip_gen: v6e
topology: v6e:2x2x1
jax: 0.10.0
libtpu: 0.0.40
codegen_flags: <defaults>
</compile_context>

<pallas_src>
import functools
import math

import jax
import jax.numpy as jnp
from jax.experimental import pallas as pl
from jax.experimental.pallas import tpu as pltpu

NEG_INF = -1e20


def _pick_tile(dim, prefs):
    """Largest preferred tile that evenly divides `dim`, else the full dim."""
    for p in prefs:
        if p <= dim and dim % p == 0:
            return p
    return dim


# ----------------------------------------------------------------------------
# Tiled linear:  y = act(x @ w + b)            (bf16 MXU operands, f32 acc)
# ----------------------------------------------------------------------------

def _matmul_kernel(x_ref, w_ref, b_ref, o_ref, acc_ref, *, activation):
    @pl.when(pl.program_id(2) == 0)
    def _init():
        acc_ref[...] = jnp.zeros_like(acc_ref)

    acc_ref[...] += jnp.dot(x_ref[...], w_ref[...],
                            preferred_element_type=jnp.float32)

    @pl.when(pl.program_id(2) == pl.num_programs(2) - 1)
    def _finalize():
        y = acc_ref[...] + b_ref[...]
        if activation == "relu":
            y = jnp.maximum(y, 0.0)
        o_ref[...] = y.astype(o_ref.dtype)


def linear(x, w, b, activation=None, out_dtype=jnp.float32):
    """x: [M, K], w: [K, N], b: [N] -> [M, N]; (tm, tn, tk)-tiled, pipelined."""
    M, K = x.shape
    N = w.shape[1]
    tm = _pick_tile(M, (256, 128, 64, 32, 16, 8))
    tn = _pick_tile(N, (512, 256, 128))
    tk = _pick_tile(K, (512, 256, 128))
    grid = (M // tm, N // tn, K // tk)
    x = x.astype(jnp.bfloat16)
    w = w.astype(jnp.bfloat16)
    b = b.astype(jnp.float32).reshape(1, N)
    return pl.pallas_call(
        functools.partial(_matmul_kernel, activation=activation),
        grid=grid,
        in_specs=[
            pl.BlockSpec((tm, tk), lambda i, j, k: (i, k)),
            pl.BlockSpec((tk, tn), lambda i, j, k: (k, j)),
            pl.BlockSpec((1, tn), lambda i, j, k: (0, j)),
        ],
        out_specs=pl.BlockSpec((tm, tn), lambda i, j, k: (i, j)),
        out_shape=jax.ShapeDtypeStruct((M, N), out_dtype),
        scratch_shapes=[pltpu.VMEM((tm, tn), jnp.float32)],
        compiler_params=pltpu.CompilerParams(
            dimension_semantics=("parallel", "parallel", "arbitrary")),
    )(x, w, b)


# ----------------------------------------------------------------------------
# Linear with residual-add + LayerNorm fused into the last-K epilogue
# ----------------------------------------------------------------------------

def _matmul_add_ln_kernel(x_ref, w_ref, b_ref, r_ref, g_ref, bt_ref,
                          o_ref, acc_ref, *, eps):
    @pl.when(pl.program_id(2) == 0)
    def _init():
        acc_ref[...] = jnp.zeros_like(acc_ref)

    acc_ref[...] += jnp.dot(x_ref[...], w_ref[...],
                            preferred_element_type=jnp.float32)

    @pl.when(pl.program_id(2) == pl.num_programs(2) - 1)
    def _finalize():
        y = acc_ref[...] + b_ref[...] + r_ref[...].astype(jnp.float32)
        mu = jnp.mean(y, axis=-1, keepdims=True)
        var = jnp.mean(jnp.square(y - mu), axis=-1, keepdims=True)
        y = (y - mu) * jax.lax.rsqrt(var + eps)
        o_ref[...] = (y * g_ref[...] + bt_ref[...]).astype(o_ref.dtype)


def linear_add_layernorm(x, w, b, res, gamma, beta, eps=1e-5,
                         out_dtype=jnp.float32):
    """LayerNorm(x @ w + b + res).  Uses full-N tiles so LN sees the full row."""
    M, K = x.shape
    N = w.shape[1]
    tm = _pick_tile(M, (256, 128, 64, 32, 16, 8))
    tk = _pick_tile(K, (512, 256, 128))
    grid = (M // tm, 1, K // tk)
    x = x.astype(jnp.bfloat16)
    w = w.astype(jnp.bfloat16)
    return pl.pallas_call(
        functools.partial(_matmul_add_ln_kernel, eps=eps),
        grid=grid,
        in_specs=[
            pl.BlockSpec((tm, tk), lambda i, j, k: (i, k)),
            pl.BlockSpec((tk, N), lambda i, j, k: (k, 0)),
            pl.BlockSpec((1, N), lambda i, j, k: (0, 0)),
            pl.BlockSpec((tm, N), lambda i, j, k: (i, 0)),
            pl.BlockSpec((1, N), lambda i, j, k: (0, 0)),
            pl.BlockSpec((1, N), lambda i, j, k: (0, 0)),
        ],
        out_specs=pl.BlockSpec((tm, N), lambda i, j, k: (i, 0)),
        out_shape=jax.ShapeDtypeStruct((M, N), out_dtype),
        scratch_shapes=[pltpu.VMEM((tm, N), jnp.float32)],
        compiler_params=pltpu.CompilerParams(
            dimension_semantics=("parallel", "parallel", "arbitrary")),
    )(x, w, b.astype(jnp.float32).reshape(1, N),
      res.astype(jnp.float32),
      gamma.astype(jnp.float32).reshape(1, N),
      beta.astype(jnp.float32).reshape(1, N))


# ----------------------------------------------------------------------------
# Flash-style multi-head attention: grid = (B, Sq-blocks, Sk-blocks)
# ----------------------------------------------------------------------------

def _flash_mha_kernel(q_ref, k_ref, v_ref, kmask_ref, o_ref,
                      m_sc, l_sc, acc_sc, *, num_heads, scale, causal, tq, tk):
    D = acc_sc.shape[-1]
    Dh = D // num_heads
    ki = pl.program_id(2)
    nk = pl.num_programs(2)

    @pl.when(ki == 0)
    def _init():
        m_sc[...] = jnp.full_like(m_sc, NEG_INF)
        l_sc[...] = jnp.zeros_like(l_sc)
        acc_sc[...] = jnp.zeros_like(acc_sc)

    # key-padding bias [1, tk]; causal visibility built from absolute positions
    kbias = jnp.where(kmask_ref[0] != 0, 0.0, NEG_INF).astype(jnp.float32)
    if causal:
        rows = pl.program_id(1) * tq + jax.lax.broadcasted_iota(
            jnp.int32, (tq, tk), 0)
        cols = ki * tk + jax.lax.broadcasted_iota(jnp.int32, (tq, tk), 1)
        visible = cols <= rows

    q = q_ref[0]            # [tq, D] (bf16)
    k = k_ref[0]            # [tk, D]
    v = v_ref[0]            # [tk, D]

    for h in range(num_heads):           # static unroll over heads
        sl = slice(h * Dh, (h + 1) * Dh)
        qh = (q[:, sl] * scale).astype(jnp.bfloat16)   # fold softmax scale into q
        kh = k[:, sl].astype(jnp.bfloat16)
        vh = v[:, sl].astype(jnp.bfloat16)
        # QK^T without materializing kh.T (contract on the Dh axis of both).
        s = jax.lax.dot_general(qh, kh, (((1,), (1,)), ((), ())),
                                preferred_element_type=jnp.float32)  # [tq, tk]
        s = s + kbias
        if causal:
            s = jnp.where(visible, s, NEG_INF)

        m_prev = m_sc[h]                                   # [tq, 1]
        m_new = jnp.maximum(m_prev, jnp.max(s, axis=-1, keepdims=True))
        alpha = jnp.exp(m_prev - m_new)
        p = jnp.exp(s - m_new)
        l_sc[h] = alpha * l_sc[h] + jnp.sum(p, axis=-1, keepdims=True)
        acc_sc[:, sl] = alpha * acc_sc[:, sl] + jax.lax.dot_general(
            p.astype(jnp.bfloat16), vh, (((1,), (0,)), ((), ())),
            preferred_element_type=jnp.float32)
        m_sc[h] = m_new

    @pl.when(ki == nk - 1)
    def _finalize():
        for h in range(num_heads):
            sl = slice(h * Dh, (h + 1) * Dh)
            acc_sc[:, sl] = acc_sc[:, sl] * pl.reciprocal(l_sc[h], approx=False)
        o_ref[0] = acc_sc[...].astype(o_ref.dtype)        # lane-dense [tq, D] store


def attention(q_arr, k_arr, v_arr, key_mask, *, num_heads, scale, causal,
              q_off, k_off, v_off, emb_dim, out_dtype=jnp.bfloat16):
    """q/k/v selected from (possibly fused) projection buffers via last-dim
    BlockSpec offsets (block width = emb_dim).  key_mask: [B,1,Sk], nonzero=keep."""
    B, Sq = q_arr.shape[0], q_arr.shape[1]
    Sk = k_arr.shape[1]
    D = emb_dim
    tq = _pick_tile(Sq, (256, 128, 64, 32, 16, 8))
    tk = _pick_tile(Sk, (512, 256, 128))
    grid = (B, Sq // tq, Sk // tk)

    def q_map(b, qi, ki, off=q_off): return (b, qi, off)
    def k_map(b, qi, ki, off=k_off): return (b, ki, off)
    def v_map(b, qi, ki, off=v_off): return (b, ki, off)

    kernel = functools.partial(_flash_mha_kernel, num_heads=num_heads,
                               scale=scale, causal=causal, tq=tq, tk=tk)
    return pl.pallas_call(
        kernel,
        grid=grid,
        in_specs=[
            pl.BlockSpec((1, tq, D), q_map),
            pl.BlockSpec((1, tk, D), k_map),
            pl.BlockSpec((1, tk, D), v_map),
            pl.BlockSpec((1, 1, tk), lambda b, qi, ki: (b, 0, ki)),
        ],
        out_specs=pl.BlockSpec((1, tq, D), lambda b, qi, ki: (b, qi, 0)),
        out_shape=jax.ShapeDtypeStruct((B, Sq, D), out_dtype),
        scratch_shapes=[
            pltpu.VMEM((num_heads, tq, 1), jnp.float32),   # running max
            pltpu.VMEM((num_heads, tq, 1), jnp.float32),   # running sum
            pltpu.VMEM((tq, D), jnp.float32),              # output accumulator
        ],
        compiler_params=pltpu.CompilerParams(
            dimension_semantics=("parallel", "parallel", "arbitrary")),
    )(q_arr, k_arr, v_arr, key_mask)


# ----------------------------------------------------------------------------
# Model glue (plain JAX: embedding lookups, reshapes, parameter plumbing)
# ----------------------------------------------------------------------------

def multi_head_attention(x_q, x_kv, key_mask, p, num_heads, causal, self_attn,
                         ln_g, ln_b):
    """Returns LayerNorm(x_q + Wo @ Attention(...)) — Wo+add+LN fused."""
    B, Sq, D = x_q.shape
    Sk = x_kv.shape[1]
    scale = 1.0 / math.sqrt(D // num_heads)
    fuse_ok = (D % 128 == 0)   # last-dim block offsets need 128-aligned blocks

    if self_attn:
        qkv = linear(x_q.reshape(B * Sq, D), p["w_qkv"], p["b_qkv"],
                     out_dtype=jnp.bfloat16)
        if fuse_ok:
            qkv3 = qkv.reshape(B, Sq, 3 * D)
            q_arr = k_arr = v_arr = qkv3
            q_off, k_off, v_off = 0, 1, 2
        else:
            q_arr = qkv[:, :D].reshape(B, Sq, D)
            k_arr = qkv[:, D:2 * D].reshape(B, Sq, D)
            v_arr = qkv[:, 2 * D:].reshape(B, Sq, D)
            q_off = k_off = v_off = 0
    else:
        q_arr = linear(x_q.reshape(B * Sq, D), p["w_q"], p["b_q"],
                       out_dtype=jnp.bfloat16).reshape(B, Sq, D)
        q_off = 0
        kv = linear(x_kv.reshape(B * Sk, D), p["w_kv"], p["b_kv"],
                    out_dtype=jnp.bfloat16)
        if fuse_ok:
            kv2 = kv.reshape(B, Sk, 2 * D)
            k_arr = v_arr = kv2
            k_off, v_off = 0, 1
        else:
            k_arr = kv[:, :D].reshape(B, Sk, D)
            v_arr = kv[:, D:].reshape(B, Sk, D)
            k_off = v_off = 0

    ctx = attention(q_arr, k_arr, v_arr, key_mask, num_heads=num_heads,
                    scale=scale, causal=causal, q_off=q_off, k_off=k_off,
                    v_off=v_off, emb_dim=D)
    out = linear_add_layernorm(ctx.reshape(B * Sq, D), p["wo"], p["bo"],
                               x_q.reshape(B * Sq, D), ln_g, ln_b)
    return out.reshape(B, Sq, D)


def transformer_block(x_q, x_kv, key_mask, p, num_heads, self_attn,
                      causal=False):
    B, S, D = x_q.shape
    x = multi_head_attention(x_q, x_kv, key_mask, p["attn"], num_heads,
                             causal=causal, self_attn=self_attn,
                             ln_g=p["ln1_g"], ln_b=p["ln1_b"])        # [B,S,D]
    h = linear(x.reshape(B * S, D), p["ff_w1"], p["ff_b1"],
               activation="relu", out_dtype=jnp.bfloat16)
    out = linear_add_layernorm(h, p["ff_w2"], p["ff_b2"],
                               x.reshape(B * S, D), p["ln2_g"], p["ln2_b"])
    return out.reshape(B, S, D)


def decoder_block(x, enc_out, src_key_mask, tgt_key_mask, p, num_heads):
    query = multi_head_attention(x, x, tgt_key_mask, p["self_attn"], num_heads,
                                 causal=True, self_attn=True,
                                 ln_g=p["ln_g"], ln_b=p["ln_b"])
    return transformer_block(query, enc_out, src_key_mask, p["block"],
                             num_heads, self_attn=False, causal=False)


def encoder_forward(src, src_key_mask, params, num_heads):
    S = src.shape[1]
    x = params["tok_emb"][src] + params["pos_emb"][jnp.arange(S)][None, :, :]
    for lp in params["layers"]:
        x = transformer_block(x, x, src_key_mask, lp, num_heads, self_attn=True)
    return x


def decoder_forward(tgt, enc_out, src_key_mask, tgt_key_mask, params, num_heads):
    T = tgt.shape[1]
    x = params["tok_emb"][tgt] + params["pos_emb"][jnp.arange(T)][None, :, :]
    for lp in params["layers"]:
        x = decoder_block(x, enc_out, src_key_mask, tgt_key_mask, lp, num_heads)
    return x


def transformer_forward(src, tgt, params, num_heads,
                        src_padding_idx=0, tgt_padding_idx=0):
    B, S = src.shape
    _, T = tgt.shape
    # Key-padding masks only ([B,1,S] / [B,1,T]); the causal part of the target
    # mask is generated inside the attention kernel from iota (no HBM bias).
    src_key_mask = (src != src_padding_idx).astype(jnp.float32)[:, None, :]
    tgt_key_mask = (tgt != tgt_padding_idx).astype(jnp.float32)[:, None, :]

    enc_out = encoder_forward(src, src_key_mask, params["encoder"], num_heads)
    dec_out = decoder_forward(tgt, enc_out, src_key_mask, tgt_key_mask,
                              params["decoder"], num_heads)

    D = dec_out.shape[-1]
    logits = linear(dec_out.reshape(B * T, D), params["out_w"], params["out_b"],
                    out_dtype=jnp.float32)
    return logits.reshape(B, T, -1)


# ----------------------------------------------------------------------------
# Deterministic parameter initialization (matmul weights stored in bf16)
# ----------------------------------------------------------------------------

def _init_attn(key, D, cross):
    kq, kk, kv, ko = jax.random.split(key, 4)
    wq = jax.random.normal(kq, (D, D), jnp.float32) * 0.02
    wk = jax.random.normal(kk, (D, D), jnp.float32) * 0.02
    wv = jax.random.normal(kv, (D, D), jnp.float32) * 0.02
    wo = jax.random.normal(ko, (D, D), jnp.float32) * 0.02
    if cross:
        p = {"w_q": wq.astype(jnp.bfloat16),
             "b_q": jnp.zeros((D,), jnp.float32),
             "w_kv": jnp.concatenate([wk, wv], axis=1).astype(jnp.bfloat16),
             "b_kv": jnp.zeros((2 * D,), jnp.float32)}
    else:
        p = {"w_qkv": jnp.concatenate([wq, wk, wv], axis=1).astype(jnp.bfloat16),
             "b_qkv": jnp.zeros((3 * D,), jnp.float32)}
    p["wo"] = wo.astype(jnp.bfloat16)
    p["bo"] = jnp.zeros((D,), jnp.float32)
    return p


def _init_block(key, D, F, cross):
    k1, k2, k3 = jax.random.split(key, 3)
    return {"attn": _init_attn(k1, D, cross),
            "ln1_g": jnp.ones((D,), jnp.float32),
            "ln1_b": jnp.zeros((D,), jnp.float32),
            "ff_w1": (jax.random.normal(k2, (D, F), jnp.float32) * 0.02
                      ).astype(jnp.bfloat16),
            "ff_b1": jnp.zeros((F,), jnp.float32),
            "ff_w2": (jax.random.normal(k3, (F, D), jnp.float32) * 0.02
                      ).astype(jnp.bfloat16),
            "ff_b2": jnp.zeros((D,), jnp.float32),
            "ln2_g": jnp.ones((D,), jnp.float32),
            "ln2_b": jnp.zeros((D,), jnp.float32)}


def _init_decoder_layer(key, D, F):
    k1, k2 = jax.random.split(key, 2)
    return {"self_attn": _init_attn(k1, D, cross=False),
            "ln_g": jnp.ones((D,), jnp.float32),
            "ln_b": jnp.zeros((D,), jnp.float32),
            "block": _init_block(k2, D, F, cross=True)}


def init_params(key, src_vocab, tgt_vocab, D, F, num_layers, max_len):
    k_enc, k_dec, k_out, k_et, k_ep, k_dt, k_dp = jax.random.split(key, 7)
    enc_layers = [_init_block(k, D, F, cross=False)
                  for k in jax.random.split(k_enc, num_layers)]
    dec_layers = [_init_decoder_layer(k, D, F)
                  for k in jax.random.split(k_dec, num_layers)]
    return {
        "encoder": {"tok_emb": jax.random.normal(k_et, (src_vocab, D), jnp.float32) * 0.02,
                    "pos_emb": jax.random.normal(k_ep, (max_len, D), jnp.float32) * 0.02,
                    "layers": enc_layers},
        "decoder": {"tok_emb": jax.random.normal(k_dt, (tgt_vocab, D), jnp.float32) * 0.02,
                    "pos_emb": jax.random.normal(k_dp, (max_len, D), jnp.float32) * 0.02,
                    "layers": dec_layers},
        "out_w": (jax.random.normal(k_out, (D, tgt_vocab), jnp.float32) * 0.02
                  ).astype(jnp.bfloat16),
        "out_b": jnp.zeros((tgt_vocab,), jnp.float32),
    }


# ----------------------------------------------------------------------------

if __name__ == "__main__":
    # Small config consistent with the module's constructor arguments
    # (128-aligned emb/vocab so stores are lane-dense and fused-QKV BlockSpec
    #  offsets are legal).
    SRC_VOCAB = 256
    TGT_VOCAB = 256
    EMB_DIM = 128
    FORWARD_DIM = 256
    NUM_HEADS = 4
    NUM_LAYERS = 2
    MAX_LEN = 32
    B, S_SRC, S_TGT = 2, 16, 16

    key = jax.random.PRNGKey(0)
    k_param, k_src, k_tgt = jax.random.split(key, 3)
    params = init_params(k_param, SRC_VOCAB, TGT_VOCAB, EMB_DIM, FORWARD_DIM,
                         NUM_LAYERS, MAX_LEN)

    src = jax.random.randint(k_src, (B, S_SRC), 1, SRC_VOCAB, dtype=jnp.int32)
    tgt = jax.random.randint(k_tgt, (B, S_TGT), 1, TGT_VOCAB, dtype=jnp.int32)
    # introduce some padding tokens (idx 0) to exercise the masks
    src = src.at[:, -3:].set(0)
    tgt = tgt.at[:, -2:].set(0)

    fwd = jax.jit(functools.partial(transformer_forward, num_heads=NUM_HEADS,
                                    src_padding_idx=0, tgt_padding_idx=0))
    logits = fwd(src, tgt, params)
    logits = jax.block_until_ready(logits)
    assert logits.shape == (B, S_TGT, TGT_VOCAB)
    assert bool(jnp.all(jnp.isfinite(logits)))
    print("KERNEL_OK")
</pallas_src>

<mosaic_0001>
module attributes {stable_mosaic.version = 11 : i64} {
  func.func @_flash_mha_kernel(%arg0: i32, %arg1: i32, %arg2: i32, %arg3: memref<1x16x128xbf16, #tpu.memory_space<vmem>>, %arg4: memref<1x16x128xbf16, #tpu.memory_space<vmem>>, %arg5: memref<1x16x128xbf16, #tpu.memory_space<vmem>>, %arg6: memref<1x1x16xf32, #tpu.memory_space<vmem>>, %arg7: memref<1x16x128xbf16, #tpu.memory_space<vmem>>, %arg8: memref<4x16x1xf32, #tpu.memory_space<vmem>>, %arg9: memref<4x16x1xf32, #tpu.memory_space<vmem>>, %arg10: memref<16x128xf32, #tpu.memory_space<vmem>>) attributes {dimension_semantics = [#tpu.dimension_semantics<parallel>, #tpu.dimension_semantics<parallel>, #tpu.dimension_semantics<arbitrary>], iteration_bounds = array<i64: 2, 1, 1>, scalar_prefetch = 0 : i64, scratch_operands = 3 : i64, tpu.core_type = #tpu.core_type<tc>, window_params = [{transform_indices = @transform_0, window_bounds = array<i64: 1, 16, 128>}, {transform_indices = @transform_1, window_bounds = array<i64: 1, 16, 128>}, {transform_indices = @transform_2, window_bounds = array<i64: 1, 16, 128>}, {transform_indices = @transform_3, window_bounds = array<i64: 1, 1, 16>}, {transform_indices = @transform_4, window_bounds = array<i64: 1, 16, 128>}]} {
    %c0_i32 = arith.constant 0 : i32
    %0 = arith.cmpi eq, %arg2, %c0_i32 : i32
    %1 = arith.extui %0 : i1 to i32
    %c0_i32_0 = arith.constant 0 : i32
    %2 = arith.cmpi ne, %1, %c0_i32_0 : i32
    scf.if %2 {
      %cst_94 = arith.constant -1.000000e+20 : f32
      %167 = vector.broadcast %cst_94 : f32 to vector<4x16x1xf32>
      %c0_95 = arith.constant 0 : index
      %c0_96 = arith.constant 0 : index
      %c0_97 = arith.constant 0 : index
      %168 = vector.load %arg8[%c0_95, %c0_96, %c0_97] : memref<4x16x1xf32, #tpu.memory_space<vmem>>, vector<4x16x1xf32>
      tpu.vector_store %arg8[%c0_95, %c0_96, %c0_97], %167 {strides = array<i32>} : memref<4x16x1xf32, #tpu.memory_space<vmem>>, vector<4x16x1xf32>,
      %cst_98 = arith.constant 0.000000e+00 : f32
      %169 = vector.broadcast %cst_98 : f32 to vector<4x16x1xf32>
      %c0_99 = arith.constant 0 : index
      %c0_100 = arith.constant 0 : index
      %c0_101 = arith.constant 0 : index
      %170 = vector.load %arg9[%c0_99, %c0_100, %c0_101] : memref<4x16x1xf32, #tpu.memory_space<vmem>>, vector<4x16x1xf32>
      tpu.vector_store %arg9[%c0_99, %c0_100, %c0_101], %169 {strides = array<i32>} : memref<4x16x1xf32, #tpu.memory_space<vmem>>, vector<4x16x1xf32>,
      %cst_102 = arith.constant 0.000000e+00 : f32
      %171 = vector.broadcast %cst_102 : f32 to vector<16x128xf32>
      %c0_103 = arith.constant 0 : index
      %c0_104 = arith.constant 0 : index
      %172 = vector.load %arg10[%c0_103, %c0_104] : memref<16x128xf32, #tpu.memory_space<vmem>>, vector<16x128xf32>
      tpu.vector_store %arg10[%c0_103, %c0_104], %171 {strides = array<i32>} : memref<16x128xf32, #tpu.memory_space<vmem>>, vector<16x128xf32>,
    } else {
    }
    %c0 = arith.constant 0 : index
    %c0_1 = arith.constant 0 : index
    %c0_2 = arith.constant 0 : index
    %3 = vector.load %arg6[%c0, %c0_1, %c0_2] : memref<1x1x16xf32, #tpu.memory_space<vmem>>, vector<1x1x16xf32>
    %4 = vector.shape_cast %3 : vector<1x1x16xf32> to vector<1x16xf32>
    %cst = arith.constant 0.000000e+00 : f32
    %5 = vector.broadcast %cst : f32 to vector<1x16xf32>
    %6 = arith.cmpf one, %4, %5 : vector<1x16xf32>
    %cst_3 = arith.constant 0.000000e+00 : f32
    %cst_4 = arith.constant -1.000000e+20 : f32
    %7 = vector.broadcast %cst_3 : f32 to vector<1x16xf32>
    %8 = vector.broadcast %cst_4 : f32 to vector<1x16xf32>
    %9 = arith.select %6, %7, %8 : vector<1x16xi1>, vector<1x16xf32>
    %c0_5 = arith.constant 0 : index
    %c0_6 = arith.constant 0 : index
    %c0_7 = arith.constant 0 : index
    %10 = vector.load %arg3[%c0_5, %c0_6, %c0_7] : memref<1x16x128xbf16, #tpu.memory_space<vmem>>, vector<1x16x128xbf16>
    %11 = vector.shape_cast %10 : vector<1x16x128xbf16> to vector<16x128xbf16>
    %c0_8 = arith.constant 0 : index
    %c0_9 = arith.constant 0 : index
    %c0_10 = arith.constant 0 : index
    %12 = vector.load %arg4[%c0_8, %c0_9, %c0_10] : memref<1x16x128xbf16, #tpu.memory_space<vmem>>, vector<1x16x128xbf16>
    %13 = vector.shape_cast %12 : vector<1x16x128xbf16> to vector<16x128xbf16>
    %c0_11 = arith.constant 0 : index
    %c0_12 = arith.constant 0 : index
    %c0_13 = arith.constant 0 : index
    %14 = vector.load %arg5[%c0_11, %c0_12, %c0_13] : memref<1x16x128xbf16, #tpu.memory_space<vmem>>, vector<1x16x128xbf16>
    %15 = vector.shape_cast %14 : vector<1x16x128xbf16> to vector<16x128xbf16>
    %16 = vector.extract_strided_slice %11 {offsets = [0, 0], sizes = [16, 32], strides = [1, 1]} : vector<16x128xbf16> to vector<16x32xbf16>
    %cst_14 = arith.constant 1.767580e-01 : bf16
    %17 = vector.broadcast %cst_14 : bf16 to vector<16x32xbf16>
    %18 = arith.mulf %16, %17 : vector<16x32xbf16>
    %19 = vector.extract_strided_slice %13 {offsets = [0, 0], sizes = [16, 32], strides = [1, 1]} : vector<16x128xbf16> to vector<16x32xbf16>
    %20 = vector.extract_strided_slice %15 {offsets = [0, 0], sizes = [16, 32], strides = [1, 1]} : vector<16x128xbf16> to vector<16x32xbf16>
    %cst_15 = arith.constant dense<0.000000e+00> : vector<16x16xf32>
    %21 = tpu.matmul %18, %19, %cst_15 {dimension_numbers = #tpu.dot_dimension_numbers<[1], [1], [0], [0], [0, 0, 1, 0], [], []>} : vector<16x32xbf16>, vector<16x32xbf16>, vector<16x16xf32> -> vector<16x16xf32>
    %22 = vector.broadcast %9 : vector<1x16xf32> to vector<16x16xf32>
    %23 = arith.addf %21, %22 : vector<16x16xf32>
    %c0_16 = arith.constant 0 : index
    %c0_17 = arith.constant 0 : index
    %c0_18 = arith.constant 0 : index
    %24 = vector.load %arg8[%c0_16, %c0_17, %c0_18] : memref<4x16x1xf32, #tpu.memory_space<vmem>>, vector<1x16x1xf32>
    %25 = vector.shape_cast %24 : vector<1x16x1xf32> to vector<16x1xf32>
    %cst_19 = arith.constant dense<0xFF800000> : vector<16xf32>
    %26 = vector.multi_reduction <maximumf>, %23, %cst_19 [1] : vector<16x16xf32> to vector<16xf32>
    %27 = vector.shape_cast %26 : vector<16xf32> to vector<16x1xf32>
    %28 = arith.maximumf %25, %27 : vector<16x1xf32>
    %29 = arith.subf %25, %28 : vector<16x1xf32>
    %30 = math.exp %29 : vector<16x1xf32>
    %31 = vector.broadcast %28 : vector<16x1xf32> to vector<16x16xf32>
    %32 = arith.subf %23, %31 : vector<16x16xf32>
    %33 = math.exp %32 : vector<16x16xf32>
    %c0_20 = arith.constant 0 : index
    %c0_21 = arith.constant 0 : index
    %c0_22 = arith.constant 0 : index
    %34 = vector.load %arg9[%c0_20, %c0_21, %c0_22] : memref<4x16x1xf32, #tpu.memory_space<vmem>>, vector<1x16x1xf32>
    %35 = vector.shape_cast %34 : vector<1x16x1xf32> to vector<16x1xf32>
    %36 = arith.mulf %30, %35 : vector<16x1xf32>
    %cst_23 = arith.constant dense<0.000000e+00> : vector<16xf32>
    %37 = vector.multi_reduction <add>, %33, %cst_23 [1] : vector<16x16xf32> to vector<16xf32>
    %38 = vector.shape_cast %37 : vector<16xf32> to vector<16x1xf32>
    %39 = arith.addf %36, %38 : vector<16x1xf32>
    %c0_24 = arith.constant 0 : index
    %c0_25 = arith.constant 0 : index
    %c0_26 = arith.constant 0 : index
    %40 = vector.load %arg9[%c0_24, %c0_25, %c0_26] : memref<4x16x1xf32, #tpu.memory_space<vmem>>, vector<1x16x1xf32>
    %41 = vector.shape_cast %40 : vector<1x16x1xf32> to vector<16x1xf32>
    %42 = vector.shape_cast %39 : vector<16x1xf32> to vector<1x16x1xf32>
    tpu.vector_store %arg9[%c0_24, %c0_25, %c0_26], %42 {strides = array<i32>} : memref<4x16x1xf32, #tpu.memory_space<vmem>>, vector<1x16x1xf32>,
    %c0_27 = arith.constant 0 : index
    %c0_28 = arith.constant 0 : index
    %43 = vector.load %arg10[%c0_27, %c0_28] : memref<16x128xf32, #tpu.memory_space<vmem>>, vector<16x32xf32>
    %44 = vector.broadcast %30 : vector<16x1xf32> to vector<16x32xf32>
    %45 = arith.mulf %44, %43 : vector<16x32xf32>
    %46 = arith.truncf %33 : vector<16x16xf32> to vector<16x16xbf16>
    %cst_29 = arith.constant dense<0.000000e+00> : vector<16x32xf32>
    %47 = tpu.matmul %46, %20, %cst_29 {dimension_numbers = #tpu.dot_dimension_numbers<[1], [0], [0], [1], [0, 0, 1, 1], [], []>} : vector<16x16xbf16>, vector<16x32xbf16>, vector<16x32xf32> -> vector<16x32xf32>
    %48 = arith.addf %45, %47 : vector<16x32xf32>
    %c0_30 = arith.constant 0 : index
    %c0_31 = arith.constant 0 : index
    %49 = vector.load %arg10[%c0_30, %c0_31] : memref<16x128xf32, #tpu.memory_space<vmem>>, vector<16x32xf32>
    tpu.vector_store %arg10[%c0_30, %c0_31], %48 {strides = array<i32>} : memref<16x128xf32, #tpu.memory_space<vmem>>, vector<16x32xf32>,
    %c0_32 = arith.constant 0 : index
    %c0_33 = arith.constant 0 : index
    %c0_34 = arith.constant 0 : index
    %50 = vector.load %arg8[%c0_32, %c0_33, %c0_34] : memref<4x16x1xf32, #tpu.memory_space<vmem>>, vector<1x16x1xf32>
    %51 = vector.shape_cast %50 : vector<1x16x1xf32> to vector<16x1xf32>
    %52 = vector.shape_cast %28 : vector<16x1xf32> to vector<1x16x1xf32>
    tpu.vector_store %arg8[%c0_32, %c0_33, %c0_34], %52 {strides = array<i32>} : memref<4x16x1xf32, #tpu.memory_space<vmem>>, vector<1x16x1xf32>,
    %53 = vector.extract_strided_slice %11 {offsets = [0, 32], sizes = [16, 32], strides = [1, 1]} : vector<16x128xbf16> to vector<16x32xbf16>
    %cst_35 = arith.constant 1.767580e-01 : bf16
    %54 = vector.broadcast %cst_35 : bf16 to vector<16x32xbf16>
    %55 = arith.mulf %53, %54 : vector<16x32xbf16>
    %56 = vector.extract_strided_slice %13 {offsets = [0, 32], sizes = [16, 32], strides = [1, 1]} : vector<16x128xbf16> to vector<16x32xbf16>
    %57 = vector.extract_strided_slice %15 {offsets = [0, 32], sizes = [16, 32], strides = [1, 1]} : vector<16x128xbf16> to vector<16x32xbf16>
    %cst_36 = arith.constant dense<0.000000e+00> : vector<16x16xf32>
    %58 = tpu.matmul %55, %56, %cst_36 {dimension_numbers = #tpu.dot_dimension_numbers<[1], [1], [0], [0], [0, 0, 1, 0], [], []>} : vector<16x32xbf16>, vector<16x32xbf16>, vector<16x16xf32> -> vector<16x16xf32>
    %59 = vector.broadcast %9 : vector<1x16xf32> to vector<16x16xf32>
    %60 = arith.addf %58, %59 : vector<16x16xf32>
    %c1 = arith.constant 1 : index
    %c0_37 = arith.constant 0 : index
    %c0_38 = arith.constant 0 : index
    %61 = vector.load %arg8[%c1, %c0_37, %c0_38] : memref<4x16x1xf32, #tpu.memory_space<vmem>>, vector<1x16x1xf32>
    %62 = vector.shape_cast %61 : vector<1x16x1xf32> to vector<16x1xf32>
    %cst_39 = arith.constant dense<0xFF800000> : vector<16xf32>
    %63 = vector.multi_reduction <maximumf>, %60, %cst_39 [1] : vector<16x16xf32> to vector<16xf32>
    %64 = vector.shape_cast %63 : vector<16xf32> to vector<16x1xf32>
    %65 = arith.maximumf %62, %64 : vector<16x1xf32>
    %66 = arith.subf %62, %65 : vector<16x1xf32>
    %67 = math.exp %66 : vector<16x1xf32>
    %68 = vector.broadcast %65 : vector<16x1xf32> to vector<16x16xf32>
    %69 = arith.subf %60, %68 : vector<16x16xf32>
    %70 = math.exp %69 : vector<16x16xf32>
    %c1_40 = arith.constant 1 : index
    %c0_41 = arith.constant 0 : index
    %c0_42 = arith.constant 0 : index
    %71 = vector.load %arg9[%c1_40, %c0_41, %c0_42] : memref<4x16x1xf32, #tpu.memory_space<vmem>>, vector<1x16x1xf32>
    %72 = vector.shape_cast %71 : vector<1x16x1xf32> to vector<16x1xf32>
    %73 = arith.mulf %67, %72 : vector<16x1xf32>
    %cst_43 = arith.constant dense<0.000000e+00> : vector<16xf32>
    %74 = vector.multi_reduction <add>, %70, %cst_43 [1] : vector<16x16xf32> to vector<16xf32>
    %75 = vector.shape_cast %74 : vector<16xf32> to vector<16x1xf32>
    %76 = arith.addf %73, %75 : vector<16x1xf32>
    %c1_44 = arith.constant 1 : index
    %c0_45 = arith.constant 0 : index
    %c0_46 = arith.constant 0 : index
    %77 = vector.load %arg9[%c1_44, %c0_45, %c0_46] : memref<4x16x1xf32, #tpu.memory_space<vmem>>, vector<1x16x1xf32>
    %78 = vector.shape_cast %77 : vector<1x16x1xf32> to vector<16x1xf32>
    %79 = vector.shape_cast %76 : vector<16x1xf32> to vector<1x16x1xf32>
    tpu.vector_store %arg9[%c1_44, %c0_45, %c0_46], %79 {strides = array<i32>} : memref<4x16x1xf32, #tpu.memory_space<vmem>>, vector<1x16x1xf32>,
    %c0_47 = arith.constant 0 : index
    %c32 = arith.constant 32 : index
    %80 = vector.load %arg10[%c0_47, %c32] : memref<16x128xf32, #tpu.memory_space<vmem>>, vector<16x32xf32>
    %81 = vector.broadcast %67 : vector<16x1xf32> to vector<16x32xf32>
    %82 = arith.mulf %81, %80 : vector<16x32xf32>
    %83 = arith.truncf %70 : vector<16x16xf32> to vector<16x16xbf16>
    %cst_48 = arith.constant dense<0.000000e+00> : vector<16x32xf32>
    %84 = tpu.matmul %83, %57, %cst_48 {dimension_numbers = #tpu.dot_dimension_numbers<[1], [0], [0], [1], [0, 0, 1, 1], [], []>} : vector<16x16xbf16>, vector<16x32xbf16>, vector<16x32xf32> -> vector<16x32xf32>
    %85 = arith.addf %82, %84 : vector<16x32xf32>
    %c0_49 = arith.constant 0 : index
    %c32_50 = arith.constant 32 : index
    %86 = vector.load %arg10[%c0_49, %c32_50] : memref<16x128xf32, #tpu.memory_space<vmem>>, vector<16x32xf32>
    tpu.vector_store %arg10[%c0_49, %c32_50], %85 {strides = array<i32>} : memref<16x128xf32, #tpu.memory_space<vmem>>, vector<16x32xf32>,
    %c1_51 = arith.constant 1 : index
    %c0_52 = arith.constant 0 : index
    %c0_53 = arith.constant 0 : index
    %87 = vector.load %arg8[%c1_51, %c0_52, %c0_53] : memref<4x16x1xf32, #tpu.memory_space<vmem>>, vector<1x16x1xf32>
    %88 = vector.shape_cast %87 : vector<1x16x1xf32> to vector<16x1xf32>
    %89 = vector.shape_cast %65 : vector<16x1xf32> to vector<1x16x1xf32>
    tpu.vector_store %arg8[%c1_51, %c0_52, %c0_53], %89 {strides = array<i32>} : memref<4x16x1xf32, #tpu.memory_space<vmem>>, vector<1x16x1xf32>,
    %90 = vector.extract_strided_slice %11 {offsets = [0, 64], sizes = [16, 32], strides = [1, 1]} : vector<16x128xbf16> to vector<16x32xbf16>
    %cst_54 = arith.constant 1.767580e-01 : bf16
    %91 = vector.broadcast %cst_54 : bf16 to vector<16x32xbf16>
    %92 = arith.mulf %90, %91 : vector<16x32xbf16>
    %93 = vector.extract_strided_slice %13 {offsets = [0, 64], sizes = [16, 32], strides = [1, 1]} : vector<16x128xbf16> to vector<16x32xbf16>
    %94 = vector.extract_strided_slice %15 {offsets = [0, 64], sizes = [16, 32], strides = [1, 1]} : vector<16x128xbf16> to vector<16x32xbf16>
    %cst_55 = arith.constant dense<0.000000e+00> : vector<16x16xf32>
    %95 = tpu.matmul %92, %93, %cst_55 {dimension_numbers = #tpu.dot_dimension_numbers<[1], [1], [0], [0], [0, 0, 1, 0], [], []>} : vector<16x32xbf16>, vector<16x32xbf16>, vector<16x16xf32> -> vector<16x16xf32>
    %96 = vector.broadcast %9 : vector<1x16xf32> to vector<16x16xf32>
    %97 = arith.addf %95, %96 : vector<16x16xf32>
    %c2 = arith.constant 2 : index
    %c0_56 = arith.constant 0 : index
    %c0_57 = arith.constant 0 : index
    %98 = vector.load %arg8[%c2, %c0_56, %c0_57] : memref<4x16x1xf32, #tpu.memory_space<vmem>>, vector<1x16x1xf32>
    %99 = vector.shape_cast %98 : vector<1x16x1xf32> to vector<16x1xf32>
    %cst_58 = arith.constant dense<0xFF800000> : vector<16xf32>
    %100 = vector.multi_reduction <maximumf>, %97, %cst_58 [1] : vector<16x16xf32> to vector<16xf32>
    %101 = vector.shape_cast %100 : vector<16xf32> to vector<16x1xf32>
    %102 = arith.maximumf %99, %101 : vector<16x1xf32>
    %103 = arith.subf %99, %102 : vector<16x1xf32>
    %104 = math.exp %103 : vector<16x1xf32>
    %105 = vector.broadcast %102 : vector<16x1xf32> to vector<16x16xf32>
    %106 = arith.subf %97, %105 : vector<16x16xf32>
    %107 = math.exp %106 : vector<16x16xf32>
    %c2_59 = arith.constant 2 : index
    %c0_60 = arith.constant 0 : index
    %c0_61 = arith.constant 0 : index
    %108 = vector.load %arg9[%c2_59, %c0_60, %c0_61] : memref<4x16x1xf32, #tpu.memory_space<vmem>>, vector<1x16x1xf32>
    %109 = vector.shape_cast %108 : vector<1x16x1xf32> to vector<16x1xf32>
    %110 = arith.mulf %104, %109 : vector<16x1xf32>
    %cst_62 = arith.constant dense<0.000000e+00> : vector<16xf32>
    %111 = vector.multi_reduction <add>, %107, %cst_62 [1] : vector<16x16xf32> to vector<16xf32>
    %112 = vector.shape_cast %111 : vector<16xf32> to vector<16x1xf32>
    %113 = arith.addf %110, %112 : vector<16x1xf32>
    %c2_63 = arith.constant 2 : index
    %c0_64 = arith.constant 0 : index
    %c0_65 = arith.constant 0 : index
    %114 = vector.load %arg9[%c2_63, %c0_64, %c0_65] : memref<4x16x1xf32, #tpu.memory_space<vmem>>, vector<1x16x1xf32>
    %115 = vector.shape_cast %114 : vector<1x16x1xf32> to vector<16x1xf32>
    %116 = vector.shape_cast %113 : vector<16x1xf32> to vector<1x16x1xf32>
    tpu.vector_store %arg9[%c2_63, %c0_64, %c0_65], %116 {strides = array<i32>} : memref<4x16x1xf32, #tpu.memory_space<vmem>>, vector<1x16x1xf32>,
    %c0_66 = arith.constant 0 : index
    %c64 = arith.constant 64 : index
    %117 = vector.load %arg10[%c0_66, %c64] : memref<16x128xf32, #tpu.memory_space<vmem>>, vector<16x32xf32>
    %118 = vector.broadcast %104 : vector<16x1xf32> to vector<16x32xf32>
    %119 = arith.mulf %118, %117 : vector<16x32xf32>
    %120 = arith.truncf %107 : vector<16x16xf32> to vector<16x16xbf16>
    %cst_67 = arith.constant dense<0.000000e+00> : vector<16x32xf32>
    %121 = tpu.matmul %120, %94, %cst_67 {dimension_numbers = #tpu.dot_dimension_numbers<[1], [0], [0], [1], [0, 0, 1, 1], [], []>} : vector<16x16xbf16>, vector<16x32xbf16>, vector<16x32xf32> -> vector<16x32xf32>
    %122 = arith.addf %119, %121 : vector<16x32xf32>
    %c0_68 = arith.constant 0 : index
    %c64_69 = arith.constant 64 : index
    %123 = vector.load %arg10[%c0_68, %c64_69] : memref<16x128xf32, #tpu.memory_space<vmem>>, vector<16x32xf32>
    tpu.vector_store %arg10[%c0_68, %c64_69], %122 {strides = array<i32>} : memref<16x128xf32, #tpu.memory_space<vmem>>, vector<16x32xf32>,
    %c2_70 = arith.constant 2 : index
    %c0_71 = arith.constant 0 : index
    %c0_72 = arith.constant 0 : index
    %124 = vector.load %arg8[%c2_70, %c0_71, %c0_72] : memref<4x16x1xf32, #tpu.memory_space<vmem>>, vector<1x16x1xf32>
    %125 = vector.shape_cast %124 : vector<1x16x1xf32> to vector<16x1xf32>
    %126 = vector.shape_cast %102 : vector<16x1xf32> to vector<1x16x1xf32>
    tpu.vector_store %arg8[%c2_70, %c0_71, %c0_72], %126 {strides = array<i32>} : memref<4x16x1xf32, #tpu.memory_space<vmem>>, vector<1x16x1xf32>,
    %127 = vector.extract_strided_slice %11 {offsets = [0, 96], sizes = [16, 32], strides = [1, 1]} : vector<16x128xbf16> to vector<16x32xbf16>
    %cst_73 = arith.constant 1.767580e-01 : bf16
    %128 = vector.broadcast %cst_73 : bf16 to vector<16x32xbf16>
    %129 = arith.mulf %127, %128 : vector<16x32xbf16>
    %130 = vector.extract_strided_slice %13 {offsets = [0, 96], sizes = [16, 32], strides = [1, 1]} : vector<16x128xbf16> to vector<16x32xbf16>
    %131 = vector.extract_strided_slice %15 {offsets = [0, 96], sizes = [16, 32], strides = [1, 1]} : vector<16x128xbf16> to vector<16x32xbf16>
    %cst_74 = arith.constant dense<0.000000e+00> : vector<16x16xf32>
    %132 = tpu.matmul %129, %130, %cst_74 {dimension_numbers = #tpu.dot_dimension_numbers<[1], [1], [0], [0], [0, 0, 1, 0], [], []>} : vector<16x32xbf16>, vector<16x32xbf16>, vector<16x16xf32> -> vector<16x16xf32>
    %133 = vector.broadcast %9 : vector<1x16xf32> to vector<16x16xf32>
    %134 = arith.addf %132, %133 : vector<16x16xf32>
    %c3 = arith.constant 3 : index
    %c0_75 = arith.constant 0 : index
    %c0_76 = arith.constant 0 : index
    %135 = vector.load %arg8[%c3, %c0_75, %c0_76] : memref<4x16x1xf32, #tpu.memory_space<vmem>>, vector<1x16x1xf32>
    %136 = vector.shape_cast %135 : vector<1x16x1xf32> to vector<16x1xf32>
    %cst_77 = arith.constant dense<0xFF800000> : vector<16xf32>
    %137 = vector.multi_reduction <maximumf>, %134, %cst_77 [1] : vector<16x16xf32> to vector<16xf32>
    %138 = vector.shape_cast %137 : vector<16xf32> to vector<16x1xf32>
    %139 = arith.maximumf %136, %138 : vector<16x1xf32>
    %140 = arith.subf %136, %139 : vector<16x1xf32>
    %141 = math.exp %140 : vector<16x1xf32>
    %142 = vector.broadcast %139 : vector<16x1xf32> to vector<16x16xf32>
    %143 = arith.subf %134, %142 : vector<16x16xf32>
    %144 = math.exp %143 : vector<16x16xf32>
    %c3_78 = arith.constant 3 : index
    %c0_79 = arith.constant 0 : index
    %c0_80 = arith.constant 0 : index
    %145 = vector.load %arg9[%c3_78, %c0_79, %c0_80] : memref<4x16x1xf32, #tpu.memory_space<vmem>>, vector<1x16x1xf32>
    %146 = vector.shape_cast %145 : vector<1x16x1xf32> to vector<16x1xf32>
    %147 = arith.mulf %141, %146 : vector<16x1xf32>
    %cst_81 = arith.constant dense<0.000000e+00> : vector<16xf32>
    %148 = vector.multi_reduction <add>, %144, %cst_81 [1] : vector<16x16xf32> to vector<16xf32>
    %149 = vector.shape_cast %148 : vector<16xf32> to vector<16x1xf32>
    %150 = arith.addf %147, %149 : vector<16x1xf32>
    %c3_82 = arith.constant 3 : index
    %c0_83 = arith.constant 0 : index
    %c0_84 = arith.constant 0 : index
    %151 = vector.load %arg9[%c3_82, %c0_83, %c0_84] : memref<4x16x1xf32, #tpu.memory_space<vmem>>, vector<1x16x1xf32>
    %152 = vector.shape_cast %151 : vector<1x16x1xf32> to vector<16x1xf32>
    %153 = vector.shape_cast %150 : vector<16x1xf32> to vector<1x16x1xf32>
    tpu.vector_store %arg9[%c3_82, %c0_83, %c0_84], %153 {strides = array<i32>} : memref<4x16x1xf32, #tpu.memory_space<vmem>>, vector<1x16x1xf32>,
    %c0_85 = arith.constant 0 : index
    %c96 = arith.constant 96 : index
    %154 = vector.load %arg10[%c0_85, %c96] : memref<16x128xf32, #tpu.memory_space<vmem>>, vector<16x32xf32>
    %155 = vector.broadcast %141 : vector<16x1xf32> to vector<16x32xf32>
    %156 = arith.mulf %155, %154 : vector<16x32xf32>
    %157 = arith.truncf %144 : vector<16x16xf32> to vector<16x16xbf16>
    %cst_86 = arith.constant dense<0.000000e+00> : vector<16x32xf32>
    %158 = tpu.matmul %157, %131, %cst_86 {dimension_numbers = #tpu.dot_dimension_numbers<[1], [0], [0], [1], [0, 0, 1, 1], [], []>} : vector<16x16xbf16>, vector<16x32xbf16>, vector<16x32xf32> -> vector<16x32xf32>
    %159 = arith.addf %156, %158 : vector<16x32xf32>
    %c0_87 = arith.constant 0 : index
    %c96_88 = arith.constant 96 : index
    %160 = vector.load %arg10[%c0_87, %c96_88] : memref<16x128xf32, #tpu.memory_space<vmem>>, vector<16x32xf32>
    tpu.vector_store %arg10[%c0_87, %c96_88], %159 {strides = array<i32>} : memref<16x128xf32, #tpu.memory_space<vmem>>, vector<16x32xf32>,
    %c3_89 = arith.constant 3 : index
    %c0_90 = arith.constant 0 : index
    %c0_91 = arith.constant 0 : index
    %161 = vector.load %arg8[%c3_89, %c0_90, %c0_91] : memref<4x16x1xf32, #tpu.memory_space<vmem>>, vector<1x16x1xf32>
    %162 = vector.shape_cast %161 : vector<1x16x1xf32> to vector<16x1xf32>
    %163 = vector.shape_cast %139 : vector<16x1xf32> to vector<1x16x1xf32>
    tpu.vector_store %arg8[%c3_89, %c0_90, %c0_91], %163 {strides = array<i32>} : memref<4x16x1xf32, #tpu.memory_space<vmem>>, vector<1x16x1xf32>,
    %c0_i32_92 = arith.constant 0 : i32
    %164 = arith.cmpi eq, %arg2, %c0_i32_92 : i32
    %165 = arith.extui %164 : i1 to i32
    %c0_i32_93 = arith.constant 0 : i32
    %166 = arith.cmpi ne, %165, %c0_i32_93 : i32
    scf.if %166 {
      %c0_94 = arith.constant 0 : index
      %c0_95 = arith.constant 0 : index
      %167 = vector.load %arg10[%c0_94, %c0_95] : memref<16x128xf32, #tpu.memory_space<vmem>>, vector<16x32xf32>
      %c0_96 = arith.constant 0 : index
      %c0_97 = arith.constant 0 : index
      %c0_98 = arith.constant 0 : index
      %168 = vector.load %arg9[%c0_96, %c0_97, %c0_98] : memref<4x16x1xf32, #tpu.memory_space<vmem>>, vector<1x16x1xf32>
      %169 = vector.shape_cast %168 : vector<1x16x1xf32> to vector<16x1xf32>
      %170 = tpu.reciprocal %169 : vector<16x1xf32> -> vector<16x1xf32>
      %171 = vector.broadcast %170 : vector<16x1xf32> to vector<16x32xf32>
      %172 = arith.mulf %167, %171 : vector<16x32xf32>
      %c0_99 = arith.constant 0 : index
      %c0_100 = arith.constant 0 : index
      %173 = vector.load %arg10[%c0_99, %c0_100] : memref<16x128xf32, #tpu.memory_space<vmem>>, vector<16x32xf32>
      tpu.vector_store %arg10[%c0_99, %c0_100], %172 {strides = array<i32>} : memref<16x128xf32, #tpu.memory_space<vmem>>, vector<16x32xf32>,
      %c0_101 = arith.constant 0 : index
      %c32_102 = arith.constant 32 : index
      %174 = vector.load %arg10[%c0_101, %c32_102] : memref<16x128xf32, #tpu.memory_space<vmem>>, vector<16x32xf32>
      %c1_103 = arith.constant 1 : index
      %c0_104 = arith.constant 0 : index
      %c0_105 = arith.constant 0 : index
      %175 = vector.load %arg9[%c1_103, %c0_104, %c0_105] : memref<4x16x1xf32, #tpu.memory_space<vmem>>, vector<1x16x1xf32>
      %176 = vector.shape_cast %175 : vector<1x16x1xf32> to vector<16x1xf32>
      %177 = tpu.reciprocal %176 : vector<16x1xf32> -> vector<16x1xf32>
      %178 = vector.broadcast %177 : vector<16x1xf32> to vector<16x32xf32>
      %179 = arith.mulf %174, %178 : vector<16x32xf32>
      %c0_106 = arith.constant 0 : index
      %c32_107 = arith.constant 32 : index
      %180 = vector.load %arg10[%c0_106, %c32_107] : memref<16x128xf32, #tpu.memory_space<vmem>>, vector<16x32xf32>
      tpu.vector_store %arg10[%c0_106, %c32_107], %179 {strides = array<i32>} : memref<16x128xf32, #tpu.memory_space<vmem>>, vector<16x32xf32>,
      %c0_108 = arith.constant 0 : index
      %c64_109 = arith.constant 64 : index
      %181 = vector.load %arg10[%c0_108, %c64_109] : memref<16x128xf32, #tpu.memory_space<vmem>>, vector<16x32xf32>
      %c2_110 = arith.constant 2 : index
      %c0_111 = arith.constant 0 : index
      %c0_112 = arith.constant 0 : index
      %182 = vector.load %arg9[%c2_110, %c0_111, %c0_112] : memref<4x16x1xf32, #tpu.memory_space<vmem>>, vector<1x16x1xf32>
      %183 = vector.shape_cast %182 : vector<1x16x1xf32> to vector<16x1xf32>
      %184 = tpu.reciprocal %183 : vector<16x1xf32> -> vector<16x1xf32>
      %185 = vector.broadcast %184 : vector<16x1xf32> to vector<16x32xf32>
      %186 = arith.mulf %181, %185 : vector<16x32xf32>
      %c0_113 = arith.constant 0 : index
      %c64_114 = arith.constant 64 : index
      %187 = vector.load %arg10[%c0_113, %c64_114] : memref<16x128xf32, #tpu.memory_space<vmem>>, vector<16x32xf32>
      tpu.vector_store %arg10[%c0_113, %c64_114], %186 {strides = array<i32>} : memref<16x128xf32, #tpu.memory_space<vmem>>, vector<16x32xf32>,
      %c0_115 = arith.constant 0 : index
      %c96_116 = arith.constant 96 : index
      %188 = vector.load %arg10[%c0_115, %c96_116] : memref<16x128xf32, #tpu.memory_space<vmem>>, vector<16x32xf32>
      %c3_117 = arith.constant 3 : index
      %c0_118 = arith.constant 0 : index
      %c0_119 = arith.constant 0 : index
      %189 = vector.load %arg9[%c3_117, %c0_118, %c0_119] : memref<4x16x1xf32, #tpu.memory_space<vmem>>, vector<1x16x1xf32>
      %190 = vector.shape_cast %189 : vector<1x16x1xf32> to vector<16x1xf32>
      %191 = tpu.reciprocal %190 : vector<16x1xf32> -> vector<16x1xf32>
      %192 = vector.broadcast %191 : vector<16x1xf32> to vector<16x32xf32>
      %193 = arith.mulf %188, %192 : vector<16x32xf32>
      %c0_120 = arith.constant 0 : index
      %c96_121 = arith.constant 96 : index
      %194 = vector.load %arg10[%c0_120, %c96_121] : memref<16x128xf32, #tpu.memory_space<vmem>>, vector<16x32xf32>
      tpu.vector_store %arg10[%c0_120, %c96_121], %193 {strides = array<i32>} : memref<16x128xf32, #tpu.memory_space<vmem>>, vector<16x32xf32>,
      %c0_122 = arith.constant 0 : index
      %c0_123 = arith.constant 0 : index
      %195 = vector.load %arg10[%c0_122, %c0_123] : memref<16x128xf32, #tpu.memory_space<vmem>>, vector<16x128xf32>
      %196 = arith.truncf %195 : vector<16x128xf32> to vector<16x128xbf16>
      %c0_124 = arith.constant 0 : index
      %c0_125 = arith.constant 0 : index
      %c0_126 = arith.constant 0 : index
      %197 = vector.load %arg7[%c0_124, %c0_125, %c0_126] : memref<1x16x128xbf16, #tpu.memory_space<vmem>>, vector<1x16x128xbf16>
      %198 = vector.shape_cast %197 : vector<1x16x128xbf16> to vector<16x128xbf16>
      %199 = vector.shape_cast %196 : vector<16x128xbf16> to vector<1x16x128xbf16>
      tpu.vector_store %arg7[%c0_124, %c0_125, %c0_126], %199 {strides = array<i32>} : memref<1x16x128xbf16, #tpu.memory_space<vmem>>, vector<1x16x128xbf16>,
    } else {
    }
    return
  }
  func.func @transform_0(%arg0: i32, %arg1: i32, %arg2: i32) -> (i32, i32, i32) {
    %c0_i32 = arith.constant 0 : i32
    %c0_i32_0 = arith.constant 0 : i32
    return %arg0, %arg1, %c0_i32 : i32, i32, i32
  }
  func.func @transform_1(%arg0: i32, %arg1: i32, %arg2: i32) -> (i32, i32, i32) {
    %c1_i32 = arith.constant 1 : i32
    %c0_i32 = arith.constant 0 : i32
    return %arg0, %arg2, %c1_i32 : i32, i32, i32
  }
  func.func @transform_2(%arg0: i32, %arg1: i32, %arg2: i32) -> (i32, i32, i32) {
    %c2_i32 = arith.constant 2 : i32
    %c0_i32 = arith.constant 0 : i32
    return %arg0, %arg2, %c2_i32 : i32, i32, i32
  }
  func.func @transform_3(%arg0: i32, %arg1: i32, %arg2: i32) -> (i32, i32, i32) {
    %c0_i32 = arith.constant 0 : i32
    %c0_i32_0 = arith.constant 0 : i32
    return %arg0, %c0_i32, %arg2 : i32, i32, i32
  }
  func.func @transform_4(%arg0: i32, %arg1: i32, %arg2: i32) -> (i32, i32, i32) {
    %c0_i32 = arith.constant 0 : i32
    %c0_i32_0 = arith.constant 0 : i32
    return %arg0, %arg1, %c0_i32 : i32, i32, i32
  }
}

module attributes {stable_mosaic.version = 11 : i64} {
  func.func @_matmul_kernel(%arg0: i32, %arg1: i32, %arg2: i32, %arg3: memref<32x128xbf16, #tpu.memory_space<vmem>>, %arg4: memref<128x128xbf16, #tpu.memory_space<vmem>>, %arg5: memref<1x128xf32, #tpu.memory_space<vmem>>, %arg6: memref<32x128xbf16, #tpu.memory_space<vmem>>, %arg7: memref<32x128xf32, #tpu.memory_space<vmem>>) attributes {dimension_semantics = [#tpu.dimension_semantics<parallel>, #tpu.dimension_semantics<parallel>, #tpu.dimension_semantics<arbitrary>], iteration_bounds = array<i64: 1, 3, 1>, scalar_prefetch = 0 : i64, scratch_operands = 1 : i64, tpu.core_type = #tpu.core_type<tc>, window_params = [{transform_indices = @transform_0, window_bounds = array<i64: 32, 128>}, {transform_indices = @transform_1, window_bounds = array<i64: 128, 128>}, {transform_indices = @transform_2, window_bounds = array<i64: 1, 128>}, {transform_indices = @transform_3, window_bounds = array<i64: 32, 128>}]} {
    %c0_i32 = arith.constant 0 : i32
    %0 = arith.cmpi eq, %arg2, %c0_i32 : i32
    %1 = arith.extui %0 : i1 to i32
    %c0_i32_0 = arith.constant 0 : i32
    %2 = arith.cmpi ne, %1, %c0_i32_0 : i32
    scf.if %2 {
      %cst_10 = arith.constant 0.000000e+00 : f32
      %12 = vector.broadcast %cst_10 : f32 to vector<32x128xf32>
      %c0_11 = arith.constant 0 : index
      %c0_12 = arith.constant 0 : index
      %13 = vector.load %arg7[%c0_11, %c0_12] : memref<32x128xf32, #tpu.memory_space<vmem>>, vector<32x128xf32>
      tpu.vector_store %arg7[%c0_11, %c0_12], %12 {strides = array<i32>} : memref<32x128xf32, #tpu.memory_space<vmem>>, vector<32x128xf32>,
    } else {
    }
    %c0 = arith.constant 0 : index
    %c0_1 = arith.constant 0 : index
    %3 = vector.load %arg7[%c0, %c0_1] : memref<32x128xf32, #tpu.memory_space<vmem>>, vector<32x128xf32>
    %c0_2 = arith.constant 0 : index
    %c0_3 = arith.constant 0 : index
    %4 = vector.load %arg3[%c0_2, %c0_3] : memref<32x128xbf16, #tpu.memory_space<vmem>>, vector<32x128xbf16>
    %c0_4 = arith.constant 0 : index
    %c0_5 = arith.constant 0 : index
    %5 = vector.load %arg4[%c0_4, %c0_5] : memref<128x128xbf16, #tpu.memory_space<vmem>>, vector<128x128xbf16>
    %cst = arith.constant dense<0.000000e+00> : vector<32x128xf32>
    %6 = tpu.matmul %4, %5, %cst {dimension_numbers = #tpu.dot_dimension_numbers<[1], [0], [0], [1], [0, 0, 1, 1], [], []>} : vector<32x128xbf16>, vector<128x128xbf16>, vector<32x128xf32> -> vector<32x128xf32>
    %7 = arith.addf %3, %6 : vector<32x128xf32>
    %c0_6 = arith.constant 0 : index
    %c0_7 = arith.constant 0 : index
    %8 = vector.load %arg7[%c0_6, %c0_7] : memref<32x128xf32, #tpu.memory_space<vmem>>, vector<32x128xf32>
    tpu.vector_store %arg7[%c0_6, %c0_7], %7 {strides = array<i32>} : memref<32x128xf32, #tpu.memory_space<vmem>>, vector<32x128xf32>,
    %c0_i32_8 = arith.constant 0 : i32
    %9 = arith.cmpi eq, %arg2, %c0_i32_8 : i32
    %10 = arith.extui %9 : i1 to i32
    %c0_i32_9 = arith.constant 0 : i32
    %11 = arith.cmpi ne, %10, %c0_i32_9 : i32
    scf.if %11 {
      %c0_10 = arith.constant 0 : index
      %c0_11 = arith.constant 0 : index
      %12 = vector.load %arg7[%c0_10, %c0_11] : memref<32x128xf32, #tpu.memory_space<vmem>>, vector<32x128xf32>
      %c0_12 = arith.constant 0 : index
      %c0_13 = arith.constant 0 : index
      %13 = vector.load %arg5[%c0_12, %c0_13] : memref<1x128xf32, #tpu.memory_space<vmem>>, vector<1x128xf32>
      %14 = vector.broadcast %13 : vector<1x128xf32> to vector<32x128xf32>
      %15 = arith.addf %12, %14 : vector<32x128xf32>
      %16 = arith.truncf %15 : vector<32x128xf32> to vector<32x128xbf16>
      %c0_14 = arith.constant 0 : index
      %c0_15 = arith.constant 0 : index
      %17 = vector.load %arg6[%c0_14, %c0_15] : memref<32x128xbf16, #tpu.memory_space<vmem>>, vector<32x128xbf16>
      tpu.vector_store %arg6[%c0_14, %c0_15], %16 {strides = array<i32>} : memref<32x128xbf16, #tpu.memory_space<vmem>>, vector<32x128xbf16>,
    } else {
    }
    return
  }
  func.func @transform_0(%arg0: i32, %arg1: i32, %arg2: i32) -> (i32, i32) {
    %c0_i32 = arith.constant 0 : i32
    return %arg0, %arg2 : i32, i32
  }
  func.func @transform_1(%arg0: i32, %arg1: i32, %arg2: i32) -> (i32, i32) {
    %c0_i32 = arith.constant 0 : i32
    return %arg2, %arg1 : i32, i32
  }
  func.func @transform_2(%arg0: i32, %arg1: i32, %arg2: i32) -> (i32, i32) {
    %c0_i32 = arith.constant 0 : i32
    %c0_i32_0 = arith.constant 0 : i32
    return %c0_i32, %arg1 : i32, i32
  }
  func.func @transform_3(%arg0: i32, %arg1: i32, %arg2: i32) -> (i32, i32) {
    %c0_i32 = arith.constant 0 : i32
    return %arg0, %arg1 : i32, i32
  }
}

module attributes {stable_mosaic.version = 11 : i64} {
  func.func @_matmul_add_ln_kernel(%arg0: i32, %arg1: i32, %arg2: i32, %arg3: memref<32x128xbf16, #tpu.memory_space<vmem>>, %arg4: memref<128x128xbf16, #tpu.memory_space<vmem>>, %arg5: memref<1x128xf32, #tpu.memory_space<vmem>>, %arg6: memref<32x128xf32, #tpu.memory_space<vmem>>, %arg7: memref<1x128xf32, #tpu.memory_space<vmem>>, %arg8: memref<1x128xf32, #tpu.memory_space<vmem>>, %arg9: memref<32x128xf32, #tpu.memory_space<vmem>>, %arg10: memref<32x128xf32, #tpu.memory_space<vmem>>) attributes {dimension_semantics = [#tpu.dimension_semantics<parallel>, #tpu.dimension_semantics<parallel>, #tpu.dimension_semantics<arbitrary>], iteration_bounds = array<i64: 1, 1, 1>, scalar_prefetch = 0 : i64, scratch_operands = 1 : i64, tpu.core_type = #tpu.core_type<tc>, window_params = [{transform_indices = @transform_0, window_bounds = array<i64: 32, 128>}, {transform_indices = @transform_1, window_bounds = array<i64: 128, 128>}, {pipeline_mode = #tpu.pipeline_mode<synchronous>, transform_indices = @transform_2, window_bounds = array<i64: 1, 128>}, {transform_indices = @transform_3, window_bounds = array<i64: 32, 128>}, {pipeline_mode = #tpu.pipeline_mode<synchronous>, transform_indices = @transform_4, window_bounds = array<i64: 1, 128>}, {pipeline_mode = #tpu.pipeline_mode<synchronous>, transform_indices = @transform_5, window_bounds = array<i64: 1, 128>}, {transform_indices = @transform_6, window_bounds = array<i64: 32, 128>}]} {
    %c0_i32 = arith.constant 0 : i32
    %0 = arith.cmpi eq, %arg2, %c0_i32 : i32
    %1 = arith.extui %0 : i1 to i32
    %c0_i32_0 = arith.constant 0 : i32
    %2 = arith.cmpi ne, %1, %c0_i32_0 : i32
    scf.if %2 {
      %cst_10 = arith.constant 0.000000e+00 : f32
      %12 = vector.broadcast %cst_10 : f32 to vector<32x128xf32>
      %c0_11 = arith.constant 0 : index
      %c0_12 = arith.constant 0 : index
      %13 = vector.load %arg10[%c0_11, %c0_12] : memref<32x128xf32, #tpu.memory_space<vmem>>, vector<32x128xf32>
      tpu.vector_store %arg10[%c0_11, %c0_12], %12 {strides = array<i32>} : memref<32x128xf32, #tpu.memory_space<vmem>>, vector<32x128xf32>,
    } else {
    }
    %c0 = arith.constant 0 : index
    %c0_1 = arith.constant 0 : index
    %3 = vector.load %arg10[%c0, %c0_1] : memref<32x128xf32, #tpu.memory_space<vmem>>, vector<32x128xf32>
    %c0_2 = arith.constant 0 : index
    %c0_3 = arith.constant 0 : index
    %4 = vector.load %arg3[%c0_2, %c0_3] : memref<32x128xbf16, #tpu.memory_space<vmem>>, vector<32x128xbf16>
    %c0_4 = arith.constant 0 : index
    %c0_5 = arith.constant 0 : index
    %5 = vector.load %arg4[%c0_4, %c0_5] : memref<128x128xbf16, #tpu.memory_space<vmem>>, vector<128x128xbf16>
    %cst = arith.constant dense<0.000000e+00> : vector<32x128xf32>
    %6 = tpu.matmul %4, %5, %cst {dimension_numbers = #tpu.dot_dimension_numbers<[1], [0], [0], [1], [0, 0, 1, 1], [], []>} : vector<32x128xbf16>, vector<128x128xbf16>, vector<32x128xf32> -> vector<32x128xf32>
    %7 = arith.addf %3, %6 : vector<32x128xf32>
    %c0_6 = arith.constant 0 : index
    %c0_7 = arith.constant 0 : index
    %8 = vector.load %arg10[%c0_6, %c0_7] : memref<32x128xf32, #tpu.memory_space<vmem>>, vector<32x128xf32>
    tpu.vector_store %arg10[%c0_6, %c0_7], %7 {strides = array<i32>} : memref<32x128xf32, #tpu.memory_space<vmem>>, vector<32x128xf32>,
    %c0_i32_8 = arith.constant 0 : i32
    %9 = arith.cmpi eq, %arg2, %c0_i32_8 : i32
    %10 = arith.extui %9 : i1 to i32
    %c0_i32_9 = arith.constant 0 : i32
    %11 = arith.cmpi ne, %10, %c0_i32_9 : i32
    scf.if %11 {
      %c0_10 = arith.constant 0 : index
      %c0_11 = arith.constant 0 : index
      %12 = vector.load %arg10[%c0_10, %c0_11] : memref<32x128xf32, #tpu.memory_space<vmem>>, vector<32x128xf32>
      %c0_12 = arith.constant 0 : index
      %c0_13 = arith.constant 0 : index
      %13 = vector.load %arg5[%c0_12, %c0_13] : memref<1x128xf32, #tpu.memory_space<vmem>>, vector<1x128xf32>
      %14 = vector.broadcast %13 : vector<1x128xf32> to vector<32x128xf32>
      %15 = arith.addf %12, %14 : vector<32x128xf32>
      %c0_14 = arith.constant 0 : index
      %c0_15 = arith.constant 0 : index
      %16 = vector.load %arg6[%c0_14, %c0_15] : memref<32x128xf32, #tpu.memory_space<vmem>>, vector<32x128xf32>
      %17 = arith.addf %15, %16 : vector<32x128xf32>
      %cst_16 = arith.constant dense<0.000000e+00> : vector<32xf32>
      %18 = vector.multi_reduction <add>, %17, %cst_16 [1] : vector<32x128xf32> to vector<32xf32>
      %19 = vector.shape_cast %18 : vector<32xf32> to vector<32x1xf32>
      %cst_17 = arith.constant 1.280000e+02 : f32
      %20 = vector.broadcast %cst_17 : f32 to vector<32x1xf32>
      %21 = arith.divf %19, %20 : vector<32x1xf32>
      %22 = vector.broadcast %21 : vector<32x1xf32> to vector<32x128xf32>
      %23 = arith.subf %17, %22 : vector<32x128xf32>
      %24 = arith.mulf %23, %23 : vector<32x128xf32>
      %cst_18 = arith.constant dense<0.000000e+00> : vector<32xf32>
      %25 = vector.multi_reduction <add>, %24, %cst_18 [1] : vector<32x128xf32> to vector<32xf32>
      %26 = vector.shape_cast %25 : vector<32xf32> to vector<32x1xf32>
      %cst_19 = arith.constant 1.280000e+02 : f32
      %27 = vector.broadcast %cst_19 : f32 to vector<32x1xf32>
      %28 = arith.divf %26, %27 : vector<32x1xf32>
      %29 = vector.broadcast %21 : vector<32x1xf32> to vector<32x128xf32>
      %30 = arith.subf %17, %29 : vector<32x128xf32>
      %cst_20 = arith.constant 9.99999974E-6 : f32
      %31 = vector.broadcast %cst_20 : f32 to vector<32x1xf32>
      %32 = arith.addf %28, %31 : vector<32x1xf32>
      %33 = math.rsqrt %32 : vector<32x1xf32>
      %34 = vector.broadcast %33 : vector<32x1xf32> to vector<32x128xf32>
      %35 = arith.mulf %30, %34 : vector<32x128xf32>
      %c0_21 = arith.constant 0 : index
      %c0_22 = arith.constant 0 : index
      %36 = vector.load %arg7[%c0_21, %c0_22] : memref<1x128xf32, #tpu.memory_space<vmem>>, vector<1x128xf32>
      %37 = vector.broadcast %36 : vector<1x128xf32> to vector<32x128xf32>
      %38 = arith.mulf %35, %37 : vector<32x128xf32>
      %c0_23 = arith.constant 0 : index
      %c0_24 = arith.constant 0 : index
      %39 = vector.load %arg8[%c0_23, %c0_24] : memref<1x128xf32, #tpu.memory_space<vmem>>, vector<1x128xf32>
      %40 = vector.broadcast %39 : vector<1x128xf32> to vector<32x128xf32>
      %41 = arith.addf %38, %40 : vector<32x128xf32>
      %c0_25 = arith.constant 0 : index
      %c0_26 = arith.constant 0 : index
      %42 = vector.load %arg9[%c0_25, %c0_26] : memref<32x128xf32, #tpu.memory_space<vmem>>, vector<32x128xf32>
      tpu.vector_store %arg9[%c0_25, %c0_26], %41 {strides = array<i32>} : memref<32x128xf32, #tpu.memory_space<vmem>>, vector<32x128xf32>,
    } else {
    }
    return
  }
  func.func @transform_0(%arg0: i32, %arg1: i32, %arg2: i32) -> (i32, i32) {
    %c0_i32 = arith.constant 0 : i32
    return %arg0, %arg2 : i32, i32
  }
  func.func @transform_1(%arg0: i32, %arg1: i32, %arg2: i32) -> (i32, i32) {
    %c0_i32 = arith.constant 0 : i32
    %c0_i32_0 = arith.constant 0 : i32
    return %arg2, %c0_i32 : i32, i32
  }
  func.func @transform_2(%arg0: i32, %arg1: i32, %arg2: i32) -> (i32, i32) {
    %c0_i32 = arith.constant 0 : i32
    %c0_i32_0 = arith.constant 0 : i32
    %c0_i32_1 = arith.constant 0 : i32
    return %c0_i32, %c0_i32_0 : i32, i32
  }
  func.func @transform_3(%arg0: i32, %arg1: i32, %arg2: i32) -> (i32, i32) {
    %c0_i32 = arith.constant 0 : i32
    %c0_i32_0 = arith.constant 0 : i32
    return %arg0, %c0_i32 : i32, i32
  }
  func.func @transform_4(%arg0: i32, %arg1: i32, %arg2: i32) -> (i32, i32) {
    %c0_i32 = arith.constant 0 : i32
    %c0_i32_0 = arith.constant 0 : i32
    %c0_i32_1 = arith.constant 0 : i32
    return %c0_i32, %c0_i32_0 : i32, i32
  }
  func.func @transform_5(%arg0: i32, %arg1: i32, %arg2: i32) -> (i32, i32) {
    %c0_i32 = arith.constant 0 : i32
    %c0_i32_0 = arith.constant 0 : i32
    %c0_i32_1 = arith.constant 0 : i32
    return %c0_i32, %c0_i32_0 : i32, i32
  }
  func.func @transform_6(%arg0: i32, %arg1: i32, %arg2: i32) -> (i32, i32) {
    %c0_i32 = arith.constant 0 : i32
    %c0_i32_0 = arith.constant 0 : i32
    return %arg0, %c0_i32 : i32, i32
  }
}

module attributes {stable_mosaic.version = 11 : i64} {
  func.func @_matmul_kernel(%arg0: i32, %arg1: i32, %arg2: i32, %arg3: memref<32x128xbf16, #tpu.memory_space<vmem>>, %arg4: memref<128x256xbf16, #tpu.memory_space<vmem>>, %arg5: memref<1x256xf32, #tpu.memory_space<vmem>>, %arg6: memref<32x256xbf16, #tpu.memory_space<vmem>>, %arg7: memref<32x256xf32, #tpu.memory_space<vmem>>) attributes {dimension_semantics = [#tpu.dimension_semantics<parallel>, #tpu.dimension_semantics<parallel>, #tpu.dimension_semantics<arbitrary>], iteration_bounds = array<i64: 1, 1, 1>, scalar_prefetch = 0 : i64, scratch_operands = 1 : i64, tpu.core_type = #tpu.core_type<tc>, window_params = [{transform_indices = @transform_0, window_bounds = array<i64: 32, 128>}, {transform_indices = @transform_1, window_bounds = array<i64: 128, 256>}, {transform_indices = @transform_2, window_bounds = array<i64: 1, 256>}, {transform_indices = @transform_3, window_bounds = array<i64: 32, 256>}]} {
    %c0_i32 = arith.constant 0 : i32
    %0 = arith.cmpi eq, %arg2, %c0_i32 : i32
    %1 = arith.extui %0 : i1 to i32
    %c0_i32_0 = arith.constant 0 : i32
    %2 = arith.cmpi ne, %1, %c0_i32_0 : i32
    scf.if %2 {
      %cst_10 = arith.constant 0.000000e+00 : f32
      %12 = vector.broadcast %cst_10 : f32 to vector<32x256xf32>
      %c0_11 = arith.constant 0 : index
      %c0_12 = arith.constant 0 : index
      %13 = vector.load %arg7[%c0_11, %c0_12] : memref<32x256xf32, #tpu.memory_space<vmem>>, vector<32x256xf32>
      tpu.vector_store %arg7[%c0_11, %c0_12], %12 {strides = array<i32>} : memref<32x256xf32, #tpu.memory_space<vmem>>, vector<32x256xf32>,
    } else {
    }
    %c0 = arith.constant 0 : index
    %c0_1 = arith.constant 0 : index
    %3 = vector.load %arg7[%c0, %c0_1] : memref<32x256xf32, #tpu.memory_space<vmem>>, vector<32x256xf32>
    %c0_2 = arith.constant 0 : index
    %c0_3 = arith.constant 0 : index
    %4 = vector.load %arg3[%c0_2, %c0_3] : memref<32x128xbf16, #tpu.memory_space<vmem>>, vector<32x128xbf16>
    %c0_4 = arith.constant 0 : index
    %c0_5 = arith.constant 0 : index
    %5 = vector.load %arg4[%c0_4, %c0_5] : memref<128x256xbf16, #tpu.memory_space<vmem>>, vector<128x256xbf16>
    %cst = arith.constant dense<0.000000e+00> : vector<32x256xf32>
    %6 = tpu.matmul %4, %5, %cst {dimension_numbers = #tpu.dot_dimension_numbers<[1], [0], [0], [1], [0, 0, 1, 1], [], []>} : vector<32x128xbf16>, vector<128x256xbf16>, vector<32x256xf32> -> vector<32x256xf32>
    %7 = arith.addf %3, %6 : vector<32x256xf32>
    %c0_6 = arith.constant 0 : index
    %c0_7 = arith.constant 0 : index
    %8 = vector.load %arg7[%c0_6, %c0_7] : memref<32x256xf32, #tpu.memory_space<vmem>>, vector<32x256xf32>
    tpu.vector_store %arg7[%c0_6, %c0_7], %7 {strides = array<i32>} : memref<32x256xf32, #tpu.memory_space<vmem>>, vector<32x256xf32>,
    %c0_i32_8 = arith.constant 0 : i32
    %9 = arith.cmpi eq, %arg2, %c0_i32_8 : i32
    %10 = arith.extui %9 : i1 to i32
    %c0_i32_9 = arith.constant 0 : i32
    %11 = arith.cmpi ne, %10, %c0_i32_9 : i32
    scf.if %11 {
      %c0_10 = arith.constant 0 : index
      %c0_11 = arith.constant 0 : index
      %12 = vector.load %arg7[%c0_10, %c0_11] : memref<32x256xf32, #tpu.memory_space<vmem>>, vector<32x256xf32>
      %c0_12 = arith.constant 0 : index
      %c0_13 = arith.constant 0 : index
      %13 = vector.load %arg5[%c0_12, %c0_13] : memref<1x256xf32, #tpu.memory_space<vmem>>, vector<1x256xf32>
      %14 = vector.broadcast %13 : vector<1x256xf32> to vector<32x256xf32>
      %15 = arith.addf %12, %14 : vector<32x256xf32>
      %cst_14 = arith.constant 0.000000e+00 : f32
      %16 = vector.broadcast %cst_14 : f32 to vector<32x256xf32>
      %17 = arith.maximumf %15, %16 : vector<32x256xf32>
      %18 = arith.truncf %17 : vector<32x256xf32> to vector<32x256xbf16>
      %c0_15 = arith.constant 0 : index
      %c0_16 = arith.constant 0 : index
      %19 = vector.load %arg6[%c0_15, %c0_16] : memref<32x256xbf16, #tpu.memory_space<vmem>>, vector<32x256xbf16>
      tpu.vector_store %arg6[%c0_15, %c0_16], %18 {strides = array<i32>} : memref<32x256xbf16, #tpu.memory_space<vmem>>, vector<32x256xbf16>,
    } else {
    }
    return
  }
  func.func @transform_0(%arg0: i32, %arg1: i32, %arg2: i32) -> (i32, i32) {
    %c0_i32 = arith.constant 0 : i32
    return %arg0, %arg2 : i32, i32
  }
  func.func @transform_1(%arg0: i32, %arg1: i32, %arg2: i32) -> (i32, i32) {
    %c0_i32 = arith.constant 0 : i32
    return %arg2, %arg1 : i32, i32
  }
  func.func @transform_2(%arg0: i32, %arg1: i32, %arg2: i32) -> (i32, i32) {
    %c0_i32 = arith.constant 0 : i32
    %c0_i32_0 = arith.constant 0 : i32
    return %c0_i32, %arg1 : i32, i32
  }
  func.func @transform_3(%arg0: i32, %arg1: i32, %arg2: i32) -> (i32, i32) {
    %c0_i32 = arith.constant 0 : i32
    return %arg0, %arg1 : i32, i32
  }
}

module attributes {stable_mosaic.version = 11 : i64} {
  func.func @_matmul_kernel(%arg0: i32, %arg1: i32, %arg2: i32, %arg3: memref<32x128xbf16, #tpu.memory_space<vmem>>, %arg4: memref<128x256xbf16, #tpu.memory_space<vmem>>, %arg5: memref<1x256xf32, #tpu.memory_space<vmem>>, %arg6: memref<32x256xbf16, #tpu.memory_space<vmem>>, %arg7: memref<32x256xf32, #tpu.memory_space<vmem>>) attributes {dimension_semantics = [#tpu.dimension_semantics<parallel>, #tpu.dimension_semantics<parallel>, #tpu.dimension_semantics<arbitrary>], iteration_bounds = array<i64: 1, 1, 1>, scalar_prefetch = 0 : i64, scratch_operands = 1 : i64, tpu.core_type = #tpu.core_type<tc>, window_params = [{transform_indices = @transform_0, window_bounds = array<i64: 32, 128>}, {transform_indices = @transform_1, window_bounds = array<i64: 128, 256>}, {transform_indices = @transform_2, window_bounds = array<i64: 1, 256>}, {transform_indices = @transform_3, window_bounds = array<i64: 32, 256>}]} {
    %c0_i32 = arith.constant 0 : i32
    %0 = arith.cmpi eq, %arg2, %c0_i32 : i32
    %1 = arith.extui %0 : i1 to i32
    %c0_i32_0 = arith.constant 0 : i32
    %2 = arith.cmpi ne, %1, %c0_i32_0 : i32
    scf.if %2 {
      %cst_10 = arith.constant 0.000000e+00 : f32
      %12 = vector.broadcast %cst_10 : f32 to vector<32x256xf32>
      %c0_11 = arith.constant 0 : index
      %c0_12 = arith.constant 0 : index
      %13 = vector.load %arg7[%c0_11, %c0_12] : memref<32x256xf32, #tpu.memory_space<vmem>>, vector<32x256xf32>
      tpu.vector_store %arg7[%c0_11, %c0_12], %12 {strides = array<i32>} : memref<32x256xf32, #tpu.memory_space<vmem>>, vector<32x256xf32>,
    } else {
    }
    %c0 = arith.constant 0 : index
    %c0_1 = arith.constant 0 : index
    %3 = vector.load %arg7[%c0, %c0_1] : memref<32x256xf32, #tpu.memory_space<vmem>>, vector<32x256xf32>
    %c0_2 = arith.constant 0 : index
    %c0_3 = arith.constant 0 : index
    %4 = vector.load %arg3[%c0_2, %c0_3] : memref<32x128xbf16, #tpu.memory_space<vmem>>, vector<32x128xbf16>
    %c0_4 = arith.constant 0 : index
    %c0_5 = arith.constant 0 : index
    %5 = vector.load %arg4[%c0_4, %c0_5] : memref<128x256xbf16, #tpu.memory_space<vmem>>, vector<128x256xbf16>
    %cst = arith.constant dense<0.000000e+00> : vector<32x256xf32>
    %6 = tpu.matmul %4, %5, %cst {dimension_numbers = #tpu.dot_dimension_numbers<[1], [0], [0], [1], [0, 0, 1, 1], [], []>} : vector<32x128xbf16>, vector<128x256xbf16>, vector<32x256xf32> -> vector<32x256xf32>
    %7 = arith.addf %3, %6 : vector<32x256xf32>
    %c0_6 = arith.constant 0 : index
    %c0_7 = arith.constant 0 : index
    %8 = vector.load %arg7[%c0_6, %c0_7] : memref<32x256xf32, #tpu.memory_space<vmem>>, vector<32x256xf32>
    tpu.vector_store %arg7[%c0_6, %c0_7], %7 {strides = array<i32>} : memref<32x256xf32, #tpu.memory_space<vmem>>, vector<32x256xf32>,
    %c0_i32_8 = arith.constant 0 : i32
    %9 = arith.cmpi eq, %arg2, %c0_i32_8 : i32
    %10 = arith.extui %9 : i1 to i32
    %c0_i32_9 = arith.constant 0 : i32
    %11 = arith.cmpi ne, %10, %c0_i32_9 : i32
    scf.if %11 {
      %c0_10 = arith.constant 0 : index
      %c0_11 = arith.constant 0 : index
      %12 = vector.load %arg7[%c0_10, %c0_11] : memref<32x256xf32, #tpu.memory_space<vmem>>, vector<32x256xf32>
      %c0_12 = arith.constant 0 : index
      %c0_13 = arith.constant 0 : index
      %13 = vector.load %arg5[%c0_12, %c0_13] : memref<1x256xf32, #tpu.memory_space<vmem>>, vector<1x256xf32>
      %14 = vector.broadcast %13 : vector<1x256xf32> to vector<32x256xf32>
      %15 = arith.addf %12, %14 : vector<32x256xf32>
      %16 = arith.truncf %15 : vector<32x256xf32> to vector<32x256xbf16>
      %c0_14 = arith.constant 0 : index
      %c0_15 = arith.constant 0 : index
      %17 = vector.load %arg6[%c0_14, %c0_15] : memref<32x256xbf16, #tpu.memory_space<vmem>>, vector<32x256xbf16>
      tpu.vector_store %arg6[%c0_14, %c0_15], %16 {strides = array<i32>} : memref<32x256xbf16, #tpu.memory_space<vmem>>, vector<32x256xbf16>,
    } else {
    }
    return
  }
  func.func @transform_0(%arg0: i32, %arg1: i32, %arg2: i32) -> (i32, i32) {
    %c0_i32 = arith.constant 0 : i32
    return %arg0, %arg2 : i32, i32
  }
  func.func @transform_1(%arg0: i32, %arg1: i32, %arg2: i32) -> (i32, i32) {
    %c0_i32 = arith.constant 0 : i32
    return %arg2, %arg1 : i32, i32
  }
  func.func @transform_2(%arg0: i32, %arg1: i32, %arg2: i32) -> (i32, i32) {
    %c0_i32 = arith.constant 0 : i32
    %c0_i32_0 = arith.constant 0 : i32
    return %c0_i32, %arg1 : i32, i32
  }
  func.func @transform_3(%arg0: i32, %arg1: i32, %arg2: i32) -> (i32, i32) {
    %c0_i32 = arith.constant 0 : i32
    return %arg0, %arg1 : i32, i32
  }
}

module attributes {stable_mosaic.version = 11 : i64} {
  func.func @_flash_mha_kernel(%arg0: i32, %arg1: i32, %arg2: i32, %arg3: memref<1x16x128xbf16, #tpu.memory_space<vmem>>, %arg4: memref<1x16x128xbf16, #tpu.memory_space<vmem>>, %arg5: memref<1x16x128xbf16, #tpu.memory_space<vmem>>, %arg6: memref<1x1x16xf32, #tpu.memory_space<vmem>>, %arg7: memref<1x16x128xbf16, #tpu.memory_space<vmem>>, %arg8: memref<4x16x1xf32, #tpu.memory_space<vmem>>, %arg9: memref<4x16x1xf32, #tpu.memory_space<vmem>>, %arg10: memref<16x128xf32, #tpu.memory_space<vmem>>) attributes {dimension_semantics = [#tpu.dimension_semantics<parallel>, #tpu.dimension_semantics<parallel>, #tpu.dimension_semantics<arbitrary>], iteration_bounds = array<i64: 2, 1, 1>, scalar_prefetch = 0 : i64, scratch_operands = 3 : i64, tpu.core_type = #tpu.core_type<tc>, window_params = [{transform_indices = @transform_0, window_bounds = array<i64: 1, 16, 128>}, {transform_indices = @transform_1, window_bounds = array<i64: 1, 16, 128>}, {transform_indices = @transform_2, window_bounds = array<i64: 1, 16, 128>}, {transform_indices = @transform_3, window_bounds = array<i64: 1, 1, 16>}, {transform_indices = @transform_4, window_bounds = array<i64: 1, 16, 128>}]} {
    %c0_i32 = arith.constant 0 : i32
    %0 = arith.cmpi eq, %arg2, %c0_i32 : i32
    %1 = arith.extui %0 : i1 to i32
    %c0_i32_0 = arith.constant 0 : i32
    %2 = arith.cmpi ne, %1, %c0_i32_0 : i32
    scf.if %2 {
      %cst_99 = arith.constant -1.000000e+20 : f32
      %184 = vector.broadcast %cst_99 : f32 to vector<4x16x1xf32>
      %c0_100 = arith.constant 0 : index
      %c0_101 = arith.constant 0 : index
      %c0_102 = arith.constant 0 : index
      %185 = vector.load %arg8[%c0_100, %c0_101, %c0_102] : memref<4x16x1xf32, #tpu.memory_space<vmem>>, vector<4x16x1xf32>
      tpu.vector_store %arg8[%c0_100, %c0_101, %c0_102], %184 {strides = array<i32>} : memref<4x16x1xf32, #tpu.memory_space<vmem>>, vector<4x16x1xf32>,
      %cst_103 = arith.constant 0.000000e+00 : f32
      %186 = vector.broadcast %cst_103 : f32 to vector<4x16x1xf32>
      %c0_104 = arith.constant 0 : index
      %c0_105 = arith.constant 0 : index
      %c0_106 = arith.constant 0 : index
      %187 = vector.load %arg9[%c0_104, %c0_105, %c0_106] : memref<4x16x1xf32, #tpu.memory_space<vmem>>, vector<4x16x1xf32>
      tpu.vector_store %arg9[%c0_104, %c0_105, %c0_106], %186 {strides = array<i32>} : memref<4x16x1xf32, #tpu.memory_space<vmem>>, vector<4x16x1xf32>,
      %cst_107 = arith.constant 0.000000e+00 : f32
      %188 = vector.broadcast %cst_107 : f32 to vector<16x128xf32>
      %c0_108 = arith.constant 0 : index
      %c0_109 = arith.constant 0 : index
      %189 = vector.load %arg10[%c0_108, %c0_109] : memref<16x128xf32, #tpu.memory_space<vmem>>, vector<16x128xf32>
      tpu.vector_store %arg10[%c0_108, %c0_109], %188 {strides = array<i32>} : memref<16x128xf32, #tpu.memory_space<vmem>>, vector<16x128xf32>,
    } else {
    }
    %c0 = arith.constant 0 : index
    %c0_1 = arith.constant 0 : index
    %c0_2 = arith.constant 0 : index
    %3 = vector.load %arg6[%c0, %c0_1, %c0_2] : memref<1x1x16xf32, #tpu.memory_space<vmem>>, vector<1x1x16xf32>
    %4 = vector.shape_cast %3 : vector<1x1x16xf32> to vector<1x16xf32>
    %cst = arith.constant 0.000000e+00 : f32
    %5 = vector.broadcast %cst : f32 to vector<1x16xf32>
    %6 = arith.cmpf one, %4, %5 : vector<1x16xf32>
    %cst_3 = arith.constant 0.000000e+00 : f32
    %cst_4 = arith.constant -1.000000e+20 : f32
    %7 = vector.broadcast %cst_3 : f32 to vector<1x16xf32>
    %8 = vector.broadcast %cst_4 : f32 to vector<1x16xf32>
    %9 = arith.select %6, %7, %8 : vector<1x16xi1>, vector<1x16xf32>
    %c16_i32 = arith.constant 16 : i32
    %10 = arith.muli %arg1, %c16_i32 : i32
    %11 = tpu.iota {dimensions = array<i32: 0>} : vector<16x16xi32>
    %12 = vector.broadcast %10 : i32 to vector<16x16xi32>
    %13 = arith.addi %12, %11 : vector<16x16xi32>
    %c16_i32_5 = arith.constant 16 : i32
    %14 = arith.muli %arg2, %c16_i32_5 : i32
    %15 = tpu.iota {dimensions = array<i32: 1>} : vector<16x16xi32>
    %16 = vector.broadcast %14 : i32 to vector<16x16xi32>
    %17 = arith.addi %16, %15 : vector<16x16xi32>
    %18 = arith.cmpi sle, %17, %13 : vector<16x16xi32>
    %c0_6 = arith.constant 0 : index
    %c0_7 = arith.constant 0 : index
    %c0_8 = arith.constant 0 : index
    %19 = vector.load %arg3[%c0_6, %c0_7, %c0_8] : memref<1x16x128xbf16, #tpu.memory_space<vmem>>, vector<1x16x128xbf16>
    %20 = vector.shape_cast %19 : vector<1x16x128xbf16> to vector<16x128xbf16>
    %c0_9 = arith.constant 0 : index
    %c0_10 = arith.constant 0 : index
    %c0_11 = arith.constant 0 : index
    %21 = vector.load %arg4[%c0_9, %c0_10, %c0_11] : memref<1x16x128xbf16, #tpu.memory_space<vmem>>, vector<1x16x128xbf16>
    %22 = vector.shape_cast %21 : vector<1x16x128xbf16> to vector<16x128xbf16>
    %c0_12 = arith.constant 0 : index
    %c0_13 = arith.constant 0 : index
    %c0_14 = arith.constant 0 : index
    %23 = vector.load %arg5[%c0_12, %c0_13, %c0_14] : memref<1x16x128xbf16, #tpu.memory_space<vmem>>, vector<1x16x128xbf16>
    %24 = vector.shape_cast %23 : vector<1x16x128xbf16> to vector<16x128xbf16>
    %25 = vector.extract_strided_slice %20 {offsets = [0, 0], sizes = [16, 32], strides = [1, 1]} : vector<16x128xbf16> to vector<16x32xbf16>
    %cst_15 = arith.constant 1.767580e-01 : bf16
    %26 = vector.broadcast %cst_15 : bf16 to vector<16x32xbf16>
    %27 = arith.mulf %25, %26 : vector<16x32xbf16>
    %28 = vector.extract_strided_slice %22 {offsets = [0, 0], sizes = [16, 32], strides = [1, 1]} : vector<16x128xbf16> to vector<16x32xbf16>
    %29 = vector.extract_strided_slice %24 {offsets = [0, 0], sizes = [16, 32], strides = [1, 1]} : vector<16x128xbf16> to vector<16x32xbf16>
    %cst_16 = arith.constant dense<0.000000e+00> : vector<16x16xf32>
    %30 = tpu.matmul %27, %28, %cst_16 {dimension_numbers = #tpu.dot_dimension_numbers<[1], [1], [0], [0], [0, 0, 1, 0], [], []>} : vector<16x32xbf16>, vector<16x32xbf16>, vector<16x16xf32> -> vector<16x16xf32>
    %31 = vector.broadcast %9 : vector<1x16xf32> to vector<16x16xf32>
    %32 = arith.addf %30, %31 : vector<16x16xf32>
    %cst_17 = arith.constant -1.000000e+20 : f32
    %33 = vector.broadcast %cst_17 : f32 to vector<16x16xf32>
    %34 = arith.select %18, %32, %33 : vector<16x16xi1>, vector<16x16xf32>
    %c0_18 = arith.constant 0 : index
    %c0_19 = arith.constant 0 : index
    %c0_20 = arith.constant 0 : index
    %35 = vector.load %arg8[%c0_18, %c0_19, %c0_20] : memref<4x16x1xf32, #tpu.memory_space<vmem>>, vector<1x16x1xf32>
    %36 = vector.shape_cast %35 : vector<1x16x1xf32> to vector<16x1xf32>
    %cst_21 = arith.constant dense<0xFF800000> : vector<16xf32>
    %37 = vector.multi_reduction <maximumf>, %34, %cst_21 [1] : vector<16x16xf32> to vector<16xf32>
    %38 = vector.shape_cast %37 : vector<16xf32> to vector<16x1xf32>
    %39 = arith.maximumf %36, %38 : vector<16x1xf32>
    %40 = arith.subf %36, %39 : vector<16x1xf32>
    %41 = math.exp %40 : vector<16x1xf32>
    %42 = vector.broadcast %39 : vector<16x1xf32> to vector<16x16xf32>
    %43 = arith.subf %34, %42 : vector<16x16xf32>
    %44 = math.exp %43 : vector<16x16xf32>
    %c0_22 = arith.constant 0 : index
    %c0_23 = arith.constant 0 : index
    %c0_24 = arith.constant 0 : index
    %45 = vector.load %arg9[%c0_22, %c0_23, %c0_24] : memref<4x16x1xf32, #tpu.memory_space<vmem>>, vector<1x16x1xf32>
    %46 = vector.shape_cast %45 : vector<1x16x1xf32> to vector<16x1xf32>
    %47 = arith.mulf %41, %46 : vector<16x1xf32>
    %cst_25 = arith.constant dense<0.000000e+00> : vector<16xf32>
    %48 = vector.multi_reduction <add>, %44, %cst_25 [1] : vector<16x16xf32> to vector<16xf32>
    %49 = vector.shape_cast %48 : vector<16xf32> to vector<16x1xf32>
    %50 = arith.addf %47, %49 : vector<16x1xf32>
    %c0_26 = arith.constant 0 : index
    %c0_27 = arith.constant 0 : index
    %c0_28 = arith.constant 0 : index
    %51 = vector.load %arg9[%c0_26, %c0_27, %c0_28] : memref<4x16x1xf32, #tpu.memory_space<vmem>>, vector<1x16x1xf32>
    %52 = vector.shape_cast %51 : vector<1x16x1xf32> to vector<16x1xf32>
    %53 = vector.shape_cast %50 : vector<16x1xf32> to vector<1x16x1xf32>
    tpu.vector_store %arg9[%c0_26, %c0_27, %c0_28], %53 {strides = array<i32>} : memref<4x16x1xf32, #tpu.memory_space<vmem>>, vector<1x16x1xf32>,
    %c0_29 = arith.constant 0 : index
    %c0_30 = arith.constant 0 : index
    %54 = vector.load %arg10[%c0_29, %c0_30] : memref<16x128xf32, #tpu.memory_space<vmem>>, vector<16x32xf32>
    %55 = vector.broadcast %41 : vector<16x1xf32> to vector<16x32xf32>
    %56 = arith.mulf %55, %54 : vector<16x32xf32>
    %57 = arith.truncf %44 : vector<16x16xf32> to vector<16x16xbf16>
    %cst_31 = arith.constant dense<0.000000e+00> : vector<16x32xf32>
    %58 = tpu.matmul %57, %29, %cst_31 {dimension_numbers = #tpu.dot_dimension_numbers<[1], [0], [0], [1], [0, 0, 1, 1], [], []>} : vector<16x16xbf16>, vector<16x32xbf16>, vector<16x32xf32> -> vector<16x32xf32>
    %59 = arith.addf %56, %58 : vector<16x32xf32>
    %c0_32 = arith.constant 0 : index
    %c0_33 = arith.constant 0 : index
    %60 = vector.load %arg10[%c0_32, %c0_33] : memref<16x128xf32, #tpu.memory_space<vmem>>, vector<16x32xf32>
    tpu.vector_store %arg10[%c0_32, %c0_33], %59 {strides = array<i32>} : memref<16x128xf32, #tpu.memory_space<vmem>>, vector<16x32xf32>,
    %c0_34 = arith.constant 0 : index
    %c0_35 = arith.constant 0 : index
    %c0_36 = arith.constant 0 : index
    %61 = vector.load %arg8[%c0_34, %c0_35, %c0_36] : memref<4x16x1xf32, #tpu.memory_space<vmem>>, vector<1x16x1xf32>
    %62 = vector.shape_cast %61 : vector<1x16x1xf32> to vector<16x1xf32>
    %63 = vector.shape_cast %39 : vector<16x1xf32> to vector<1x16x1xf32>
    tpu.vector_store %arg8[%c0_34, %c0_35, %c0_36], %63 {strides = array<i32>} : memref<4x16x1xf32, #tpu.memory_space<vmem>>, vector<1x16x1xf32>,
    %64 = vector.extract_strided_slice %20 {offsets = [0, 32], sizes = [16, 32], strides = [1, 1]} : vector<16x128xbf16> to vector<16x32xbf16>
    %cst_37 = arith.constant 1.767580e-01 : bf16
    %65 = vector.broadcast %cst_37 : bf16 to vector<16x32xbf16>
    %66 = arith.mulf %64, %65 : vector<16x32xbf16>
    %67 = vector.extract_strided_slice %22 {offsets = [0, 32], sizes = [16, 32], strides = [1, 1]} : vector<16x128xbf16> to vector<16x32xbf16>
    %68 = vector.extract_strided_slice %24 {offsets = [0, 32], sizes = [16, 32], strides = [1, 1]} : vector<16x128xbf16> to vector<16x32xbf16>
    %cst_38 = arith.constant dense<0.000000e+00> : vector<16x16xf32>
    %69 = tpu.matmul %66, %67, %cst_38 {dimension_numbers = #tpu.dot_dimension_numbers<[1], [1], [0], [0], [0, 0, 1, 0], [], []>} : vector<16x32xbf16>, vector<16x32xbf16>, vector<16x16xf32> -> vector<16x16xf32>
    %70 = vector.broadcast %9 : vector<1x16xf32> to vector<16x16xf32>
    %71 = arith.addf %69, %70 : vector<16x16xf32>
    %cst_39 = arith.constant -1.000000e+20 : f32
    %72 = vector.broadcast %cst_39 : f32 to vector<16x16xf32>
    %73 = arith.select %18, %71, %72 : vector<16x16xi1>, vector<16x16xf32>
    %c1 = arith.constant 1 : index
    %c0_40 = arith.constant 0 : index
    %c0_41 = arith.constant 0 : index
    %74 = vector.load %arg8[%c1, %c0_40, %c0_41] : memref<4x16x1xf32, #tpu.memory_space<vmem>>, vector<1x16x1xf32>
    %75 = vector.shape_cast %74 : vector<1x16x1xf32> to vector<16x1xf32>
    %cst_42 = arith.constant dense<0xFF800000> : vector<16xf32>
    %76 = vector.multi_reduction <maximumf>, %73, %cst_42 [1] : vector<16x16xf32> to vector<16xf32>
    %77 = vector.shape_cast %76 : vector<16xf32> to vector<16x1xf32>
    %78 = arith.maximumf %75, %77 : vector<16x1xf32>
    %79 = arith.subf %75, %78 : vector<16x1xf32>
    %80 = math.exp %79 : vector<16x1xf32>
    %81 = vector.broadcast %78 : vector<16x1xf32> to vector<16x16xf32>
    %82 = arith.subf %73, %81 : vector<16x16xf32>
    %83 = math.exp %82 : vector<16x16xf32>
    %c1_43 = arith.constant 1 : index
    %c0_44 = arith.constant 0 : index
    %c0_45 = arith.constant 0 : index
    %84 = vector.load %arg9[%c1_43, %c0_44, %c0_45] : memref<4x16x1xf32, #tpu.memory_space<vmem>>, vector<1x16x1xf32>
    %85 = vector.shape_cast %84 : vector<1x16x1xf32> to vector<16x1xf32>
    %86 = arith.mulf %80, %85 : vector<16x1xf32>
    %cst_46 = arith.constant dense<0.000000e+00> : vector<16xf32>
    %87 = vector.multi_reduction <add>, %83, %cst_46 [1] : vector<16x16xf32> to vector<16xf32>
    %88 = vector.shape_cast %87 : vector<16xf32> to vector<16x1xf32>
    %89 = arith.addf %86, %88 : vector<16x1xf32>
    %c1_47 = arith.constant 1 : index
    %c0_48 = arith.constant 0 : index
    %c0_49 = arith.constant 0 : index
    %90 = vector.load %arg9[%c1_47, %c0_48, %c0_49] : memref<4x16x1xf32, #tpu.memory_space<vmem>>, vector<1x16x1xf32>
    %91 = vector.shape_cast %90 : vector<1x16x1xf32> to vector<16x1xf32>
    %92 = vector.shape_cast %89 : vector<16x1xf32> to vector<1x16x1xf32>
    tpu.vector_store %arg9[%c1_47, %c0_48, %c0_49], %92 {strides = array<i32>} : memref<4x16x1xf32, #tpu.memory_space<vmem>>, vector<1x16x1xf32>,
    %c0_50 = arith.constant 0 : index
    %c32 = arith.constant 32 : index
    %93 = vector.load %arg10[%c0_50, %c32] : memref<16x128xf32, #tpu.memory_space<vmem>>, vector<16x32xf32>
    %94 = vector.broadcast %80 : vector<16x1xf32> to vector<16x32xf32>
    %95 = arith.mulf %94, %93 : vector<16x32xf32>
    %96 = arith.truncf %83 : vector<16x16xf32> to vector<16x16xbf16>
    %cst_51 = arith.constant dense<0.000000e+00> : vector<16x32xf32>
    %97 = tpu.matmul %96, %68, %cst_51 {dimension_numbers = #tpu.dot_dimension_numbers<[1], [0], [0], [1], [0, 0, 1, 1], [], []>} : vector<16x16xbf16>, vector<16x32xbf16>, vector<16x32xf32> -> vector<16x32xf32>
    %98 = arith.addf %95, %97 : vector<16x32xf32>
    %c0_52 = arith.constant 0 : index
    %c32_53 = arith.constant 32 : index
    %99 = vector.load %arg10[%c0_52, %c32_53] : memref<16x128xf32, #tpu.memory_space<vmem>>, vector<16x32xf32>
    tpu.vector_store %arg10[%c0_52, %c32_53], %98 {strides = array<i32>} : memref<16x128xf32, #tpu.memory_space<vmem>>, vector<16x32xf32>,
    %c1_54 = arith.constant 1 : index
    %c0_55 = arith.constant 0 : index
    %c0_56 = arith.constant 0 : index
    %100 = vector.load %arg8[%c1_54, %c0_55, %c0_56] : memref<4x16x1xf32, #tpu.memory_space<vmem>>, vector<1x16x1xf32>
    %101 = vector.shape_cast %100 : vector<1x16x1xf32> to vector<16x1xf32>
    %102 = vector.shape_cast %78 : vector<16x1xf32> to vector<1x16x1xf32>
    tpu.vector_store %arg8[%c1_54, %c0_55, %c0_56], %102 {strides = array<i32>} : memref<4x16x1xf32, #tpu.memory_space<vmem>>, vector<1x16x1xf32>,
    %103 = vector.extract_strided_slice %20 {offsets = [0, 64], sizes = [16, 32], strides = [1, 1]} : vector<16x128xbf16> to vector<16x32xbf16>
    %cst_57 = arith.constant 1.767580e-01 : bf16
    %104 = vector.broadcast %cst_57 : bf16 to vector<16x32xbf16>
    %105 = arith.mulf %103, %104 : vector<16x32xbf16>
    %106 = vector.extract_strided_slice %22 {offsets = [0, 64], sizes = [16, 32], strides = [1, 1]} : vector<16x128xbf16> to vector<16x32xbf16>
    %107 = vector.extract_strided_slice %24 {offsets = [0, 64], sizes = [16, 32], strides = [1, 1]} : vector<16x128xbf16> to vector<16x32xbf16>
    %cst_58 = arith.constant dense<0.000000e+00> : vector<16x16xf32>
    %108 = tpu.matmul %105, %106, %cst_58 {dimension_numbers = #tpu.dot_dimension_numbers<[1], [1], [0], [0], [0, 0, 1, 0], [], []>} : vector<16x32xbf16>, vector<16x32xbf16>, vector<16x16xf32> -> vector<16x16xf32>
    %109 = vector.broadcast %9 : vector<1x16xf32> to vector<16x16xf32>
    %110 = arith.addf %108, %109 : vector<16x16xf32>
    %cst_59 = arith.constant -1.000000e+20 : f32
    %111 = vector.broadcast %cst_59 : f32 to vector<16x16xf32>
    %112 = arith.select %18, %110, %111 : vector<16x16xi1>, vector<16x16xf32>
    %c2 = arith.constant 2 : index
    %c0_60 = arith.constant 0 : index
    %c0_61 = arith.constant 0 : index
    %113 = vector.load %arg8[%c2, %c0_60, %c0_61] : memref<4x16x1xf32, #tpu.memory_space<vmem>>, vector<1x16x1xf32>
    %114 = vector.shape_cast %113 : vector<1x16x1xf32> to vector<16x1xf32>
    %cst_62 = arith.constant dense<0xFF800000> : vector<16xf32>
    %115 = vector.multi_reduction <maximumf>, %112, %cst_62 [1] : vector<16x16xf32> to vector<16xf32>
    %116 = vector.shape_cast %115 : vector<16xf32> to vector<16x1xf32>
    %117 = arith.maximumf %114, %116 : vector<16x1xf32>
    %118 = arith.subf %114, %117 : vector<16x1xf32>
    %119 = math.exp %118 : vector<16x1xf32>
    %120 = vector.broadcast %117 : vector<16x1xf32> to vector<16x16xf32>
    %121 = arith.subf %112, %120 : vector<16x16xf32>
    %122 = math.exp %121 : vector<16x16xf32>
    %c2_63 = arith.constant 2 : index
    %c0_64 = arith.constant 0 : index
    %c0_65 = arith.constant 0 : index
    %123 = vector.load %arg9[%c2_63, %c0_64, %c0_65] : memref<4x16x1xf32, #tpu.memory_space<vmem>>, vector<1x16x1xf32>
    %124 = vector.shape_cast %123 : vector<1x16x1xf32> to vector<16x1xf32>
    %125 = arith.mulf %119, %124 : vector<16x1xf32>
    %cst_66 = arith.constant dense<0.000000e+00> : vector<16xf32>
    %126 = vector.multi_reduction <add>, %122, %cst_66 [1] : vector<16x16xf32> to vector<16xf32>
    %127 = vector.shape_cast %126 : vector<16xf32> to vector<16x1xf32>
    %128 = arith.addf %125, %127 : vector<16x1xf32>
    %c2_67 = arith.constant 2 : index
    %c0_68 = arith.constant 0 : index
    %c0_69 = arith.constant 0 : index
    %129 = vector.load %arg9[%c2_67, %c0_68, %c0_69] : memref<4x16x1xf32, #tpu.memory_space<vmem>>, vector<1x16x1xf32>
    %130 = vector.shape_cast %129 : vector<1x16x1xf32> to vector<16x1xf32>
    %131 = vector.shape_cast %128 : vector<16x1xf32> to vector<1x16x1xf32>
    tpu.vector_store %arg9[%c2_67, %c0_68, %c0_69], %131 {strides = array<i32>} : memref<4x16x1xf32, #tpu.memory_space<vmem>>, vector<1x16x1xf32>,
    %c0_70 = arith.constant 0 : index
    %c64 = arith.constant 64 : index
    %132 = vector.load %arg10[%c0_70, %c64] : memref<16x128xf32, #tpu.memory_space<vmem>>, vector<16x32xf32>
    %133 = vector.broadcast %119 : vector<16x1xf32> to vector<16x32xf32>
    %134 = arith.mulf %133, %132 : vector<16x32xf32>
    %135 = arith.truncf %122 : vector<16x16xf32> to vector<16x16xbf16>
    %cst_71 = arith.constant dense<0.000000e+00> : vector<16x32xf32>
    %136 = tpu.matmul %135, %107, %cst_71 {dimension_numbers = #tpu.dot_dimension_numbers<[1], [0], [0], [1], [0, 0, 1, 1], [], []>} : vector<16x16xbf16>, vector<16x32xbf16>, vector<16x32xf32> -> vector<16x32xf32>
    %137 = arith.addf %134, %136 : vector<16x32xf32>
    %c0_72 = arith.constant 0 : index
    %c64_73 = arith.constant 64 : index
    %138 = vector.load %arg10[%c0_72, %c64_73] : memref<16x128xf32, #tpu.memory_space<vmem>>, vector<16x32xf32>
    tpu.vector_store %arg10[%c0_72, %c64_73], %137 {strides = array<i32>} : memref<16x128xf32, #tpu.memory_space<vmem>>, vector<16x32xf32>,
    %c2_74 = arith.constant 2 : index
    %c0_75 = arith.constant 0 : index
    %c0_76 = arith.constant 0 : index
    %139 = vector.load %arg8[%c2_74, %c0_75, %c0_76] : memref<4x16x1xf32, #tpu.memory_space<vmem>>, vector<1x16x1xf32>
    %140 = vector.shape_cast %139 : vector<1x16x1xf32> to vector<16x1xf32>
    %141 = vector.shape_cast %117 : vector<16x1xf32> to vector<1x16x1xf32>
    tpu.vector_store %arg8[%c2_74, %c0_75, %c0_76], %141 {strides = array<i32>} : memref<4x16x1xf32, #tpu.memory_space<vmem>>, vector<1x16x1xf32>,
    %142 = vector.extract_strided_slice %20 {offsets = [0, 96], sizes = [16, 32], strides = [1, 1]} : vector<16x128xbf16> to vector<16x32xbf16>
    %cst_77 = arith.constant 1.767580e-01 : bf16
    %143 = vector.broadcast %cst_77 : bf16 to vector<16x32xbf16>
    %144 = arith.mulf %142, %143 : vector<16x32xbf16>
    %145 = vector.extract_strided_slice %22 {offsets = [0, 96], sizes = [16, 32], strides = [1, 1]} : vector<16x128xbf16> to vector<16x32xbf16>
    %146 = vector.extract_strided_slice %24 {offsets = [0, 96], sizes = [16, 32], strides = [1, 1]} : vector<16x128xbf16> to vector<16x32xbf16>
    %cst_78 = arith.constant dense<0.000000e+00> : vector<16x16xf32>
    %147 = tpu.matmul %144, %145, %cst_78 {dimension_numbers = #tpu.dot_dimension_numbers<[1], [1], [0], [0], [0, 0, 1, 0], [], []>} : vector<16x32xbf16>, vector<16x32xbf16>, vector<16x16xf32> -> vector<16x16xf32>
    %148 = vector.broadcast %9 : vector<1x16xf32> to vector<16x16xf32>
    %149 = arith.addf %147, %148 : vector<16x16xf32>
    %cst_79 = arith.constant -1.000000e+20 : f32
    %150 = vector.broadcast %cst_79 : f32 to vector<16x16xf32>
    %151 = arith.select %18, %149, %150 : vector<16x16xi1>, vector<16x16xf32>
    %c3 = arith.constant 3 : index
    %c0_80 = arith.constant 0 : index
    %c0_81 = arith.constant 0 : index
    %152 = vector.load %arg8[%c3, %c0_80, %c0_81] : memref<4x16x1xf32, #tpu.memory_space<vmem>>, vector<1x16x1xf32>
    %153 = vector.shape_cast %152 : vector<1x16x1xf32> to vector<16x1xf32>
    %cst_82 = arith.constant dense<0xFF800000> : vector<16xf32>
    %154 = vector.multi_reduction <maximumf>, %151, %cst_82 [1] : vector<16x16xf32> to vector<16xf32>
    %155 = vector.shape_cast %154 : vector<16xf32> to vector<16x1xf32>
    %156 = arith.maximumf %153, %155 : vector<16x1xf32>
    %157 = arith.subf %153, %156 : vector<16x1xf32>
    %158 = math.exp %157 : vector<16x1xf32>
    %159 = vector.broadcast %156 : vector<16x1xf32> to vector<16x16xf32>
    %160 = arith.subf %151, %159 : vector<16x16xf32>
    %161 = math.exp %160 : vector<16x16xf32>
    %c3_83 = arith.constant 3 : index
    %c0_84 = arith.constant 0 : index
    %c0_85 = arith.constant 0 : index
    %162 = vector.load %arg9[%c3_83, %c0_84, %c0_85] : memref<4x16x1xf32, #tpu.memory_space<vmem>>, vector<1x16x1xf32>
    %163 = vector.shape_cast %162 : vector<1x16x1xf32> to vector<16x1xf32>
    %164 = arith.mulf %158, %163 : vector<16x1xf32>
    %cst_86 = arith.constant dense<0.000000e+00> : vector<16xf32>
    %165 = vector.multi_reduction <add>, %161, %cst_86 [1] : vector<16x16xf32> to vector<16xf32>
    %166 = vector.shape_cast %165 : vector<16xf32> to vector<16x1xf32>
    %167 = arith.addf %164, %166 : vector<16x1xf32>
    %c3_87 = arith.constant 3 : index
    %c0_88 = arith.constant 0 : index
    %c0_89 = arith.constant 0 : index
    %168 = vector.load %arg9[%c3_87, %c0_88, %c0_89] : memref<4x16x1xf32, #tpu.memory_space<vmem>>, vector<1x16x1xf32>
    %169 = vector.shape_cast %168 : vector<1x16x1xf32> to vector<16x1xf32>
    %170 = vector.shape_cast %167 : vector<16x1xf32> to vector<1x16x1xf32>
    tpu.vector_store %arg9[%c3_87, %c0_88, %c0_89], %170 {strides = array<i32>} : memref<4x16x1xf32, #tpu.memory_space<vmem>>, vector<1x16x1xf32>,
    %c0_90 = arith.constant 0 : index
    %c96 = arith.constant 96 : index
    %171 = vector.load %arg10[%c0_90, %c96] : memref<16x128xf32, #tpu.memory_space<vmem>>, vector<16x32xf32>
    %172 = vector.broadcast %158 : vector<16x1xf32> to vector<16x32xf32>
    %173 = arith.mulf %172, %171 : vector<16x32xf32>
    %174 = arith.truncf %161 : vector<16x16xf32> to vector<16x16xbf16>
    %cst_91 = arith.constant dense<0.000000e+00> : vector<16x32xf32>
    %175 = tpu.matmul %174, %146, %cst_91 {dimension_numbers = #tpu.dot_dimension_numbers<[1], [0], [0], [1], [0, 0, 1, 1], [], []>} : vector<16x16xbf16>, vector<16x32xbf16>, vector<16x32xf32> -> vector<16x32xf32>
    %176 = arith.addf %173, %175 : vector<16x32xf32>
    %c0_92 = arith.constant 0 : index
    %c96_93 = arith.constant 96 : index
    %177 = vector.load %arg10[%c0_92, %c96_93] : memref<16x128xf32, #tpu.memory_space<vmem>>, vector<16x32xf32>
    tpu.vector_store %arg10[%c0_92, %c96_93], %176 {strides = array<i32>} : memref<16x128xf32, #tpu.memory_space<vmem>>, vector<16x32xf32>,
    %c3_94 = arith.constant 3 : index
    %c0_95 = arith.constant 0 : index
    %c0_96 = arith.constant 0 : index
    %178 = vector.load %arg8[%c3_94, %c0_95, %c0_96] : memref<4x16x1xf32, #tpu.memory_space<vmem>>, vector<1x16x1xf32>
    %179 = vector.shape_cast %178 : vector<1x16x1xf32> to vector<16x1xf32>
    %180 = vector.shape_cast %156 : vector<16x1xf32> to vector<1x16x1xf32>
    tpu.vector_store %arg8[%c3_94, %c0_95, %c0_96], %180 {strides = array<i32>} : memref<4x16x1xf32, #tpu.memory_space<vmem>>, vector<1x16x1xf32>,
    %c0_i32_97 = arith.constant 0 : i32
    %181 = arith.cmpi eq, %arg2, %c0_i32_97 : i32
    %182 = arith.extui %181 : i1 to i32
    %c0_i32_98 = arith.constant 0 : i32
    %183 = arith.cmpi ne, %182, %c0_i32_98 : i32
    scf.if %183 {
      %c0_99 = arith.constant 0 : index
      %c0_100 = arith.constant 0 : index
      %184 = vector.load %arg10[%c0_99, %c0_100] : memref<16x128xf32, #tpu.memory_space<vmem>>, vector<16x32xf32>
      %c0_101 = arith.constant 0 : index
      %c0_102 = arith.constant 0 : index
      %c0_103 = arith.constant 0 : index
      %185 = vector.load %arg9[%c0_101, %c0_102, %c0_103] : memref<4x16x1xf32, #tpu.memory_space<vmem>>, vector<1x16x1xf32>
      %186 = vector.shape_cast %185 : vector<1x16x1xf32> to vector<16x1xf32>
      %187 = tpu.reciprocal %186 : vector<16x1xf32> -> vector<16x1xf32>
      %188 = vector.broadcast %187 : vector<16x1xf32> to vector<16x32xf32>
      %189 = arith.mulf %184, %188 : vector<16x32xf32>
      %c0_104 = arith.constant 0 : index
      %c0_105 = arith.constant 0 : index
      %190 = vector.load %arg10[%c0_104, %c0_105] : memref<16x128xf32, #tpu.memory_space<vmem>>, vector<16x32xf32>
      tpu.vector_store %arg10[%c0_104, %c0_105], %189 {strides = array<i32>} : memref<16x128xf32, #tpu.memory_space<vmem>>, vector<16x32xf32>,
      %c0_106 = arith.constant 0 : index
      %c32_107 = arith.constant 32 : index
      %191 = vector.load %arg10[%c0_106, %c32_107] : memref<16x128xf32, #tpu.memory_space<vmem>>, vector<16x32xf32>
      %c1_108 = arith.constant 1 : index
      %c0_109 = arith.constant 0 : index
      %c0_110 = arith.constant 0 : index
      %192 = vector.load %arg9[%c1_108, %c0_109, %c0_110] : memref<4x16x1xf32, #tpu.memory_space<vmem>>, vector<1x16x1xf32>
      %193 = vector.shape_cast %192 : vector<1x16x1xf32> to vector<16x1xf32>
      %194 = tpu.reciprocal %193 : vector<16x1xf32> -> vector<16x1xf32>
      %195 = vector.broadcast %194 : vector<16x1xf32> to vector<16x32xf32>
      %196 = arith.mulf %191, %195 : vector<16x32xf32>
      %c0_111 = arith.constant 0 : index
      %c32_112 = arith.constant 32 : index
      %197 = vector.load %arg10[%c0_111, %c32_112] : memref<16x128xf32, #tpu.memory_space<vmem>>, vector<16x32xf32>
      tpu.vector_store %arg10[%c0_111, %c32_112], %196 {strides = array<i32>} : memref<16x128xf32, #tpu.memory_space<vmem>>, vector<16x32xf32>,
      %c0_113 = arith.constant 0 : index
      %c64_114 = arith.constant 64 : index
      %198 = vector.load %arg10[%c0_113, %c64_114] : memref<16x128xf32, #tpu.memory_space<vmem>>, vector<16x32xf32>
      %c2_115 = arith.constant 2 : index
      %c0_116 = arith.constant 0 : index
      %c0_117 = arith.constant 0 : index
      %199 = vector.load %arg9[%c2_115, %c0_116, %c0_117] : memref<4x16x1xf32, #tpu.memory_space<vmem>>, vector<1x16x1xf32>
      %200 = vector.shape_cast %199 : vector<1x16x1xf32> to vector<16x1xf32>
      %201 = tpu.reciprocal %200 : vector<16x1xf32> -> vector<16x1xf32>
      %202 = vector.broadcast %201 : vector<16x1xf32> to vector<16x32xf32>
      %203 = arith.mulf %198, %202 : vector<16x32xf32>
      %c0_118 = arith.constant 0 : index
      %c64_119 = arith.constant 64 : index
      %204 = vector.load %arg10[%c0_118, %c64_119] : memref<16x128xf32, #tpu.memory_space<vmem>>, vector<16x32xf32>
      tpu.vector_store %arg10[%c0_118, %c64_119], %203 {strides = array<i32>} : memref<16x128xf32, #tpu.memory_space<vmem>>, vector<16x32xf32>,
      %c0_120 = arith.constant 0 : index
      %c96_121 = arith.constant 96 : index
      %205 = vector.load %arg10[%c0_120, %c96_121] : memref<16x128xf32, #tpu.memory_space<vmem>>, vector<16x32xf32>
      %c3_122 = arith.constant 3 : index
      %c0_123 = arith.constant 0 : index
      %c0_124 = arith.constant 0 : index
      %206 = vector.load %arg9[%c3_122, %c0_123, %c0_124] : memref<4x16x1xf32, #tpu.memory_space<vmem>>, vector<1x16x1xf32>
      %207 = vector.shape_cast %206 : vector<1x16x1xf32> to vector<16x1xf32>
      %208 = tpu.reciprocal %207 : vector<16x1xf32> -> vector<16x1xf32>
      %209 = vector.broadcast %208 : vector<16x1xf32> to vector<16x32xf32>
      %210 = arith.mulf %205, %209 : vector<16x32xf32>
      %c0_125 = arith.constant 0 : index
      %c96_126 = arith.constant 96 : index
      %211 = vector.load %arg10[%c0_125, %c96_126] : memref<16x128xf32, #tpu.memory_space<vmem>>, vector<16x32xf32>
      tpu.vector_store %arg10[%c0_125, %c96_126], %210 {strides = array<i32>} : memref<16x128xf32, #tpu.memory_space<vmem>>, vector<16x32xf32>,
      %c0_127 = arith.constant 0 : index
      %c0_128 = arith.constant 0 : index
      %212 = vector.load %arg10[%c0_127, %c0_128] : memref<16x128xf32, #tpu.memory_space<vmem>>, vector<16x128xf32>
      %213 = arith.truncf %212 : vector<16x128xf32> to vector<16x128xbf16>
      %c0_129 = arith.constant 0 : index
      %c0_130 = arith.constant 0 : index
      %c0_131 = arith.constant 0 : index
      %214 = vector.load %arg7[%c0_129, %c0_130, %c0_131] : memref<1x16x128xbf16, #tpu.memory_space<vmem>>, vector<1x16x128xbf16>
      %215 = vector.shape_cast %214 : vector<1x16x128xbf16> to vector<16x128xbf16>
      %216 = vector.shape_cast %213 : vector<16x128xbf16> to vector<1x16x128xbf16>
      tpu.vector_store %arg7[%c0_129, %c0_130, %c0_131], %216 {strides = array<i32>} : memref<1x16x128xbf16, #tpu.memory_space<vmem>>, vector<1x16x128xbf16>,
    } else {
    }
    return
  }
  func.func @transform_0(%arg0: i32, %arg1: i32, %arg2: i32) -> (i32, i32, i32) {
    %c0_i32 = arith.constant 0 : i32
    %c0_i32_0 = arith.constant 0 : i32
    return %arg0, %arg1, %c0_i32 : i32, i32, i32
  }
  func.func @transform_1(%arg0: i32, %arg1: i32, %arg2: i32) -> (i32, i32, i32) {
    %c1_i32 = arith.constant 1 : i32
    %c0_i32 = arith.constant 0 : i32
    return %arg0, %arg2, %c1_i32 : i32, i32, i32
  }
  func.func @transform_2(%arg0: i32, %arg1: i32, %arg2: i32) -> (i32, i32, i32) {
    %c2_i32 = arith.constant 2 : i32
    %c0_i32 = arith.constant 0 : i32
    return %arg0, %arg2, %c2_i32 : i32, i32, i32
  }
  func.func @transform_3(%arg0: i32, %arg1: i32, %arg2: i32) -> (i32, i32, i32) {
    %c0_i32 = arith.constant 0 : i32
    %c0_i32_0 = arith.constant 0 : i32
    return %arg0, %c0_i32, %arg2 : i32, i32, i32
  }
  func.func @transform_4(%arg0: i32, %arg1: i32, %arg2: i32) -> (i32, i32, i32) {
    %c0_i32 = arith.constant 0 : i32
    %c0_i32_0 = arith.constant 0 : i32
    return %arg0, %arg1, %c0_i32 : i32, i32, i32
  }
}

module attributes {stable_mosaic.version = 11 : i64} {
  func.func @_matmul_add_ln_kernel(%arg0: i32, %arg1: i32, %arg2: i32, %arg3: memref<32x256xbf16, #tpu.memory_space<vmem>>, %arg4: memref<256x128xbf16, #tpu.memory_space<vmem>>, %arg5: memref<1x128xf32, #tpu.memory_space<vmem>>, %arg6: memref<32x128xf32, #tpu.memory_space<vmem>>, %arg7: memref<1x128xf32, #tpu.memory_space<vmem>>, %arg8: memref<1x128xf32, #tpu.memory_space<vmem>>, %arg9: memref<32x128xf32, #tpu.memory_space<vmem>>, %arg10: memref<32x128xf32, #tpu.memory_space<vmem>>) attributes {dimension_semantics = [#tpu.dimension_semantics<parallel>, #tpu.dimension_semantics<parallel>, #tpu.dimension_semantics<arbitrary>], iteration_bounds = array<i64: 1, 1, 1>, scalar_prefetch = 0 : i64, scratch_operands = 1 : i64, tpu.core_type = #tpu.core_type<tc>, window_params = [{transform_indices = @transform_0, window_bounds = array<i64: 32, 256>}, {transform_indices = @transform_1, window_bounds = array<i64: 256, 128>}, {pipeline_mode = #tpu.pipeline_mode<synchronous>, transform_indices = @transform_2, window_bounds = array<i64: 1, 128>}, {transform_indices = @transform_3, window_bounds = array<i64: 32, 128>}, {pipeline_mode = #tpu.pipeline_mode<synchronous>, transform_indices = @transform_4, window_bounds = array<i64: 1, 128>}, {pipeline_mode = #tpu.pipeline_mode<synchronous>, transform_indices = @transform_5, window_bounds = array<i64: 1, 128>}, {transform_indices = @transform_6, window_bounds = array<i64: 32, 128>}]} {
    %c0_i32 = arith.constant 0 : i32
    %0 = arith.cmpi eq, %arg2, %c0_i32 : i32
    %1 = arith.extui %0 : i1 to i32
    %c0_i32_0 = arith.constant 0 : i32
    %2 = arith.cmpi ne, %1, %c0_i32_0 : i32
    scf.if %2 {
      %cst_10 = arith.constant 0.000000e+00 : f32
      %12 = vector.broadcast %cst_10 : f32 to vector<32x128xf32>
      %c0_11 = arith.constant 0 : index
      %c0_12 = arith.constant 0 : index
      %13 = vector.load %arg10[%c0_11, %c0_12] : memref<32x128xf32, #tpu.memory_space<vmem>>, vector<32x128xf32>
      tpu.vector_store %arg10[%c0_11, %c0_12], %12 {strides = array<i32>} : memref<32x128xf32, #tpu.memory_space<vmem>>, vector<32x128xf32>,
    } else {
    }
    %c0 = arith.constant 0 : index
    %c0_1 = arith.constant 0 : index
    %3 = vector.load %arg10[%c0, %c0_1] : memref<32x128xf32, #tpu.memory_space<vmem>>, vector<32x128xf32>
    %c0_2 = arith.constant 0 : index
    %c0_3 = arith.constant 0 : index
    %4 = vector.load %arg3[%c0_2, %c0_3] : memref<32x256xbf16, #tpu.memory_space<vmem>>, vector<32x256xbf16>
    %c0_4 = arith.constant 0 : index
    %c0_5 = arith.constant 0 : index
    %5 = vector.load %arg4[%c0_4, %c0_5] : memref<256x128xbf16, #tpu.memory_space<vmem>>, vector<256x128xbf16>
    %cst = arith.constant dense<0.000000e+00> : vector<32x128xf32>
    %6 = tpu.matmul %4, %5, %cst {dimension_numbers = #tpu.dot_dimension_numbers<[1], [0], [0], [1], [0, 0, 1, 1], [], []>} : vector<32x256xbf16>, vector<256x128xbf16>, vector<32x128xf32> -> vector<32x128xf32>
    %7 = arith.addf %3, %6 : vector<32x128xf32>
    %c0_6 = arith.constant 0 : index
    %c0_7 = arith.constant 0 : index
    %8 = vector.load %arg10[%c0_6, %c0_7] : memref<32x128xf32, #tpu.memory_space<vmem>>, vector<32x128xf32>
    tpu.vector_store %arg10[%c0_6, %c0_7], %7 {strides = array<i32>} : memref<32x128xf32, #tpu.memory_space<vmem>>, vector<32x128xf32>,
    %c0_i32_8 = arith.constant 0 : i32
    %9 = arith.cmpi eq, %arg2, %c0_i32_8 : i32
    %10 = arith.extui %9 : i1 to i32
    %c0_i32_9 = arith.constant 0 : i32
    %11 = arith.cmpi ne, %10, %c0_i32_9 : i32
    scf.if %11 {
      %c0_10 = arith.constant 0 : index
      %c0_11 = arith.constant 0 : index
      %12 = vector.load %arg10[%c0_10, %c0_11] : memref<32x128xf32, #tpu.memory_space<vmem>>, vector<32x128xf32>
      %c0_12 = arith.constant 0 : index
      %c0_13 = arith.constant 0 : index
      %13 = vector.load %arg5[%c0_12, %c0_13] : memref<1x128xf32, #tpu.memory_space<vmem>>, vector<1x128xf32>
      %14 = vector.broadcast %13 : vector<1x128xf32> to vector<32x128xf32>
      %15 = arith.addf %12, %14 : vector<32x128xf32>
      %c0_14 = arith.constant 0 : index
      %c0_15 = arith.constant 0 : index
      %16 = vector.load %arg6[%c0_14, %c0_15] : memref<32x128xf32, #tpu.memory_space<vmem>>, vector<32x128xf32>
      %17 = arith.addf %15, %16 : vector<32x128xf32>
      %cst_16 = arith.constant dense<0.000000e+00> : vector<32xf32>
      %18 = vector.multi_reduction <add>, %17, %cst_16 [1] : vector<32x128xf32> to vector<32xf32>
      %19 = vector.shape_cast %18 : vector<32xf32> to vector<32x1xf32>
      %cst_17 = arith.constant 1.280000e+02 : f32
      %20 = vector.broadcast %cst_17 : f32 to vector<32x1xf32>
      %21 = arith.divf %19, %20 : vector<32x1xf32>
      %22 = vector.broadcast %21 : vector<32x1xf32> to vector<32x128xf32>
      %23 = arith.subf %17, %22 : vector<32x128xf32>
      %24 = arith.mulf %23, %23 : vector<32x128xf32>
      %cst_18 = arith.constant dense<0.000000e+00> : vector<32xf32>
      %25 = vector.multi_reduction <add>, %24, %cst_18 [1] : vector<32x128xf32> to vector<32xf32>
      %26 = vector.shape_cast %25 : vector<32xf32> to vector<32x1xf32>
      %cst_19 = arith.constant 1.280000e+02 : f32
      %27 = vector.broadcast %cst_19 : f32 to vector<32x1xf32>
      %28 = arith.divf %26, %27 : vector<32x1xf32>
      %29 = vector.broadcast %21 : vector<32x1xf32> to vector<32x128xf32>
      %30 = arith.subf %17, %29 : vector<32x128xf32>
      %cst_20 = arith.constant 9.99999974E-6 : f32
      %31 = vector.broadcast %cst_20 : f32 to vector<32x1xf32>
      %32 = arith.addf %28, %31 : vector<32x1xf32>
      %33 = math.rsqrt %32 : vector<32x1xf32>
      %34 = vector.broadcast %33 : vector<32x1xf32> to vector<32x128xf32>
      %35 = arith.mulf %30, %34 : vector<32x128xf32>
      %c0_21 = arith.constant 0 : index
      %c0_22 = arith.constant 0 : index
      %36 = vector.load %arg7[%c0_21, %c0_22] : memref<1x128xf32, #tpu.memory_space<vmem>>, vector<1x128xf32>
      %37 = vector.broadcast %36 : vector<1x128xf32> to vector<32x128xf32>
      %38 = arith.mulf %35, %37 : vector<32x128xf32>
      %c0_23 = arith.constant 0 : index
      %c0_24 = arith.constant 0 : index
      %39 = vector.load %arg8[%c0_23, %c0_24] : memref<1x128xf32, #tpu.memory_space<vmem>>, vector<1x128xf32>
      %40 = vector.broadcast %39 : vector<1x128xf32> to vector<32x128xf32>
      %41 = arith.addf %38, %40 : vector<32x128xf32>
      %c0_25 = arith.constant 0 : index
      %c0_26 = arith.constant 0 : index
      %42 = vector.load %arg9[%c0_25, %c0_26] : memref<32x128xf32, #tpu.memory_space<vmem>>, vector<32x128xf32>
      tpu.vector_store %arg9[%c0_25, %c0_26], %41 {strides = array<i32>} : memref<32x128xf32, #tpu.memory_space<vmem>>, vector<32x128xf32>,
    } else {
    }
    return
  }
  func.func @transform_0(%arg0: i32, %arg1: i32, %arg2: i32) -> (i32, i32) {
    %c0_i32 = arith.constant 0 : i32
    return %arg0, %arg2 : i32, i32
  }
  func.func @transform_1(%arg0: i32, %arg1: i32, %arg2: i32) -> (i32, i32) {
    %c0_i32 = arith.constant 0 : i32
    %c0_i32_0 = arith.constant 0 : i32
    return %arg2, %c0_i32 : i32, i32
  }
  func.func @transform_2(%arg0: i32, %arg1: i32, %arg2: i32) -> (i32, i32) {
    %c0_i32 = arith.constant 0 : i32
    %c0_i32_0 = arith.constant 0 : i32
    %c0_i32_1 = arith.constant 0 : i32
    return %c0_i32, %c0_i32_0 : i32, i32
  }
  func.func @transform_3(%arg0: i32, %arg1: i32, %arg2: i32) -> (i32, i32) {
    %c0_i32 = arith.constant 0 : i32
    %c0_i32_0 = arith.constant 0 : i32
    return %arg0, %c0_i32 : i32, i32
  }
  func.func @transform_4(%arg0: i32, %arg1: i32, %arg2: i32) -> (i32, i32) {
    %c0_i32 = arith.constant 0 : i32
    %c0_i32_0 = arith.constant 0 : i32
    %c0_i32_1 = arith.constant 0 : i32
    return %c0_i32, %c0_i32_0 : i32, i32
  }
  func.func @transform_5(%arg0: i32, %arg1: i32, %arg2: i32) -> (i32, i32) {
    %c0_i32 = arith.constant 0 : i32
    %c0_i32_0 = arith.constant 0 : i32
    %c0_i32_1 = arith.constant 0 : i32
    return %c0_i32, %c0_i32_0 : i32, i32
  }
  func.func @transform_6(%arg0: i32, %arg1: i32, %arg2: i32) -> (i32, i32) {
    %c0_i32 = arith.constant 0 : i32
    %c0_i32_0 = arith.constant 0 : i32
    return %arg0, %c0_i32 : i32, i32
  }
}

module attributes {stable_mosaic.version = 11 : i64} {
  func.func @_matmul_kernel(%arg0: i32, %arg1: i32, %arg2: i32, %arg3: memref<32x128xbf16, #tpu.memory_space<vmem>>, %arg4: memref<128x128xbf16, #tpu.memory_space<vmem>>, %arg5: memref<1x128xf32, #tpu.memory_space<vmem>>, %arg6: memref<32x128xbf16, #tpu.memory_space<vmem>>, %arg7: memref<32x128xf32, #tpu.memory_space<vmem>>) attributes {dimension_semantics = [#tpu.dimension_semantics<parallel>, #tpu.dimension_semantics<parallel>, #tpu.dimension_semantics<arbitrary>], iteration_bounds = array<i64: 1, 1, 1>, scalar_prefetch = 0 : i64, scratch_operands = 1 : i64, tpu.core_type = #tpu.core_type<tc>, window_params = [{transform_indices = @transform_0, window_bounds = array<i64: 32, 128>}, {transform_indices = @transform_1, window_bounds = array<i64: 128, 128>}, {transform_indices = @transform_2, window_bounds = array<i64: 1, 128>}, {transform_indices = @transform_3, window_bounds = array<i64: 32, 128>}]} {
    %c0_i32 = arith.constant 0 : i32
    %0 = arith.cmpi eq, %arg2, %c0_i32 : i32
    %1 = arith.extui %0 : i1 to i32
    %c0_i32_0 = arith.constant 0 : i32
    %2 = arith.cmpi ne, %1, %c0_i32_0 : i32
    scf.if %2 {
      %cst_10 = arith.constant 0.000000e+00 : f32
      %12 = vector.broadcast %cst_10 : f32 to vector<32x128xf32>
      %c0_11 = arith.constant 0 : index
      %c0_12 = arith.constant 0 : index
      %13 = vector.load %arg7[%c0_11, %c0_12] : memref<32x128xf32, #tpu.memory_space<vmem>>, vector<32x128xf32>
      tpu.vector_store %arg7[%c0_11, %c0_12], %12 {strides = array<i32>} : memref<32x128xf32, #tpu.memory_space<vmem>>, vector<32x128xf32>,
    } else {
    }
    %c0 = arith.constant 0 : index
    %c0_1 = arith.constant 0 : index
    %3 = vector.load %arg7[%c0, %c0_1] : memref<32x128xf32, #tpu.memory_space<vmem>>, vector<32x128xf32>
    %c0_2 = arith.constant 0 : index
    %c0_3 = arith.constant 0 : index
    %4 = vector.load %arg3[%c0_2, %c0_3] : memref<32x128xbf16, #tpu.memory_space<vmem>>, vector<32x128xbf16>
    %c0_4 = arith.constant 0 : index
    %c0_5 = arith.constant 0 : index
    %5 = vector.load %arg4[%c0_4, %c0_5] : memref<128x128xbf16, #tpu.memory_space<vmem>>, vector<128x128xbf16>
    %cst = arith.constant dense<0.000000e+00> : vector<32x128xf32>
    %6 = tpu.matmul %4, %5, %cst {dimension_numbers = #tpu.dot_dimension_numbers<[1], [0], [0], [1], [0, 0, 1, 1], [], []>} : vector<32x128xbf16>, vector<128x128xbf16>, vector<32x128xf32> -> vector<32x128xf32>
    %7 = arith.addf %3, %6 : vector<32x128xf32>
    %c0_6 = arith.constant 0 : index
    %c0_7 = arith.constant 0 : index
    %8 = vector.load %arg7[%c0_6, %c0_7] : memref<32x128xf32, #tpu.memory_space<vmem>>, vector<32x128xf32>
    tpu.vector_store %arg7[%c0_6, %c0_7], %7 {strides = array<i32>} : memref<32x128xf32, #tpu.memory_space<vmem>>, vector<32x128xf32>,
    %c0_i32_8 = arith.constant 0 : i32
    %9 = arith.cmpi eq, %arg2, %c0_i32_8 : i32
    %10 = arith.extui %9 : i1 to i32
    %c0_i32_9 = arith.constant 0 : i32
    %11 = arith.cmpi ne, %10, %c0_i32_9 : i32
    scf.if %11 {
      %c0_10 = arith.constant 0 : index
      %c0_11 = arith.constant 0 : index
      %12 = vector.load %arg7[%c0_10, %c0_11] : memref<32x128xf32, #tpu.memory_space<vmem>>, vector<32x128xf32>
      %c0_12 = arith.constant 0 : index
      %c0_13 = arith.constant 0 : index
      %13 = vector.load %arg5[%c0_12, %c0_13] : memref<1x128xf32, #tpu.memory_space<vmem>>, vector<1x128xf32>
      %14 = vector.broadcast %13 : vector<1x128xf32> to vector<32x128xf32>
      %15 = arith.addf %12, %14 : vector<32x128xf32>
      %16 = arith.truncf %15 : vector<32x128xf32> to vector<32x128xbf16>
      %c0_14 = arith.constant 0 : index
      %c0_15 = arith.constant 0 : index
      %17 = vector.load %arg6[%c0_14, %c0_15] : memref<32x128xbf16, #tpu.memory_space<vmem>>, vector<32x128xbf16>
      tpu.vector_store %arg6[%c0_14, %c0_15], %16 {strides = array<i32>} : memref<32x128xbf16, #tpu.memory_space<vmem>>, vector<32x128xbf16>,
    } else {
    }
    return
  }
  func.func @transform_0(%arg0: i32, %arg1: i32, %arg2: i32) -> (i32, i32) {
    %c0_i32 = arith.constant 0 : i32
    return %arg0, %arg2 : i32, i32
  }
  func.func @transform_1(%arg0: i32, %arg1: i32, %arg2: i32) -> (i32, i32) {
    %c0_i32 = arith.constant 0 : i32
    return %arg2, %arg1 : i32, i32
  }
  func.func @transform_2(%arg0: i32, %arg1: i32, %arg2: i32) -> (i32, i32) {
    %c0_i32 = arith.constant 0 : i32
    %c0_i32_0 = arith.constant 0 : i32
    return %c0_i32, %arg1 : i32, i32
  }
  func.func @transform_3(%arg0: i32, %arg1: i32, %arg2: i32) -> (i32, i32) {
    %c0_i32 = arith.constant 0 : i32
    return %arg0, %arg1 : i32, i32
  }
}

module attributes {stable_mosaic.version = 11 : i64} {
  func.func @_flash_mha_kernel(%arg0: i32, %arg1: i32, %arg2: i32, %arg3: memref<1x16x128xbf16, #tpu.memory_space<vmem>>, %arg4: memref<1x16x128xbf16, #tpu.memory_space<vmem>>, %arg5: memref<1x16x128xbf16, #tpu.memory_space<vmem>>, %arg6: memref<1x1x16xf32, #tpu.memory_space<vmem>>, %arg7: memref<1x16x128xbf16, #tpu.memory_space<vmem>>, %arg8: memref<4x16x1xf32, #tpu.memory_space<vmem>>, %arg9: memref<4x16x1xf32, #tpu.memory_space<vmem>>, %arg10: memref<16x128xf32, #tpu.memory_space<vmem>>) attributes {dimension_semantics = [#tpu.dimension_semantics<parallel>, #tpu.dimension_semantics<parallel>, #tpu.dimension_semantics<arbitrary>], iteration_bounds = array<i64: 2, 1, 1>, scalar_prefetch = 0 : i64, scratch_operands = 3 : i64, tpu.core_type = #tpu.core_type<tc>, window_params = [{transform_indices = @transform_0, window_bounds = array<i64: 1, 16, 128>}, {transform_indices = @transform_1, window_bounds = array<i64: 1, 16, 128>}, {transform_indices = @transform_2, window_bounds = array<i64: 1, 16, 128>}, {transform_indices = @transform_3, window_bounds = array<i64: 1, 1, 16>}, {transform_indices = @transform_4, window_bounds = array<i64: 1, 16, 128>}]} {
    %c0_i32 = arith.constant 0 : i32
    %0 = arith.cmpi eq, %arg2, %c0_i32 : i32
    %1 = arith.extui %0 : i1 to i32
    %c0_i32_0 = arith.constant 0 : i32
    %2 = arith.cmpi ne, %1, %c0_i32_0 : i32
    scf.if %2 {
      %cst_94 = arith.constant -1.000000e+20 : f32
      %167 = vector.broadcast %cst_94 : f32 to vector<4x16x1xf32>
      %c0_95 = arith.constant 0 : index
      %c0_96 = arith.constant 0 : index
      %c0_97 = arith.constant 0 : index
      %168 = vector.load %arg8[%c0_95, %c0_96, %c0_97] : memref<4x16x1xf32, #tpu.memory_space<vmem>>, vector<4x16x1xf32>
      tpu.vector_store %arg8[%c0_95, %c0_96, %c0_97], %167 {strides = array<i32>} : memref<4x16x1xf32, #tpu.memory_space<vmem>>, vector<4x16x1xf32>,
      %cst_98 = arith.constant 0.000000e+00 : f32
      %169 = vector.broadcast %cst_98 : f32 to vector<4x16x1xf32>
      %c0_99 = arith.constant 0 : index
      %c0_100 = arith.constant 0 : index
      %c0_101 = arith.constant 0 : index
      %170 = vector.load %arg9[%c0_99, %c0_100, %c0_101] : memref<4x16x1xf32, #tpu.memory_space<vmem>>, vector<4x16x1xf32>
      tpu.vector_store %arg9[%c0_99, %c0_100, %c0_101], %169 {strides = array<i32>} : memref<4x16x1xf32, #tpu.memory_space<vmem>>, vector<4x16x1xf32>,
      %cst_102 = arith.constant 0.000000e+00 : f32
      %171 = vector.broadcast %cst_102 : f32 to vector<16x128xf32>
      %c0_103 = arith.constant 0 : index
      %c0_104 = arith.constant 0 : index
      %172 = vector.load %arg10[%c0_103, %c0_104] : memref<16x128xf32, #tpu.memory_space<vmem>>, vector<16x128xf32>
      tpu.vector_store %arg10[%c0_103, %c0_104], %171 {strides = array<i32>} : memref<16x128xf32, #tpu.memory_space<vmem>>, vector<16x128xf32>,
    } else {
    }
    %c0 = arith.constant 0 : index
    %c0_1 = arith.constant 0 : index
    %c0_2 = arith.constant 0 : index
    %3 = vector.load %arg6[%c0, %c0_1, %c0_2] : memref<1x1x16xf32, #tpu.memory_space<vmem>>, vector<1x1x16xf32>
    %4 = vector.shape_cast %3 : vector<1x1x16xf32> to vector<1x16xf32>
    %cst = arith.constant 0.000000e+00 : f32
    %5 = vector.broadcast %cst : f32 to vector<1x16xf32>
    %6 = arith.cmpf one, %4, %5 : vector<1x16xf32>
    %cst_3 = arith.constant 0.000000e+00 : f32
    %cst_4 = arith.constant -1.000000e+20 : f32
    %7 = vector.broadcast %cst_3 : f32 to vector<1x16xf32>
    %8 = vector.broadcast %cst_4 : f32 to vector<1x16xf32>
    %9 = arith.select %6, %7, %8 : vector<1x16xi1>, vector<1x16xf32>
    %c0_5 = arith.constant 0 : index
    %c0_6 = arith.constant 0 : index
    %c0_7 = arith.constant 0 : index
    %10 = vector.load %arg3[%c0_5, %c0_6, %c0_7] : memref<1x16x128xbf16, #tpu.memory_space<vmem>>, vector<1x16x128xbf16>
    %11 = vector.shape_cast %10 : vector<1x16x128xbf16> to vector<16x128xbf16>
    %c0_8 = arith.constant 0 : index
    %c0_9 = arith.constant 0 : index
    %c0_10 = arith.constant 0 : index
    %12 = vector.load %arg4[%c0_8, %c0_9, %c0_10] : memref<1x16x128xbf16, #tpu.memory_space<vmem>>, vector<1x16x128xbf16>
    %13 = vector.shape_cast %12 : vector<1x16x128xbf16> to vector<16x128xbf16>
    %c0_11 = arith.constant 0 : index
    %c0_12 = arith.constant 0 : index
    %c0_13 = arith.constant 0 : index
    %14 = vector.load %arg5[%c0_11, %c0_12, %c0_13] : memref<1x16x128xbf16, #tpu.memory_space<vmem>>, vector<1x16x128xbf16>
    %15 = vector.shape_cast %14 : vector<1x16x128xbf16> to vector<16x128xbf16>
    %16 = vector.extract_strided_slice %11 {offsets = [0, 0], sizes = [16, 32], strides = [1, 1]} : vector<16x128xbf16> to vector<16x32xbf16>
    %cst_14 = arith.constant 1.767580e-01 : bf16
    %17 = vector.broadcast %cst_14 : bf16 to vector<16x32xbf16>
    %18 = arith.mulf %16, %17 : vector<16x32xbf16>
    %19 = vector.extract_strided_slice %13 {offsets = [0, 0], sizes = [16, 32], strides = [1, 1]} : vector<16x128xbf16> to vector<16x32xbf16>
    %20 = vector.extract_strided_slice %15 {offsets = [0, 0], sizes = [16, 32], strides = [1, 1]} : vector<16x128xbf16> to vector<16x32xbf16>
    %cst_15 = arith.constant dense<0.000000e+00> : vector<16x16xf32>
    %21 = tpu.matmul %18, %19, %cst_15 {dimension_numbers = #tpu.dot_dimension_numbers<[1], [1], [0], [0], [0, 0, 1, 0], [], []>} : vector<16x32xbf16>, vector<16x32xbf16>, vector<16x16xf32> -> vector<16x16xf32>
    %22 = vector.broadcast %9 : vector<1x16xf32> to vector<16x16xf32>
    %23 = arith.addf %21, %22 : vector<16x16xf32>
    %c0_16 = arith.constant 0 : index
    %c0_17 = arith.constant 0 : index
    %c0_18 = arith.constant 0 : index
    %24 = vector.load %arg8[%c0_16, %c0_17, %c0_18] : memref<4x16x1xf32, #tpu.memory_space<vmem>>, vector<1x16x1xf32>
    %25 = vector.shape_cast %24 : vector<1x16x1xf32> to vector<16x1xf32>
    %cst_19 = arith.constant dense<0xFF800000> : vector<16xf32>
    %26 = vector.multi_reduction <maximumf>, %23, %cst_19 [1] : vector<16x16xf32> to vector<16xf32>
    %27 = vector.shape_cast %26 : vector<16xf32> to vector<16x1xf32>
    %28 = arith.maximumf %25, %27 : vector<16x1xf32>
    %29 = arith.subf %25, %28 : vector<16x1xf32>
    %30 = math.exp %29 : vector<16x1xf32>
    %31 = vector.broadcast %28 : vector<16x1xf32> to vector<16x16xf32>
    %32 = arith.subf %23, %31 : vector<16x16xf32>
    %33 = math.exp %32 : vector<16x16xf32>
    %c0_20 = arith.constant 0 : index
    %c0_21 = arith.constant 0 : index
    %c0_22 = arith.constant 0 : index
    %34 = vector.load %arg9[%c0_20, %c0_21, %c0_22] : memref<4x16x1xf32, #tpu.memory_space<vmem>>, vector<1x16x1xf32>
    %35 = vector.shape_cast %34 : vector<1x16x1xf32> to vector<16x1xf32>
    %36 = arith.mulf %30, %35 : vector<16x1xf32>
    %cst_23 = arith.constant dense<0.000000e+00> : vector<16xf32>
    %37 = vector.multi_reduction <add>, %33, %cst_23 [1] : vector<16x16xf32> to vector<16xf32>
    %38 = vector.shape_cast %37 : vector<16xf32> to vector<16x1xf32>
    %39 = arith.addf %36, %38 : vector<16x1xf32>
    %c0_24 = arith.constant 0 : index
    %c0_25 = arith.constant 0 : index
    %c0_26 = arith.constant 0 : index
    %40 = vector.load %arg9[%c0_24, %c0_25, %c0_26] : memref<4x16x1xf32, #tpu.memory_space<vmem>>, vector<1x16x1xf32>
    %41 = vector.shape_cast %40 : vector<1x16x1xf32> to vector<16x1xf32>
    %42 = vector.shape_cast %39 : vector<16x1xf32> to vector<1x16x1xf32>
    tpu.vector_store %arg9[%c0_24, %c0_25, %c0_26], %42 {strides = array<i32>} : memref<4x16x1xf32, #tpu.memory_space<vmem>>, vector<1x16x1xf32>,
    %c0_27 = arith.constant 0 : index
    %c0_28 = arith.constant 0 : index
    %43 = vector.load %arg10[%c0_27, %c0_28] : memref<16x128xf32, #tpu.memory_space<vmem>>, vector<16x32xf32>
    %44 = vector.broadcast %30 : vector<16x1xf32> to vector<16x32xf32>
    %45 = arith.mulf %44, %43 : vector<16x32xf32>
    %46 = arith.truncf %33 : vector<16x16xf32> to vector<16x16xbf16>
    %cst_29 = arith.constant dense<0.000000e+00> : vector<16x32xf32>
    %47 = tpu.matmul %46, %20, %cst_29 {dimension_numbers = #tpu.dot_dimension_numbers<[1], [0], [0], [1], [0, 0, 1, 1], [], []>} : vector<16x16xbf16>, vector<16x32xbf16>, vector<16x32xf32> -> vector<16x32xf32>
    %48 = arith.addf %45, %47 : vector<16x32xf32>
    %c0_30 = arith.constant 0 : index
    %c0_31 = arith.constant 0 : index
    %49 = vector.load %arg10[%c0_30, %c0_31] : memref<16x128xf32, #tpu.memory_space<vmem>>, vector<16x32xf32>
    tpu.vector_store %arg10[%c0_30, %c0_31], %48 {strides = array<i32>} : memref<16x128xf32, #tpu.memory_space<vmem>>, vector<16x32xf32>,
    %c0_32 = arith.constant 0 : index
    %c0_33 = arith.constant 0 : index
    %c0_34 = arith.constant 0 : index
    %50 = vector.load %arg8[%c0_32, %c0_33, %c0_34] : memref<4x16x1xf32, #tpu.memory_space<vmem>>, vector<1x16x1xf32>
    %51 = vector.shape_cast %50 : vector<1x16x1xf32> to vector<16x1xf32>
    %52 = vector.shape_cast %28 : vector<16x1xf32> to vector<1x16x1xf32>
    tpu.vector_store %arg8[%c0_32, %c0_33, %c0_34], %52 {strides = array<i32>} : memref<4x16x1xf32, #tpu.memory_space<vmem>>, vector<1x16x1xf32>,
    %53 = vector.extract_strided_slice %11 {offsets = [0, 32], sizes = [16, 32], strides = [1, 1]} : vector<16x128xbf16> to vector<16x32xbf16>
    %cst_35 = arith.constant 1.767580e-01 : bf16
    %54 = vector.broadcast %cst_35 : bf16 to vector<16x32xbf16>
    %55 = arith.mulf %53, %54 : vector<16x32xbf16>
    %56 = vector.extract_strided_slice %13 {offsets = [0, 32], sizes = [16, 32], strides = [1, 1]} : vector<16x128xbf16> to vector<16x32xbf16>
    %57 = vector.extract_strided_slice %15 {offsets = [0, 32], sizes = [16, 32], strides = [1, 1]} : vector<16x128xbf16> to vector<16x32xbf16>
    %cst_36 = arith.constant dense<0.000000e+00> : vector<16x16xf32>
    %58 = tpu.matmul %55, %56, %cst_36 {dimension_numbers = #tpu.dot_dimension_numbers<[1], [1], [0], [0], [0, 0, 1, 0], [], []>} : vector<16x32xbf16>, vector<16x32xbf16>, vector<16x16xf32> -> vector<16x16xf32>
    %59 = vector.broadcast %9 : vector<1x16xf32> to vector<16x16xf32>
    %60 = arith.addf %58, %59 : vector<16x16xf32>
    %c1 = arith.constant 1 : index
    %c0_37 = arith.constant 0 : index
    %c0_38 = arith.constant 0 : index
    %61 = vector.load %arg8[%c1, %c0_37, %c0_38] : memref<4x16x1xf32, #tpu.memory_space<vmem>>, vector<1x16x1xf32>
    %62 = vector.shape_cast %61 : vector<1x16x1xf32> to vector<16x1xf32>
    %cst_39 = arith.constant dense<0xFF800000> : vector<16xf32>
    %63 = vector.multi_reduction <maximumf>, %60, %cst_39 [1] : vector<16x16xf32> to vector<16xf32>
    %64 = vector.shape_cast %63 : vector<16xf32> to vector<16x1xf32>
    %65 = arith.maximumf %62, %64 : vector<16x1xf32>
    %66 = arith.subf %62, %65 : vector<16x1xf32>
    %67 = math.exp %66 : vector<16x1xf32>
    %68 = vector.broadcast %65 : vector<16x1xf32> to vector<16x16xf32>
    %69 = arith.subf %60, %68 : vector<16x16xf32>
    %70 = math.exp %69 : vector<16x16xf32>
    %c1_40 = arith.constant 1 : index
    %c0_41 = arith.constant 0 : index
    %c0_42 = arith.constant 0 : index
    %71 = vector.load %arg9[%c1_40, %c0_41, %c0_42] : memref<4x16x1xf32, #tpu.memory_space<vmem>>, vector<1x16x1xf32>
    %72 = vector.shape_cast %71 : vector<1x16x1xf32> to vector<16x1xf32>
    %73 = arith.mulf %67, %72 : vector<16x1xf32>
    %cst_43 = arith.constant dense<0.000000e+00> : vector<16xf32>
    %74 = vector.multi_reduction <add>, %70, %cst_43 [1] : vector<16x16xf32> to vector<16xf32>
    %75 = vector.shape_cast %74 : vector<16xf32> to vector<16x1xf32>
    %76 = arith.addf %73, %75 : vector<16x1xf32>
    %c1_44 = arith.constant 1 : index
    %c0_45 = arith.constant 0 : index
    %c0_46 = arith.constant 0 : index
    %77 = vector.load %arg9[%c1_44, %c0_45, %c0_46] : memref<4x16x1xf32, #tpu.memory_space<vmem>>, vector<1x16x1xf32>
    %78 = vector.shape_cast %77 : vector<1x16x1xf32> to vector<16x1xf32>
    %79 = vector.shape_cast %76 : vector<16x1xf32> to vector<1x16x1xf32>
    tpu.vector_store %arg9[%c1_44, %c0_45, %c0_46], %79 {strides = array<i32>} : memref<4x16x1xf32, #tpu.memory_space<vmem>>, vector<1x16x1xf32>,
    %c0_47 = arith.constant 0 : index
    %c32 = arith.constant 32 : index
    %80 = vector.load %arg10[%c0_47, %c32] : memref<16x128xf32, #tpu.memory_space<vmem>>, vector<16x32xf32>
    %81 = vector.broadcast %67 : vector<16x1xf32> to vector<16x32xf32>
    %82 = arith.mulf %81, %80 : vector<16x32xf32>
    %83 = arith.truncf %70 : vector<16x16xf32> to vector<16x16xbf16>
    %cst_48 = arith.constant dense<0.000000e+00> : vector<16x32xf32>
    %84 = tpu.matmul %83, %57, %cst_48 {dimension_numbers = #tpu.dot_dimension_numbers<[1], [0], [0], [1], [0, 0, 1, 1], [], []>} : vector<16x16xbf16>, vector<16x32xbf16>, vector<16x32xf32> -> vector<16x32xf32>
    %85 = arith.addf %82, %84 : vector<16x32xf32>
    %c0_49 = arith.constant 0 : index
    %c32_50 = arith.constant 32 : index
    %86 = vector.load %arg10[%c0_49, %c32_50] : memref<16x128xf32, #tpu.memory_space<vmem>>, vector<16x32xf32>
    tpu.vector_store %arg10[%c0_49, %c32_50], %85 {strides = array<i32>} : memref<16x128xf32, #tpu.memory_space<vmem>>, vector<16x32xf32>,
    %c1_51 = arith.constant 1 : index
    %c0_52 = arith.constant 0 : index
    %c0_53 = arith.constant 0 : index
    %87 = vector.load %arg8[%c1_51, %c0_52, %c0_53] : memref<4x16x1xf32, #tpu.memory_space<vmem>>, vector<1x16x1xf32>
    %88 = vector.shape_cast %87 : vector<1x16x1xf32> to vector<16x1xf32>
    %89 = vector.shape_cast %65 : vector<16x1xf32> to vector<1x16x1xf32>
    tpu.vector_store %arg8[%c1_51, %c0_52, %c0_53], %89 {strides = array<i32>} : memref<4x16x1xf32, #tpu.memory_space<vmem>>, vector<1x16x1xf32>,
    %90 = vector.extract_strided_slice %11 {offsets = [0, 64], sizes = [16, 32], strides = [1, 1]} : vector<16x128xbf16> to vector<16x32xbf16>
    %cst_54 = arith.constant 1.767580e-01 : bf16
    %91 = vector.broadcast %cst_54 : bf16 to vector<16x32xbf16>
    %92 = arith.mulf %90, %91 : vector<16x32xbf16>
    %93 = vector.extract_strided_slice %13 {offsets = [0, 64], sizes = [16, 32], strides = [1, 1]} : vector<16x128xbf16> to vector<16x32xbf16>
    %94 = vector.extract_strided_slice %15 {offsets = [0, 64], sizes = [16, 32], strides = [1, 1]} : vector<16x128xbf16> to vector<16x32xbf16>
    %cst_55 = arith.constant dense<0.000000e+00> : vector<16x16xf32>
    %95 = tpu.matmul %92, %93, %cst_55 {dimension_numbers = #tpu.dot_dimension_numbers<[1], [1], [0], [0], [0, 0, 1, 0], [], []>} : vector<16x32xbf16>, vector<16x32xbf16>, vector<16x16xf32> -> vector<16x16xf32>
    %96 = vector.broadcast %9 : vector<1x16xf32> to vector<16x16xf32>
    %97 = arith.addf %95, %96 : vector<16x16xf32>
    %c2 = arith.constant 2 : index
    %c0_56 = arith.constant 0 : index
    %c0_57 = arith.constant 0 : index
    %98 = vector.load %arg8[%c2, %c0_56, %c0_57] : memref<4x16x1xf32, #tpu.memory_space<vmem>>, vector<1x16x1xf32>
    %99 = vector.shape_cast %98 : vector<1x16x1xf32> to vector<16x1xf32>
    %cst_58 = arith.constant dense<0xFF800000> : vector<16xf32>
    %100 = vector.multi_reduction <maximumf>, %97, %cst_58 [1] : vector<16x16xf32> to vector<16xf32>
    %101 = vector.shape_cast %100 : vector<16xf32> to vector<16x1xf32>
    %102 = arith.maximumf %99, %101 : vector<16x1xf32>
    %103 = arith.subf %99, %102 : vector<16x1xf32>
    %104 = math.exp %103 : vector<16x1xf32>
    %105 = vector.broadcast %102 : vector<16x1xf32> to vector<16x16xf32>
    %106 = arith.subf %97, %105 : vector<16x16xf32>
    %107 = math.exp %106 : vector<16x16xf32>
    %c2_59 = arith.constant 2 : index
    %c0_60 = arith.constant 0 : index
    %c0_61 = arith.constant 0 : index
    %108 = vector.load %arg9[%c2_59, %c0_60, %c0_61] : memref<4x16x1xf32, #tpu.memory_space<vmem>>, vector<1x16x1xf32>
    %109 = vector.shape_cast %108 : vector<1x16x1xf32> to vector<16x1xf32>
    %110 = arith.mulf %104, %109 : vector<16x1xf32>
    %cst_62 = arith.constant dense<0.000000e+00> : vector<16xf32>
    %111 = vector.multi_reduction <add>, %107, %cst_62 [1] : vector<16x16xf32> to vector<16xf32>
    %112 = vector.shape_cast %111 : vector<16xf32> to vector<16x1xf32>
    %113 = arith.addf %110, %112 : vector<16x1xf32>
    %c2_63 = arith.constant 2 : index
    %c0_64 = arith.constant 0 : index
    %c0_65 = arith.constant 0 : index
    %114 = vector.load %arg9[%c2_63, %c0_64, %c0_65] : memref<4x16x1xf32, #tpu.memory_space<vmem>>, vector<1x16x1xf32>
    %115 = vector.shape_cast %114 : vector<1x16x1xf32> to vector<16x1xf32>
    %116 = vector.shape_cast %113 : vector<16x1xf32> to vector<1x16x1xf32>
    tpu.vector_store %arg9[%c2_63, %c0_64, %c0_65], %116 {strides = array<i32>} : memref<4x16x1xf32, #tpu.memory_space<vmem>>, vector<1x16x1xf32>,
    %c0_66 = arith.constant 0 : index
    %c64 = arith.constant 64 : index
    %117 = vector.load %arg10[%c0_66, %c64] : memref<16x128xf32, #tpu.memory_space<vmem>>, vector<16x32xf32>
    %118 = vector.broadcast %104 : vector<16x1xf32> to vector<16x32xf32>
    %119 = arith.mulf %118, %117 : vector<16x32xf32>
    %120 = arith.truncf %107 : vector<16x16xf32> to vector<16x16xbf16>
    %cst_67 = arith.constant dense<0.000000e+00> : vector<16x32xf32>
    %121 = tpu.matmul %120, %94, %cst_67 {dimension_numbers = #tpu.dot_dimension_numbers<[1], [0], [0], [1], [0, 0, 1, 1], [], []>} : vector<16x16xbf16>, vector<16x32xbf16>, vector<16x32xf32> -> vector<16x32xf32>
    %122 = arith.addf %119, %121 : vector<16x32xf32>
    %c0_68 = arith.constant 0 : index
    %c64_69 = arith.constant 64 : index
    %123 = vector.load %arg10[%c0_68, %c64_69] : memref<16x128xf32, #tpu.memory_space<vmem>>, vector<16x32xf32>
    tpu.vector_store %arg10[%c0_68, %c64_69], %122 {strides = array<i32>} : memref<16x128xf32, #tpu.memory_space<vmem>>, vector<16x32xf32>,
    %c2_70 = arith.constant 2 : index
    %c0_71 = arith.constant 0 : index
    %c0_72 = arith.constant 0 : index
    %124 = vector.load %arg8[%c2_70, %c0_71, %c0_72] : memref<4x16x1xf32, #tpu.memory_space<vmem>>, vector<1x16x1xf32>
    %125 = vector.shape_cast %124 : vector<1x16x1xf32> to vector<16x1xf32>
    %126 = vector.shape_cast %102 : vector<16x1xf32> to vector<1x16x1xf32>
    tpu.vector_store %arg8[%c2_70, %c0_71, %c0_72], %126 {strides = array<i32>} : memref<4x16x1xf32, #tpu.memory_space<vmem>>, vector<1x16x1xf32>,
    %127 = vector.extract_strided_slice %11 {offsets = [0, 96], sizes = [16, 32], strides = [1, 1]} : vector<16x128xbf16> to vector<16x32xbf16>
    %cst_73 = arith.constant 1.767580e-01 : bf16
    %128 = vector.broadcast %cst_73 : bf16 to vector<16x32xbf16>
    %129 = arith.mulf %127, %128 : vector<16x32xbf16>
    %130 = vector.extract_strided_slice %13 {offsets = [0, 96], sizes = [16, 32], strides = [1, 1]} : vector<16x128xbf16> to vector<16x32xbf16>
    %131 = vector.extract_strided_slice %15 {offsets = [0, 96], sizes = [16, 32], strides = [1, 1]} : vector<16x128xbf16> to vector<16x32xbf16>
    %cst_74 = arith.constant dense<0.000000e+00> : vector<16x16xf32>
    %132 = tpu.matmul %129, %130, %cst_74 {dimension_numbers = #tpu.dot_dimension_numbers<[1], [1], [0], [0], [0, 0, 1, 0], [], []>} : vector<16x32xbf16>, vector<16x32xbf16>, vector<16x16xf32> -> vector<16x16xf32>
    %133 = vector.broadcast %9 : vector<1x16xf32> to vector<16x16xf32>
    %134 = arith.addf %132, %133 : vector<16x16xf32>
    %c3 = arith.constant 3 : index
    %c0_75 = arith.constant 0 : index
    %c0_76 = arith.constant 0 : index
    %135 = vector.load %arg8[%c3, %c0_75, %c0_76] : memref<4x16x1xf32, #tpu.memory_space<vmem>>, vector<1x16x1xf32>
    %136 = vector.shape_cast %135 : vector<1x16x1xf32> to vector<16x1xf32>
    %cst_77 = arith.constant dense<0xFF800000> : vector<16xf32>
    %137 = vector.multi_reduction <maximumf>, %134, %cst_77 [1] : vector<16x16xf32> to vector<16xf32>
    %138 = vector.shape_cast %137 : vector<16xf32> to vector<16x1xf32>
    %139 = arith.maximumf %136, %138 : vector<16x1xf32>
    %140 = arith.subf %136, %139 : vector<16x1xf32>
    %141 = math.exp %140 : vector<16x1xf32>
    %142 = vector.broadcast %139 : vector<16x1xf32> to vector<16x16xf32>
    %143 = arith.subf %134, %142 : vector<16x16xf32>
    %144 = math.exp %143 : vector<16x16xf32>
    %c3_78 = arith.constant 3 : index
    %c0_79 = arith.constant 0 : index
    %c0_80 = arith.constant 0 : index
    %145 = vector.load %arg9[%c3_78, %c0_79, %c0_80] : memref<4x16x1xf32, #tpu.memory_space<vmem>>, vector<1x16x1xf32>
    %146 = vector.shape_cast %145 : vector<1x16x1xf32> to vector<16x1xf32>
    %147 = arith.mulf %141, %146 : vector<16x1xf32>
    %cst_81 = arith.constant dense<0.000000e+00> : vector<16xf32>
    %148 = vector.multi_reduction <add>, %144, %cst_81 [1] : vector<16x16xf32> to vector<16xf32>
    %149 = vector.shape_cast %148 : vector<16xf32> to vector<16x1xf32>
    %150 = arith.addf %147, %149 : vector<16x1xf32>
    %c3_82 = arith.constant 3 : index
    %c0_83 = arith.constant 0 : index
    %c0_84 = arith.constant 0 : index
    %151 = vector.load %arg9[%c3_82, %c0_83, %c0_84] : memref<4x16x1xf32, #tpu.memory_space<vmem>>, vector<1x16x1xf32>
    %152 = vector.shape_cast %151 : vector<1x16x1xf32> to vector<16x1xf32>
    %153 = vector.shape_cast %150 : vector<16x1xf32> to vector<1x16x1xf32>
    tpu.vector_store %arg9[%c3_82, %c0_83, %c0_84], %153 {strides = array<i32>} : memref<4x16x1xf32, #tpu.memory_space<vmem>>, vector<1x16x1xf32>,
    %c0_85 = arith.constant 0 : index
    %c96 = arith.constant 96 : index
    %154 = vector.load %arg10[%c0_85, %c96] : memref<16x128xf32, #tpu.memory_space<vmem>>, vector<16x32xf32>
    %155 = vector.broadcast %141 : vector<16x1xf32> to vector<16x32xf32>
    %156 = arith.mulf %155, %154 : vector<16x32xf32>
    %157 = arith.truncf %144 : vector<16x16xf32> to vector<16x16xbf16>
    %cst_86 = arith.constant dense<0.000000e+00> : vector<16x32xf32>
    %158 = tpu.matmul %157, %131, %cst_86 {dimension_numbers = #tpu.dot_dimension_numbers<[1], [0], [0], [1], [0, 0, 1, 1], [], []>} : vector<16x16xbf16>, vector<16x32xbf16>, vector<16x32xf32> -> vector<16x32xf32>
    %159 = arith.addf %156, %158 : vector<16x32xf32>
    %c0_87 = arith.constant 0 : index
    %c96_88 = arith.constant 96 : index
    %160 = vector.load %arg10[%c0_87, %c96_88] : memref<16x128xf32, #tpu.memory_space<vmem>>, vector<16x32xf32>
    tpu.vector_store %arg10[%c0_87, %c96_88], %159 {strides = array<i32>} : memref<16x128xf32, #tpu.memory_space<vmem>>, vector<16x32xf32>,
    %c3_89 = arith.constant 3 : index
    %c0_90 = arith.constant 0 : index
    %c0_91 = arith.constant 0 : index
    %161 = vector.load %arg8[%c3_89, %c0_90, %c0_91] : memref<4x16x1xf32, #tpu.memory_space<vmem>>, vector<1x16x1xf32>
    %162 = vector.shape_cast %161 : vector<1x16x1xf32> to vector<16x1xf32>
    %163 = vector.shape_cast %139 : vector<16x1xf32> to vector<1x16x1xf32>
    tpu.vector_store %arg8[%c3_89, %c0_90, %c0_91], %163 {strides = array<i32>} : memref<4x16x1xf32, #tpu.memory_space<vmem>>, vector<1x16x1xf32>,
    %c0_i32_92 = arith.constant 0 : i32
    %164 = arith.cmpi eq, %arg2, %c0_i32_92 : i32
    %165 = arith.extui %164 : i1 to i32
    %c0_i32_93 = arith.constant 0 : i32
    %166 = arith.cmpi ne, %165, %c0_i32_93 : i32
    scf.if %166 {
      %c0_94 = arith.constant 0 : index
      %c0_95 = arith.constant 0 : index
      %167 = vector.load %arg10[%c0_94, %c0_95] : memref<16x128xf32, #tpu.memory_space<vmem>>, vector<16x32xf32>
      %c0_96 = arith.constant 0 : index
      %c0_97 = arith.constant 0 : index
      %c0_98 = arith.constant 0 : index
      %168 = vector.load %arg9[%c0_96, %c0_97, %c0_98] : memref<4x16x1xf32, #tpu.memory_space<vmem>>, vector<1x16x1xf32>
      %169 = vector.shape_cast %168 : vector<1x16x1xf32> to vector<16x1xf32>
      %170 = tpu.reciprocal %169 : vector<16x1xf32> -> vector<16x1xf32>
      %171 = vector.broadcast %170 : vector<16x1xf32> to vector<16x32xf32>
      %172 = arith.mulf %167, %171 : vector<16x32xf32>
      %c0_99 = arith.constant 0 : index
      %c0_100 = arith.constant 0 : index
      %173 = vector.load %arg10[%c0_99, %c0_100] : memref<16x128xf32, #tpu.memory_space<vmem>>, vector<16x32xf32>
      tpu.vector_store %arg10[%c0_99, %c0_100], %172 {strides = array<i32>} : memref<16x128xf32, #tpu.memory_space<vmem>>, vector<16x32xf32>,
      %c0_101 = arith.constant 0 : index
      %c32_102 = arith.constant 32 : index
      %174 = vector.load %arg10[%c0_101, %c32_102] : memref<16x128xf32, #tpu.memory_space<vmem>>, vector<16x32xf32>
      %c1_103 = arith.constant 1 : index
      %c0_104 = arith.constant 0 : index
      %c0_105 = arith.constant 0 : index
      %175 = vector.load %arg9[%c1_103, %c0_104, %c0_105] : memref<4x16x1xf32, #tpu.memory_space<vmem>>, vector<1x16x1xf32>
      %176 = vector.shape_cast %175 : vector<1x16x1xf32> to vector<16x1xf32>
      %177 = tpu.reciprocal %176 : vector<16x1xf32> -> vector<16x1xf32>
      %178 = vector.broadcast %177 : vector<16x1xf32> to vector<16x32xf32>
      %179 = arith.mulf %174, %178 : vector<16x32xf32>
      %c0_106 = arith.constant 0 : index
      %c32_107 = arith.constant 32 : index
      %180 = vector.load %arg10[%c0_106, %c32_107] : memref<16x128xf32, #tpu.memory_space<vmem>>, vector<16x32xf32>
      tpu.vector_store %arg10[%c0_106, %c32_107], %179 {strides = array<i32>} : memref<16x128xf32, #tpu.memory_space<vmem>>, vector<16x32xf32>,
      %c0_108 = arith.constant 0 : index
      %c64_109 = arith.constant 64 : index
      %181 = vector.load %arg10[%c0_108, %c64_109] : memref<16x128xf32, #tpu.memory_space<vmem>>, vector<16x32xf32>
      %c2_110 = arith.constant 2 : index
      %c0_111 = arith.constant 0 : index
      %c0_112 = arith.constant 0 : index
      %182 = vector.load %arg9[%c2_110, %c0_111, %c0_112] : memref<4x16x1xf32, #tpu.memory_space<vmem>>, vector<1x16x1xf32>
      %183 = vector.shape_cast %182 : vector<1x16x1xf32> to vector<16x1xf32>
      %184 = tpu.reciprocal %183 : vector<16x1xf32> -> vector<16x1xf32>
      %185 = vector.broadcast %184 : vector<16x1xf32> to vector<16x32xf32>
      %186 = arith.mulf %181, %185 : vector<16x32xf32>
      %c0_113 = arith.constant 0 : index
      %c64_114 = arith.constant 64 : index
      %187 = vector.load %arg10[%c0_113, %c64_114] : memref<16x128xf32, #tpu.memory_space<vmem>>, vector<16x32xf32>
      tpu.vector_store %arg10[%c0_113, %c64_114], %186 {strides = array<i32>} : memref<16x128xf32, #tpu.memory_space<vmem>>, vector<16x32xf32>,
      %c0_115 = arith.constant 0 : index
      %c96_116 = arith.constant 96 : index
      %188 = vector.load %arg10[%c0_115, %c96_116] : memref<16x128xf32, #tpu.memory_space<vmem>>, vector<16x32xf32>
      %c3_117 = arith.constant 3 : index
      %c0_118 = arith.constant 0 : index
      %c0_119 = arith.constant 0 : index
      %189 = vector.load %arg9[%c3_117, %c0_118, %c0_119] : memref<4x16x1xf32, #tpu.memory_space<vmem>>, vector<1x16x1xf32>
      %190 = vector.shape_cast %189 : vector<1x16x1xf32> to vector<16x1xf32>
      %191 = tpu.reciprocal %190 : vector<16x1xf32> -> vector<16x1xf32>
      %192 = vector.broadcast %191 : vector<16x1xf32> to vector<16x32xf32>
      %193 = arith.mulf %188, %192 : vector<16x32xf32>
      %c0_120 = arith.constant 0 : index
      %c96_121 = arith.constant 96 : index
      %194 = vector.load %arg10[%c0_120, %c96_121] : memref<16x128xf32, #tpu.memory_space<vmem>>, vector<16x32xf32>
      tpu.vector_store %arg10[%c0_120, %c96_121], %193 {strides = array<i32>} : memref<16x128xf32, #tpu.memory_space<vmem>>, vector<16x32xf32>,
      %c0_122 = arith.constant 0 : index
      %c0_123 = arith.constant 0 : index
      %195 = vector.load %arg10[%c0_122, %c0_123] : memref<16x128xf32, #tpu.memory_space<vmem>>, vector<16x128xf32>
      %196 = arith.truncf %195 : vector<16x128xf32> to vector<16x128xbf16>
      %c0_124 = arith.constant 0 : index
      %c0_125 = arith.constant 0 : index
      %c0_126 = arith.constant 0 : index
      %197 = vector.load %arg7[%c0_124, %c0_125, %c0_126] : memref<1x16x128xbf16, #tpu.memory_space<vmem>>, vector<1x16x128xbf16>
      %198 = vector.shape_cast %197 : vector<1x16x128xbf16> to vector<16x128xbf16>
      %199 = vector.shape_cast %196 : vector<16x128xbf16> to vector<1x16x128xbf16>
      tpu.vector_store %arg7[%c0_124, %c0_125, %c0_126], %199 {strides = array<i32>} : memref<1x16x128xbf16, #tpu.memory_space<vmem>>, vector<1x16x128xbf16>,
    } else {
    }
    return
  }
  func.func @transform_0(%arg0: i32, %arg1: i32, %arg2: i32) -> (i32, i32, i32) {
    %c0_i32 = arith.constant 0 : i32
    %c0_i32_0 = arith.constant 0 : i32
    return %arg0, %arg1, %c0_i32 : i32, i32, i32
  }
  func.func @transform_1(%arg0: i32, %arg1: i32, %arg2: i32) -> (i32, i32, i32) {
    %c0_i32 = arith.constant 0 : i32
    %c0_i32_0 = arith.constant 0 : i32
    return %arg0, %arg2, %c0_i32 : i32, i32, i32
  }
  func.func @transform_2(%arg0: i32, %arg1: i32, %arg2: i32) -> (i32, i32, i32) {
    %c1_i32 = arith.constant 1 : i32
    %c0_i32 = arith.constant 0 : i32
    return %arg0, %arg2, %c1_i32 : i32, i32, i32
  }
  func.func @transform_3(%arg0: i32, %arg1: i32, %arg2: i32) -> (i32, i32, i32) {
    %c0_i32 = arith.constant 0 : i32
    %c0_i32_0 = arith.constant 0 : i32
    return %arg0, %c0_i32, %arg2 : i32, i32, i32
  }
  func.func @transform_4(%arg0: i32, %arg1: i32, %arg2: i32) -> (i32, i32, i32) {
    %c0_i32 = arith.constant 0 : i32
    %c0_i32_0 = arith.constant 0 : i32
    return %arg0, %arg1, %c0_i32 : i32, i32, i32
  }
}

module attributes {stable_mosaic.version = 11 : i64} {
  func.func @_matmul_kernel(%arg0: i32, %arg1: i32, %arg2: i32, %arg3: memref<32x128xbf16, #tpu.memory_space<vmem>>, %arg4: memref<128x256xbf16, #tpu.memory_space<vmem>>, %arg5: memref<1x256xf32, #tpu.memory_space<vmem>>, %arg6: memref<32x256xf32, #tpu.memory_space<vmem>>, %arg7: memref<32x256xf32, #tpu.memory_space<vmem>>) attributes {dimension_semantics = [#tpu.dimension_semantics<parallel>, #tpu.dimension_semantics<parallel>, #tpu.dimension_semantics<arbitrary>], iteration_bounds = array<i64: 1, 1, 1>, scalar_prefetch = 0 : i64, scratch_operands = 1 : i64, tpu.core_type = #tpu.core_type<tc>, window_params = [{transform_indices = @transform_0, window_bounds = array<i64: 32, 128>}, {transform_indices = @transform_1, window_bounds = array<i64: 128, 256>}, {transform_indices = @transform_2, window_bounds = array<i64: 1, 256>}, {transform_indices = @transform_3, window_bounds = array<i64: 32, 256>}]} {
    %c0_i32 = arith.constant 0 : i32
    %0 = arith.cmpi eq, %arg2, %c0_i32 : i32
    %1 = arith.extui %0 : i1 to i32
    %c0_i32_0 = arith.constant 0 : i32
    %2 = arith.cmpi ne, %1, %c0_i32_0 : i32
    scf.if %2 {
      %cst_10 = arith.constant 0.000000e+00 : f32
      %12 = vector.broadcast %cst_10 : f32 to vector<32x256xf32>
      %c0_11 = arith.constant 0 : index
      %c0_12 = arith.constant 0 : index
      %13 = vector.load %arg7[%c0_11, %c0_12] : memref<32x256xf32, #tpu.memory_space<vmem>>, vector<32x256xf32>
      tpu.vector_store %arg7[%c0_11, %c0_12], %12 {strides = array<i32>} : memref<32x256xf32, #tpu.memory_space<vmem>>, vector<32x256xf32>,
    } else {
    }
    %c0 = arith.constant 0 : index
    %c0_1 = arith.constant 0 : index
    %3 = vector.load %arg7[%c0, %c0_1] : memref<32x256xf32, #tpu.memory_space<vmem>>, vector<32x256xf32>
    %c0_2 = arith.constant 0 : index
    %c0_3 = arith.constant 0 : index
    %4 = vector.load %arg3[%c0_2, %c0_3] : memref<32x128xbf16, #tpu.memory_space<vmem>>, vector<32x128xbf16>
    %c0_4 = arith.constant 0 : index
    %c0_5 = arith.constant 0 : index
    %5 = vector.load %arg4[%c0_4, %c0_5] : memref<128x256xbf16, #tpu.memory_space<vmem>>, vector<128x256xbf16>
    %cst = arith.constant dense<0.000000e+00> : vector<32x256xf32>
    %6 = tpu.matmul %4, %5, %cst {dimension_numbers = #tpu.dot_dimension_numbers<[1], [0], [0], [1], [0, 0, 1, 1], [], []>} : vector<32x128xbf16>, vector<128x256xbf16>, vector<32x256xf32> -> vector<32x256xf32>
    %7 = arith.addf %3, %6 : vector<32x256xf32>
    %c0_6 = arith.constant 0 : index
    %c0_7 = arith.constant 0 : index
    %8 = vector.load %arg7[%c0_6, %c0_7] : memref<32x256xf32, #tpu.memory_space<vmem>>, vector<32x256xf32>
    tpu.vector_store %arg7[%c0_6, %c0_7], %7 {strides = array<i32>} : memref<32x256xf32, #tpu.memory_space<vmem>>, vector<32x256xf32>,
    %c0_i32_8 = arith.constant 0 : i32
    %9 = arith.cmpi eq, %arg2, %c0_i32_8 : i32
    %10 = arith.extui %9 : i1 to i32
    %c0_i32_9 = arith.constant 0 : i32
    %11 = arith.cmpi ne, %10, %c0_i32_9 : i32
    scf.if %11 {
      %c0_10 = arith.constant 0 : index
      %c0_11 = arith.constant 0 : index
      %12 = vector.load %arg7[%c0_10, %c0_11] : memref<32x256xf32, #tpu.memory_space<vmem>>, vector<32x256xf32>
      %c0_12 = arith.constant 0 : index
      %c0_13 = arith.constant 0 : index
      %13 = vector.load %arg5[%c0_12, %c0_13] : memref<1x256xf32, #tpu.memory_space<vmem>>, vector<1x256xf32>
      %14 = vector.broadcast %13 : vector<1x256xf32> to vector<32x256xf32>
      %15 = arith.addf %12, %14 : vector<32x256xf32>
      %c0_14 = arith.constant 0 : index
      %c0_15 = arith.constant 0 : index
      %16 = vector.load %arg6[%c0_14, %c0_15] : memref<32x256xf32, #tpu.memory_space<vmem>>, vector<32x256xf32>
      tpu.vector_store %arg6[%c0_14, %c0_15], %15 {strides = array<i32>} : memref<32x256xf32, #tpu.memory_space<vmem>>, vector<32x256xf32>,
    } else {
    }
    return
  }
  func.func @transform_0(%arg0: i32, %arg1: i32, %arg2: i32) -> (i32, i32) {
    %c0_i32 = arith.constant 0 : i32
    return %arg0, %arg2 : i32, i32
  }
  func.func @transform_1(%arg0: i32, %arg1: i32, %arg2: i32) -> (i32, i32) {
    %c0_i32 = arith.constant 0 : i32
    return %arg2, %arg1 : i32, i32
  }
  func.func @transform_2(%arg0: i32, %arg1: i32, %arg2: i32) -> (i32, i32) {
    %c0_i32 = arith.constant 0 : i32
    %c0_i32_0 = arith.constant 0 : i32
    return %c0_i32, %arg1 : i32, i32
  }
  func.func @transform_3(%arg0: i32, %arg1: i32, %arg2: i32) -> (i32, i32) {
    %c0_i32 = arith.constant 0 : i32
    return %arg0, %arg1 : i32, i32
  }
}

</mosaic_0001>

<bundles_post_ra>
// kernel: transformer_forward.32
= control target key start
LH: loop header
LB: loop body
LE: loop exit
PB: predicated region body
PF: predicated region fallthrough
CT: control target
= control target key end

     0   :  { %v356_v1 = vmov 0   ;;  %v229_v19 = vlaneseq  ;;  %s446_s1 = inlined_call_operand.vmem [shape: bf16[128,256], index: 1, kind: input, shape index: {}]   ;;  %s447_s0 = inlined_call_operand.vmem [shape: bf16[32,128], index: 0, kind: input, shape index: {}]   ;;  %s448_s2 = inlined_call_operand.vmem [shape: f32[1,256], index: 2, kind: input, shape index: {}]   ;;  %s449_s3 = inlined_call_operand.vmem [shape: bf16[32,256], index: 3, kind: output, shape index: {}]  }
   0x1   :  { %v330_v0 = vld [vmem:[%s446_s1 + $0x74] ss:$8 sps:$4 sm:$0xff]   ;;  %179 = vmatprep.mubr.bf16.mxu0 %v356_v1  ;;  %189 = vmatprep.mubr.bf16.mxu1 %v356_v1  ;;  %v332_v2 = vld [vmem:[%s446_s1 + $0x70] ss:$8 sps:$4 sm:$0xff]   ;;  %v333_v3 = vld [vmem:[%s446_s1 + $0x64] ss:$8 sps:$4 sm:$0xff]  }
   0x2   :  { %147 = vmatprep.subr.bf16.mxu0 %v330_v0  ;;  %313 = vmatprep.subr.bf16.mxu1 %v330_v0  ;;  %v335_v4 = vld [vmem:[%s446_s1 + $0x60] ss:$8 sps:$4 sm:$0xff]   ;;  %v336_v5 = vld [vmem:[%s446_s1 + $0x54] ss:$8 sps:$4 sm:$0xff]   ;;  %v338_v6 = vld [vmem:[%s446_s1 + $0x50] ss:$8 sps:$4 sm:$0xff]  }
   0x3   :  { %148 = vmatpush1.bf16.msra.mxu0 %v332_v2  ;;  %321 = vmatpush1.bf16.msra.mxu1 %v332_v2  ;;  %v339_v7 = vld [vmem:[%s446_s1 + $0x44] ss:$8 sps:$4 sm:$0xff]   ;;  %v341_v8 = vld [vmem:[%s446_s1 + $0x40] ss:$8 sps:$4 sm:$0xff]   ;;  %v342_v9 = vld [vmem:[%s446_s1 + $0x34] ss:$8 sps:$4 sm:$0xff]  }
   0x4   :  { %149 = vmatprep.subr.bf16.mxu0 %v333_v3  ;;  %314 = vmatprep.subr.bf16.mxu1 %v333_v3  ;;  %v344_v10 = vld [vmem:[%s446_s1 + $0x30] ss:$8 sps:$4 sm:$0xff]   ;;  %v345_v11 = vld [vmem:[%s446_s1 + $0x24] ss:$8 sps:$4 sm:$0xff]   ;;  %v347_v12 = vld [vmem:[%s446_s1 + $0x20] ss:$8 sps:$4 sm:$0xff]  }
   0x5   :  { %v348_v13 = vld [vmem:[%s446_s1 + $0x14] ss:$8 sps:$4 sm:$0xff]   ;;  %v350_v14 = vld [vmem:[%s446_s1 + $0x10] ss:$8 sps:$4 sm:$0xff]   ;;  %v351_v15 = vld [vmem:[%s446_s1 + $0x4] ss:$8 sps:$4 sm:$0xff]  }
   0x6   :  { %v353_v16 = vld [vmem:[%s446_s1] ss:$8 sps:$4 sm:$0xff]   ;;  %v230_v20 = vshrl.u32 %v229_v19, 7 }
   0x7   :  { %150 = vmatpush1.bf16.msra.mxu0 %v335_v4  ;;  %322 = vmatpush1.bf16.msra.mxu1 %v335_v4  ;;  %v354_v17 = vld [vmem:[%s447_s0] sm:$0xff]   ;;  %v355_v18 = vld [vmem:[%s447_s0 + $0x8] sm:$0xff]  }
   0x8   :  { %151 = vmatprep.subr.bf16.mxu0 %v336_v5  ;;  %315 = vmatprep.subr.bf16.mxu1 %v336_v5  ;;  %v231_v21 = vsub.s32 0, %v230_v20  ;;  %v227_v22 = vld [vmem:[%s448_s2] sm:$0x3]  ;;  %v235_v23 = vsub.s32 1, %v230_v20 }
   0xa   :  { %v232_v24 = vrot.slane %v227_v22, %v231_v21  ;;  %v236_v25 = vrot.slane %v227_v22, %v235_v23 }
   0xb   :  { %152 = vmatpush1.bf16.msra.mxu0 %v338_v6  ;;  %323 = vmatpush1.bf16.msra.mxu1 %v338_v6 }
   0xc   :  { %153 = vmatprep.subr.bf16.mxu0 %v339_v7  ;;  %316 = vmatprep.subr.bf16.mxu1 %v339_v7 }
   0xf   :  { %154 = vmatpush1.bf16.msra.mxu0 %v341_v8  ;;  %324 = vmatpush1.bf16.msra.mxu1 %v341_v8 }
  0x10   :  { %155 = vmatprep.subr.bf16.mxu0 %v342_v9  ;;  %317 = vmatprep.subr.bf16.mxu1 %v342_v9 }
  0x13   :  { %156 = vmatpush1.bf16.msra.mxu0 %v344_v10  ;;  %325 = vmatpush1.bf16.msra.mxu1 %v344_v10 }
  0x14   :  { %157 = vmatprep.subr.bf16.mxu0 %v345_v11  ;;  %318 = vmatprep.subr.bf16.mxu1 %v345_v11 }
  0x17   :  { %158 = vmatpush1.bf16.msra.mxu0 %v347_v12  ;;  %326 = vmatpush1.bf16.msra.mxu1 %v347_v12 }
  0x18   :  { %159 = vmatprep.subr.bf16.mxu0 %v348_v13  ;;  %319 = vmatprep.subr.bf16.mxu1 %v348_v13 }
  0x1b   :  { %160 = vmatpush1.bf16.msra.mxu0 %v350_v14  ;;  %327 = vmatpush1.bf16.msra.mxu1 %v350_v14 }
  0x1c   :  { %161 = vmatprep.subr.bf16.mxu0 %v351_v15  ;;  %320 = vmatprep.subr.bf16.mxu1 %v351_v15 }
  0x1f   :  { %162 = vmatpush1.bf16.msra.mxu0 %v353_v16  ;;  %328 = vmatpush1.bf16.msra.mxu1 %v353_v16 }
  0x22   :  { %180 = vmatmul.mubr.bf16.vlgmr.msra.gmra.mxu0 %v354_v17  ;;  %190 = vmatmul.mubr.bf16.vlgmr.msra.gmra.mxu1 %v355_v18 }
  0xe2   :  { %v181_v26 = vpop.f32.mrf.mxu0  ;;  %v191_v27 = vpop.f32.mrf.mxu1 }
  0xe3   :  { %v239_v28 = vadd.f32 %v232_v24, %v181_v26  ;;  %v243_v29 = vadd.f32 %v232_v24, %v191_v27 }
  0xe4   :  { %v183_v30 = vpop.f32.mrf.mxu0  ;;  %v193_v31 = vpop.f32.mrf.mxu1 }
  0xe5   :  { %v240_v32 = vadd.f32 %v236_v25, %v183_v30  ;;  %v244_v33 = vadd.f32 %v236_v25, %v193_v31  ;;  %v247_v36 = vmax.f32 %v239_v28, 0.0  ;;  %v251_v37 = vmax.f32 %v243_v29, 0.0 }
  0xe6   :  { %v185_v34 = vpop.f32.mrf.mxu0  ;;  %v195_v35 = vpop.f32.mrf.mxu1 }
  0xe7   :  { %v248_v38 = vmax.f32 %v240_v32, 0.0  ;;  %v252_v39 = vmax.f32 %v244_v33, 0.0  ;;  %v241_v40 = vadd.f32 %v232_v24, %v185_v34  ;;  %v245_v41 = vadd.f32 %v232_v24, %v195_v35 }
  0xe8   :  { %v187_v42 = vpop.f32.mrf.mxu0  ;;  %v197_v43 = vpop.f32.mrf.mxu1 }
  0xe9   :  { %v309_v44 = vpack.c.bf16 %v248_v38, %v247_v36  ;;  %v311_v45 = vpack.c.bf16 %v252_v39, %v251_v37  ;;  %v242_v46 = vadd.f32 %v236_v25, %v187_v42  ;;  %v246_v47 = vadd.f32 %v236_v25, %v197_v43 }
  0xea   :  { %v249_v48 = vmax.f32 %v241_v40, 0.0  ;;  %v253_v49 = vmax.f32 %v245_v41, 0.0 }
  0xeb   :  { %279 = vst [vmem:[%s449_s3] sm:$0xff] %v309_v44  ;;  %281 = vst [vmem:[%s449_s3 + $0x10] sm:$0xff] %v311_v45  ;;  %v250_v50 = vmax.f32 %v242_v46, 0.0  ;;  %v254_v51 = vmax.f32 %v246_v47, 0.0 }
  0xed   :  { %v310_v52 = vpack.c.bf16 %v250_v50, %v249_v48  ;;  %v312_v53 = vpack.c.bf16 %v254_v51, %v253_v49 }
  0xef   :  { %280 = vst [vmem:[%s449_s3 + $0x8] sm:$0xff] %v310_v52  ;;  %282 = vst [vmem:[%s449_s3 + $0x18] sm:$0xff] %v312_v53 }

// kernel: transformer_forward.31
= control target key start
LH: loop header
LB: loop body
LE: loop exit
PB: predicated region body
PF: predicated region fallthrough
CT: control target
= control target key end

     0   :  { %s433_s1 = inlined_call_operand.vmem [shape: bf16[128,128], index: 1, kind: input, shape index: {}]   ;;  %s434_s0 = inlined_call_operand.vmem [shape: bf16[32,128], index: 0, kind: input, shape index: {}]   ;;  %s435_s2 = inlined_call_operand.vmem [shape: f32[1,128], index: 2, kind: input, shape index: {}]   ;;  %s436_s3 = inlined_call_operand.vmem [shape: f32[32,128], index: 3, kind: input, shape index: {}]   ;;  %s437_s4 = inlined_call_operand.vmem [shape: f32[1,128], index: 4, kind: input, shape index: {}]   ;;  %s438_s5 = inlined_call_operand.vmem [shape: f32[1,128], index: 5, kind: input, shape index: {}]   ;;  %s439_s6 = inlined_call_operand.vmem [shape: f32[32,128], index: 6, kind: output, shape index: {}]  }
   0x1   :  { %v317_v0 = vld [vmem:[%s433_s1 + $0x38] sm:$0xff]   ;;  %v318_v1 = vld [vmem:[%s433_s1 + $0x30] sm:$0xff]   ;;  %v319_v2 = vld [vmem:[%s433_s1 + $0x28] sm:$0xff]  }
   0x2   :  { %297 = vmatprep.subr.bf16.mxu0 %v317_v0  ;;  %v320_v3 = vld [vmem:[%s433_s1 + $0x20] sm:$0xff]   ;;  %v321_v5 = vld [vmem:[%s433_s1 + $0x18] sm:$0xff]   ;;  %v322_v6 = vld [vmem:[%s433_s1 + $0x10] sm:$0xff]  }
   0x3   :  { %298 = vmatpush3.bf16.msra.mxu0 %v317_v0  ;;  %v325_v4 = vld [vmem:[%s434_s0] sm:$0xff]   ;;  %v323_v7 = vld [vmem:[%s433_s1 + $0x8] sm:$0xff]   ;;  %v193_v12 = vld [vmem:[%s436_s3 + $0x10] sm:$0xff] }
   0x4   :  { %299 = vmatprep.subr.bf16.mxu0 %v318_v1  ;;  %313 = vmatprep.mubr.bf16.mxu0 %v325_v4  ;;  %v324_v8 = vld [vmem:[%s433_s1] sm:$0xff]   ;;  %v326_v9 = vld [vmem:[%s434_s0 + $0x8] sm:$0xff]   ;;  %v194_v19 = vld [vmem:[%s436_s3 + $0x18] sm:$0xff] }
   0x5   :  { %v284_v10 = vld [vmem:[%s435_s2] ss:$0 sm:$0xff]  ;;  %v192_v23 = vld [vmem:[%s436_s3 + $0x8] sm:$0xff] }
   0x6   :  { %v191_v15 = vld [vmem:[%s436_s3] sm:$0xff] }
   0x7   :  { %300 = vmatpush3.bf16.msra.mxu0 %v318_v1  ;;  %v285_v56 = vld [vmem:[%s437_s4] ss:$0 sm:$0xff] }
   0x8   :  { %301 = vmatprep.subr.bf16.mxu0 %v319_v2  ;;  %v286_v58 = vld [vmem:[%s438_s5] ss:$0 sm:$0xff] }
   0xb   :  { %302 = vmatpush3.bf16.msra.mxu0 %v319_v2 }
   0xc   :  { %303 = vmatprep.subr.bf16.mxu0 %v320_v3 }
   0xf   :  { %304 = vmatpush3.bf16.msra.mxu0 %v320_v3 }
  0x10   :  { %305 = vmatprep.subr.bf16.mxu0 %v321_v5 }
  0x13   :  { %306 = vmatpush3.bf16.msra.mxu0 %v321_v5 }
  0x14   :  { %307 = vmatprep.subr.bf16.mxu0 %v322_v6 }
  0x17   :  { %308 = vmatpush3.bf16.msra.mxu0 %v322_v6 }
  0x18   :  { %309 = vmatprep.subr.bf16.mxu0 %v323_v7 }
  0x1b   :  { %310 = vmatpush3.bf16.msra.mxu0 %v323_v7 }
  0x1c   :  { %311 = vmatprep.subr.bf16.mxu0 %v324_v8 }
  0x1f   :  { %312 = vmatpush3.bf16.msra.mxu0 %v324_v8 }
  0x22   :  { %314 = vmatmul.mubr.bf16.vlgmr.msra.gmra.mxu0 %v326_v9 }
  0xe2   :  { %v315_v11 = vpop.f32.mrf.mxu0 }
  0xe3   :  { %v189_v13 = vadd.f32 %v315_v11, %v284_v10 }
  0xe4   :  { %v150_v14 = vpop.f32.mrf.mxu0 }
  0xe5   :  { %v187_v16 = vadd.f32 %v284_v10, %v150_v14  ;;  %v197_v17 = vadd.f32 %v193_v12, %v189_v13 }
  0xe6   :  { %v316_v18 = vpop.f32.mrf.mxu0 }
  0xe7   :  { %v190_v20 = vadd.f32 %v316_v18, %v284_v10  ;;  %203 = vadd.xlane.f32.xlu1 %v197_v17  ;;  %v195_v21 = vadd.f32 %v191_v15, %v187_v16 }
  0xe8   :  { %v153_v22 = vpop.f32.mrf.mxu0 }
  0xe9   :  { %v188_v24 = vadd.f32 %v284_v10, %v153_v22  ;;  %199 = vadd.xlane.f32.xlu0 %v195_v21  ;;  %v198_v25 = vadd.f32 %v194_v19, %v190_v20 }
  0xeb   :  { %205 = vadd.xlane.f32.xlu1 %v198_v25  ;;  %v196_v26 = vadd.f32 %v192_v23, %v188_v24 }
  0xed   :  { %201 = vadd.xlane.f32.xlu0 %v196_v26 }
 0x170   :  { %v204_v27 = vpop.xlane.xlu1 %203 }
 0x171   :  { %v210_v29 = vmul.f32 0.0078125, %v204_v27 }
 0x172   :  { %v200_v28 = vpop.xlane.xlu0 %199 }
 0x173   :  { %v208_v30 = vmul.f32 0.0078125, %v200_v28  ;;  %v214_v34 = vsub.f32 %v197_v17, %v210_v29 }
 0x174   :  { %v206_v31 = vpop.xlane.xlu1 %205 }
 0x175   :  { %v212_v32 = vsub.f32 %v195_v21, %v208_v30  ;;  %v211_v35 = vmul.f32 0.0078125, %v206_v31  ;;  %v218_v40 = vmul.f32 %v214_v34, %v214_v34 }
 0x176   :  { %v202_v33 = vpop.xlane.xlu0 %201 }
 0x177   :  { %v209_v36 = vmul.f32 0.0078125, %v202_v33  ;;  %v216_v37 = vmul.f32 %v212_v32, %v212_v32  ;;  %v215_v39 = vsub.f32 %v198_v25, %v211_v35 }
 0x179   :  { %v213_v38 = vsub.f32 %v196_v26, %v209_v36  ;;  %220 = vadd.xlane.f32.xlu0 %v216_v37  ;;  %v219_v42 = vmul.f32 %v215_v39, %v215_v39 }
 0x17b   :  { %v217_v41 = vmul.f32 %v213_v38, %v213_v38 }
 0x17d   :  { %224 = vadd.xlane.f32.xlu0 %v218_v40  ;;  %222 = vadd.xlane.f32.xlu1 %v217_v41 }
 0x181   :  { %226 = vadd.xlane.f32.xlu1 %v219_v42 }
 0x202   :  { %v221_v43 = vpop.xlane.xlu0 %220 }
 0x203   :  { %v228_v44 = vmul.f32 0.0078125, %v221_v43 }
 0x205   :  { %v232_v45 = vadd.f32 1e-05, %v228_v44 }
 0x206   :  { %v223_v46 = vpop.xlane.xlu1 %222  ;;  %v225_v47 = vpop.xlane.xlu0 %224 }
 0x207   :  { %327 = vrsqrt.f32 %v232_v45  ;;  %v229_v48 = vmul.f32 0.0078125, %v223_v46  ;;  %v230_v49 = vmul.f32 0.0078125, %v225_v47 }
 0x209   :  { %v233_v50 = vadd.f32 1e-05, %v229_v48  ;;  %v234_v51 = vadd.f32 1e-05, %v230_v49 }
 0x20a   :  { %v227_v52 = vpop.xlane.xlu1 %226 }
 0x20b   :  { %329 = vrsqrt.f32 %v233_v50  ;;  %v231_v53 = vmul.f32 0.0078125, %v227_v52 }
 0x20c   :  { %331 = vrsqrt.f32 %v234_v51 }
 0x20d   :  { %v235_v54 = vadd.f32 1e-05, %v231_v53 }
 0x20f   :  { %333 = vrsqrt.f32 %v235_v54 }
 0x214   :  { %v328_v55 = vpop.eup %327 }
 0x215   :  { %v240_v57 = vmul.f32 %v328_v55, %v212_v32 }
 0x217   :  { %v251_v59 = vmul.f32 %v285_v56, %v240_v57 }
 0x218   :  { %v330_v60 = vpop.eup %329 }
 0x219   :  { %v332_v61 = vpop.eup %331  ;;  %v262_v62 = vadd.f32 %v286_v58, %v251_v59  ;;  %v241_v63 = vmul.f32 %v330_v60, %v213_v38 }
 0x21a   :  { %v242_v0 = vmul.f32 %v332_v61, %v214_v34 }
 0x21b   :  { %266 = vst [vmem:[%s439_s6] sm:$0xff] %v262_v62  ;;  %v252_v1 = vmul.f32 %v285_v56, %v241_v63 }
 0x21c   :  { %v334_v2 = vpop.eup %333  ;;  %v253_v3 = vmul.f32 %v285_v56, %v242_v0 }
 0x21d   :  { %v263_v4 = vadd.f32 %v286_v58, %v252_v1  ;;  %v243_v5 = vmul.f32 %v334_v2, %v215_v39 }
 0x21e   :  { %v264_v6 = vadd.f32 %v286_v58, %v253_v3 }
 0x21f   :  { %267 = vst [vmem:[%s439_s6 + $0x8] sm:$0xff] %v263_v4  ;;  %v254_v7 = vmul.f32 %v285_v56, %v243_v5 }
 0x220   :  { %268 = vst [vmem:[%s439_s6 + $0x10] sm:$0xff] %v264_v6 }
 0x221   :  { %v265_v8 = vadd.f32 %v286_v58, %v254_v7 }
 0x223   :  { %269 = vst [vmem:[%s439_s6 + $0x18] sm:$0xff] %v265_v8 }

// kernel: transformer_forward.29
= control target key start
LH: loop header
LB: loop body
LE: loop exit
PB: predicated region body
PF: predicated region fallthrough
CT: control target
= control target key end

     0   :  { %s879_s12 = smov 0   ;;  %s881_s13 = smov 0   ;;  %s984_s0 = inlined_call_operand.vmem [shape: bf16[32,128], index: 0, kind: input, shape index: {}]   ;;  %s985_s1 = inlined_call_operand.vmem [shape: bf16[128,384], index: 1, kind: input, shape index: {}]   ;;  %s986_s2 = inlined_call_operand.vmem [shape: f32[1,384], index: 2, kind: input, shape index: {}]   ;;  %s987_s3 = inlined_call_operand.vmem [shape: bf16[32,384], index: 3, kind: output, shape index: {}]  }
   0x1   :  { %s883_s14 = smov 0   ;;  %s885_s15 = smov 0  }
   0x2   :  { %s887_s16 = smov 0  }
   0x3 LB: > { %s28_s17 = sadd.s32 1, %s853_s15  ;;  %s695_s18 = sadd.s32 4294967295, %s857_s16   ;;  %s857_s16 = sphi %s887_s16, %s13_s16   ;;  %s853_s15 = sphi %s885_s15, %s992_s15   ;;  %s849_s14 = sphi %s883_s14, %s991_s14   ;;  %s845_s13 = sphi %s881_s13, %s990_s13   ;;  %s841_s12 = sphi %s879_s12, %s989_s12  }
   0x4   : > { %p30_p0 = scmp.ge.s32.totalorder %s28_s17, 3  ;;  %p76_p1 = scmp.ne.s32.totalorder %s845_s13, %s841_s12 }
   0x5   : > { %p77_p2 = scmp.eq.s32.totalorder %s857_s16, 0  ;;  %p134_p4 = scmp.eq.s32.totalorder %s695_s18, 2 }
   0x6   : > { %s994_s17 = smov (%p30_p0, %s28_s17), 0  ;;  %s69_s20 = sadd.s32 1, %s845_s13 }
   0x7   : > { %p78_p3 = por %p77_p2, %p76_p1  ;;  %s65_s19 = ssub.s32 %s853_s15, %s994_s17 }
   0x8   : > { %p67_p5 = scmp.eq.s32.totalorder %s65_s19, 0  ;;  %p914_p6 = por %p134_p4, %p76_p1 }
   0x9   : > { %p699_p7 = scmp.ge.s32.totalorder %s857_s16, 3 }
   0xa   : > { %s919_s22 = scalar_select %p67_p5, %s845_s13, %s69_s20  }
   0xb   : > { %168 = sbr.rel (%p699_p7) target bundleno = 30 (0x1e), region = 20 }
  0x10   : > { %171 = sbr.rel (!%p78_p3) target bundleno = 30 (0x1e), region = 24  ;;  %s173_s23 = sand.u32 (%p78_p3), 1, %s845_s13  }
  0x11   : > { %s701_s24 = sshll.u32 (%p78_p3), %s853_s15, 2  ;;  %s700_s25 = sshll.u32 (%p78_p3), %s173_s23, 6 }
  0x12   : > { %s927_s28 = scalar_lea.vmem (%p78_p3), %s985_s1, %s701_s24  ;;  %s175_s29 = scalar_lea.vmem (%p78_p3), [#allocation3], %s700_s25 }
  0x13   : > { %v197_v0 = vld [vmem:[%s927_s28] sm:$0xf] (%p78_p3)  ;;  %v199_v1 = vld [vmem:[%s927_s28 + $0xc] sm:$0xf] (%p78_p3)  ;;  %v201_v2 = vld [vmem:[%s927_s28 + $0x18] sm:$0xf] (%p78_p3) }
  0x14   : > { %198 = vst [vmem:[%s175_s29] sm:$0xf] (%p78_p3), %v197_v0  ;;  %200 = vst [vmem:[%s175_s29 + $0x4] sm:$0xf] (%p78_p3), %v199_v1  ;;  %v203_v3 = vld [vmem:[%s927_s28 + $0x24] sm:$0xf] (%p78_p3) }
  0x15   : > { %v205_v4 = vld [vmem:[%s927_s28 + $0x30] sm:$0xf]  ;;  %202 = vst [vmem:[%s175_s29 + $0x8] sm:$0xf] %v201_v2  ;;  %204 = vst [vmem:[%s175_s29 + $0xc] sm:$0xf] %v203_v3 }
  0x16   : > { %206 = vst [vmem:[%s175_s29 + $0x10] sm:$0xf] %v205_v4  ;;  %v207_v5 = vld [vmem:[%s927_s28 + $0x3c] sm:$0xf]  ;;  %v209_v6 = vld [vmem:[%s927_s28 + $0x48] sm:$0xf] }
  0x17   : > { %v211_v7 = vld [vmem:[%s927_s28 + $0x54] sm:$0xf]  ;;  %208 = vst [vmem:[%s175_s29 + $0x14] sm:$0xf] %v207_v5  ;;  %210 = vst [vmem:[%s175_s29 + $0x18] sm:$0xf] %v209_v6 }
  0x18   : > { %212 = vst [vmem:[%s175_s29 + $0x1c] sm:$0xf] %v211_v7  ;;  %v213_v8 = vld [vmem:[%s927_s28 + $0x60] sm:$0xf]  ;;  %v215_v9 = vld [vmem:[%s927_s28 + $0x6c] sm:$0xf] }
  0x19   : > { %v217_v10 = vld [vmem:[%s927_s28 + $0x78] sm:$0xf]  ;;  %214 = vst [vmem:[%s175_s29 + $0x20] sm:$0xf] %v213_v8  ;;  %216 = vst [vmem:[%s175_s29 + $0x24] sm:$0xf] %v215_v9 }
  0x1a   : > { %218 = vst [vmem:[%s175_s29 + $0x28] sm:$0xf] %v217_v10  ;;  %v219_v11 = vld [vmem:[%s927_s28 + $0x84] sm:$0xf]  ;;  %v221_v12 = vld [vmem:[%s927_s28 + $0x90] sm:$0xf] }
  0x1b   : > { %v223_v13 = vld [vmem:[%s927_s28 + $0x9c] sm:$0xf]  ;;  %220 = vst [vmem:[%s175_s29 + $0x2c] sm:$0xf] %v219_v11  ;;  %222 = vst [vmem:[%s175_s29 + $0x30] sm:$0xf] %v221_v12 }
  0x1c   : > { %224 = vst [vmem:[%s175_s29 + $0x34] sm:$0xf] %v223_v13  ;;  %v225_v14 = vld [vmem:[%s927_s28 + $0xa8] sm:$0xf]  ;;  %v227_v15 = vld [vmem:[%s927_s28 + $0xb4] sm:$0xf] }
  0x1d   : > { %226 = vst [vmem:[%s175_s29 + $0x38] sm:$0xf] %v225_v14  ;;  %228 = vst [vmem:[%s175_s29 + $0x3c] sm:$0xf] %v227_v15 }
  0x1e PF: > { %p702_p8 = scmp.ge.s32.totalorder %s857_s16, 1  ;;  %p289_p9 = scmp.lt.s32.totalorder %s857_s16, 4 }
  0x20   : > { %p290_p10 = pnand %p702_p8, %p289_p9 }
  0x21   : > { %s296_s30 = sand.u32 (!%p290_p10), 1, %s841_s12   ;;  %p339_p11 = scmp.lt.s32.totalorder (!%p290_p10), %s849_s14, 2 }
  0x22   : > { %293 = sbr.rel (%p290_p10) target bundleno = 284 (0x11c), region = 69  ;;  %s703_s6 = sshll.u32 (!%p290_p10), %s296_s30, 6 }
  0x23   : > { %s298_s7 = scalar_lea.vmem (!%p290_p10), [#allocation3], %s703_s6  ;;  %s704_s20 = sshll.u32 (!%p290_p10), %s296_s30, 4 }
  0x24   : > { %s328_s23 = scalar_lea.vmem (!%p290_p10), [#allocation4], %s704_s20 }
  0x27   : > { %v817_v16 = vld [vmem:[%s984_s0] sm:$0xff]   ;;  %v809_v17 = vld [vmem:[%s298_s7 + $0x38] sm:$0xff]   ;;  %v810_v18 = vld [vmem:[%s298_s7 + $0x30] sm:$0xff]   ;;  %s340_s10 = scalar_select %p339_p11, %s849_s14, 2 }
  0x28   : > { %765 = vmatprep.mubr.bf16.mxu0 %v817_v16  ;;  %749 = vmatprep.subr.bf16.mxu0 %v809_v17  ;;  %v811_v19 = vld [vmem:[%s298_s7 + $0x28] sm:$0xff]   ;;  %v812_v20 = vld [vmem:[%s298_s7 + $0x20] sm:$0xff]   ;;  %v813_v21 = vld [vmem:[%s298_s7 + $0x18] sm:$0xff]   ;;  %s721_s24 = sshll.u32 (%p914_p6), %s849_s14, 2 }
  0x29   : > { %750 = vmatpush3.bf16.msra.mxu0 %v809_v17  ;;  %v814_v22 = vld [vmem:[%s298_s7 + $0x10] sm:$0xff]   ;;  %v815_v23 = vld [vmem:[%s298_s7 + $0x8] sm:$0xff]   ;;  %v816_v24 = vld [vmem:[%s298_s7] sm:$0xff]   ;;  %s341_s19 = scalar_lea.vmem %s986_s2, %s340_s10  ;;  %s542_s26 = scalar_lea.vmem (%p914_p6), %s987_s3, %s721_s24 }
  0x2a   : > { %751 = vmatprep.subr.bf16.mxu0 %v810_v18  ;;  %v818_v25 = vld [vmem:[%s984_s0 + $0x8] sm:$0xff]   ;;  %v715_v27 = vld [vmem:[%s341_s19] ss:$0 sm:$0xff] }
  0x2d   : > { %752 = vmatpush3.bf16.msra.mxu0 %v810_v18 }
  0x2e   : > { %753 = vmatprep.subr.bf16.mxu0 %v811_v19 }
  0x31   : > { %754 = vmatpush3.bf16.msra.mxu0 %v811_v19 }
  0x32   : > { %755 = vmatprep.subr.bf16.mxu0 %v812_v20 }
  0x35   : > { %756 = vmatpush3.bf16.msra.mxu0 %v812_v20 }
  0x36   : > { %757 = vmatprep.subr.bf16.mxu0 %v813_v21 }
  0x39   : > { %758 = vmatpush3.bf16.msra.mxu0 %v813_v21 }
  0x3a   : > { %759 = vmatprep.subr.bf16.mxu0 %v814_v22 }
  0x3d   : > { %760 = vmatpush3.bf16.msra.mxu0 %v814_v22 }
  0x3e   : > { %761 = vmatprep.subr.bf16.mxu0 %v815_v23 }
  0x41   : > { %762 = vmatpush3.bf16.msra.mxu0 %v815_v23 }
  0x42   : > { %763 = vmatprep.subr.bf16.mxu0 %v816_v24 }
  0x45   : > { %764 = vmatpush3.bf16.msra.mxu0 %v816_v24 }
  0x48   : > { %766 = vmatmul.mubr.bf16.vlgmr.msra.gmra.mxu0 %v818_v25 }
 0x108   : > { %v767_v26 = vpop.f32.mrf.mxu0 }
 0x109   : > { %v509_v30 = vadd.f32 %v767_v26, %v715_v27 }
 0x10a   : > { %v470_v28 = vpop.f32.mrf.mxu0 }
 0x10b   : > { %v507_v33 = vadd.f32 %v715_v27, %v470_v28 }
 0x10c   : > { %v768_v29 = vpop.f32.mrf.mxu0 }
 0x10d   : > { %v510_v31 = vadd.f32 %v768_v29, %v715_v27 }
 0x10e   : > { %v473_v32 = vpop.f32.mrf.mxu0 }
 0x10f   : > { %v736_v34 = vpack.c.bf16 %v510_v31, %v509_v30  ;;  %v508_v35 = vadd.f32 %v715_v27, %v473_v32  ;;  %537 = sbr.rel (!%p914_p6) target bundleno = 284 (0x11c), region = 85 }
 0x111   : > { %738 = vst [vmem:[%s328_s23 + $0x8] sm:$0xff] %v736_v34   ;;  %v731_v36 = vpack.c.bf16 %v508_v35, %v507_v33 }
 0x113   : > { %732 = vst [vmem:[%s328_s23] sm:$0xff] %v731_v36  }
 0x118   : > { %v563_v39 = vld [vmem:[%s328_s23 + $0x8] sm:$0xf]  ;;  %v565_v40 = vld [vmem:[%s328_s23 + $0xc] sm:$0xf] }
 0x119   : > { %564 = vst [vmem:[%s542_s26 + $0x18] sm:$0xf] %v563_v39  ;;  %566 = vst [vmem:[%s542_s26 + $0x24] sm:$0xf] %v565_v40 }
 0x11a   : > { %v559_v37 = vld [vmem:[%s328_s23] sm:$0xf]  ;;  %v561_v38 = vld [vmem:[%s328_s23 + $0x4] sm:$0xf] }
 0x11b   : > { %560 = vst [vmem:[%s542_s26] sm:$0xf] %v559_v37  ;;  %562 = vst [vmem:[%s542_s26 + $0xc] sm:$0xf] %v561_v38 }
 0x11c PF: > { %s13_s16 = sadd.s32 1, %s857_s16   ;;  %s989_s12 = smov %s845_s13 }
 0x11d   : > { %p10_p12 = scmp.ge.s32.totalorder %s13_s16, 5   ;;  %s990_s13 = smov %s919_s22 }
 0x11e   : > { %s991_s14 = smov %s853_s15  ;;  %s992_s15 = smov %s994_s17 }
 0x11f   :  { %12 = sbr.rel (!%p10_p12) target bundleno = 3 (0x3), region = 163 }

// kernel: transformer_forward.30
= control target key start
LH: loop header
LB: loop body
LE: loop exit
PB: predicated region body
PF: predicated region fallthrough
CT: control target
= control target key end

     0   :  { %s1727_s15 = smov 0   ;;  %s1729_s16 = smov 0   ;;  %s2127_s0 = inlined_call_operand.vmem [shape: bf16[2,16,384], index: 0, kind: input, shape index: {}, may-alias: {0,1,2}]   ;;  %s2128_s1 = inlined_call_operand.vmem [shape: bf16[2,16,384], index: 1, kind: input, shape index: {}, may-alias: {0,1,2}]   ;;  %s2129_s2 = inlined_call_operand.vmem [shape: bf16[2,16,384], index: 2, kind: input, shape index: {}, may-alias: {0,1,2}]   ;;  %s2130_s3 = inlined_call_operand.vmem [shape: f32[2,1,16], index: 3, kind: input, shape index: {}]   ;;  %s2131_s4 = inlined_call_operand.vmem [shape: bf16[2,16,128], index: 4, kind: output, shape index: {}]  }
   0x1   :  { %s1731_s17 = smov 0   ;;  %s1733_s18 = smov 0  }
   0x2   :  { %s1735_s19 = smov 0  }
   0x3 LB: > { %s33_s20 = sadd.s32 1, %s1689_s18  ;;  %p49_p1 = scmp.ne.s32.totalorder %s1681_s16, %s1677_s15  ;;  %s1693_s19 = sphi %s1735_s19, %s14_s19   ;;  %s1689_s18 = sphi %s1733_s18, %s2136_s18   ;;  %s1685_s17 = sphi %s1731_s17, %s2135_s17   ;;  %s1681_s16 = sphi %s1729_s16, %s2134_s16   ;;  %s1677_s15 = sphi %s1727_s15, %s2133_s15  }
   0x4   : > { %p35_p0 = scmp.ge.s32.totalorder %s33_s20, 2  ;;  %p50_p2 = scmp.eq.s32.totalorder %s1693_s19, 0 }
   0x5   : > { %s42_s23 = sadd.s32 1, %s1681_s16  ;;  %p1451_p5 = scmp.ge.s32.totalorder %s1693_s19, 2 }
   0x6   : > { %s2138_s20 = smov (%p35_p0, %s33_s20), 0  ;;  %p1758_p3 = por %p50_p2, %p49_p1 }
   0x7   : > { %s37_s22 = ssub.s32 %s1689_s18, %s2138_s20  ;;  %187 = sbr.rel (%p1451_p5) target bundleno = 30 (0x1e), region = 16 }
   0x8   : > { %p40_p4 = scmp.eq.s32.totalorder %s37_s22, 0 }
   0xa   : > { %s1766_s24 = scalar_select %p40_p4, %s1681_s16, %s42_s23  }
   0xc   : > { %190 = sbr.rel (!%p1758_p3) target bundleno = 18 (0x12), region = 20  ;;  %s192_s25 = sand.u32 (%p1758_p3), 1, %s1681_s16  }
   0xd   : > { %s1555_s26 = smul.u32 (%p1758_p3), 24, %s1689_s18  ;;  %s1452_s27 = sshll.u32 (%p1758_p3), %s192_s25, 3 }
   0xe   : > { %s194_s5 = scalar_lea.vmem (%p1758_p3), [#allocation5], %s1452_s27 }
   0xf   : > { %s200_s30 = scalar_lea.vmem (%p1758_p3), %s2127_s0, %s1555_s26 }
  0x10   : > { %v217_v0 = vld [vmem:[%s200_s30] sm:$0xf] (%p1758_p3)  ;;  %v219_v1 = vld [vmem:[%s200_s30 + $0xc] sm:$0xf] (%p1758_p3) }
  0x11   : > { %218 = vst [vmem:[%s194_s5] sm:$0xf] %v217_v0  ;;  %220 = vst [vmem:[%s194_s5 + $0x4] sm:$0xf] %v219_v1 }
  0x12 PF: > { %248 = sbr.rel (!%p1758_p3) target bundleno = 24 (0x18), region = 61  ;;  %s250_s6 = sand.u32 (%p1758_p3), 1, %s1681_s16  }
  0x13   : > { %s1455_s7 = smul.u32 (%p1758_p3), 24, %s1689_s18  ;;  %s1454_s8 = sshll.u32 (%p1758_p3), %s250_s6, 3 }
  0x14   : > { %s252_s12 = scalar_lea.vmem (%p1758_p3), [#allocation6], %s1454_s8 }
  0x15   : > { %s1342_s11 = scalar_lea.vmem (%p1758_p3), %s2128_s1, %s1455_s7 }
  0x16   : > { %v1456_v2 = vld [vmem:[%s1342_s11 + $0x4] sm:$0xf] (%p1758_p3)  ;;  %v1457_v3 = vld [vmem:[%s1342_s11 + $0x10] sm:$0xf] (%p1758_p3) }
  0x17   : > { %277 = vst [vmem:[%s252_s12] sm:$0xf] %v1456_v2  ;;  %279 = vst [vmem:[%s252_s12 + $0x4] sm:$0xf] %v1457_v3 }
  0x18 PF: > { %307 = sbr.rel (!%p1758_p3) target bundleno = 30 (0x1e), region = 102  ;;  %s309_s13 = sand.u32 (%p1758_p3), 1, %s1681_s16  }
  0x19   : > { %s1459_s14 = smul.u32 (%p1758_p3), 24, %s1689_s18  ;;  %s1458_s22 = sshll.u32 (%p1758_p3), %s309_s13, 3 }
  0x1a   : > { %s311_s27 = scalar_lea.vmem (%p1758_p3), [#allocation7], %s1458_s22 }
  0x1b   : > { %s1350_s26 = scalar_lea.vmem (%p1758_p3), %s2129_s2, %s1459_s14 }
  0x1c   : > { %v1460_v4 = vld [vmem:[%s1350_s26 + $0x8] sm:$0xf] (%p1758_p3)  ;;  %v1461_v5 = vld [vmem:[%s1350_s26 + $0x14] sm:$0xf] (%p1758_p3) }
  0x1d   : > { %336 = vst [vmem:[%s311_s27] sm:$0xf] %v1460_v4  ;;  %338 = vst [vmem:[%s311_s27 + $0x4] sm:$0xf] %v1461_v5 }
  0x1e PF: > { %p1462_p6 = scmp.ge.s32.totalorder %s1693_s19, 1  ;;  %p374_p7 = scmp.lt.s32.totalorder %s1693_s19, 3 }
  0x20   : > { %p375_p8 = pnand %p1462_p6, %p374_p7 }
  0x21   : > { %s381_s21 = sand.u32 (!%p375_p8), 1, %s1677_s15   ;;  %p441_p9 = scmp.lt.s32.totalorder (!%p375_p8), %s1685_s17, 1 }
  0x22   : > { %378 = sbr.rel (%p375_p8) target bundleno = 1557 (0x615), region = 147  ;;  %s1796_s28 = sshll.u32 (!%p375_p8), %s381_s21, 3 }
  0x23   : > { %s390_s15 = scalar_lea.vmem (!%p375_p8), [#allocation6], %s1796_s28  ;;  %s383_s29 = scalar_lea.vmem (!%p375_p8), [#allocation5], %s1796_s28 }
  0x24   : > { %s1699_s7 = smov (!%p375_p8), 96   ;;  %s397_s8 = scalar_lea.vmem (!%p375_p8), [#allocation7], %s1796_s28 }
  0x25   : > { %s1700_s9 = smov (!%p375_p8), 64   ;;  %s1701_s10 = smov (!%p375_p8), 32  }
  0x27   : > { %v1695_v6 = vmov 0.0   ;;  %vm1696_vm0 = vmmov 0   ;;  %vm509_vm1 = vcmask 261120   ;;  %v1804_v7 = vld [vmem:[%s390_s15] sm:$0xff]   ;;  %v485_v8 = vld [vmem:[%s383_s29] sm:$0xf]  ;;  %v494_v15 = vlaneseq }
  0x28   : > { %1507 = vmatprep.subr.bf16.mxu0 %v1695_v6  ;;  %480 = vst [vmem:[#allocation4] sm:$0xff] %v1695_v6  ;;  %481 = vst [vmem:[#allocation4 + $0x8] sm:$0xff] %v1695_v6  ;;  %1509 = vmatprep.mubr.msk.bf16.mxu0 %vm1696_vm0, %v1695_v6  ;;  %v486_v9 = vld [vmem:[%s383_s29 + $0x4] sm:$0xf]  ;;  %v514_v10 = vsel %vm509_vm1, %v1804_v7, 0  ;;  %vm463_vm2 = vcmask 7168  }
  0x29   : > { %1513 = vmatprep.subr.bf16.mxu1 %v1695_v6  ;;  %1515 = vmatprep.mubr.msk.bf16.mxu1 %vm1696_vm0, %v1695_v6  ;;  %v491_v11 = vmul.bf16 1043676725, %v485_v8  ;;  %v492_v12 = vmul.bf16 1043676725, %v486_v9  ;;  %v1697_v14 = vmov -1e+20  }
  0x2a   : > { %1508 = vmatpush3.bf16.xpose.msra.mxu0 %v514_v10  ;;  %464 = vst.msk [vmem:[#allocation2] sm:$0xff] %vm463_vm2, %v1697_v14  ;;  %465 = vst.msk [vmem:[#allocation2 + $0x8] sm:$0xff] %vm463_vm2, %v1697_v14  ;;  %s2140_s17 = smov (!%p441_p9, %s1685_s17), 1  ;;  %v495_v17 = vshrl.u32 %v494_v15, 7  ;;  %vm559_vm4 = vcmask 130048   ;;  %v1698_v29 = vmov 0  }
  0x2b   : > { %1525 = vmatprep.subr.bf16.mxu0 %v1695_v6  ;;  %v1810_v13 = vcombine.low %v491_v11, %v492_v12  ;;  %466 = vst.msk [vmem:[#allocation2 + $0x10] sm:$0xff] %vm463_vm2, %v1697_v14  ;;  %467 = vst.msk [vmem:[#allocation2 + $0x18] sm:$0xff] %vm463_vm2, %v1697_v14  ;;  %s446_s6 = scalar_lea.vmem %s2130_s3, %s2140_s17  ;;  %1603 = vset.pattern.permute.xlu1 %v1698_v29  ;;  %v1877_v38 = vld [vmem:[%s397_s8] sm:$0xff]   ;;  %vm847_vm5 = vcmask 523520   ;;  %vm1023_vm6 = vcmask 785920   ;;  %vm1199_vm7 = vcmask 1048320  }
  0x2c   : > { %468 = vst.msk [vmem:[#allocation2 + $0x20] sm:$0xff] %vm463_vm2, %v1697_v14  ;;  %469 = vst.msk [vmem:[#allocation2 + $0x28] sm:$0xff] %vm463_vm2, %v1697_v14  ;;  %v482_v16 = vld [vmem:[%s446_s6] sm:$0x1]  ;;  %v496_v18 = vsub.s32 0, %v495_v17  ;;  %1604 = vset.pattern.permute.xlu0 %v1698_v29  ;;  %1514 = vmatpush3.bf16.msra.mxu1 %v1877_v38  ;;  %s1483_s11 = sshll.u32 %s2140_s17, 3 }
  0x2d   : > { %470 = vst.msk [vmem:[#allocation2 + $0x30] sm:$0xff] %vm463_vm2, %v1697_v14  ;;  %471 = vst.msk [vmem:[#allocation2 + $0x38] sm:$0xff] %vm463_vm2, %v1697_v14  ;;  %vm483_vm3 = vcmp.ne.f32.partialorder %v482_v16, 0.0  ;;  %1519 = vmatprep.subr.bf16.mxu1 %v1695_v6  ;;  %s455_s14 = scalar_lea.vmem %s2131_s4, %s1483_s11 }
  0x2e   : > { %472 = vst.msk [vmem:[#allocation3] sm:$0xff] %vm463_vm2, %v1695_v6  ;;  %473 = vst.msk [vmem:[#allocation3 + $0x8] sm:$0xff] %vm463_vm2, %v1695_v6  ;;  %v484_v19 = vsel %vm483_vm3, 0.0, %v1697_v14 }
  0x2f   : > { %474 = vst.msk [vmem:[#allocation3 + $0x10] sm:$0xff] %vm463_vm2, %v1695_v6  ;;  %475 = vst.msk [vmem:[#allocation3 + $0x18] sm:$0xff] %vm463_vm2, %v1695_v6  ;;  %v1848_v20 = vrot.slane %v484_v19, %v496_v18 }
  0x30   : > { %476 = vst.msk [vmem:[#allocation3 + $0x20] sm:$0xff] %vm463_vm2, %v1695_v6  ;;  %477 = vst.msk [vmem:[#allocation3 + $0x28] sm:$0xff] %vm463_vm2, %v1695_v6 }
  0x31   : > { %1510 = vmatmul.mubr.msk.bf16.vlgmr.msra.gmra.mxu0 %vm509_vm1, %v1810_v13  ;;  %478 = vst.msk [vmem:[#allocation3 + $0x30] sm:$0xff] %vm463_vm2, %v1695_v6  ;;  %479 = vst.msk [vmem:[#allocation3 + $0x38] sm:$0xff] %vm463_vm2, %v1695_v6  ;;  %v1856_v30 = vld [vmem:[#allocation2] sm:$0xff]  ;;  %v1861_v33 = vld [vmem:[#allocation2 + $0x8] sm:$0xff] }
  0x32   : > { %1527 = vmatprep.mubr.msk.bf16.mxu0 %vm1696_vm0, %v1695_v6 }
  0x33   : > { %v1961_v29 = vld [vmem:[#allocation2 + $0x20] sm:$0xff] }
  0xf1   : > { %v550_v21 = vpop.f32.mrf.mxu0 }
  0xf2   : > { %v551_v22 = vadd.f32 %v550_v21, %v1848_v20 }
  0xf3   : > { %v1511_v23 = vpop.f32.mrf.mxu0 }
  0xf4   : > { %v560_v24 = vsel %vm559_vm4, %v551_v22, -inf  ;;  %v1946_v23 = vld [vmem:[#allocation2 + $0x10] sm:$0xff] }
  0xf5   : > { %561 = vmax.xlane.f32.xlu0 %v560_v24  ;;  %v553_v25 = vpop.f32.mrf.mxu0 }
  0xf6   : > { %v554_v26 = vadd.f32 %v553_v25, %v1848_v20 }
  0xf7   : > { %v1512_v27 = vpop.f32.mrf.mxu0 }
  0xf8   : > { %v563_v28 = vsel %vm559_vm4, %v554_v26, -inf }
  0xf9   : > { %564 = vmax.xlane.f32.xlu0 %v563_v28 }
 0x10f   : > { %678 = vrot.lane.b32.xlu0 %v1804_v7, %s1699_s7 }
 0x17e   : > { %v562_v31 = vpop.xlane.xlu0 %561 }
 0x17f   : > { %v1859_v32 = vmax.f32 %v1856_v30, %v562_v31 }
 0x181   : > { %v568_v34 = vsub.f32 %v1856_v30, %v1859_v32  ;;  %674 = vst.msk [vmem:[#allocation2] sm:$0xff] %vm463_vm2, %v1859_v32  ;;  %576 = vperm.xlu1 %1603, %v1859_v32  }
 0x182   : > { %v565_v35 = vpop.xlane.xlu0 %564 }
 0x183   : > { %v1869_v36 = vmax.f32 %v1861_v33, %v565_v35 }
 0x185   : > { %v569_v37 = vsub.f32 %v1861_v33, %v1869_v36  ;;  %675 = vst.msk [vmem:[#allocation2 + $0x8] sm:$0xff] %vm463_vm2, %v1869_v36  ;;  %581 = vperm.xlu1 %1603, %v1869_v36  }
 0x186   : > { %v679_v45 = vpop.permute.xlu0 %678 }
 0x187   : > { %v684_v49 = vsel %vm509_vm1, %v679_v45, 0 }
 0x189   : > { %676 = vrot.lane.b32.xlu1 %v1810_v13, %s1699_s7 }
 0x18d   : > { %854 = vrot.lane.b32.xlu1 %v1804_v7, %s1700_s9 }
 0x191   : > { %852 = vrot.lane.b32.xlu1 %v1810_v13, %s1700_s9 }
 0x195   : > { %1030 = vrot.lane.b32.xlu1 %v1804_v7, %s1701_s10 }
 0x199   : > { %1028 = vrot.lane.b32.xlu1 %v1810_v13, %s1701_s10 }
 0x1fc   : > { %v577_v39 = vpop.permute.xlu1 %576 }
 0x1fd   : > { %v584_v40 = vsub.f32 %v551_v22, %v577_v39 }
 0x1ff   : > { %v586_v41 = vmul.f32 1.442695, %v584_v40  ;;  %v1973_v40 = vld [vmem:[#allocation2 + $0x28] sm:$0xff] }
 0x200   : > { %v582_v42 = vpop.permute.xlu1 %581 }
 0x201   : > { %v585_v43 = vsub.f32 %v554_v26, %v582_v42  ;;  %1607 = vpow2.f32 %v586_v41  ;;  %v1951_v26 = vld [vmem:[#allocation2 + $0x18] sm:$0xff] }
 0x203   : > { %v588_v44 = vmul.f32 1.442695, %v585_v43 }
 0x204   : > { %v677_v46 = vpop.permute.xlu1 %676 }
 0x205   : > { %1609 = vpow2.f32 %v588_v44  ;;  %v1983_v44 = vld [vmem:[#allocation2 + $0x30] sm:$0xff] }
 0x208   : > { %v855_v51 = vpop.permute.xlu1 %854 }
 0x209   : > { %v860_v53 = vsel %vm509_vm1, %v855_v51, 0 }
 0x20c   : > { %v853_v52 = vpop.permute.xlu1 %852 }
 0x20e   : > { %v1891_v47 = vpop.eup %1607 }
 0x210   : > { %v1031_v54 = vpop.permute.xlu1 %1030 }
 0x211   : > { %v1036_v55 = vsel %vm509_vm1, %v1031_v54, 0 }
 0x212   : > { %v1893_v48 = vpop.eup %1609 }
 0x213   : > { %v619_v50 = vpack.c.bf16 %v1893_v48, %v1891_v47 }
 0x214   : > { %v1029_v56 = vpop.permute.xlu1 %1028 }
 0x215   : > { %1516 = vmatmul.mubr.msk.bf16.vlgmr.msra.gmra.mxu1 %vm559_vm4, %v619_v50  ;;  %v1993_v50 = vld [vmem:[#allocation2 + $0x38] sm:$0xff] }
 0x216   : > { %1520 = vmatpush3.bf16.xpose.msra.mxu1 %v684_v49  ;;  %1521 = vmatprep.mubr.msk.bf16.mxu1 %vm1696_vm0, %v1695_v6 }
 0x217   : > { %1531 = vmatprep.subr.bf16.mxu1 %v1695_v6 }
 0x21d   : > { %1522 = vmatmul.mubr.msk.bf16.vlgmr.msra.gmra.mxu1 %vm509_vm1, %v677_v46 }
 0x21e   : > { %1532 = vmatpush3.bf16.xpose.msra.mxu1 %v860_v53  ;;  %1533 = vmatprep.mubr.msk.bf16.mxu1 %vm1696_vm0, %v1695_v6 }
 0x21f   : > { %1543 = vmatprep.subr.bf16.mxu1 %v1695_v6 }
 0x225   : > { %1534 = vmatmul.mubr.msk.bf16.vlgmr.msra.gmra.mxu1 %vm509_vm1, %v853_v52 }
 0x226   : > { %1544 = vmatpush3.bf16.xpose.msra.mxu1 %v1036_v55  ;;  %1545 = vmatprep.mubr.msk.bf16.mxu1 %vm1696_vm0, %v1695_v6  ;;  %v597_v55 = vsel %vm559_vm4, %v1893_v48, 0.0 }
 0x22d   : > { %1546 = vmatmul.mubr.msk.bf16.vlgmr.msra.gmra.mxu1 %vm509_vm1, %v1029_v56  ;;  %v570_v56 = vmul.f32 1.442695, %v568_v34 }
 0x22f   : > { %1611 = vpow2.f32 %v570_v56 }
 0x2d5   : > { %v1912_v57 = vpop.f32.mrf.mxu1 }
 0x2d7   : > { %v1517_v58 = vpop.f32.mrf.mxu1 }
 0x2d8   : > { %v2017_v58 = vpop.eup %1611 }
 0x2d9   : > { %v1914_v59 = vpop.f32.mrf.mxu1 }
 0x2db   : > { %v1518_v60 = vpop.f32.mrf.mxu1 }
 0x2dc   : > { %v572_v60 = vmul.f32 1.442695, %v569_v37 }
 0x2dd   : > { %v720_v61 = vpop.f32.mrf.mxu1 }
 0x2de   : > { %v1917_v62 = vadd.f32 %v720_v61, %v1848_v20  ;;  %1613 = vpow2.f32 %v572_v60 }
 0x2df   : > { %v1523_v63 = vpop.f32.mrf.mxu1 }
 0x2e0   : > { %v730_v0 = vsel %vm559_vm4, %v1917_v62, -inf }
 0x2e1   : > { %731 = vmax.xlane.f32.xlu1 %v730_v0  ;;  %v723_v1 = vpop.f32.mrf.mxu1 }
 0x2e2   : > { %v1922_v2 = vadd.f32 %v723_v1, %v1848_v20 }
 0x2e3   : > { %v1524_v3 = vpop.f32.mrf.mxu1 }
 0x2e4   : > { %v733_v4 = vsel %vm559_vm4, %v1922_v2, -inf }
 0x2e5   : > { %734 = vmax.xlane.f32.xlu0 %v733_v4  ;;  %v896_v5 = vpop.f32.mrf.mxu1 }
 0x2e6   : > { %v1927_v7 = vadd.f32 %v896_v5, %v1848_v20 }
 0x2e7   : > { %v1535_v8 = vpop.f32.mrf.mxu1 }
 0x2e8   : > { %v906_v9 = vsel %vm559_vm4, %v1927_v7, -inf }
 0x2e9   : > { %907 = vmax.xlane.f32.xlu0 %v906_v9  ;;  %v899_v10 = vpop.f32.mrf.mxu1 }
 0x2ea   : > { %v1932_v11 = vadd.f32 %v899_v10, %v1848_v20 }
 0x2eb   : > { %v1536_v12 = vpop.f32.mrf.mxu1  ;;  %v1614_v48 = vpop.eup %1613 }
 0x2ec   : > { %v909_v13 = vsel %vm559_vm4, %v1932_v11, -inf }
 0x2ed   : > { %910 = vmax.xlane.f32.xlu1 %v909_v13  ;;  %v1072_v14 = vpop.f32.mrf.mxu1 }
 0x2ee   : > { %v1937_v15 = vadd.f32 %v1072_v14, %v1848_v20 }
 0x2ef   : > { %v1547_v16 = vpop.f32.mrf.mxu1 }
 0x2f0   : > { %v1082_v17 = vsel %vm559_vm4, %v1937_v15, -inf }
 0x2f1   : > { %1083 = vmax.xlane.f32.xlu0 %v1082_v17  ;;  %v1075_v18 = vpop.f32.mrf.mxu1 }
 0x2f2   : > { %v1942_v19 = vadd.f32 %v1075_v18, %v1848_v20 }
 0x2f3   : > { %v1548_v21 = vpop.f32.mrf.mxu1 }
 0x2f4   : > { %v1085_v22 = vsel %vm559_vm4, %v1942_v19, -inf }
 0x2f5   : > { %1086 = vmax.xlane.f32.xlu1 %v1085_v22 }
 0x36a   : > { %v732_v24 = vpop.xlane.xlu1 %731 }
 0x36b   : > { %v1949_v25 = vmax.f32 %v1946_v23, %v732_v24 }
 0x36d   : > { %v738_v27 = vsub.f32 %v1946_v23, %v1949_v25  ;;  %850 = vst.msk [vmem:[#allocation2 + $0x10] sm:$0xff] %vm463_vm2, %v1949_v25  ;;  %746 = vperm.xlu0 %1604, %v1949_v25  }
 0x36e   : > { %v735_v20 = vpop.xlane.xlu0 %734 }
 0x36f   : > { %v1959_v28 = vmax.f32 %v1951_v26, %v735_v20  ;;  %v591_v20 = vld [vmem:[#allocation3 + $0x8] sm:$0xff] }
 0x371   : > { %v739_v31 = vsub.f32 %v1951_v26, %v1959_v28  ;;  %851 = vst.msk [vmem:[#allocation2 + $0x18] sm:$0xff] %vm463_vm2, %v1959_v28  ;;  %1142 = vrot.lane.b32.xlu0 %v1877_v38, %s1701_s10  ;;  %751 = vperm.xlu1 %1603, %v1959_v28   ;;  %v593_v28 = vmul.f32 %v1614_v48, %v591_v20 }
 0x372   : > { %v908_v35 = vpop.xlane.xlu0 %907 }
 0x373   : > { %v1971_v39 = vmax.f32 %v1961_v29, %v908_v35  ;;  %v742_v5 = vmul.f32 1.442695, %v739_v31 }
 0x375   : > { %v914_v41 = vsub.f32 %v1961_v29, %v1971_v39  ;;  %1026 = vst.msk [vmem:[#allocation2 + $0x20] sm:$0xff] %vm463_vm2, %v1971_v39  ;;  %922 = vperm.xlu1 %1603, %v1971_v39  }
 0x376   : > { %v911_v42 = vpop.xlane.xlu1 %910 }
 0x377   : > { %v1981_v43 = vmax.f32 %v1973_v40, %v911_v42 }
 0x379   : > { %v915_v45 = vsub.f32 %v1973_v40, %v1981_v43  ;;  %1027 = vst.msk [vmem:[#allocation2 + $0x28] sm:$0xff] %vm463_vm2, %v1981_v43  ;;  %927 = vperm.xlu1 %1603, %v1981_v43  }
 0x37a   : > { %v1084_v46 = vpop.xlane.xlu0 %1083 }
 0x37b   : > { %v1991_v49 = vmax.f32 %v1983_v44, %v1084_v46 }
 0x37d   : > { %790 = vrot.lane.b32.xlu1 %v1877_v38, %s1699_s7  ;;  %v1090_v51 = vsub.f32 %v1983_v44, %v1991_v49  ;;  %1202 = vst.msk [vmem:[#allocation2 + $0x30] sm:$0xff] %vm463_vm2, %v1991_v49 }
 0x37e   : > { %v1087_v52 = vpop.xlane.xlu1 %1086 }
 0x37f   : > { %v2002_v53 = vmax.f32 %v1993_v50, %v1087_v52 }
 0x381   : > { %1098 = vperm.xlu1 %1603, %v1991_v49   ;;  %v1091_v54 = vsub.f32 %v1993_v50, %v2002_v53  ;;  %1203 = vst.msk [vmem:[#allocation2 + $0x38] sm:$0xff] %vm463_vm2, %v2002_v53 }
 0x385   : > { %1103 = vperm.xlu1 %1603, %v2002_v53  }
 0x389   : > { %966 = vrot.lane.b32.xlu1 %v1877_v38, %s1700_s9  ;;  %v594_v38 = vsel %vm559_vm4, %v1891_v47, 0.0 }
 0x390   : > { %598 = vadd.xlane.f32.xlu0 %v597_v55  ;;  %v590_v55 = vld [vmem:[#allocation3] sm:$0xff] }
 0x391   : > { %v592_v60 = vmul.f32 %v2017_v58, %v590_v55 }
 0x3a6   : > { %609 = vperm.xlu0 %1604, %v2017_v58  }
 0x3ad   : > { %595 = vadd.xlane.f32.xlu1 %v594_v38 }
 0x3be   : > { %614 = vperm.xlu1 %1603, %v1614_v48  }
 0x3e8   : > { %v747_v61 = vpop.permute.xlu0 %746 }
 0x3e9   : > { %v754_v30 = vsub.f32 %v1917_v62, %v747_v61 }
 0x3eb   : > { %v756_v32 = vmul.f32 1.442695, %v754_v30 }
 0x3ec   : > { %v752_v34 = vpop.permute.xlu1 %751 }
 0x3ed   : > { %1615 = vpow2.f32 %v756_v32  ;;  %v755_v63 = vsub.f32 %v1922_v2, %v752_v34 }
 0x3ef   : > { %v758_v0 = vmul.f32 1.442695, %v755_v63 }
 0x3f0   : > { %v923_v1 = vpop.permute.xlu1 %922 }
 0x3f1   : > { %1617 = vpow2.f32 %v758_v0  ;;  %v930_v33 = vsub.f32 %v1927_v7, %v923_v1  ;;  %v762_v0 = vld [vmem:[#allocation3 + $0x18] sm:$0xff] }
 0x3f3   : > { %v932_v36 = vmul.f32 1.442695, %v930_v33 }
 0x3f4   : > { %v928_v37 = vpop.permute.xlu1 %927 }
 0x3f5   : > { %v931_v47 = vsub.f32 %v1932_v11, %v928_v37  ;;  %1619 = vpow2.f32 %v932_v36  ;;  %v916_v37 = vmul.f32 1.442695, %v914_v41 }
 0x3f7   : > { %v934_v3 = vmul.f32 1.442695, %v931_v47 }
 0x3f8   : > { %v791_v4 = vpop.permute.xlu1 %790 }
 0x3f9   : > { %1621 = vpow2.f32 %v934_v3  ;;  %1526 = vmatpush3.bf16.msra.mxu0 %v791_v4  ;;  %v937_v4 = vld [vmem:[#allocation3 + $0x20] sm:$0xff] }
 0x3fa   : > { %v1616_v62 = vpop.eup %1615  ;;  %1537 = vmatprep.subr.bf16.mxu0 %v1695_v6  ;;  %1623 = vpow2.f32 %v742_v5 }
 0x3fb   : > { %v765_v2 = vsel %vm559_vm4, %v1616_v62, 0.0 }
 0x3fc   : > { %766 = vadd.xlane.f32.xlu1 %v765_v2  ;;  %v1099_v8 = vpop.permute.xlu1 %1098 }
 0x3fd   : > { %v1106_v9 = vsub.f32 %v1937_v15, %v1099_v8  ;;  %v740_v15 = vmul.f32 1.442695, %v738_v27 }
 0x3fe   : > { %v1618_v7 = vpop.eup %1617 }
 0x3ff   : > { %v768_v10 = vsel %vm559_vm4, %v1618_v7, 0.0  ;;  %v789_v11 = vpack.c.bf16 %v1618_v7, %v1616_v62  ;;  %v1108_v12 = vmul.f32 1.442695, %v1106_v9  ;;  %v938_v9 = vld [vmem:[#allocation3 + $0x28] sm:$0xff] }
 0x400   : > { %769 = vadd.xlane.f32.xlu0 %v768_v10  ;;  %v1104_v13 = vpop.permute.xlu1 %1103 }
 0x401   : > { %v1107_v14 = vsub.f32 %v1942_v19, %v1104_v13  ;;  %1528 = vmatmul.mubr.msk.bf16.vlgmr.msra.gmra.mxu0 %vm559_vm4, %v789_v11  ;;  %1625 = vpow2.f32 %v1108_v12  ;;  %v1143_v19 = vpop.permute.xlu0 %1142 }
 0x402   : > { %1539 = vmatprep.mubr.msk.bf16.mxu0 %vm1696_vm0, %v1695_v6  ;;  %v1620_v18 = vpop.eup %1619 }
 0x403   : > { %v1110_v16 = vmul.f32 1.442695, %v1107_v14  ;;  %v941_v52 = vsel %vm559_vm4, %v1620_v18, 0.0 }
 0x404   : > { %v967_v17 = vpop.permute.xlu1 %966 }
 0x405   : > { %1627 = vpow2.f32 %v1110_v16  ;;  %1538 = vmatpush3.bf16.msra.mxu0 %v967_v17 }
 0x406   : > { %v1622_v21 = vpop.eup %1621  ;;  %1549 = vmatprep.subr.bf16.mxu0 %v1695_v6  ;;  %1629 = vpow2.f32 %v740_v15 }
 0x407   : > { %v965_v22 = vpack.c.bf16 %v1622_v21, %v1620_v18  ;;  %v1624_v24 = vpop.eup %1623  ;;  %v944_v56 = vsel %vm559_vm4, %v1622_v21, 0.0  ;;  %1631 = vpow2.f32 %v916_v37 }
 0x408   : > { %v764_v33 = vmul.f32 %v1624_v24, %v762_v0 }
 0x409   : > { %1540 = vmatmul.mubr.msk.bf16.vlgmr.msra.gmra.mxu0 %vm559_vm4, %v965_v22 }
 0x40a   : > { %1550 = vmatpush3.bf16.msra.mxu0 %v1143_v19  ;;  %1551 = vmatprep.mubr.msk.bf16.mxu0 %vm1696_vm0, %v1695_v6 }
 0x40d   : > { %784 = vperm.xlu1 %1603, %v1624_v24  }
 0x40e   : > { %v2044_v23 = vpop.eup %1625 }
 0x412   : > { %v2046_v25 = vpop.eup %1627 }
 0x413   : > { %v1141_v26 = vpack.c.bf16 %v2046_v25, %v2044_v23  ;;  %v1630_v27 = vpop.eup %1629  ;;  %v1120_v20 = vsel %vm559_vm4, %v2046_v25, 0.0 }
 0x414   : > { %v1632_v47 = vpop.eup %1631 }
 0x415   : > { %1552 = vmatmul.mubr.msk.bf16.vlgmr.msra.gmra.mxu0 %vm559_vm4, %v1141_v26  ;;  %v939_v62 = vmul.f32 %v1632_v47, %v937_v4 }
 0x416   : > { %779 = vperm.xlu0 %1604, %v1630_v27  }
 0x419   : > { %v599_v31 = vpop.xlane.xlu0 %598 }
 0x41a   : > { %v601_v35 = vadd.f32 %v599_v31, %v593_v28  ;;  %v1092_v28 = vmul.f32 1.442695, %v1090_v51 }
 0x41c   : > { %604 = vst.msk [vmem:[#allocation3 + $0x8] sm:$0xff] %vm463_vm2, %v601_v35 }
 0x421   : > { %v610_v6 = vpop.permute.xlu0 %609 }
 0x422   : > { %v617_v42 = vmul.f32 0.0, %v610_v6 }
 0x423   : > { %v1210_v16 = vld [vmem:[#allocation3 + $0x8] sm:$0xff] }
 0x424   : > { %v670_v46 = vadd.f32 %v1912_v57, %v617_v42  ;;  %v761_v57 = vld [vmem:[#allocation3 + $0x10] sm:$0xff] }
 0x425   : > { %v763_v34 = vmul.f32 %v1630_v27, %v761_v57  ;;  %v1117_v27 = vsel %vm559_vm4, %v2044_v23, 0.0 }
 0x426   : > { %672 = vst.msk [vmem:[#allocation4] sm:$0xff] %vm509_vm1, %v670_v46 }
 0x42d   : > { %v775_v44 = vld [vmem:[#allocation4] sm:$0xff] }
 0x431   : > { %942 = vadd.xlane.f32.xlu1 %v941_v52 }
 0x435   : > { %945 = vadd.xlane.f32.xlu0 %v944_v56 }
 0x436   : > { %v596_v38 = vpop.xlane.xlu1 %595 }
 0x437   : > { %v600_v48 = vadd.f32 %v596_v38, %v592_v60 }
 0x439   : > { %603 = vst.msk [vmem:[#allocation3] sm:$0xff] %vm463_vm2, %v600_v48 }
 0x43a   : > { %v615_v61 = vpop.permute.xlu1 %614 }
 0x43b   : > { %v618_v30 = vmul.f32 0.0, %v615_v61 }
 0x43d   : > { %v671_v32 = vadd.f32 %v1914_v59, %v618_v30  ;;  %v918_v59 = vmul.f32 1.442695, %v915_v45  ;;  %v1094_v45 = vmul.f32 1.442695, %v1091_v54 }
 0x43f   : > { %673 = vst.msk [vmem:[#allocation4 + $0x8] sm:$0xff] %vm509_vm1, %v671_v32  ;;  %1633 = vpow2.f32 %v918_v59 }
 0x440   : > { %1635 = vpow2.f32 %v1094_v45  ;;  %v1209_v31 = vld [vmem:[#allocation3] sm:$0xff] }
 0x441   : > { %1637 = vrcp.f32 %v1210_v16 }
 0x446   : > { %v776_v55 = vld [vmem:[#allocation4 + $0x8] sm:$0xff] }
 0x44c   : > { %v1634_v5 = vpop.eup %1633 }
 0x44d   : > { %v940_v29 = vmul.f32 %v1634_v5, %v938_v9  ;;  %v1636_v50 = vpop.eup %1635 }
 0x44e   : > { %v1638_v19 = vpop.eup %1637 }
 0x485   : > { %v767_v63 = vpop.xlane.xlu1 %766 }
 0x486   : > { %v771_v1 = vadd.f32 %v767_v63, %v763_v34  ;;  %v1113_v34 = vld [vmem:[#allocation3 + $0x30] sm:$0xff] }
 0x488   : > { %773 = vst.msk [vmem:[#allocation3 + $0x10] sm:$0xff] %vm463_vm2, %v771_v1  ;;  %v1114_v1 = vld [vmem:[#allocation3 + $0x38] sm:$0xff] }
 0x489   : > { %v770_v36 = vpop.xlane.xlu0 %769  ;;  %v2068_v3 = vpop.permute.xlu1 %784 }
 0x48a   : > { %v772_v58 = vadd.f32 %v770_v36, %v764_v33  ;;  %v788_v56 = vmul.f32 %v2068_v3, %v776_v55  ;;  %v1116_v36 = vmul.f32 %v1636_v50, %v1114_v1 }
 0x48c   : > { %774 = vst.msk [vmem:[#allocation3 + $0x18] sm:$0xff] %vm463_vm2, %v772_v58 }
 0x48f   : > { %v1229_v35 = vld [vmem:[#allocation3 + $0x10] sm:$0xff] }
 0x491   : > { %v2070_v2 = vpop.permute.xlu0 %779 }
 0x492   : > { %v787_v49 = vmul.f32 %v2070_v2, %v775_v44 }
 0x493   : > { %v1230_v17 = vld [vmem:[#allocation3 + $0x18] sm:$0xff] }
 0x494   : > { %1639 = vrcp.f32 %v1230_v17 }
 0x4a1   : > { %v1640_v24 = vpop.eup %1639 }
 0x4ba   : > { %v943_v8 = vpop.xlane.xlu1 %942 }
 0x4bb   : > { %v947_v7 = vadd.f32 %v943_v8, %v939_v62 }
 0x4bd   : > { %949 = vst.msk [vmem:[#allocation3 + $0x20] sm:$0xff] %vm463_vm2, %v947_v7 }
 0x4be   : > { %v946_v39 = vpop.xlane.xlu0 %945 }
 0x4bf   : > { %v948_v41 = vadd.f32 %v946_v39, %v940_v29 }
 0x4c1   : > { %950 = vst.msk [vmem:[#allocation3 + $0x28] sm:$0xff] %vm463_vm2, %v948_v41  ;;  %v830_v40 = vpop.f32.mrf.mxu0 }
 0x4c2   : > { %839 = vrot.lane.b32.xlu1 %v830_v40, %s1701_s10 }
 0x4c3   : > { %v1529_v43 = vpop.f32.mrf.mxu0 }
 0x4c4   : > { %v1249_v42 = vld [vmem:[#allocation3 + $0x20] sm:$0xff] }
 0x4c5   : > { %v833_v10 = vpop.f32.mrf.mxu0 }
 0x4c6   : > { %841 = vrot.lane.b32.xlu0 %v833_v10, %s1701_s10 }
 0x4c7   : > { %v1530_v11 = vpop.f32.mrf.mxu0 }
 0x4c8   : > { %v1250_v54 = vld [vmem:[#allocation3 + $0x28] sm:$0xff] }
 0x4c9   : > { %v1006_v12 = vpop.f32.mrf.mxu0  ;;  %1641 = vrcp.f32 %v1250_v54 }
 0x4ca   : > { %955 = vperm.xlu0 %1604, %v1632_v47   ;;  %1643 = vpow2.f32 %v1092_v28 }
 0x4cb   : > { %v1541_v13 = vpop.f32.mrf.mxu0  ;;  %1645 = vrcp.f32 %v1209_v31 }
 0x4cc   : > { %1647 = vrcp.f32 %v1229_v35 }
 0x4cd   : > { %v1009_v14 = vpop.f32.mrf.mxu0  ;;  %1649 = vrcp.f32 %v1249_v42 }
 0x4ce   : > { %1015 = vrot.lane.b32.xlu0 %v1006_v12, %s1700_s9 }
 0x4cf   : > { %v1542_v15 = vpop.f32.mrf.mxu0 }
 0x4d2   : > { %1017 = vrot.lane.b32.xlu0 %v1009_v14, %s1700_s9 }
 0x4d5   : > { %v1182_v53 = vpop.f32.mrf.mxu0 }
 0x4d6   : > { %1136 = vperm.xlu0 %1604, %v1636_v50   ;;  %v1642_v26 = vpop.eup %1641 }
 0x4d7   : > { %v1553_v18 = vpop.f32.mrf.mxu0  ;;  %v1644_v6 = vpop.eup %1643 }
 0x4d8   : > { %v1646_v23 = vpop.eup %1645  ;;  %v1115_v63 = vmul.f32 %v1644_v6, %v1113_v34 }
 0x4d9   : > { %v1185_v21 = vpop.f32.mrf.mxu0  ;;  %v1648_v25 = vpop.eup %1647 }
 0x4da   : > { %1193 = vrot.lane.b32.xlu0 %v1185_v21, %s1699_s7  ;;  %v1650_v46 = vpop.eup %1649 }
 0x4db   : > { %v1554_v22 = vpop.f32.mrf.mxu0 }
 0x4de   : > { %1220 = vperm.xlu0 %1604, %v1638_v19  }
 0x4e2   : > { %1240 = vperm.xlu0 %1604, %v1640_v24  }
 0x4e6   : > { %1118 = vadd.xlane.f32.xlu1 %v1117_v27  ;;  %1260 = vperm.xlu0 %1604, %v1642_v26  }
 0x4ea   : > { %1121 = vadd.xlane.f32.xlu1 %v1120_v20 }
 0x4fb   : > { %960 = vperm.xlu1 %1603, %v1634_v5  }
 0x4ff   : > { %1131 = vperm.xlu1 %1603, %v1644_v6  }
 0x503   : > { %1191 = vrot.lane.b32.xlu1 %v1182_v53, %s1699_s7 }
 0x507   : > { %1215 = vperm.xlu1 %1603, %v1646_v23  }
 0x50b   : > { %1235 = vperm.xlu1 %1603, %v1648_v25  }
 0x50f   : > { %1255 = vperm.xlu1 %1603, %v1650_v46  }
 0x534   : > { %v840_v51 = vpop.permute.xlu1 %839 }
 0x535   : > { %v845_v52 = vadd.f32 %v840_v51, %v787_v49 }
 0x537   : > { %848 = vst.msk [vmem:[#allocation4] sm:$0xff] %vm847_vm5, %v845_v52 }
 0x538   : > { %v842_v60 = vpop.permute.xlu0 %841 }
 0x539   : > { %v846_v38 = vadd.f32 %v842_v60, %v788_v56 }
 0x53b   : > { %849 = vst.msk [vmem:[#allocation4 + $0x8] sm:$0xff] %vm847_vm5, %v846_v38 }
 0x53e   : > { %v951_v61 = vld [vmem:[#allocation4] sm:$0xff] }
 0x542   : > { %v952_v47 = vld [vmem:[#allocation4 + $0x8] sm:$0xff] }
 0x545   : > { %v956_v48 = vpop.permute.xlu0 %955 }
 0x546   : > { %v963_v30 = vmul.f32 %v956_v48, %v951_v61 }
 0x549   : > { %v1016_v32 = vpop.permute.xlu0 %1015 }
 0x54a   : > { %v1021_v57 = vadd.f32 %v1016_v32, %v963_v30 }
 0x54c   : > { %1024 = vst.msk [vmem:[#allocation4] sm:$0xff] %vm1023_vm6, %v1021_v57 }
 0x54d   : > { %v1018_v4 = vpop.permute.xlu0 %1017 }
 0x551   : > { %v1137_v29 = vpop.permute.xlu0 %1136 }
 0x553   : > { %v1127_v8 = vld [vmem:[#allocation4] sm:$0xff] }
 0x555   : > { %v1194_v45 = vpop.permute.xlu0 %1193 }
 0x559   : > { %v1221_v15 = vpop.permute.xlu0 %1220 }
 0x55d   : > { %v1241_v21 = vpop.permute.xlu0 %1240 }
 0x561   : > { %v1261_v20 = vpop.permute.xlu0 %1260 }
 0x56f   : > { %v1119_v0 = vpop.xlane.xlu1 %1118 }
 0x570   : > { %v1123_v33 = vadd.f32 %v1119_v0, %v1115_v63 }
 0x572   : > { %1125 = vst.msk [vmem:[#allocation3 + $0x30] sm:$0xff] %vm463_vm2, %v1123_v33 }
 0x573   : > { %v1122_v58 = vpop.xlane.xlu1 %1121 }
 0x574   : > { %v1124_v37 = vadd.f32 %v1122_v58, %v1116_v36 }
 0x576   : > { %1126 = vst.msk [vmem:[#allocation3 + $0x38] sm:$0xff] %vm463_vm2, %v1124_v37 }
 0x577   : > { %v961_v59 = vpop.permute.xlu1 %960 }
 0x578   : > { %v964_v3 = vmul.f32 %v961_v59, %v952_v47 }
 0x579   : > { %v1269_v62 = vld [vmem:[#allocation3 + $0x30] sm:$0xff] }
 0x57a   : > { %v1022_v5 = vadd.f32 %v1018_v4, %v964_v3  ;;  %1651 = vrcp.f32 %v1269_v62 }
 0x57b   : > { %v1132_v2 = vpop.permute.xlu1 %1131 }
 0x57c   : > { %1025 = vst.msk [vmem:[#allocation4 + $0x8] sm:$0xff] %vm1023_vm6, %v1022_v5  ;;  %v1139_v7 = vmul.f32 %v1132_v2, %v1127_v8 }
 0x57d   : > { %v1270_v9 = vld [vmem:[#allocation3 + $0x38] sm:$0xff] }
 0x57e   : > { %1653 = vrcp.f32 %v1270_v9 }
 0x57f   : > { %v1192_v39 = vpop.permute.xlu1 %1191 }
 0x580   : > { %v1197_v41 = vadd.f32 %v1192_v39, %v1139_v7 }
 0x582   : > { %1200 = vst.msk [vmem:[#allocation4] sm:$0xff] %vm1199_vm7, %v1197_v41 }
 0x583   : > { %v1128_v40 = vld [vmem:[#allocation4 + $0x8] sm:$0xff]  ;;  %v1216_v13 = vpop.permute.xlu1 %1215 }
 0x584   : > { %v1140_v43 = vmul.f32 %v1137_v29, %v1128_v40 }
 0x586   : > { %v1198_v10 = vadd.f32 %v1194_v45, %v1140_v43 }
 0x587   : > { %v1652_v11 = vpop.eup %1651  ;;  %v1236_v54 = vpop.permute.xlu1 %1235 }
 0x588   : > { %1201 = vst.msk [vmem:[#allocation4 + $0x8] sm:$0xff] %vm1199_vm7, %v1198_v10  ;;  %1275 = vperm.xlu1 %1603, %v1652_v11  }
 0x589   : > { %v1207_v12 = vld [vmem:[#allocation4] sm:$0xff] }
 0x58a   : > { %v1223_v14 = vmul.f32 %v1216_v13, %v1207_v12 }
 0x58b   : > { %v1654_v16 = vpop.eup %1653  ;;  %v1256_v26 = vpop.permute.xlu1 %1255 }
 0x58c   : > { %1225 = vst.msk [vmem:[#allocation4] sm:$0xff] %vm509_vm1, %v1223_v14  ;;  %1280 = vperm.xlu0 %1604, %v1654_v16  }
 0x58f   : > { %v1208_v17 = vld [vmem:[#allocation4 + $0x8] sm:$0xff] }
 0x590   : > { %v1224_v50 = vmul.f32 %v1221_v15, %v1208_v17 }
 0x592   : > { %1226 = vst.msk [vmem:[#allocation4 + $0x8] sm:$0xff] %vm509_vm1, %v1224_v50 }
 0x593   : > { %v1227_v53 = vld [vmem:[#allocation4] sm:$0xff] }
 0x594   : > { %v1243_v18 = vmul.f32 %v1236_v54, %v1227_v53 }
 0x596   : > { %1245 = vst.msk [vmem:[#allocation4] sm:$0xff] %vm847_vm5, %v1243_v18 }
 0x599   : > { %v1228_v22 = vld [vmem:[#allocation4 + $0x8] sm:$0xff] }
 0x59a   : > { %v1244_v19 = vmul.f32 %v1241_v21, %v1228_v22 }
 0x59c   : > { %1246 = vst.msk [vmem:[#allocation4 + $0x8] sm:$0xff] %vm847_vm5, %v1244_v19 }
 0x59d   : > { %v1247_v24 = vld [vmem:[#allocation4] sm:$0xff] }
 0x59e   : > { %v1263_v27 = vmul.f32 %v1256_v26, %v1247_v24 }
 0x5a0   : > { %1265 = vst.msk [vmem:[#allocation4] sm:$0xff] %vm1023_vm6, %v1263_v27 }
 0x5a3   : > { %v1248_v28 = vld [vmem:[#allocation4 + $0x8] sm:$0xff] }
 0x5a4   : > { %v1264_v31 = vmul.f32 %v1261_v20, %v1248_v28 }
 0x5a6   : > { %1266 = vst.msk [vmem:[#allocation4 + $0x8] sm:$0xff] %vm1023_vm6, %v1264_v31 }
 0x5a7   : > { %v1267_v35 = vld [vmem:[#allocation4] sm:$0xff] }
 0x5ad   : > { %v1268_v23 = vld [vmem:[#allocation4 + $0x8] sm:$0xff] }
 0x603   : > { %v1276_v6 = vpop.permute.xlu1 %1275 }
 0x604   : > { %v1283_v42 = vmul.f32 %v1276_v6, %v1267_v35 }
 0x606   : > { %1285 = vst.msk [vmem:[#allocation4] sm:$0xff] %vm1199_vm7, %v1283_v42 }
 0x607   : > { %v1281_v25 = vpop.permute.xlu0 %1280 }
 0x608   : > { %v1284_v46 = vmul.f32 %v1281_v25, %v1268_v23 }
 0x60a   : > { %1286 = vst.msk [vmem:[#allocation4 + $0x8] sm:$0xff] %vm1199_vm7, %v1284_v46 }
 0x60d   : > { %v1287_v44 = vld [vmem:[#allocation4] sm:$0xff] }
 0x611   : > { %v1288_v49 = vld [vmem:[#allocation4 + $0x8] sm:$0xff] }
 0x612   : > { %v1489_v51 = vpack.c.bf16 %v1288_v49, %v1287_v44 }
 0x614   : > { %1490 = vst [vmem:[%s455_s14] sm:$0xff] %v1489_v51  }
 0x615 PF: > { %s14_s19 = sadd.s32 1, %s1693_s19   ;;  %s2133_s15 = smov %s1681_s16 }
 0x616   : > { %p11_p10 = scmp.ge.s32.totalorder %s14_s19, 4   ;;  %s2134_s16 = smov %s1766_s24 }
 0x617   : > { %s2135_s17 = smov %s1689_s18  ;;  %s2136_s18 = smov %s2138_s20 }
 0x618   :  { %13 = sbr.rel (!%p11_p10) target bundleno = 3 (0x3), region = 227 }

// kernel: transformer_forward.43
= control target key start
LH: loop header
LB: loop body
LE: loop exit
PB: predicated region body
PF: predicated region fallthrough
CT: control target
= control target key end

     0   :  { %v348_v1 = vmov 0   ;;  %v229_v19 = vlaneseq  ;;  %s438_s1 = inlined_call_operand.vmem [shape: bf16[128,256], index: 1, kind: input, shape index: {}]   ;;  %s439_s0 = inlined_call_operand.vmem [shape: bf16[32,128], index: 0, kind: input, shape index: {}]   ;;  %s440_s2 = inlined_call_operand.vmem [shape: f32[1,256], index: 2, kind: input, shape index: {}]   ;;  %s441_s3 = inlined_call_operand.vmem [shape: bf16[32,256], index: 3, kind: output, shape index: {}]  }
   0x1   :  { %v322_v0 = vld [vmem:[%s438_s1 + $0x74] ss:$8 sps:$4 sm:$0xff]   ;;  %179 = vmatprep.mubr.bf16.mxu0 %v348_v1  ;;  %189 = vmatprep.mubr.bf16.mxu1 %v348_v1  ;;  %v324_v2 = vld [vmem:[%s438_s1 + $0x70] ss:$8 sps:$4 sm:$0xff]   ;;  %v325_v3 = vld [vmem:[%s438_s1 + $0x64] ss:$8 sps:$4 sm:$0xff]  }
   0x2   :  { %147 = vmatprep.subr.bf16.mxu0 %v322_v0  ;;  %305 = vmatprep.subr.bf16.mxu1 %v322_v0  ;;  %v327_v4 = vld [vmem:[%s438_s1 + $0x60] ss:$8 sps:$4 sm:$0xff]   ;;  %v328_v5 = vld [vmem:[%s438_s1 + $0x54] ss:$8 sps:$4 sm:$0xff]   ;;  %v330_v6 = vld [vmem:[%s438_s1 + $0x50] ss:$8 sps:$4 sm:$0xff]  }
   0x3   :  { %148 = vmatpush1.bf16.msra.mxu0 %v324_v2  ;;  %313 = vmatpush1.bf16.msra.mxu1 %v324_v2  ;;  %v331_v7 = vld [vmem:[%s438_s1 + $0x44] ss:$8 sps:$4 sm:$0xff]   ;;  %v333_v8 = vld [vmem:[%s438_s1 + $0x40] ss:$8 sps:$4 sm:$0xff]   ;;  %v334_v9 = vld [vmem:[%s438_s1 + $0x34] ss:$8 sps:$4 sm:$0xff]  }
   0x4   :  { %149 = vmatprep.subr.bf16.mxu0 %v325_v3  ;;  %306 = vmatprep.subr.bf16.mxu1 %v325_v3  ;;  %v336_v10 = vld [vmem:[%s438_s1 + $0x30] ss:$8 sps:$4 sm:$0xff]   ;;  %v337_v11 = vld [vmem:[%s438_s1 + $0x24] ss:$8 sps:$4 sm:$0xff]   ;;  %v339_v12 = vld [vmem:[%s438_s1 + $0x20] ss:$8 sps:$4 sm:$0xff]  }
   0x5   :  { %v340_v13 = vld [vmem:[%s438_s1 + $0x14] ss:$8 sps:$4 sm:$0xff]   ;;  %v342_v14 = vld [vmem:[%s438_s1 + $0x10] ss:$8 sps:$4 sm:$0xff]   ;;  %v343_v15 = vld [vmem:[%s438_s1 + $0x4] ss:$8 sps:$4 sm:$0xff]  }
   0x6   :  { %v345_v16 = vld [vmem:[%s438_s1] ss:$8 sps:$4 sm:$0xff]   ;;  %v230_v20 = vshrl.u32 %v229_v19, 7 }
   0x7   :  { %150 = vmatpush1.bf16.msra.mxu0 %v327_v4  ;;  %314 = vmatpush1.bf16.msra.mxu1 %v327_v4  ;;  %v346_v17 = vld [vmem:[%s439_s0] sm:$0xff]   ;;  %v347_v18 = vld [vmem:[%s439_s0 + $0x8] sm:$0xff]  }
   0x8   :  { %151 = vmatprep.subr.bf16.mxu0 %v328_v5  ;;  %307 = vmatprep.subr.bf16.mxu1 %v328_v5  ;;  %v231_v21 = vsub.s32 0, %v230_v20  ;;  %v235_v22 = vsub.s32 1, %v230_v20  ;;  %v227_v23 = vld [vmem:[%s440_s2] sm:$0x3] }
   0xa   :  { %v232_v24 = vrot.slane %v227_v23, %v231_v21  ;;  %v236_v25 = vrot.slane %v227_v23, %v235_v22 }
   0xb   :  { %152 = vmatpush1.bf16.msra.mxu0 %v330_v6  ;;  %315 = vmatpush1.bf16.msra.mxu1 %v330_v6 }
   0xc   :  { %153 = vmatprep.subr.bf16.mxu0 %v331_v7  ;;  %308 = vmatprep.subr.bf16.mxu1 %v331_v7 }
   0xf   :  { %154 = vmatpush1.bf16.msra.mxu0 %v333_v8  ;;  %316 = vmatpush1.bf16.msra.mxu1 %v333_v8 }
  0x10   :  { %155 = vmatprep.subr.bf16.mxu0 %v334_v9  ;;  %309 = vmatprep.subr.bf16.mxu1 %v334_v9 }
  0x13   :  { %156 = vmatpush1.bf16.msra.mxu0 %v336_v10  ;;  %317 = vmatpush1.bf16.msra.mxu1 %v336_v10 }
  0x14   :  { %157 = vmatprep.subr.bf16.mxu0 %v337_v11  ;;  %310 = vmatprep.subr.bf16.mxu1 %v337_v11 }
  0x17   :  { %158 = vmatpush1.bf16.msra.mxu0 %v339_v12  ;;  %318 = vmatpush1.bf16.msra.mxu1 %v339_v12 }
  0x18   :  { %159 = vmatprep.subr.bf16.mxu0 %v340_v13  ;;  %311 = vmatprep.subr.bf16.mxu1 %v340_v13 }
  0x1b   :  { %160 = vmatpush1.bf16.msra.mxu0 %v342_v14  ;;  %319 = vmatpush1.bf16.msra.mxu1 %v342_v14 }
  0x1c   :  { %161 = vmatprep.subr.bf16.mxu0 %v343_v15  ;;  %312 = vmatprep.subr.bf16.mxu1 %v343_v15 }
  0x1f   :  { %162 = vmatpush1.bf16.msra.mxu0 %v345_v16  ;;  %320 = vmatpush1.bf16.msra.mxu1 %v345_v16 }
  0x22   :  { %180 = vmatmul.mubr.bf16.vlgmr.msra.gmra.mxu0 %v346_v17  ;;  %190 = vmatmul.mubr.bf16.vlgmr.msra.gmra.mxu1 %v347_v18 }
  0xe2   :  { %v181_v26 = vpop.f32.mrf.mxu0  ;;  %v191_v27 = vpop.f32.mrf.mxu1 }
  0xe3   :  { %v239_v30 = vadd.f32 %v232_v24, %v181_v26  ;;  %v243_v31 = vadd.f32 %v232_v24, %v191_v27 }
  0xe4   :  { %v183_v28 = vpop.f32.mrf.mxu0  ;;  %v193_v29 = vpop.f32.mrf.mxu1 }
  0xe5   :  { %v240_v32 = vadd.f32 %v236_v25, %v183_v28  ;;  %v244_v33 = vadd.f32 %v236_v25, %v193_v29 }
  0xe6   :  { %v185_v34 = vpop.f32.mrf.mxu0  ;;  %v195_v35 = vpop.f32.mrf.mxu1 }
  0xe7   :  { %v301_v36 = vpack.c.bf16 %v240_v32, %v239_v30  ;;  %v303_v37 = vpack.c.bf16 %v244_v33, %v243_v31  ;;  %v241_v40 = vadd.f32 %v232_v24, %v185_v34  ;;  %v245_v41 = vadd.f32 %v232_v24, %v195_v35 }
  0xe8   :  { %v187_v38 = vpop.f32.mrf.mxu0  ;;  %v197_v39 = vpop.f32.mrf.mxu1 }
  0xe9   :  { %271 = vst [vmem:[%s441_s3] sm:$0xff] %v301_v36  ;;  %273 = vst [vmem:[%s441_s3 + $0x10] sm:$0xff] %v303_v37  ;;  %v242_v42 = vadd.f32 %v236_v25, %v187_v38  ;;  %v246_v43 = vadd.f32 %v236_v25, %v197_v39 }
  0xeb   :  { %v302_v44 = vpack.c.bf16 %v242_v42, %v241_v40  ;;  %v304_v45 = vpack.c.bf16 %v246_v43, %v245_v41 }
  0xed   :  { %272 = vst [vmem:[%s441_s3 + $0x8] sm:$0xff] %v302_v44  ;;  %274 = vst [vmem:[%s441_s3 + $0x18] sm:$0xff] %v304_v45 }

// kernel: transformer_forward.33
= control target key start
LH: loop header
LB: loop body
LE: loop exit
PB: predicated region body
PF: predicated region fallthrough
CT: control target
= control target key end

     0   :  { %s571_s1 = inlined_call_operand.vmem [shape: bf16[256,128], index: 1, kind: input, shape index: {}]   ;;  %s572_s0 = inlined_call_operand.vmem [shape: bf16[32,256], index: 0, kind: input, shape index: {}]   ;;  %s573_s2 = inlined_call_operand.vmem [shape: f32[1,128], index: 2, kind: input, shape index: {}]   ;;  %s574_s3 = inlined_call_operand.vmem [shape: f32[32,128], index: 3, kind: input, shape index: {}]   ;;  %s575_s4 = inlined_call_operand.vmem [shape: f32[1,128], index: 4, kind: input, shape index: {}]   ;;  %s576_s5 = inlined_call_operand.vmem [shape: f32[1,128], index: 5, kind: input, shape index: {}]   ;;  %s577_s6 = inlined_call_operand.vmem [shape: f32[32,128], index: 6, kind: output, shape index: {}]  }
   0x1   :  { %v413_v0 = vld [vmem:[%s571_s1 + $0x78] sm:$0xff]   ;;  %v415_v2 = vld [vmem:[%s571_s1 + $0x70] sm:$0xff]   ;;  %v417_v4 = vld [vmem:[%s571_s1 + $0x68] sm:$0xff]  }
   0x2   :  { %v414_v1 = vld [vmem:[%s571_s1 + $0x38] sm:$0xff]   ;;  %369 = vmatprep.subr.bf16.mxu0 %v413_v0  ;;  %397 = vmatprep.subr.bf16.mxu1 %v413_v0  ;;  %v416_v3 = vld [vmem:[%s571_s1 + $0x30] sm:$0xff]   ;;  %v418_v5 = vld [vmem:[%s571_s1 + $0x28] sm:$0xff]  }
   0x3   :  { %370 = vmatpush3.bf16.msra.mxu0 %v414_v1  ;;  %405 = vmatpush3.bf16.msra.mxu1 %v414_v1  ;;  %v419_v6 = vld [vmem:[%s571_s1 + $0x60] sm:$0xff]   ;;  %v421_v8 = vld [vmem:[%s571_s1 + $0x58] sm:$0xff]   ;;  %v423_v10 = vld [vmem:[%s571_s1 + $0x50] sm:$0xff]  }
   0x4   :  { %371 = vmatprep.subr.bf16.mxu0 %v415_v2  ;;  %398 = vmatprep.subr.bf16.mxu1 %v415_v2  ;;  %v420_v7 = vld [vmem:[%s571_s1 + $0x20] sm:$0xff]   ;;  %v422_v9 = vld [vmem:[%s571_s1 + $0x18] sm:$0xff]   ;;  %v424_v13 = vld [vmem:[%s571_s1 + $0x10] sm:$0xff]  }
   0x5   :  { %v431_v11 = vld [vmem:[%s572_s0 + $0x4] ss:$8 sps:$4 sm:$0xff]   ;;  %v434_v12 = vld [vmem:[%s572_s0 + $0x14] ss:$8 sps:$4 sm:$0xff]   ;;  %v429_v18 = vld [vmem:[%s572_s0] ss:$8 sps:$4 sm:$0xff]  }
   0x6   :  { %v425_v14 = vld [vmem:[%s571_s1 + $0x48] sm:$0xff]   ;;  %220 = vmatprep.mubr.bf16.mxu0 %v431_v11  ;;  %228 = vmatprep.mubr.bf16.mxu1 %v434_v12  ;;  %v427_v16 = vld [vmem:[%s571_s1 + $0x40] sm:$0xff]   ;;  %v432_v19 = vld [vmem:[%s572_s0 + $0x10] ss:$8 sps:$4 sm:$0xff]  }
   0x7   :  { %372 = vmatpush3.bf16.msra.mxu0 %v416_v3  ;;  %406 = vmatpush3.bf16.msra.mxu1 %v416_v3  ;;  %v426_v15 = vld [vmem:[%s571_s1 + $0x8] sm:$0xff]   ;;  %v428_v17 = vld [vmem:[%s571_s1] sm:$0xff]   ;;  %v265_v29 = vld [vmem:[%s574_s3 + $0x10] sm:$0xff] }
   0x8   :  { %373 = vmatprep.subr.bf16.mxu0 %v417_v4  ;;  %399 = vmatprep.subr.bf16.mxu1 %v417_v4  ;;  %v366_v23 = vld [vmem:[%s573_s2] ss:$0 sm:$0xff]  ;;  %v266_v39 = vld [vmem:[%s574_s3 + $0x18] sm:$0xff]  ;;  %v264_v40 = vld [vmem:[%s574_s3 + $0x8] sm:$0xff] }
   0x9   :  { %v263_v30 = vld [vmem:[%s574_s3] sm:$0xff] }
   0xa   :  { %v368_v12 = vld [vmem:[%s576_s5] ss:$0 sm:$0xff] }
   0xb   :  { %374 = vmatpush3.bf16.msra.mxu0 %v418_v5  ;;  %407 = vmatpush3.bf16.msra.mxu1 %v418_v5 }
   0xc   :  { %375 = vmatprep.subr.bf16.mxu0 %v419_v6  ;;  %400 = vmatprep.subr.bf16.mxu1 %v419_v6 }
   0xf   :  { %376 = vmatpush3.bf16.msra.mxu0 %v420_v7  ;;  %408 = vmatpush3.bf16.msra.mxu1 %v420_v7 }
  0x10   :  { %377 = vmatprep.subr.bf16.mxu0 %v421_v8  ;;  %401 = vmatprep.subr.bf16.mxu1 %v421_v8 }
  0x13   :  { %378 = vmatpush3.bf16.msra.mxu0 %v422_v9  ;;  %409 = vmatpush3.bf16.msra.mxu1 %v422_v9 }
  0x14   :  { %379 = vmatprep.subr.bf16.mxu0 %v423_v10  ;;  %402 = vmatprep.subr.bf16.mxu1 %v423_v10  ;;  %v367_v10 = vld [vmem:[%s575_s4] ss:$0 sm:$0xff] }
  0x17   :  { %380 = vmatpush3.bf16.msra.mxu0 %v424_v13  ;;  %410 = vmatpush3.bf16.msra.mxu1 %v424_v13 }
  0x18   :  { %381 = vmatprep.subr.bf16.mxu0 %v425_v14  ;;  %403 = vmatprep.subr.bf16.mxu1 %v425_v14 }
  0x1b   :  { %382 = vmatpush3.bf16.msra.mxu0 %v426_v15  ;;  %411 = vmatpush3.bf16.msra.mxu1 %v426_v15 }
  0x1c   :  { %383 = vmatprep.subr.bf16.mxu0 %v427_v16  ;;  %404 = vmatprep.subr.bf16.mxu1 %v427_v16 }
  0x1f   :  { %384 = vmatpush3.bf16.msra.mxu0 %v428_v17  ;;  %412 = vmatpush3.bf16.msra.mxu1 %v428_v17 }
  0x22   :  { %221 = vmatmul.mubr.bf16.vlgmr.msra.gmra.mxu0 %v429_v18  ;;  %229 = vmatmul.mubr.bf16.vlgmr.msra.gmra.mxu1 %v432_v19 }
  0xe2   :  { %v385_v20 = vpop.f32.mrf.mxu0  ;;  %v391_v21 = vpop.f32.mrf.mxu1 }
  0xe4   :  { %v386_v22 = vpop.f32.mrf.mxu0  ;;  %v392_v24 = vpop.f32.mrf.mxu1 }
  0xe5   :  { %v387_v25 = vadd.f32 %v386_v22, %v385_v20  ;;  %v393_v26 = vadd.f32 %v392_v24, %v391_v21 }
  0xe6   :  { %v388_v27 = vpop.f32.mrf.mxu0  ;;  %v394_v28 = vpop.f32.mrf.mxu1 }
  0xe7   :  { %v259_v31 = vadd.f32 %v387_v25, %v366_v23  ;;  %v261_v32 = vadd.f32 %v393_v26, %v366_v23 }
  0xe8   :  { %v389_v33 = vpop.f32.mrf.mxu0  ;;  %v395_v34 = vpop.f32.mrf.mxu1 }
  0xe9   :  { %v390_v35 = vadd.f32 %v389_v33, %v388_v27  ;;  %v396_v36 = vadd.f32 %v395_v34, %v394_v28  ;;  %v269_v37 = vadd.f32 %v265_v29, %v261_v32  ;;  %v267_v38 = vadd.f32 %v263_v30, %v259_v31 }
  0xeb   :  { %v260_v41 = vadd.f32 %v390_v35, %v366_v23  ;;  %v262_v42 = vadd.f32 %v396_v36, %v366_v23  ;;  %275 = vadd.xlane.f32.xlu1 %v269_v37  ;;  %271 = vadd.xlane.f32.xlu0 %v267_v38 }
  0xed   :  { %v270_v43 = vadd.f32 %v266_v39, %v262_v42  ;;  %v268_v44 = vadd.f32 %v264_v40, %v260_v41 }
  0xef   :  { %277 = vadd.xlane.f32.xlu1 %v270_v43  ;;  %273 = vadd.xlane.f32.xlu0 %v268_v44 }
 0x174   :  { %v276_v45 = vpop.xlane.xlu1 %275  ;;  %v272_v46 = vpop.xlane.xlu0 %271 }
 0x175   :  { %v282_v47 = vmul.f32 0.0078125, %v276_v45  ;;  %v280_v48 = vmul.f32 0.0078125, %v272_v46 }
 0x177   :  { %v284_v49 = vsub.f32 %v267_v38, %v280_v48  ;;  %v286_v52 = vsub.f32 %v269_v37, %v282_v47 }
 0x178   :  { %v278_v50 = vpop.xlane.xlu1 %277  ;;  %v274_v51 = vpop.xlane.xlu0 %273 }
 0x179   :  { %v283_v53 = vmul.f32 0.0078125, %v278_v50  ;;  %v281_v54 = vmul.f32 0.0078125, %v274_v51  ;;  %v288_v55 = vmul.f32 %v284_v49, %v284_v49  ;;  %v290_v58 = vmul.f32 %v286_v52, %v286_v52 }
 0x17b   :  { %v285_v56 = vsub.f32 %v268_v44, %v281_v54  ;;  %292 = vadd.xlane.f32.xlu0 %v288_v55  ;;  %v287_v57 = vsub.f32 %v270_v43, %v283_v53 }
 0x17d   :  { %v289_v59 = vmul.f32 %v285_v56, %v285_v56  ;;  %v291_v60 = vmul.f32 %v287_v57, %v287_v57 }
 0x17f   :  { %296 = vadd.xlane.f32.xlu0 %v290_v58  ;;  %294 = vadd.xlane.f32.xlu1 %v289_v59 }
 0x183   :  { %298 = vadd.xlane.f32.xlu1 %v291_v60 }
 0x204   :  { %v293_v61 = vpop.xlane.xlu0 %292 }
 0x205   :  { %v300_v62 = vmul.f32 0.0078125, %v293_v61 }
 0x207   :  { %v304_v63 = vadd.f32 1e-05, %v300_v62 }
 0x208   :  { %v295_v0 = vpop.xlane.xlu1 %294  ;;  %v297_v1 = vpop.xlane.xlu0 %296 }
 0x209   :  { %435 = vrsqrt.f32 %v304_v63  ;;  %v301_v2 = vmul.f32 0.0078125, %v295_v0  ;;  %v302_v3 = vmul.f32 0.0078125, %v297_v1 }
 0x20b   :  { %v305_v4 = vadd.f32 1e-05, %v301_v2  ;;  %v306_v5 = vadd.f32 1e-05, %v302_v3 }
 0x20c   :  { %v299_v6 = vpop.xlane.xlu1 %298 }
 0x20d   :  { %437 = vrsqrt.f32 %v305_v4  ;;  %v303_v7 = vmul.f32 0.0078125, %v299_v6 }
 0x20e   :  { %439 = vrsqrt.f32 %v306_v5 }
 0x20f   :  { %v307_v8 = vadd.f32 1e-05, %v303_v7 }
 0x211   :  { %441 = vrsqrt.f32 %v307_v8 }
 0x216   :  { %v436_v9 = vpop.eup %435 }
 0x217   :  { %v312_v11 = vmul.f32 %v436_v9, %v284_v49 }
 0x219   :  { %v323_v13 = vmul.f32 %v367_v10, %v312_v11 }
 0x21a   :  { %v438_v14 = vpop.eup %437 }
 0x21b   :  { %v440_v15 = vpop.eup %439  ;;  %v334_v16 = vadd.f32 %v368_v12, %v323_v13  ;;  %v313_v17 = vmul.f32 %v438_v14, %v285_v56 }
 0x21c   :  { %v314_v18 = vmul.f32 %v440_v15, %v286_v52 }
 0x21d   :  { %338 = vst [vmem:[%s577_s6] sm:$0xff] %v334_v16  ;;  %v324_v19 = vmul.f32 %v367_v10, %v313_v17 }
 0x21e   :  { %v442_v20 = vpop.eup %441  ;;  %v325_v21 = vmul.f32 %v367_v10, %v314_v18 }
 0x21f   :  { %v335_v22 = vadd.f32 %v368_v12, %v324_v19  ;;  %v315_v23 = vmul.f32 %v442_v20, %v287_v57 }
 0x220   :  { %v336_v24 = vadd.f32 %v368_v12, %v325_v21 }
 0x221   :  { %339 = vst [vmem:[%s577_s6 + $0x8] sm:$0xff] %v335_v22  ;;  %v326_v25 = vmul.f32 %v367_v10, %v315_v23 }
 0x222   :  { %340 = vst [vmem:[%s577_s6 + $0x10] sm:$0xff] %v336_v24 }
 0x223   :  { %v337_v26 = vadd.f32 %v368_v12, %v326_v25 }
 0x225   :  { %341 = vst [vmem:[%s577_s6 + $0x18] sm:$0xff] %v337_v26 }

// kernel: transformer_forward.42
= control target key start
LH: loop header
LB: loop body
LE: loop exit
PB: predicated region body
PF: predicated region fallthrough
CT: control target
= control target key end

     0   :  { %s335_s1 = inlined_call_operand.vmem [shape: bf16[128,128], index: 1, kind: input, shape index: {}]   ;;  %s336_s0 = inlined_call_operand.vmem [shape: bf16[32,128], index: 0, kind: input, shape index: {}]   ;;  %s337_s2 = inlined_call_operand.vmem [shape: f32[1,128], index: 2, kind: input, shape index: {}]   ;;  %s338_s3 = inlined_call_operand.vmem [shape: bf16[32,128], index: 3, kind: output, shape index: {}]  }
   0x1   :  { %v266_v0 = vld [vmem:[%s335_s1 + $0x38] sm:$0xff]   ;;  %v267_v1 = vld [vmem:[%s335_s1 + $0x30] sm:$0xff]   ;;  %v268_v2 = vld [vmem:[%s335_s1 + $0x28] sm:$0xff]  }
   0x2   :  { %246 = vmatprep.subr.bf16.mxu0 %v266_v0  ;;  %v269_v3 = vld [vmem:[%s335_s1 + $0x20] sm:$0xff]   ;;  %v270_v5 = vld [vmem:[%s335_s1 + $0x18] sm:$0xff]   ;;  %v271_v6 = vld [vmem:[%s335_s1 + $0x10] sm:$0xff]  }
   0x3   :  { %247 = vmatpush3.bf16.msra.mxu0 %v266_v0  ;;  %v274_v4 = vld [vmem:[%s336_s0] sm:$0xff]   ;;  %v272_v7 = vld [vmem:[%s335_s1 + $0x8] sm:$0xff]  }
   0x4   :  { %248 = vmatprep.subr.bf16.mxu0 %v267_v1  ;;  %262 = vmatprep.mubr.bf16.mxu0 %v274_v4  ;;  %v273_v8 = vld [vmem:[%s335_s1] sm:$0xff]   ;;  %v275_v9 = vld [vmem:[%s336_s0 + $0x8] sm:$0xff]  }
   0x5   :  { %v216_v11 = vld [vmem:[%s337_s2] ss:$0 sm:$0xff] }
   0x7   :  { %249 = vmatpush3.bf16.msra.mxu0 %v267_v1 }
   0x8   :  { %250 = vmatprep.subr.bf16.mxu0 %v268_v2 }
   0xb   :  { %251 = vmatpush3.bf16.msra.mxu0 %v268_v2 }
   0xc   :  { %252 = vmatprep.subr.bf16.mxu0 %v269_v3 }
   0xf   :  { %253 = vmatpush3.bf16.msra.mxu0 %v269_v3 }
  0x10   :  { %254 = vmatprep.subr.bf16.mxu0 %v270_v5 }
  0x13   :  { %255 = vmatpush3.bf16.msra.mxu0 %v270_v5 }
  0x14   :  { %256 = vmatprep.subr.bf16.mxu0 %v271_v6 }
  0x17   :  { %257 = vmatpush3.bf16.msra.mxu0 %v271_v6 }
  0x18   :  { %258 = vmatprep.subr.bf16.mxu0 %v272_v7 }
  0x1b   :  { %259 = vmatpush3.bf16.msra.mxu0 %v272_v7 }
  0x1c   :  { %260 = vmatprep.subr.bf16.mxu0 %v273_v8 }
  0x1f   :  { %261 = vmatpush3.bf16.msra.mxu0 %v273_v8 }
  0x22   :  { %263 = vmatmul.mubr.bf16.vlgmr.msra.gmra.mxu0 %v275_v9 }
  0xe2   :  { %v264_v10 = vpop.f32.mrf.mxu0 }
  0xe3   :  { %v180_v14 = vadd.f32 %v264_v10, %v216_v11 }
  0xe4   :  { %v141_v12 = vpop.f32.mrf.mxu0 }
  0xe5   :  { %v178_v17 = vadd.f32 %v216_v11, %v141_v12 }
  0xe6   :  { %v265_v13 = vpop.f32.mrf.mxu0 }
  0xe7   :  { %v181_v15 = vadd.f32 %v265_v13, %v216_v11 }
  0xe8   :  { %v144_v16 = vpop.f32.mrf.mxu0 }
  0xe9   :  { %v233_v18 = vpack.c.bf16 %v181_v15, %v180_v14  ;;  %v179_v19 = vadd.f32 %v216_v11, %v144_v16 }
  0xeb   :  { %235 = vst [vmem:[%s338_s3 + $0x8] sm:$0xff] %v233_v18   ;;  %v228_v20 = vpack.c.bf16 %v179_v19, %v178_v17 }
  0xed   :  { %229 = vst [vmem:[%s338_s3] sm:$0xff] %v228_v20  }

// kernel: transformer_forward.40
= control target key start
LH: loop header
LB: loop body
LE: loop exit
PB: predicated region body
PF: predicated region fallthrough
CT: control target
= control target key end

     0   :  { %s1749_s15 = smov 0   ;;  %s1751_s16 = smov 0   ;;  %s2185_s0 = inlined_call_operand.vmem [shape: bf16[2,16,384], index: 0, kind: input, shape index: {}, may-alias: {0,1,2}]   ;;  %s2186_s1 = inlined_call_operand.vmem [shape: bf16[2,16,384], index: 1, kind: input, shape index: {}, may-alias: {0,1,2}]   ;;  %s2187_s2 = inlined_call_operand.vmem [shape: bf16[2,16,384], index: 2, kind: input, shape index: {}, may-alias: {0,1,2}]   ;;  %s2188_s3 = inlined_call_operand.vmem [shape: f32[2,1,16], index: 3, kind: input, shape index: {}]   ;;  %s2189_s4 = inlined_call_operand.vmem [shape: bf16[2,16,128], index: 4, kind: output, shape index: {}]  }
   0x1   :  { %s1753_s17 = smov 0   ;;  %s1755_s18 = smov 0  }
   0x2   :  { %s1757_s19 = smov 0  }
   0x3 LB: > { %s33_s20 = sadd.s32 1, %s1711_s18  ;;  %p49_p1 = scmp.ne.s32.totalorder %s1703_s16, %s1699_s15  ;;  %s1715_s19 = sphi %s1757_s19, %s14_s19   ;;  %s1711_s18 = sphi %s1755_s18, %s2194_s18   ;;  %s1707_s17 = sphi %s1753_s17, %s2193_s17   ;;  %s1703_s16 = sphi %s1751_s16, %s2192_s16   ;;  %s1699_s15 = sphi %s1749_s15, %s2191_s15  }
   0x4   : > { %p35_p0 = scmp.ge.s32.totalorder %s33_s20, 2  ;;  %p50_p2 = scmp.eq.s32.totalorder %s1715_s19, 0 }
   0x5   : > { %s42_s23 = sadd.s32 1, %s1703_s16  ;;  %p1473_p5 = scmp.ge.s32.totalorder %s1715_s19, 2 }
   0x6   : > { %s2196_s20 = smov (%p35_p0, %s33_s20), 0  ;;  %p1780_p3 = por %p50_p2, %p49_p1 }
   0x7   : > { %s37_s22 = ssub.s32 %s1711_s18, %s2196_s20  ;;  %187 = sbr.rel (%p1473_p5) target bundleno = 30 (0x1e), region = 16 }
   0x8   : > { %p40_p4 = scmp.eq.s32.totalorder %s37_s22, 0 }
   0xa   : > { %s1788_s24 = scalar_select %p40_p4, %s1703_s16, %s42_s23  }
   0xc   : > { %190 = sbr.rel (!%p1780_p3) target bundleno = 18 (0x12), region = 20  ;;  %s192_s25 = sand.u32 (%p1780_p3), 1, %s1703_s16  }
   0xd   : > { %s1577_s26 = smul.u32 (%p1780_p3), 24, %s1711_s18  ;;  %s1474_s27 = sshll.u32 (%p1780_p3), %s192_s25, 3 }
   0xe   : > { %s194_s5 = scalar_lea.vmem (%p1780_p3), [#allocation5], %s1474_s27 }
   0xf   : > { %s200_s30 = scalar_lea.vmem (%p1780_p3), %s2185_s0, %s1577_s26 }
  0x10   : > { %v217_v0 = vld [vmem:[%s200_s30] sm:$0xf] (%p1780_p3)  ;;  %v219_v1 = vld [vmem:[%s200_s30 + $0xc] sm:$0xf] (%p1780_p3) }
  0x11   : > { %218 = vst [vmem:[%s194_s5] sm:$0xf] %v217_v0  ;;  %220 = vst [vmem:[%s194_s5 + $0x4] sm:$0xf] %v219_v1 }
  0x12 PF: > { %248 = sbr.rel (!%p1780_p3) target bundleno = 24 (0x18), region = 61  ;;  %s250_s6 = sand.u32 (%p1780_p3), 1, %s1703_s16  }
  0x13   : > { %s1477_s7 = smul.u32 (%p1780_p3), 24, %s1711_s18  ;;  %s1476_s8 = sshll.u32 (%p1780_p3), %s250_s6, 3 }
  0x14   : > { %s252_s12 = scalar_lea.vmem (%p1780_p3), [#allocation6], %s1476_s8 }
  0x15   : > { %s1364_s11 = scalar_lea.vmem (%p1780_p3), %s2186_s1, %s1477_s7 }
  0x16   : > { %v1478_v2 = vld [vmem:[%s1364_s11 + $0x4] sm:$0xf] (%p1780_p3)  ;;  %v1479_v3 = vld [vmem:[%s1364_s11 + $0x10] sm:$0xf] (%p1780_p3) }
  0x17   : > { %277 = vst [vmem:[%s252_s12] sm:$0xf] %v1478_v2  ;;  %279 = vst [vmem:[%s252_s12 + $0x4] sm:$0xf] %v1479_v3 }
  0x18 PF: > { %307 = sbr.rel (!%p1780_p3) target bundleno = 30 (0x1e), region = 102  ;;  %s309_s13 = sand.u32 (%p1780_p3), 1, %s1703_s16  }
  0x19   : > { %s1481_s14 = smul.u32 (%p1780_p3), 24, %s1711_s18  ;;  %s1480_s22 = sshll.u32 (%p1780_p3), %s309_s13, 3 }
  0x1a   : > { %s311_s27 = scalar_lea.vmem (%p1780_p3), [#allocation7], %s1480_s22 }
  0x1b   : > { %s1372_s26 = scalar_lea.vmem (%p1780_p3), %s2187_s2, %s1481_s14 }
  0x1c   : > { %v1482_v4 = vld [vmem:[%s1372_s26 + $0x8] sm:$0xf] (%p1780_p3)  ;;  %v1483_v5 = vld [vmem:[%s1372_s26 + $0x14] sm:$0xf] (%p1780_p3) }
  0x1d   : > { %336 = vst [vmem:[%s311_s27] sm:$0xf] %v1482_v4  ;;  %338 = vst [vmem:[%s311_s27 + $0x4] sm:$0xf] %v1483_v5 }
  0x1e PF: > { %p1484_p6 = scmp.ge.s32.totalorder %s1715_s19, 1  ;;  %p374_p7 = scmp.lt.s32.totalorder %s1715_s19, 3 }
  0x20   : > { %p375_p8 = pnand %p1484_p6, %p374_p7 }
  0x21   : > { %s381_s21 = sand.u32 (!%p375_p8), 1, %s1699_s15   ;;  %p441_p9 = scmp.lt.s32.totalorder (!%p375_p8), %s1707_s17, 1 }
  0x22   : > { %378 = sbr.rel (%p375_p8) target bundleno = 1559 (0x617), region = 147  ;;  %s1818_s28 = sshll.u32 (!%p375_p8), %s381_s21, 3 }
  0x23   : > { %s390_s15 = scalar_lea.vmem (!%p375_p8), [#allocation6], %s1818_s28  ;;  %s383_s29 = scalar_lea.vmem (!%p375_p8), [#allocation5], %s1818_s28 }
  0x24   : > { %s1721_s7 = smov (!%p375_p8), 96   ;;  %s397_s8 = scalar_lea.vmem (!%p375_p8), [#allocation7], %s1818_s28 }
  0x25   : > { %s1722_s9 = smov (!%p375_p8), 64   ;;  %s1723_s10 = smov (!%p375_p8), 32  }
  0x27   : > { %v1717_v6 = vmov 0.0   ;;  %vm1718_vm0 = vmmov 0   ;;  %vm523_vm1 = vcmask 261120   ;;  %v1826_v7 = vld [vmem:[%s390_s15] sm:$0xff]   ;;  %v499_v8 = vld [vmem:[%s383_s29] sm:$0xf]  ;;  %v486_v15 = vlaneseq }
  0x28   : > { %1529 = vmatprep.subr.bf16.mxu0 %v1717_v6  ;;  %480 = vst [vmem:[#allocation4] sm:$0xff] %v1717_v6  ;;  %481 = vst [vmem:[#allocation4 + $0x8] sm:$0xff] %v1717_v6  ;;  %1531 = vmatprep.mubr.msk.bf16.mxu0 %vm1718_vm0, %v1717_v6  ;;  %v500_v9 = vld [vmem:[%s383_s29 + $0x4] sm:$0xf]  ;;  %v528_v10 = vsel %vm523_vm1, %v1826_v7, 0  ;;  %vm463_vm2 = vcmask 7168  }
  0x29   : > { %1535 = vmatprep.subr.bf16.mxu1 %v1717_v6  ;;  %1537 = vmatprep.mubr.msk.bf16.mxu1 %vm1718_vm0, %v1717_v6  ;;  %v505_v11 = vmul.bf16 1043676725, %v499_v8  ;;  %v506_v12 = vmul.bf16 1043676725, %v500_v9  ;;  %v1719_v14 = vmov -1e+20  }
  0x2a   : > { %1530 = vmatpush3.bf16.xpose.msra.mxu0 %v528_v10  ;;  %464 = vst.msk [vmem:[#allocation2] sm:$0xff] %vm463_vm2, %v1719_v14  ;;  %465 = vst.msk [vmem:[#allocation2 + $0x8] sm:$0xff] %vm463_vm2, %v1719_v14  ;;  %s2198_s17 = smov (!%p441_p9, %s1707_s17), 1  ;;  %v1870_v17 = vshrl.u32 %v486_v15, 7  ;;  %v1873_v20 = vand.u32 127, %v486_v15  ;;  %vm575_vm5 = vcmask 130048  }
  0x2b   : > { %1547 = vmatprep.subr.bf16.mxu0 %v1717_v6  ;;  %v1832_v13 = vcombine.low %v505_v11, %v506_v12  ;;  %466 = vst.msk [vmem:[#allocation2 + $0x10] sm:$0xff] %vm463_vm2, %v1719_v14  ;;  %467 = vst.msk [vmem:[#allocation2 + $0x18] sm:$0xff] %vm463_vm2, %v1719_v14  ;;  %s446_s6 = scalar_lea.vmem %s2188_s3, %s2198_s17  ;;  %v1720_v33 = vmov 0   ;;  %v1917_v42 = vld [vmem:[%s397_s8] sm:$0xff]   ;;  %vm865_vm7 = vcmask 523520   ;;  %vm1043_vm8 = vcmask 785920  }
  0x2c   : > { %468 = vst.msk [vmem:[#allocation2 + $0x20] sm:$0xff] %vm463_vm2, %v1719_v14  ;;  %469 = vst.msk [vmem:[#allocation2 + $0x28] sm:$0xff] %vm463_vm2, %v1719_v14  ;;  %v482_v16 = vld [vmem:[%s446_s6] sm:$0x1]  ;;  %v510_v18 = vsub.s32 0, %v1870_v17  ;;  %vm497_vm4 = vcmp.le.s32.totalorder %v1873_v20, %v1870_v17  ;;  %v1880_v23 = vadd.s32 8, %v1870_v17  ;;  %1625 = vset.pattern.permute.xlu1 %v1720_v33  ;;  %1626 = vset.pattern.permute.xlu0 %v1720_v33 }
  0x2d   : > { %470 = vst.msk [vmem:[#allocation2 + $0x30] sm:$0xff] %vm463_vm2, %v1719_v14  ;;  %471 = vst.msk [vmem:[#allocation2 + $0x38] sm:$0xff] %vm463_vm2, %v1719_v14  ;;  %vm483_vm3 = vcmp.ne.f32.partialorder %v482_v16, 0.0  ;;  %1536 = vmatpush3.bf16.msra.mxu1 %v1917_v42  ;;  %vm1221_vm9 = vcmask 1048320   ;;  %s1505_s11 = sshll.u32 %s2198_s17, 3 }
  0x2e   : > { %472 = vst.msk [vmem:[#allocation3] sm:$0xff] %vm463_vm2, %v1717_v6  ;;  %473 = vst.msk [vmem:[#allocation3 + $0x8] sm:$0xff] %vm463_vm2, %v1717_v6  ;;  %v484_v19 = vsel %vm483_vm3, 0.0, %v1719_v14  ;;  %vm498_vm6 = vcmp.le.s32.totalorder %v1873_v20, %v1880_v23  ;;  %1541 = vmatprep.subr.bf16.mxu1 %v1717_v6  ;;  %s455_s14 = scalar_lea.vmem %s2189_s4, %s1505_s11 }
  0x2f   : > { %474 = vst.msk [vmem:[#allocation3 + $0x10] sm:$0xff] %vm463_vm2, %v1717_v6  ;;  %475 = vst.msk [vmem:[#allocation3 + $0x18] sm:$0xff] %vm463_vm2, %v1717_v6  ;;  %v1875_v21 = vrot.slane %v484_v19, %v510_v18 }
  0x30   : > { %476 = vst.msk [vmem:[#allocation3 + $0x20] sm:$0xff] %vm463_vm2, %v1717_v6  ;;  %477 = vst.msk [vmem:[#allocation3 + $0x28] sm:$0xff] %vm463_vm2, %v1717_v6 }
  0x31   : > { %1532 = vmatmul.mubr.msk.bf16.vlgmr.msra.gmra.mxu0 %vm523_vm1, %v1832_v13  ;;  %478 = vst.msk [vmem:[#allocation3 + $0x30] sm:$0xff] %vm463_vm2, %v1717_v6  ;;  %479 = vst.msk [vmem:[#allocation3 + $0x38] sm:$0xff] %vm463_vm2, %v1717_v6  ;;  %v1896_v34 = vld [vmem:[#allocation2] sm:$0xff]  ;;  %v1901_v37 = vld [vmem:[#allocation2 + $0x8] sm:$0xff] }
  0x32   : > { %1549 = vmatprep.mubr.msk.bf16.mxu0 %vm1718_vm0, %v1717_v6  ;;  %v2004_v17 = vld [vmem:[#allocation2 + $0x10] sm:$0xff] }
  0xf1   : > { %v564_v22 = vpop.f32.mrf.mxu0 }
  0xf2   : > { %v565_v24 = vadd.f32 %v564_v22, %v1875_v21 }
  0xf3   : > { %v1533_v25 = vpop.f32.mrf.mxu0 }
  0xf4   : > { %v571_v26 = vsel %vm497_vm4, %v565_v24, -1e+20 }
  0xf5   : > { %v567_v27 = vpop.f32.mrf.mxu0  ;;  %v576_v28 = vsel %vm575_vm5, %v571_v26, -inf }
  0xf6   : > { %v568_v29 = vadd.f32 %v567_v27, %v1875_v21  ;;  %577 = vmax.xlane.f32.xlu0 %v576_v28 }
  0xf7   : > { %v1534_v30 = vpop.f32.mrf.mxu0 }
  0xf8   : > { %v572_v31 = vsel %vm498_vm6, %v568_v29, -1e+20 }
  0xf9   : > { %v579_v32 = vsel %vm575_vm5, %v572_v31, -inf }
  0xfa   : > { %580 = vmax.xlane.f32.xlu0 %v579_v32 }
 0x110   : > { %694 = vrot.lane.b32.xlu0 %v1826_v7, %s1721_s7 }
 0x17f   : > { %v578_v35 = vpop.xlane.xlu0 %577 }
 0x180   : > { %v1899_v36 = vmax.f32 %v1896_v34, %v578_v35 }
 0x182   : > { %v584_v38 = vsub.f32 %v1896_v34, %v1899_v36  ;;  %690 = vst.msk [vmem:[#allocation2] sm:$0xff] %vm463_vm2, %v1899_v36  ;;  %592 = vperm.xlu1 %1625, %v1899_v36  }
 0x183   : > { %v581_v39 = vpop.xlane.xlu0 %580 }
 0x184   : > { %v1909_v40 = vmax.f32 %v1901_v37, %v581_v39 }
 0x186   : > { %v585_v41 = vsub.f32 %v1901_v37, %v1909_v40  ;;  %691 = vst.msk [vmem:[#allocation2 + $0x8] sm:$0xff] %vm463_vm2, %v1909_v40  ;;  %597 = vperm.xlu1 %1625, %v1909_v40  }
 0x187   : > { %v695_v49 = vpop.permute.xlu0 %694 }
 0x188   : > { %v700_v53 = vsel %vm523_vm1, %v695_v49, 0 }
 0x18a   : > { %692 = vrot.lane.b32.xlu1 %v1832_v13, %s1721_s7 }
 0x18e   : > { %872 = vrot.lane.b32.xlu1 %v1826_v7, %s1722_s9 }
 0x192   : > { %870 = vrot.lane.b32.xlu1 %v1832_v13, %s1722_s9 }
 0x196   : > { %1050 = vrot.lane.b32.xlu1 %v1826_v7, %s1723_s10 }
 0x19a   : > { %1048 = vrot.lane.b32.xlu1 %v1832_v13, %s1723_s10 }
 0x1fd   : > { %v593_v43 = vpop.permute.xlu1 %592 }
 0x1fe   : > { %v600_v44 = vsub.f32 %v571_v26, %v593_v43 }
 0x200   : > { %v602_v45 = vmul.f32 1.442695, %v600_v44 }
 0x201   : > { %v598_v46 = vpop.permute.xlu1 %597 }
 0x202   : > { %v601_v47 = vsub.f32 %v572_v31, %v598_v46  ;;  %1629 = vpow2.f32 %v602_v45  ;;  %v2009_v45 = vld [vmem:[#allocation2 + $0x18] sm:$0xff]  ;;  %v2019_v46 = vld [vmem:[#allocation2 + $0x20] sm:$0xff] }
 0x204   : > { %v604_v48 = vmul.f32 1.442695, %v601_v47 }
 0x205   : > { %v693_v50 = vpop.permute.xlu1 %692 }
 0x206   : > { %1631 = vpow2.f32 %v604_v48 }
 0x209   : > { %v873_v55 = vpop.permute.xlu1 %872 }
 0x20a   : > { %v878_v57 = vsel %vm523_vm1, %v873_v55, 0 }
 0x20d   : > { %v871_v56 = vpop.permute.xlu1 %870 }
 0x20f   : > { %v1931_v51 = vpop.eup %1629 }
 0x211   : > { %v1051_v58 = vpop.permute.xlu1 %1050 }
 0x212   : > { %v1056_v59 = vsel %vm523_vm1, %v1051_v58, 0 }
 0x213   : > { %v1933_v52 = vpop.eup %1631 }
 0x214   : > { %v635_v54 = vpack.c.bf16 %v1933_v52, %v1931_v51 }
 0x215   : > { %v1049_v60 = vpop.permute.xlu1 %1048 }
 0x216   : > { %1538 = vmatmul.mubr.msk.bf16.vlgmr.msra.gmra.mxu1 %vm575_vm5, %v635_v54 }
 0x217   : > { %1542 = vmatpush3.bf16.xpose.msra.mxu1 %v700_v53  ;;  %1543 = vmatprep.mubr.msk.bf16.mxu1 %vm1718_vm0, %v1717_v6 }
 0x218   : > { %1553 = vmatprep.subr.bf16.mxu1 %v1717_v6 }
 0x21e   : > { %1544 = vmatmul.mubr.msk.bf16.vlgmr.msra.gmra.mxu1 %vm523_vm1, %v693_v50  ;;  %v2031_v50 = vld [vmem:[#allocation2 + $0x28] sm:$0xff] }
 0x21f   : > { %1554 = vmatpush3.bf16.xpose.msra.mxu1 %v878_v57  ;;  %1555 = vmatprep.mubr.msk.bf16.mxu1 %vm1718_vm0, %v1717_v6 }
 0x220   : > { %1565 = vmatprep.subr.bf16.mxu1 %v1717_v6 }
 0x226   : > { %1556 = vmatmul.mubr.msk.bf16.vlgmr.msra.gmra.mxu1 %vm523_vm1, %v871_v56  ;;  %v2041_v56 = vld [vmem:[#allocation2 + $0x30] sm:$0xff] }
 0x227   : > { %1566 = vmatpush3.bf16.xpose.msra.mxu1 %v1056_v59  ;;  %1567 = vmatprep.mubr.msk.bf16.mxu1 %vm1718_vm0, %v1717_v6 }
 0x22e   : > { %1568 = vmatmul.mubr.msk.bf16.vlgmr.msra.gmra.mxu1 %vm523_vm1, %v1049_v60  ;;  %v2051_v60 = vld [vmem:[#allocation2 + $0x38] sm:$0xff] }
 0x2d6   : > { %v1952_v61 = vpop.f32.mrf.mxu1 }
 0x2d8   : > { %v1539_v62 = vpop.f32.mrf.mxu1 }
 0x2da   : > { %v1954_v63 = vpop.f32.mrf.mxu1 }
 0x2dc   : > { %v1540_v0 = vpop.f32.mrf.mxu1 }
 0x2de   : > { %v736_v1 = vpop.f32.mrf.mxu1 }
 0x2df   : > { %v737_v2 = vadd.f32 %v736_v1, %v1875_v21 }
 0x2e0   : > { %v1545_v3 = vpop.f32.mrf.mxu1 }
 0x2e1   : > { %v1960_v4 = vsel %vm497_vm4, %v737_v2, -1e+20  ;;  %v613_v3 = vsel %vm575_vm5, %v1933_v52, 0.0 }
 0x2e2   : > { %v739_v5 = vpop.f32.mrf.mxu1  ;;  %v748_v7 = vsel %vm575_vm5, %v1960_v4, -inf }
 0x2e3   : > { %v740_v8 = vadd.f32 %v739_v5, %v1875_v21  ;;  %749 = vmax.xlane.f32.xlu1 %v748_v7  ;;  %v586_v5 = vmul.f32 1.442695, %v584_v38 }
 0x2e4   : > { %v1546_v9 = vpop.f32.mrf.mxu1 }
 0x2e5   : > { %v1968_v10 = vsel %vm498_vm6, %v740_v8, -1e+20  ;;  %1633 = vpow2.f32 %v586_v5  ;;  %v588_v8 = vmul.f32 1.442695, %v585_v41 }
 0x2e6   : > { %v914_v11 = vpop.f32.mrf.mxu1  ;;  %v751_v12 = vsel %vm575_vm5, %v1968_v10, -inf }
 0x2e7   : > { %v915_v13 = vadd.f32 %v914_v11, %v1875_v21  ;;  %752 = vmax.xlane.f32.xlu0 %v751_v12  ;;  %1635 = vpow2.f32 %v588_v8 }
 0x2e8   : > { %v1557_v14 = vpop.f32.mrf.mxu1 }
 0x2e9   : > { %v1976_v15 = vsel %vm497_vm4, %v915_v13, -1e+20 }
 0x2ea   : > { %v917_v16 = vpop.f32.mrf.mxu1  ;;  %v926_v18 = vsel %vm575_vm5, %v1976_v15, -inf }
 0x2eb   : > { %v918_v19 = vadd.f32 %v917_v16, %v1875_v21  ;;  %927 = vmax.xlane.f32.xlu0 %v926_v18 }
 0x2ec   : > { %v1558_v22 = vpop.f32.mrf.mxu1 }
 0x2ed   : > { %v1984_v24 = vsel %vm498_vm6, %v918_v19, -1e+20 }
 0x2ee   : > { %v929_v25 = vsel %vm575_vm5, %v1984_v24, -inf  ;;  %v1092_v26 = vpop.f32.mrf.mxu1 }
 0x2ef   : > { %930 = vmax.xlane.f32.xlu1 %v929_v25  ;;  %v1093_v27 = vadd.f32 %v1092_v26, %v1875_v21 }
 0x2f0   : > { %v1569_v28 = vpop.f32.mrf.mxu1 }
 0x2f1   : > { %v1992_v29 = vsel %vm497_vm4, %v1093_v27, -1e+20 }
 0x2f2   : > { %v1095_v30 = vpop.f32.mrf.mxu1  ;;  %v1104_v31 = vsel %vm575_vm5, %v1992_v29, -inf  ;;  %v2075_v7 = vpop.eup %1633 }
 0x2f3   : > { %v1096_v32 = vadd.f32 %v1095_v30, %v1875_v21  ;;  %1105 = vmax.xlane.f32.xlu0 %v1104_v31 }
 0x2f4   : > { %v1570_v33 = vpop.f32.mrf.mxu1  ;;  %v1636_v52 = vpop.eup %1635 }
 0x2f5   : > { %v2000_v35 = vsel %vm498_vm6, %v1096_v32, -1e+20 }
 0x2f6   : > { %v1107_v39 = vsel %vm575_vm5, %v2000_v35, -inf }
 0x2f7   : > { %1108 = vmax.xlane.f32.xlu1 %v1107_v39 }
 0x36c   : > { %v750_v43 = vpop.xlane.xlu1 %749 }
 0x36d   : > { %v2007_v44 = vmax.f32 %v2004_v17, %v750_v43 }
 0x36f   : > { %v756_v21 = vsub.f32 %v2004_v17, %v2007_v44  ;;  %868 = vst.msk [vmem:[#allocation2 + $0x10] sm:$0xff] %vm463_vm2, %v2007_v44  ;;  %764 = vperm.xlu0 %1626, %v2007_v44  }
 0x370   : > { %v753_v20 = vpop.xlane.xlu0 %752 }
 0x371   : > { %v2017_v23 = vmax.f32 %v2009_v45, %v753_v20  ;;  %v607_v20 = vld [vmem:[#allocation3 + $0x8] sm:$0xff] }
 0x373   : > { %v757_v47 = vsub.f32 %v2009_v45, %v2017_v23  ;;  %869 = vst.msk [vmem:[#allocation2 + $0x18] sm:$0xff] %vm463_vm2, %v2017_v23  ;;  %1164 = vrot.lane.b32.xlu0 %v1917_v42, %s1723_s10  ;;  %769 = vperm.xlu1 %1625, %v2017_v23   ;;  %v609_v23 = vmul.f32 %v1636_v52, %v607_v20 }
 0x374   : > { %v928_v48 = vpop.xlane.xlu0 %927 }
 0x375   : > { %v2029_v49 = vmax.f32 %v2019_v46, %v928_v48  ;;  %v760_v18 = vmul.f32 1.442695, %v757_v47 }
 0x377   : > { %v934_v53 = vsub.f32 %v2019_v46, %v2029_v49  ;;  %1046 = vst.msk [vmem:[#allocation2 + $0x20] sm:$0xff] %vm463_vm2, %v2029_v49  ;;  %942 = vperm.xlu1 %1625, %v2029_v49  }
 0x378   : > { %v931_v54 = vpop.xlane.xlu1 %930 }
 0x379   : > { %v2039_v55 = vmax.f32 %v2031_v50, %v931_v54 }
 0x37b   : > { %v935_v57 = vsub.f32 %v2031_v50, %v2039_v55  ;;  %1047 = vst.msk [vmem:[#allocation2 + $0x28] sm:$0xff] %vm463_vm2, %v2039_v55  ;;  %947 = vperm.xlu1 %1625, %v2039_v55  }
 0x37c   : > { %v1106_v58 = vpop.xlane.xlu0 %1105 }
 0x37d   : > { %v2049_v59 = vmax.f32 %v2041_v56, %v1106_v58 }
 0x37f   : > { %808 = vrot.lane.b32.xlu1 %v1917_v42, %s1721_s7  ;;  %v1112_v62 = vsub.f32 %v2041_v56, %v2049_v59  ;;  %1224 = vst.msk [vmem:[#allocation2 + $0x30] sm:$0xff] %vm463_vm2, %v2049_v59 }
 0x380   : > { %v1109_v0 = vpop.xlane.xlu1 %1108 }
 0x381   : > { %v2060_v1 = vmax.f32 %v2051_v60, %v1109_v0 }
 0x383   : > { %1120 = vperm.xlu1 %1625, %v2049_v59   ;;  %v1113_v2 = vsub.f32 %v2051_v60, %v2060_v1  ;;  %1225 = vst.msk [vmem:[#allocation2 + $0x38] sm:$0xff] %vm463_vm2, %v2060_v1 }
 0x387   : > { %1125 = vperm.xlu1 %1625, %v2060_v1  }
 0x38b   : > { %986 = vrot.lane.b32.xlu1 %v1917_v42, %s1722_s9  ;;  %v610_v42 = vsel %vm575_vm5, %v1931_v51, 0.0 }
 0x392   : > { %614 = vadd.xlane.f32.xlu0 %v613_v3  ;;  %v606_v3 = vld [vmem:[#allocation3] sm:$0xff] }
 0x393   : > { %v608_v8 = vmul.f32 %v2075_v7, %v606_v3 }
 0x3a8   : > { %625 = vperm.xlu0 %1626, %v2075_v7  }
 0x3af   : > { %611 = vadd.xlane.f32.xlu1 %v610_v42 }
 0x3c0   : > { %630 = vperm.xlu1 %1625, %v1636_v52  }
 0x3ea   : > { %v765_v9 = vpop.permute.xlu0 %764 }
 0x3eb   : > { %v772_v34 = vsub.f32 %v1960_v4, %v765_v9 }
 0x3ed   : > { %v774_v36 = vmul.f32 1.442695, %v772_v34 }
 0x3ee   : > { %v770_v38 = vpop.permute.xlu1 %769 }
 0x3ef   : > { %1637 = vpow2.f32 %v774_v36  ;;  %v773_v11 = vsub.f32 %v1968_v10, %v770_v38 }
 0x3f1   : > { %v776_v12 = vmul.f32 1.442695, %v773_v11 }
 0x3f2   : > { %v943_v13 = vpop.permute.xlu1 %942 }
 0x3f3   : > { %1639 = vpow2.f32 %v776_v12  ;;  %v950_v37 = vsub.f32 %v1976_v15, %v943_v13  ;;  %v780_v12 = vld [vmem:[#allocation3 + $0x18] sm:$0xff] }
 0x3f5   : > { %v952_v40 = vmul.f32 1.442695, %v950_v37 }
 0x3f6   : > { %v948_v41 = vpop.permute.xlu1 %947 }
 0x3f7   : > { %v951_v51 = vsub.f32 %v1984_v24, %v948_v41  ;;  %1641 = vpow2.f32 %v952_v40  ;;  %v936_v41 = vmul.f32 1.442695, %v934_v53 }
 0x3f9   : > { %v954_v14 = vmul.f32 1.442695, %v951_v51 }
 0x3fa   : > { %v809_v16 = vpop.permute.xlu1 %808 }
 0x3fb   : > { %1643 = vpow2.f32 %v954_v14  ;;  %1548 = vmatpush3.bf16.msra.mxu0 %v809_v16  ;;  %v957_v16 = vld [vmem:[#allocation3 + $0x20] sm:$0xff] }
 0x3fc   : > { %v1638_v4 = vpop.eup %1637  ;;  %1559 = vmatprep.subr.bf16.mxu0 %v1717_v6  ;;  %1645 = vpow2.f32 %v760_v18 }
 0x3fd   : > { %v783_v10 = vsel %vm575_vm5, %v1638_v4, 0.0 }
 0x3fe   : > { %784 = vadd.xlane.f32.xlu1 %v783_v10  ;;  %v1121_v19 = vpop.permute.xlu1 %1120 }
 0x3ff   : > { %v1128_v22 = vsub.f32 %v1992_v29, %v1121_v19  ;;  %v758_v29 = vmul.f32 1.442695, %v756_v21 }
 0x400   : > { %v1640_v15 = vpop.eup %1639 }
 0x401   : > { %v786_v25 = vsel %vm575_vm5, %v1640_v15, 0.0  ;;  %v807_v24 = vpack.c.bf16 %v1640_v15, %v1638_v4  ;;  %v1130_v26 = vmul.f32 1.442695, %v1128_v22  ;;  %v958_v22 = vld [vmem:[#allocation3 + $0x28] sm:$0xff] }
 0x402   : > { %787 = vadd.xlane.f32.xlu0 %v786_v25  ;;  %v1126_v27 = vpop.permute.xlu1 %1125 }
 0x403   : > { %v1129_v28 = vsub.f32 %v2000_v35, %v1126_v27  ;;  %1550 = vmatmul.mubr.msk.bf16.vlgmr.msra.gmra.mxu0 %vm575_vm5, %v807_v24  ;;  %1647 = vpow2.f32 %v1130_v26  ;;  %v1165_v35 = vpop.permute.xlu0 %1164 }
 0x404   : > { %1561 = vmatprep.mubr.msk.bf16.mxu0 %vm1718_vm0, %v1717_v6  ;;  %v1642_v32 = vpop.eup %1641 }
 0x405   : > { %v1132_v30 = vmul.f32 1.442695, %v1129_v28  ;;  %v961_v0 = vsel %vm575_vm5, %v1642_v32, 0.0 }
 0x406   : > { %v987_v31 = vpop.permute.xlu1 %986 }
 0x407   : > { %1649 = vpow2.f32 %v1132_v30  ;;  %1560 = vmatpush3.bf16.msra.mxu0 %v987_v31 }
 0x408   : > { %v1644_v33 = vpop.eup %1643  ;;  %1571 = vmatprep.subr.bf16.mxu0 %v1717_v6  ;;  %1651 = vpow2.f32 %v758_v29 }
 0x409   : > { %v985_v39 = vpack.c.bf16 %v1644_v33, %v1642_v32  ;;  %v1646_v43 = vpop.eup %1645  ;;  %v964_v5 = vsel %vm575_vm5, %v1644_v33, 0.0  ;;  %1653 = vpow2.f32 %v936_v41 }
 0x40a   : > { %v782_v37 = vmul.f32 %v1646_v43, %v780_v12 }
 0x40b   : > { %1562 = vmatmul.mubr.msk.bf16.vlgmr.msra.gmra.mxu0 %vm575_vm5, %v985_v39 }
 0x40c   : > { %1572 = vmatpush3.bf16.msra.mxu0 %v1165_v35  ;;  %1573 = vmatprep.mubr.msk.bf16.mxu0 %vm1718_vm0, %v1717_v6 }
 0x40f   : > { %802 = vperm.xlu1 %1625, %v1646_v43  }
 0x410   : > { %v2102_v17 = vpop.eup %1647 }
 0x414   : > { %v2104_v44 = vpop.eup %1649 }
 0x415   : > { %v1163_v45 = vpack.c.bf16 %v2104_v44, %v2102_v17  ;;  %v1652_v21 = vpop.eup %1651  ;;  %v1142_v20 = vsel %vm575_vm5, %v2104_v44, 0.0 }
 0x416   : > { %v1654_v51 = vpop.eup %1653 }
 0x417   : > { %1574 = vmatmul.mubr.msk.bf16.vlgmr.msra.gmra.mxu0 %vm575_vm5, %v1163_v45  ;;  %v959_v4 = vmul.f32 %v1654_v51, %v957_v16 }
 0x418   : > { %797 = vperm.xlu0 %1626, %v1652_v21  }
 0x41b   : > { %v615_v47 = vpop.xlane.xlu0 %614 }
 0x41c   : > { %v617_v48 = vadd.f32 %v615_v47, %v609_v23  ;;  %v1114_v23 = vmul.f32 1.442695, %v1112_v62 }
 0x41e   : > { %620 = vst.msk [vmem:[#allocation3 + $0x8] sm:$0xff] %vm463_vm2, %v617_v48 }
 0x423   : > { %v626_v6 = vpop.permute.xlu0 %625 }
 0x424   : > { %v633_v54 = vmul.f32 0.0, %v626_v6 }
 0x425   : > { %v1232_v30 = vld [vmem:[#allocation3 + $0x8] sm:$0xff] }
 0x426   : > { %v686_v58 = vadd.f32 %v1952_v61, %v633_v54  ;;  %v779_v61 = vld [vmem:[#allocation3 + $0x10] sm:$0xff] }
 0x427   : > { %v781_v38 = vmul.f32 %v1652_v21, %v779_v61  ;;  %v1139_v21 = vsel %vm575_vm5, %v2102_v17, 0.0 }
 0x428   : > { %688 = vst.msk [vmem:[#allocation4] sm:$0xff] %vm523_vm1, %v686_v58 }
 0x42f   : > { %v793_v56 = vld [vmem:[#allocation4] sm:$0xff] }
 0x433   : > { %962 = vadd.xlane.f32.xlu1 %v961_v0 }
 0x437   : > { %965 = vadd.xlane.f32.xlu0 %v964_v5 }
 0x438   : > { %v612_v42 = vpop.xlane.xlu1 %611 }
 0x439   : > { %v616_v52 = vadd.f32 %v612_v42, %v608_v8 }
 0x43b   : > { %619 = vst.msk [vmem:[#allocation3] sm:$0xff] %vm463_vm2, %v616_v52 }
 0x43c   : > { %v631_v9 = vpop.permute.xlu1 %630 }
 0x43d   : > { %v634_v34 = vmul.f32 0.0, %v631_v9 }
 0x43f   : > { %v687_v36 = vadd.f32 %v1954_v63, %v634_v34  ;;  %v938_v63 = vmul.f32 1.442695, %v935_v57  ;;  %v1116_v57 = vmul.f32 1.442695, %v1113_v2 }
 0x441   : > { %689 = vst.msk [vmem:[#allocation4 + $0x8] sm:$0xff] %vm523_vm1, %v687_v36  ;;  %1655 = vpow2.f32 %v938_v63 }
 0x442   : > { %1657 = vpow2.f32 %v1116_v57  ;;  %v1231_v47 = vld [vmem:[#allocation3] sm:$0xff] }
 0x443   : > { %1659 = vrcp.f32 %v1232_v30 }
 0x448   : > { %v794_v3 = vld [vmem:[#allocation4 + $0x8] sm:$0xff] }
 0x44e   : > { %v1656_v18 = vpop.eup %1655 }
 0x44f   : > { %v960_v46 = vmul.f32 %v1656_v18, %v958_v22  ;;  %v1658_v60 = vpop.eup %1657 }
 0x450   : > { %v1660_v35 = vpop.eup %1659 }
 0x487   : > { %v785_v11 = vpop.xlane.xlu1 %784 }
 0x488   : > { %v789_v13 = vadd.f32 %v785_v11, %v781_v38  ;;  %v1135_v38 = vld [vmem:[#allocation3 + $0x30] sm:$0xff] }
 0x48a   : > { %791 = vst.msk [vmem:[#allocation3 + $0x10] sm:$0xff] %vm463_vm2, %v789_v13  ;;  %v1136_v13 = vld [vmem:[#allocation3 + $0x38] sm:$0xff] }
 0x48b   : > { %v788_v40 = vpop.xlane.xlu0 %787  ;;  %v2126_v14 = vpop.permute.xlu1 %802 }
 0x48c   : > { %v790_v7 = vadd.f32 %v788_v40, %v782_v37  ;;  %v806_v5 = vmul.f32 %v2126_v14, %v794_v3  ;;  %v1138_v40 = vmul.f32 %v1658_v60, %v1136_v13 }
 0x48e   : > { %792 = vst.msk [vmem:[#allocation3 + $0x18] sm:$0xff] %vm463_vm2, %v790_v7 }
 0x491   : > { %v1251_v48 = vld [vmem:[#allocation3 + $0x10] sm:$0xff] }
 0x493   : > { %v2128_v10 = vpop.permute.xlu0 %797 }
 0x494   : > { %v805_v59 = vmul.f32 %v2128_v10, %v793_v56 }
 0x495   : > { %v1252_v31 = vld [vmem:[#allocation3 + $0x18] sm:$0xff] }
 0x496   : > { %1661 = vrcp.f32 %v1252_v31 }
 0x4a3   : > { %v1662_v43 = vpop.eup %1661 }
 0x4bc   : > { %v963_v19 = vpop.xlane.xlu1 %962 }
 0x4bd   : > { %v967_v15 = vadd.f32 %v963_v19, %v959_v4 }
 0x4bf   : > { %969 = vst.msk [vmem:[#allocation3 + $0x20] sm:$0xff] %vm463_vm2, %v967_v15 }
 0x4c0   : > { %v966_v49 = vpop.xlane.xlu0 %965 }
 0x4c1   : > { %v968_v53 = vadd.f32 %v966_v49, %v960_v46 }
 0x4c3   : > { %970 = vst.msk [vmem:[#allocation3 + $0x28] sm:$0xff] %vm463_vm2, %v968_v53  ;;  %v848_v50 = vpop.f32.mrf.mxu0 }
 0x4c4   : > { %857 = vrot.lane.b32.xlu1 %v848_v50, %s1723_s10 }
 0x4c5   : > { %v1551_v55 = vpop.f32.mrf.mxu0 }
 0x4c6   : > { %v1271_v54 = vld [vmem:[#allocation3 + $0x20] sm:$0xff] }
 0x4c7   : > { %v851_v25 = vpop.f32.mrf.mxu0 }
 0x4c8   : > { %859 = vrot.lane.b32.xlu0 %v851_v25, %s1723_s10 }
 0x4c9   : > { %v1552_v24 = vpop.f32.mrf.mxu0 }
 0x4ca   : > { %v1272_v2 = vld [vmem:[#allocation3 + $0x28] sm:$0xff] }
 0x4cb   : > { %v1026_v26 = vpop.f32.mrf.mxu0  ;;  %1663 = vrcp.f32 %v1272_v2 }
 0x4cc   : > { %975 = vperm.xlu0 %1626, %v1654_v51   ;;  %1665 = vpow2.f32 %v1114_v23 }
 0x4cd   : > { %v1563_v27 = vpop.f32.mrf.mxu0  ;;  %1667 = vrcp.f32 %v1231_v47 }
 0x4ce   : > { %1669 = vrcp.f32 %v1251_v48 }
 0x4cf   : > { %v1029_v28 = vpop.f32.mrf.mxu0  ;;  %1671 = vrcp.f32 %v1271_v54 }
 0x4d0   : > { %1035 = vrot.lane.b32.xlu0 %v1026_v26, %s1722_s9 }
 0x4d1   : > { %v1564_v29 = vpop.f32.mrf.mxu0 }
 0x4d4   : > { %1037 = vrot.lane.b32.xlu0 %v1029_v28, %s1722_s9 }
 0x4d7   : > { %v1204_v1 = vpop.f32.mrf.mxu0 }
 0x4d8   : > { %1158 = vperm.xlu0 %1626, %v1658_v60   ;;  %v1664_v45 = vpop.eup %1663 }
 0x4d9   : > { %v1575_v32 = vpop.f32.mrf.mxu0  ;;  %v1666_v6 = vpop.eup %1665 }
 0x4da   : > { %v1668_v17 = vpop.eup %1667  ;;  %v1137_v11 = vmul.f32 %v1666_v6, %v1135_v38 }
 0x4db   : > { %v1207_v33 = vpop.f32.mrf.mxu0  ;;  %v1670_v44 = vpop.eup %1669 }
 0x4dc   : > { %1215 = vrot.lane.b32.xlu0 %v1207_v33, %s1721_s7  ;;  %v1672_v58 = vpop.eup %1671 }
 0x4dd   : > { %v1576_v39 = vpop.f32.mrf.mxu0 }
 0x4e0   : > { %1242 = vperm.xlu0 %1626, %v1660_v35  }
 0x4e4   : > { %1262 = vperm.xlu0 %1626, %v1662_v43  }
 0x4e8   : > { %1140 = vadd.xlane.f32.xlu1 %v1139_v21  ;;  %1282 = vperm.xlu0 %1626, %v1664_v45  }
 0x4ec   : > { %1143 = vadd.xlane.f32.xlu1 %v1142_v20 }
 0x4fd   : > { %980 = vperm.xlu1 %1625, %v1656_v18  }
 0x501   : > { %1153 = vperm.xlu1 %1625, %v1666_v6  }
 0x505   : > { %1213 = vrot.lane.b32.xlu1 %v1204_v1, %s1721_s7 }
 0x509   : > { %1237 = vperm.xlu1 %1625, %v1668_v17  }
 0x50d   : > { %1257 = vperm.xlu1 %1625, %v1670_v44  }
 0x511   : > { %1277 = vperm.xlu1 %1625, %v1672_v58  }
 0x536   : > { %v858_v62 = vpop.permute.xlu1 %857 }
 0x537   : > { %v863_v0 = vadd.f32 %v858_v62, %v805_v59 }
 0x539   : > { %866 = vst.msk [vmem:[#allocation4] sm:$0xff] %vm865_vm7, %v863_v0 }
 0x53a   : > { %v860_v8 = vpop.permute.xlu0 %859 }
 0x53b   : > { %v864_v42 = vadd.f32 %v860_v8, %v806_v5 }
 0x53d   : > { %867 = vst.msk [vmem:[#allocation4 + $0x8] sm:$0xff] %vm865_vm7, %v864_v42 }
 0x540   : > { %v971_v9 = vld [vmem:[#allocation4] sm:$0xff] }
 0x544   : > { %v972_v51 = vld [vmem:[#allocation4 + $0x8] sm:$0xff] }
 0x547   : > { %v976_v52 = vpop.permute.xlu0 %975 }
 0x548   : > { %v983_v34 = vmul.f32 %v976_v52, %v971_v9 }
 0x54b   : > { %v1036_v36 = vpop.permute.xlu0 %1035 }
 0x54c   : > { %v1041_v61 = vadd.f32 %v1036_v36, %v983_v34 }
 0x54e   : > { %1044 = vst.msk [vmem:[#allocation4] sm:$0xff] %vm1043_vm8, %v1041_v61 }
 0x54f   : > { %v1038_v16 = vpop.permute.xlu0 %1037 }
 0x553   : > { %v1159_v46 = vpop.permute.xlu0 %1158 }
 0x555   : > { %v1149_v19 = vld [vmem:[#allocation4] sm:$0xff] }
 0x557   : > { %v1216_v57 = vpop.permute.xlu0 %1215 }
 0x55b   : > { %v1243_v29 = vpop.permute.xlu0 %1242 }
 0x55f   : > { %v1263_v33 = vpop.permute.xlu0 %1262 }
 0x563   : > { %v1283_v20 = vpop.permute.xlu0 %1282 }
 0x571   : > { %v1141_v12 = vpop.xlane.xlu1 %1140 }
 0x572   : > { %v1145_v37 = vadd.f32 %v1141_v12, %v1137_v11 }
 0x574   : > { %1147 = vst.msk [vmem:[#allocation3 + $0x30] sm:$0xff] %vm463_vm2, %v1145_v37 }
 0x575   : > { %v1144_v7 = vpop.xlane.xlu1 %1143 }
 0x576   : > { %v1146_v41 = vadd.f32 %v1144_v7, %v1138_v40 }
 0x578   : > { %1148 = vst.msk [vmem:[#allocation3 + $0x38] sm:$0xff] %vm463_vm2, %v1146_v41 }
 0x579   : > { %v981_v63 = vpop.permute.xlu1 %980 }
 0x57a   : > { %v984_v14 = vmul.f32 %v981_v63, %v972_v51 }
 0x57b   : > { %v1291_v4 = vld [vmem:[#allocation3 + $0x30] sm:$0xff] }
 0x57c   : > { %v1042_v18 = vadd.f32 %v1038_v16, %v984_v14  ;;  %1673 = vrcp.f32 %v1291_v4 }
 0x57d   : > { %v1154_v10 = vpop.permute.xlu1 %1153 }
 0x57e   : > { %1045 = vst.msk [vmem:[#allocation4 + $0x8] sm:$0xff] %vm1043_vm8, %v1042_v18  ;;  %v1161_v15 = vmul.f32 %v1154_v10, %v1149_v19 }
 0x57f   : > { %v1292_v22 = vld [vmem:[#allocation3 + $0x38] sm:$0xff] }
 0x580   : > { %1675 = vrcp.f32 %v1292_v22 }
 0x581   : > { %v1214_v49 = vpop.permute.xlu1 %1213 }
 0x582   : > { %v1219_v53 = vadd.f32 %v1214_v49, %v1161_v15 }
 0x584   : > { %1222 = vst.msk [vmem:[#allocation4] sm:$0xff] %vm1221_vm9, %v1219_v53 }
 0x585   : > { %v1150_v50 = vld [vmem:[#allocation4 + $0x8] sm:$0xff]  ;;  %v1238_v27 = vpop.permute.xlu1 %1237 }
 0x586   : > { %v1162_v55 = vmul.f32 %v1159_v46, %v1150_v50 }
 0x588   : > { %v1220_v25 = vadd.f32 %v1216_v57, %v1162_v55 }
 0x589   : > { %v1674_v24 = vpop.eup %1673  ;;  %v1258_v2 = vpop.permute.xlu1 %1257 }
 0x58a   : > { %1223 = vst.msk [vmem:[#allocation4 + $0x8] sm:$0xff] %vm1221_vm9, %v1220_v25  ;;  %1297 = vperm.xlu1 %1625, %v1674_v24  }
 0x58b   : > { %v1229_v26 = vld [vmem:[#allocation4] sm:$0xff] }
 0x58c   : > { %v1245_v28 = vmul.f32 %v1238_v27, %v1229_v26 }
 0x58d   : > { %v1676_v30 = vpop.eup %1675  ;;  %v1278_v45 = vpop.permute.xlu1 %1277 }
 0x58e   : > { %1247 = vst.msk [vmem:[#allocation4] sm:$0xff] %vm523_vm1, %v1245_v28  ;;  %1302 = vperm.xlu0 %1626, %v1676_v30  }
 0x591   : > { %v1230_v31 = vld [vmem:[#allocation4 + $0x8] sm:$0xff] }
 0x592   : > { %v1246_v60 = vmul.f32 %v1243_v29, %v1230_v31 }
 0x594   : > { %1248 = vst.msk [vmem:[#allocation4 + $0x8] sm:$0xff] %vm523_vm1, %v1246_v60 }
 0x595   : > { %v1249_v1 = vld [vmem:[#allocation4] sm:$0xff] }
 0x596   : > { %v1265_v32 = vmul.f32 %v1258_v2, %v1249_v1 }
 0x598   : > { %1267 = vst.msk [vmem:[#allocation4] sm:$0xff] %vm865_vm7, %v1265_v32 }
 0x59b   : > { %v1250_v39 = vld [vmem:[#allocation4 + $0x8] sm:$0xff] }
 0x59c   : > { %v1266_v35 = vmul.f32 %v1263_v33, %v1250_v39 }
 0x59e   : > { %1268 = vst.msk [vmem:[#allocation4 + $0x8] sm:$0xff] %vm865_vm7, %v1266_v35 }
 0x59f   : > { %v1269_v43 = vld [vmem:[#allocation4] sm:$0xff] }
 0x5a0   : > { %v1285_v21 = vmul.f32 %v1278_v45, %v1269_v43 }
 0x5a2   : > { %1287 = vst.msk [vmem:[#allocation4] sm:$0xff] %vm1043_vm8, %v1285_v21 }
 0x5a5   : > { %v1270_v23 = vld [vmem:[#allocation4 + $0x8] sm:$0xff] }
 0x5a6   : > { %v1286_v47 = vmul.f32 %v1283_v20, %v1270_v23 }
 0x5a8   : > { %1288 = vst.msk [vmem:[#allocation4 + $0x8] sm:$0xff] %vm1043_vm8, %v1286_v47 }
 0x5a9   : > { %v1289_v48 = vld [vmem:[#allocation4] sm:$0xff] }
 0x5af   : > { %v1290_v17 = vld [vmem:[#allocation4 + $0x8] sm:$0xff] }
 0x605   : > { %v1298_v6 = vpop.permute.xlu1 %1297 }
 0x606   : > { %v1305_v54 = vmul.f32 %v1298_v6, %v1289_v48 }
 0x608   : > { %1307 = vst.msk [vmem:[#allocation4] sm:$0xff] %vm1221_vm9, %v1305_v54 }
 0x609   : > { %v1303_v44 = vpop.permute.xlu0 %1302 }
 0x60a   : > { %v1306_v58 = vmul.f32 %v1303_v44, %v1290_v17 }
 0x60c   : > { %1308 = vst.msk [vmem:[#allocation4 + $0x8] sm:$0xff] %vm1221_vm9, %v1306_v58 }
 0x60f   : > { %v1309_v56 = vld [vmem:[#allocation4] sm:$0xff] }
 0x613   : > { %v1310_v59 = vld [vmem:[#allocation4 + $0x8] sm:$0xff] }
 0x614   : > { %v1511_v62 = vpack.c.bf16 %v1310_v59, %v1309_v56 }
 0x616   : > { %1512 = vst [vmem:[%s455_s14] sm:$0xff] %v1511_v62  }
 0x617 PF: > { %s14_s19 = sadd.s32 1, %s1715_s19   ;;  %s2191_s15 = smov %s1703_s16 }
 0x618   : > { %p11_p10 = scmp.ge.s32.totalorder %s14_s19, 4   ;;  %s2192_s16 = smov %s1788_s24 }
 0x619   : > { %s2193_s17 = smov %s1711_s18  ;;  %s2194_s18 = smov %s2196_s20 }
 0x61a   :  { %13 = sbr.rel (!%p11_p10) target bundleno = 3 (0x3), region = 227 }

// kernel: transformer_forward.57
= control target key start
LH: loop header
LB: loop body
LE: loop exit
PB: predicated region body
PF: predicated region fallthrough
CT: control target
= control target key end

     0   :  { %v358_v2 = vmov 0   ;;  %s442_s0 = inlined_call_operand.vmem [shape: bf16[32,128], index: 0, kind: input, shape index: {}]   ;;  %s443_s1 = inlined_call_operand.vmem [shape: bf16[128,256], index: 1, kind: input, shape index: {}]   ;;  %s444_s2 = inlined_call_operand.vmem [shape: f32[1,256], index: 2, kind: input, shape index: {}]   ;;  %s445_s3 = inlined_call_operand.hbm [shape: f32[32,256], index: 3, kind: output, shape index: {}]  }
   0x1   :  { %v310_v0 = vld [vmem:[%s443_s1 + $0x74] ss:$8 sps:$4 sm:$0xff]   ;;  %v312_v1 = vld [vmem:[%s443_s1 + $0x70] ss:$8 sps:$4 sm:$0xff]   ;;  %180 = vmatprep.mubr.bf16.mxu0 %v358_v2  ;;  %190 = vmatprep.mubr.bf16.mxu1 %v358_v2  ;;  %v313_v3 = vld [vmem:[%s443_s1 + $0x64] ss:$8 sps:$4 sm:$0xff]  }
   0x2   :  { %148 = vmatprep.subr.bf16.mxu0 %v310_v0  ;;  %290 = vmatprep.subr.bf16.mxu1 %v310_v0  ;;  %v315_v4 = vld [vmem:[%s443_s1 + $0x60] ss:$8 sps:$4 sm:$0xff]   ;;  %v316_v5 = vld [vmem:[%s443_s1 + $0x54] ss:$8 sps:$4 sm:$0xff]   ;;  %v318_v6 = vld [vmem:[%s443_s1 + $0x50] ss:$8 sps:$4 sm:$0xff]  }
   0x3   :  { %149 = vmatpush1.bf16.msra.mxu0 %v312_v1  ;;  %298 = vmatpush1.bf16.msra.mxu1 %v312_v1  ;;  %v319_v7 = vld [vmem:[%s443_s1 + $0x44] ss:$8 sps:$4 sm:$0xff]   ;;  %v321_v8 = vld [vmem:[%s443_s1 + $0x40] ss:$8 sps:$4 sm:$0xff]   ;;  %v322_v9 = vld [vmem:[%s443_s1 + $0x34] ss:$8 sps:$4 sm:$0xff]  }
   0x4   :  { %150 = vmatprep.subr.bf16.mxu0 %v313_v3  ;;  %291 = vmatprep.subr.bf16.mxu1 %v313_v3 }
   0x7   :  { %151 = vmatpush1.bf16.msra.mxu0 %v315_v4  ;;  %299 = vmatpush1.bf16.msra.mxu1 %v315_v4 }
   0x8   :  { %152 = vmatprep.subr.bf16.mxu0 %v316_v5  ;;  %292 = vmatprep.subr.bf16.mxu1 %v316_v5 }
   0xb   :  { %153 = vmatpush1.bf16.msra.mxu0 %v318_v6  ;;  %300 = vmatpush1.bf16.msra.mxu1 %v318_v6 }
   0xc   :  { %154 = vmatprep.subr.bf16.mxu0 %v319_v7  ;;  %293 = vmatprep.subr.bf16.mxu1 %v319_v7 }
   0xd   :  { %8 = vsyncpa [#allocation4], 0  ;;  %v324_v10 = vld [vmem:[%s443_s1 + $0x30] ss:$8 sps:$4 sm:$0xff]   ;;  %v325_v11 = vld [vmem:[%s443_s1 + $0x24] ss:$8 sps:$4 sm:$0xff]   ;;  %v230_v19 = vlaneseq }
   0xe   :  { %v327_v12 = vld [vmem:[%s443_s1 + $0x20] ss:$8 sps:$4 sm:$0xff]   ;;  %v328_v13 = vld [vmem:[%s443_s1 + $0x14] ss:$8 sps:$4 sm:$0xff]   ;;  %v330_v14 = vld [vmem:[%s443_s1 + $0x10] ss:$8 sps:$4 sm:$0xff]  }
   0xf   :  { %155 = vmatpush1.bf16.msra.mxu0 %v321_v8  ;;  %301 = vmatpush1.bf16.msra.mxu1 %v321_v8  ;;  %v331_v15 = vld [vmem:[%s443_s1 + $0x4] ss:$8 sps:$4 sm:$0xff]   ;;  %v333_v16 = vld [vmem:[%s443_s1] ss:$8 sps:$4 sm:$0xff]   ;;  %v231_v20 = vshrl.u32 %v230_v19, 7 }
  0x10   :  { %156 = vmatprep.subr.bf16.mxu0 %v322_v9  ;;  %294 = vmatprep.subr.bf16.mxu1 %v322_v9  ;;  %v334_v17 = vld [vmem:[%s442_s0] sm:$0xff]   ;;  %v335_v18 = vld [vmem:[%s442_s0 + $0x8] sm:$0xff]   ;;  %s359_s0 = smov [#allocation3]  }
  0x11   :  { %v232_v21 = vsub.s32 0, %v231_v20  ;;  %v228_v22 = vld [vmem:[%s444_s2] sm:$0x3]  ;;  %v236_v23 = vsub.s32 1, %v231_v20  ;;  %s261_s1 = sshll.u32 %s359_s0, 4  ;;  %s262_s1 = int_to_ptr.vmem [resolvable:$true] %s261_s1 }
  0x12   :  { %s336_s2 = scalar_lea.vmem %s262_s1, 1024  ;;  %p341_p1 = scmp.lt.s32.totalorder %s262_s1, %s262_s1 }
  0x13   :  { %157 = vmatpush1.bf16.msra.mxu0 %v324_v10  ;;  %302 = vmatpush1.bf16.msra.mxu1 %v324_v10  ;;  %v233_v24 = vrot.slane %v228_v22, %v232_v21  ;;  %v237_v25 = vrot.slane %v228_v22, %v236_v23  ;;  %p337_p0 = scmp.ne.s32.totalorder %s262_s1, %s336_s2  ;;  %p342_p2 = scmp.lt.s32.totalorder %s336_s2, %s336_s2 }
  0x14   :  { %158 = vmatprep.subr.bf16.mxu0 %v325_v11  ;;  %295 = vmatprep.subr.bf16.mxu1 %v325_v11 }
  0x15   :  { %p343_p3 = por %p342_p2, %p341_p1 }
  0x17   :  { %159 = vmatpush1.bf16.msra.mxu0 %v327_v12  ;;  %303 = vmatpush1.bf16.msra.mxu1 %v327_v12  ;;  %p344_p4 = pnand %p343_p3, %p337_p0 }
  0x18   :  { %160 = vmatprep.subr.bf16.mxu0 %v328_v13  ;;  %296 = vmatprep.subr.bf16.mxu1 %v328_v13 }
  0x1b   :  { %161 = vmatpush1.bf16.msra.mxu0 %v330_v14  ;;  %304 = vmatpush1.bf16.msra.mxu1 %v330_v14 }
  0x1c   :  { %162 = vmatprep.subr.bf16.mxu0 %v331_v15  ;;  %297 = vmatprep.subr.bf16.mxu1 %v331_v15 }
  0x1f   :  { %163 = vmatpush1.bf16.msra.mxu0 %v333_v16  ;;  %305 = vmatpush1.bf16.msra.mxu1 %v333_v16 }
  0x22   :  { %181 = vmatmul.mubr.bf16.vlgmr.msra.gmra.mxu0 %v334_v17  ;;  %191 = vmatmul.mubr.bf16.vlgmr.msra.gmra.mxu1 %v335_v18 }
  0xe2   :  { %v182_v26 = vpop.f32.mrf.mxu0  ;;  %v192_v27 = vpop.f32.mrf.mxu1 }
  0xe3   :  { %v240_v28 = vadd.f32 %v233_v24, %v182_v26  ;;  %v244_v29 = vadd.f32 %v233_v24, %v192_v27 }
  0xe4   :  { %v184_v30 = vpop.f32.mrf.mxu0  ;;  %v194_v31 = vpop.f32.mrf.mxu1 }
  0xe5   :  { %248 = vst [vmem:[#allocation3] sm:$0xff] %v240_v28  ;;  %252 = vst [vmem:[#allocation3 + $0x20] sm:$0xff] %v244_v29  ;;  %v241_v32 = vadd.f32 %v237_v25, %v184_v30  ;;  %v245_v33 = vadd.f32 %v237_v25, %v194_v31 }
  0xe6   :  { %v186_v34 = vpop.f32.mrf.mxu0  ;;  %v196_v35 = vpop.f32.mrf.mxu1 }
  0xe7   :  { %249 = vst [vmem:[#allocation3 + $0x8] sm:$0xff] %v241_v32  ;;  %253 = vst [vmem:[#allocation3 + $0x28] sm:$0xff] %v245_v33  ;;  %v242_v36 = vadd.f32 %v233_v24, %v186_v34  ;;  %v246_v37 = vadd.f32 %v233_v24, %v196_v35 }
  0xe8   :  { %v188_v38 = vpop.f32.mrf.mxu0  ;;  %v198_v39 = vpop.f32.mrf.mxu1 }
  0xe9   :  { %250 = vst [vmem:[#allocation3 + $0x10] sm:$0xff] %v242_v36  ;;  %254 = vst [vmem:[#allocation3 + $0x30] sm:$0xff] %v246_v37  ;;  %v243_v40 = vadd.f32 %v237_v25, %v188_v38  ;;  %v247_v41 = vadd.f32 %v237_v25, %v198_v39 }
  0xeb   :  { %251 = vst [vmem:[#allocation3 + $0x18] sm:$0xff] %v243_v40  ;;  %255 = vst [vmem:[#allocation3 + $0x38] sm:$0xff] %v247_v41 }
  0xec   :  { %347 = shalt.err (!%p344_p4)
}
  0xed   :  { %s360_s23 = smov 256   ;;  %s361_s24 = smov 16  }
  0xee   :  { %267 = dma.vmem_to_hbm [thread:$0]  %s262_s1, 1024, %s445_s3, [#allocation4], %s360_s23, %s360_s23, %s361_s24  }
  0xef   :  { %356 = dma.done.wait [#allocation4], 1024  }
  0xf0   :  { %357 = vsyncadd [#allocation4], 4294966272 }
  0xf1   :  { %271 = vsyncpa [#allocation4], 1 }

// kernel: transformer_forward.44
= control target key start
LH: loop header
LB: loop body
LE: loop exit
PB: predicated region body
PF: predicated region fallthrough
CT: control target
= control target key end

     0   :  { %s1685_s15 = smov 0   ;;  %s1687_s16 = smov 0   ;;  %s2084_s0 = inlined_call_operand.vmem [shape: bf16[2,16,128], index: 0, kind: input, shape index: {}]   ;;  %s2085_s1 = inlined_call_operand.vmem [shape: bf16[2,16,256], index: 1, kind: input, shape index: {}, may-alias: {1,2}]   ;;  %s2086_s2 = inlined_call_operand.vmem [shape: bf16[2,16,256], index: 2, kind: input, shape index: {}, may-alias: {1,2}]   ;;  %s2087_s3 = inlined_call_operand.vmem [shape: f32[2,1,16], index: 3, kind: input, shape index: {}]   ;;  %s2088_s4 = inlined_call_operand.vmem [shape: bf16[2,16,128], index: 4, kind: output, shape index: {}]  }
   0x1   :  { %s1689_s17 = smov 0   ;;  %s1691_s18 = smov 0  }
   0x2   :  { %s1693_s19 = smov 0  }
   0x3 LB: > { %s33_s20 = sadd.s32 1, %s1647_s18  ;;  %p77_p1 = scmp.ne.s32.totalorder %s1639_s16, %s1635_s15  ;;  %s1651_s19 = sphi %s1693_s19, %s14_s19   ;;  %s1647_s18 = sphi %s1691_s18, %s2093_s18   ;;  %s1643_s17 = sphi %s1689_s17, %s2092_s17   ;;  %s1639_s16 = sphi %s1687_s16, %s2091_s16   ;;  %s1635_s15 = sphi %s1685_s15, %s2090_s15  }
   0x4   : > { %p35_p0 = scmp.ge.s32.totalorder %s33_s20, 2  ;;  %p78_p2 = scmp.eq.s32.totalorder %s1651_s19, 0 }
   0x5   : > { %s70_s23 = sadd.s32 1, %s1639_s16  ;;  %p1408_p5 = scmp.ge.s32.totalorder %s1651_s19, 2 }
   0x6   : > { %s2095_s20 = smov (%p35_p0, %s33_s20), 0  ;;  %p1716_p3 = por %p78_p2, %p77_p1 }
   0x7   : > { %s65_s22 = ssub.s32 %s1647_s18, %s2095_s20  ;;  %187 = sbr.rel (%p1408_p5) target bundleno = 22 (0x16), region = 16 }
   0x8   : > { %p68_p4 = scmp.eq.s32.totalorder %s65_s22, 0 }
   0xa   : > { %s1724_s24 = scalar_select %p68_p4, %s1639_s16, %s70_s23  }
   0xc   : > { %203 = sbr.rel (!%p1716_p3) target bundleno = 17 (0x11), region = 24  ;;  %s205_s25 = sand.u32 (%p1716_p3), 1, %s1639_s16  }
   0xd   : > { %s1439_s26 = sshll.u32 (%p1716_p3), %s1647_s18, 4  ;;  %s1409_s27 = sshll.u32 (%p1716_p3), %s205_s25, 3 }
   0xe   : > { %s213_s30 = scalar_lea.vmem (%p1716_p3), %s2085_s1, %s1439_s26  ;;  %s207_s5 = scalar_lea.vmem (%p1716_p3), [#allocation5], %s1409_s27 }
   0xf   : > { %v230_v0 = vld [vmem:[%s213_s30] sm:$0xf] (%p1716_p3)  ;;  %v232_v1 = vld [vmem:[%s213_s30 + $0x8] sm:$0xf] (%p1716_p3) }
  0x10   : > { %231 = vst [vmem:[%s207_s5] sm:$0xf] (%p1716_p3), %v230_v0  ;;  %233 = vst [vmem:[%s207_s5 + $0x4] sm:$0xf] (%p1716_p3), %v232_v1 }
  0x11 PF: > { %261 = sbr.rel (!%p1716_p3) target bundleno = 22 (0x16), region = 65  ;;  %s263_s6 = sand.u32 (%p1716_p3), 1, %s1639_s16  }
  0x12   : > { %s1440_s7 = sshll.u32 (%p1716_p3), %s1647_s18, 4  ;;  %s1412_s8 = sshll.u32 (%p1716_p3), %s263_s6, 3 }
  0x13   : > { %s1307_s11 = scalar_lea.vmem (%p1716_p3), %s2086_s2, %s1440_s7  ;;  %s265_s12 = scalar_lea.vmem (%p1716_p3), [#allocation6], %s1412_s8 }
  0x14   : > { %v1415_v2 = vld [vmem:[%s1307_s11 + $0x4] sm:$0xf] (%p1716_p3)  ;;  %v1416_v3 = vld [vmem:[%s1307_s11 + $0xc] sm:$0xf] (%p1716_p3) }
  0x15   : > { %290 = vst [vmem:[%s265_s12] sm:$0xf] (%p1716_p3), %v1415_v2  ;;  %292 = vst [vmem:[%s265_s12 + $0x4] sm:$0xf] (%p1716_p3), %v1416_v3 }
  0x16 PF: > { %p1417_p6 = scmp.ge.s32.totalorder %s1651_s19, 1  ;;  %p328_p7 = scmp.lt.s32.totalorder %s1651_s19, 3 }
  0x18   : > { %p329_p8 = pnand %p1417_p6, %p328_p7 }
  0x19   : > { %s335_s13 = sand.u32 (!%p329_p8), 1, %s1635_s15   ;;  %p391_p9 = scmp.lt.s32.totalorder (!%p329_p8), %s1643_s17, 1 }
  0x1a   : > { %332 = sbr.rel (%p329_p8) target bundleno = 1549 (0x60d), region = 110  ;;  %s1748_s14 = sshll.u32 (!%p329_p8), %s335_s13, 3 }
  0x1b   : > { %s337_s15 = scalar_lea.vmem (!%p329_p8), [#allocation5], %s1748_s14  ;;  %s1657_s29 = smov (!%p329_p8), 96  }
  0x1c   : > { %s344_s30 = scalar_lea.vmem (!%p329_p8), [#allocation6], %s1748_s14  ;;  %s1658_s5 = smov (!%p329_p8), 64  }
  0x1d   : > { %s1659_s6 = smov (!%p329_p8), 32  }
  0x1f   : > { %v1653_v4 = vmov 0.0   ;;  %vm1654_vm0 = vmmov 0   ;;  %vm470_vm1 = vcmask 261120   ;;  %v1756_v5 = vld [vmem:[%s337_s15] sm:$0xff]   ;;  %s2097_s17 = smov (!%p391_p9, %s1643_s17), 1  ;;  %vm424_vm2 = vcmask 7168  }
  0x20   : > { %1466 = vmatprep.subr.bf16.mxu0 %v1653_v4  ;;  %441 = vst [vmem:[#allocation4] sm:$0xff] %v1653_v4  ;;  %442 = vst [vmem:[#allocation4 + $0x8] sm:$0xff] %v1653_v4  ;;  %1468 = vmatprep.mubr.msk.bf16.mxu0 %vm1654_vm0, %v1653_v4  ;;  %v475_v6 = vsel %vm470_vm1, %v1756_v5, 0  ;;  %s1441_s21 = sshll.u32 %s2097_s17, 3  ;;  %v1655_v12 = vmov -1e+20   ;;  %s407_s28 = scalar_lea.vmem %s2087_s3, %s2097_s17  ;;  %v455_v13 = vlaneseq }
  0x21   : > { %1472 = vmatprep.subr.bf16.mxu1 %v1653_v4  ;;  %1474 = vmatprep.mubr.msk.bf16.mxu1 %vm1654_vm0, %v1653_v4  ;;  %s398_s25 = scalar_lea.vmem %s2084_s0, %s1441_s21  ;;  %425 = vst.msk [vmem:[#allocation2] sm:$0xff] %vm424_vm2, %v1655_v12  ;;  %426 = vst.msk [vmem:[#allocation2 + $0x8] sm:$0xff] %vm424_vm2, %v1655_v12  ;;  %v443_v14 = vld [vmem:[%s407_s28] sm:$0x1]  ;;  %vm520_vm4 = vcmask 130048   ;;  %v1656_v27 = vmov 0   ;;  %s416_s9 = scalar_lea.vmem %s2088_s4, %s1441_s21 }
  0x22   : > { %1467 = vmatpush3.bf16.xpose.msra.mxu0 %v475_v6  ;;  %v446_v7 = vld [vmem:[%s398_s25] sm:$0xf]  ;;  %v447_v8 = vld [vmem:[%s398_s25 + $0x4] sm:$0xf]  ;;  %427 = vst.msk [vmem:[#allocation2 + $0x10] sm:$0xff] %vm424_vm2, %v1655_v12  ;;  %428 = vst.msk [vmem:[#allocation2 + $0x18] sm:$0xff] %vm424_vm2, %v1655_v12  ;;  %1561 = vset.pattern.permute.xlu1 %v1656_v27 }
  0x23   : > { %1484 = vmatprep.subr.bf16.mxu0 %v1653_v4  ;;  %v452_v9 = vmul.bf16 1043676725, %v446_v7  ;;  %v453_v10 = vmul.bf16 1043676725, %v447_v8  ;;  %429 = vst.msk [vmem:[#allocation2 + $0x20] sm:$0xff] %vm424_vm2, %v1655_v12  ;;  %430 = vst.msk [vmem:[#allocation2 + $0x28] sm:$0xff] %vm424_vm2, %v1655_v12  ;;  %1562 = vset.pattern.permute.xlu0 %v1656_v27 }
  0x24   : > { %431 = vst.msk [vmem:[#allocation2 + $0x30] sm:$0xff] %vm424_vm2, %v1655_v12  ;;  %432 = vst.msk [vmem:[#allocation2 + $0x38] sm:$0xff] %vm424_vm2, %v1655_v12  ;;  %v456_v15 = vshrl.u32 %v455_v13, 7  ;;  %vm444_vm3 = vcmp.ne.f32.partialorder %v443_v14, 0.0  ;;  %v1833_v36 = vld [vmem:[%s344_s30] sm:$0xff]   ;;  %vm808_vm5 = vcmask 523520  }
  0x25   : > { %v1770_v11 = vcombine.low %v452_v9, %v453_v10  ;;  %433 = vst.msk [vmem:[#allocation3] sm:$0xff] %vm424_vm2, %v1653_v4  ;;  %434 = vst.msk [vmem:[#allocation3 + $0x8] sm:$0xff] %vm424_vm2, %v1653_v4  ;;  %v445_v17 = vsel %vm444_vm3, 0.0, %v1655_v12  ;;  %1473 = vmatpush3.bf16.msra.mxu1 %v1833_v36  ;;  %vm984_vm6 = vcmask 785920   ;;  %vm1160_vm7 = vcmask 1048320  }
  0x26   : > { %435 = vst.msk [vmem:[#allocation3 + $0x10] sm:$0xff] %vm424_vm2, %v1653_v4  ;;  %436 = vst.msk [vmem:[#allocation3 + $0x18] sm:$0xff] %vm424_vm2, %v1653_v4  ;;  %v457_v16 = vsub.s32 0, %v456_v15  ;;  %1478 = vmatprep.subr.bf16.mxu1 %v1653_v4 }
  0x27   : > { %437 = vst.msk [vmem:[#allocation3 + $0x20] sm:$0xff] %vm424_vm2, %v1653_v4  ;;  %438 = vst.msk [vmem:[#allocation3 + $0x28] sm:$0xff] %vm424_vm2, %v1653_v4 }
  0x28   : > { %439 = vst.msk [vmem:[#allocation3 + $0x30] sm:$0xff] %vm424_vm2, %v1653_v4  ;;  %440 = vst.msk [vmem:[#allocation3 + $0x38] sm:$0xff] %vm424_vm2, %v1653_v4  ;;  %v1804_v18 = vrot.slane %v445_v17, %v457_v16  ;;  %v1812_v28 = vld [vmem:[#allocation2] sm:$0xff]  ;;  %v1817_v31 = vld [vmem:[#allocation2 + $0x8] sm:$0xff] }
  0x29   : > { %1469 = vmatmul.mubr.msk.bf16.vlgmr.msra.gmra.mxu0 %vm470_vm1, %v1770_v11 }
  0x2a   : > { %1486 = vmatprep.mubr.msk.bf16.mxu0 %vm1654_vm0, %v1653_v4  ;;  %v1917_v27 = vld [vmem:[#allocation2 + $0x20] sm:$0xff] }
  0xe9   : > { %v511_v19 = vpop.f32.mrf.mxu0 }
  0xea   : > { %v512_v20 = vadd.f32 %v511_v19, %v1804_v18 }
  0xeb   : > { %v1470_v21 = vpop.f32.mrf.mxu0 }
  0xec   : > { %v521_v22 = vsel %vm520_vm4, %v512_v20, -inf  ;;  %v1902_v21 = vld [vmem:[#allocation2 + $0x10] sm:$0xff] }
  0xed   : > { %522 = vmax.xlane.f32.xlu0 %v521_v22  ;;  %v514_v23 = vpop.f32.mrf.mxu0 }
  0xee   : > { %v515_v24 = vadd.f32 %v514_v23, %v1804_v18 }
  0xef   : > { %v1471_v25 = vpop.f32.mrf.mxu0 }
  0xf0   : > { %v524_v26 = vsel %vm520_vm4, %v515_v24, -inf }
  0xf1   : > { %525 = vmax.xlane.f32.xlu0 %v524_v26 }
 0x107   : > { %639 = vrot.lane.b32.xlu0 %v1756_v5, %s1657_s29 }
 0x176   : > { %v523_v29 = vpop.xlane.xlu0 %522 }
 0x177   : > { %v1815_v30 = vmax.f32 %v1812_v28, %v523_v29 }
 0x179   : > { %v529_v32 = vsub.f32 %v1812_v28, %v1815_v30  ;;  %635 = vst.msk [vmem:[#allocation2] sm:$0xff] %vm424_vm2, %v1815_v30  ;;  %537 = vperm.xlu1 %1561, %v1815_v30  }
 0x17a   : > { %v526_v33 = vpop.xlane.xlu0 %525 }
 0x17b   : > { %v1825_v34 = vmax.f32 %v1817_v31, %v526_v33 }
 0x17d   : > { %v530_v35 = vsub.f32 %v1817_v31, %v1825_v34  ;;  %636 = vst.msk [vmem:[#allocation2 + $0x8] sm:$0xff] %vm424_vm2, %v1825_v34  ;;  %542 = vperm.xlu1 %1561, %v1825_v34  }
 0x17e   : > { %v640_v43 = vpop.permute.xlu0 %639 }
 0x17f   : > { %v645_v47 = vsel %vm470_vm1, %v640_v43, 0 }
 0x181   : > { %637 = vrot.lane.b32.xlu1 %v1770_v11, %s1657_s29 }
 0x185   : > { %815 = vrot.lane.b32.xlu1 %v1756_v5, %s1658_s5 }
 0x189   : > { %813 = vrot.lane.b32.xlu1 %v1770_v11, %s1658_s5 }
 0x18d   : > { %991 = vrot.lane.b32.xlu1 %v1756_v5, %s1659_s6 }
 0x191   : > { %989 = vrot.lane.b32.xlu1 %v1770_v11, %s1659_s6 }
 0x1f4   : > { %v538_v37 = vpop.permute.xlu1 %537 }
 0x1f5   : > { %v545_v38 = vsub.f32 %v512_v20, %v538_v37 }
 0x1f7   : > { %v547_v39 = vmul.f32 1.442695, %v545_v38  ;;  %v1929_v38 = vld [vmem:[#allocation2 + $0x28] sm:$0xff] }
 0x1f8   : > { %v543_v40 = vpop.permute.xlu1 %542 }
 0x1f9   : > { %v546_v41 = vsub.f32 %v515_v24, %v543_v40  ;;  %1565 = vpow2.f32 %v547_v39  ;;  %v1907_v24 = vld [vmem:[#allocation2 + $0x18] sm:$0xff] }
 0x1fb   : > { %v549_v42 = vmul.f32 1.442695, %v546_v41 }
 0x1fc   : > { %v638_v44 = vpop.permute.xlu1 %637 }
 0x1fd   : > { %1567 = vpow2.f32 %v549_v42  ;;  %v1939_v42 = vld [vmem:[#allocation2 + $0x30] sm:$0xff] }
 0x200   : > { %v816_v49 = vpop.permute.xlu1 %815 }
 0x201   : > { %v821_v51 = vsel %vm470_vm1, %v816_v49, 0 }
 0x204   : > { %v814_v50 = vpop.permute.xlu1 %813 }
 0x206   : > { %v1847_v45 = vpop.eup %1565 }
 0x208   : > { %v992_v52 = vpop.permute.xlu1 %991 }
 0x209   : > { %v997_v53 = vsel %vm470_vm1, %v992_v52, 0 }
 0x20a   : > { %v1849_v46 = vpop.eup %1567 }
 0x20b   : > { %v580_v48 = vpack.c.bf16 %v1849_v46, %v1847_v45 }
 0x20c   : > { %v990_v54 = vpop.permute.xlu1 %989 }
 0x20d   : > { %1475 = vmatmul.mubr.msk.bf16.vlgmr.msra.gmra.mxu1 %vm520_vm4, %v580_v48  ;;  %v1949_v48 = vld [vmem:[#allocation2 + $0x38] sm:$0xff] }
 0x20e   : > { %1479 = vmatpush3.bf16.xpose.msra.mxu1 %v645_v47  ;;  %1480 = vmatprep.mubr.msk.bf16.mxu1 %vm1654_vm0, %v1653_v4 }
 0x20f   : > { %1490 = vmatprep.subr.bf16.mxu1 %v1653_v4 }
 0x215   : > { %1481 = vmatmul.mubr.msk.bf16.vlgmr.msra.gmra.mxu1 %vm470_vm1, %v638_v44 }
 0x216   : > { %1491 = vmatpush3.bf16.xpose.msra.mxu1 %v821_v51  ;;  %1492 = vmatprep.mubr.msk.bf16.mxu1 %vm1654_vm0, %v1653_v4 }
 0x217   : > { %1502 = vmatprep.subr.bf16.mxu1 %v1653_v4 }
 0x21d   : > { %1493 = vmatmul.mubr.msk.bf16.vlgmr.msra.gmra.mxu1 %vm470_vm1, %v814_v50 }
 0x21e   : > { %1503 = vmatpush3.bf16.xpose.msra.mxu1 %v997_v53  ;;  %1504 = vmatprep.mubr.msk.bf16.mxu1 %vm1654_vm0, %v1653_v4  ;;  %v558_v53 = vsel %vm520_vm4, %v1849_v46, 0.0 }
 0x225   : > { %1505 = vmatmul.mubr.msk.bf16.vlgmr.msra.gmra.mxu1 %vm470_vm1, %v990_v54  ;;  %v531_v54 = vmul.f32 1.442695, %v529_v32 }
 0x227   : > { %1569 = vpow2.f32 %v531_v54 }
 0x2cd   : > { %v1868_v55 = vpop.f32.mrf.mxu1 }
 0x2cf   : > { %v1476_v56 = vpop.f32.mrf.mxu1 }
 0x2d0   : > { %v1973_v56 = vpop.eup %1569 }
 0x2d1   : > { %v1870_v57 = vpop.f32.mrf.mxu1 }
 0x2d3   : > { %v1477_v58 = vpop.f32.mrf.mxu1 }
 0x2d4   : > { %v533_v58 = vmul.f32 1.442695, %v530_v35 }
 0x2d5   : > { %v681_v59 = vpop.f32.mrf.mxu1 }
 0x2d6   : > { %v1873_v60 = vadd.f32 %v681_v59, %v1804_v18  ;;  %1571 = vpow2.f32 %v533_v58 }
 0x2d7   : > { %v1482_v61 = vpop.f32.mrf.mxu1 }
 0x2d8   : > { %v691_v62 = vsel %vm520_vm4, %v1873_v60, -inf }
 0x2d9   : > { %692 = vmax.xlane.f32.xlu1 %v691_v62  ;;  %v684_v63 = vpop.f32.mrf.mxu1 }
 0x2da   : > { %v1878_v0 = vadd.f32 %v684_v63, %v1804_v18 }
 0x2db   : > { %v1483_v1 = vpop.f32.mrf.mxu1 }
 0x2dc   : > { %v694_v2 = vsel %vm520_vm4, %v1878_v0, -inf }
 0x2dd   : > { %695 = vmax.xlane.f32.xlu0 %v694_v2  ;;  %v857_v3 = vpop.f32.mrf.mxu1 }
 0x2de   : > { %v1883_v5 = vadd.f32 %v857_v3, %v1804_v18 }
 0x2df   : > { %v1494_v6 = vpop.f32.mrf.mxu1 }
 0x2e0   : > { %v867_v7 = vsel %vm520_vm4, %v1883_v5, -inf }
 0x2e1   : > { %868 = vmax.xlane.f32.xlu0 %v867_v7  ;;  %v860_v8 = vpop.f32.mrf.mxu1 }
 0x2e2   : > { %v1888_v9 = vadd.f32 %v860_v8, %v1804_v18 }
 0x2e3   : > { %v1495_v10 = vpop.f32.mrf.mxu1  ;;  %v1572_v46 = vpop.eup %1571 }
 0x2e4   : > { %v870_v11 = vsel %vm520_vm4, %v1888_v9, -inf }
 0x2e5   : > { %871 = vmax.xlane.f32.xlu1 %v870_v11  ;;  %v1033_v12 = vpop.f32.mrf.mxu1 }
 0x2e6   : > { %v1893_v13 = vadd.f32 %v1033_v12, %v1804_v18 }
 0x2e7   : > { %v1506_v14 = vpop.f32.mrf.mxu1 }
 0x2e8   : > { %v1043_v15 = vsel %vm520_vm4, %v1893_v13, -inf }
 0x2e9   : > { %1044 = vmax.xlane.f32.xlu0 %v1043_v15  ;;  %v1036_v16 = vpop.f32.mrf.mxu1 }
 0x2ea   : > { %v1898_v17 = vadd.f32 %v1036_v16, %v1804_v18 }
 0x2eb   : > { %v1507_v19 = vpop.f32.mrf.mxu1 }
 0x2ec   : > { %v1046_v20 = vsel %vm520_vm4, %v1898_v17, -inf }
 0x2ed   : > { %1047 = vmax.xlane.f32.xlu1 %v1046_v20 }
 0x362   : > { %v693_v22 = vpop.xlane.xlu1 %692 }
 0x363   : > { %v1905_v23 = vmax.f32 %v1902_v21, %v693_v22 }
 0x365   : > { %v699_v25 = vsub.f32 %v1902_v21, %v1905_v23  ;;  %811 = vst.msk [vmem:[#allocation2 + $0x10] sm:$0xff] %vm424_vm2, %v1905_v23  ;;  %707 = vperm.xlu0 %1562, %v1905_v23  }
 0x366   : > { %v696_v18 = vpop.xlane.xlu0 %695 }
 0x367   : > { %v1915_v26 = vmax.f32 %v1907_v24, %v696_v18  ;;  %v552_v18 = vld [vmem:[#allocation3 + $0x8] sm:$0xff] }
 0x369   : > { %v700_v29 = vsub.f32 %v1907_v24, %v1915_v26  ;;  %812 = vst.msk [vmem:[#allocation2 + $0x18] sm:$0xff] %vm424_vm2, %v1915_v26  ;;  %1103 = vrot.lane.b32.xlu0 %v1833_v36, %s1659_s6  ;;  %712 = vperm.xlu1 %1561, %v1915_v26   ;;  %v554_v26 = vmul.f32 %v1572_v46, %v552_v18 }
 0x36a   : > { %v869_v33 = vpop.xlane.xlu0 %868 }
 0x36b   : > { %v1927_v37 = vmax.f32 %v1917_v27, %v869_v33  ;;  %v703_v3 = vmul.f32 1.442695, %v700_v29 }
 0x36d   : > { %v875_v39 = vsub.f32 %v1917_v27, %v1927_v37  ;;  %987 = vst.msk [vmem:[#allocation2 + $0x20] sm:$0xff] %vm424_vm2, %v1927_v37  ;;  %883 = vperm.xlu1 %1561, %v1927_v37  }
 0x36e   : > { %v872_v40 = vpop.xlane.xlu1 %871 }
 0x36f   : > { %v1937_v41 = vmax.f32 %v1929_v38, %v872_v40 }
 0x371   : > { %v876_v43 = vsub.f32 %v1929_v38, %v1937_v41  ;;  %988 = vst.msk [vmem:[#allocation2 + $0x28] sm:$0xff] %vm424_vm2, %v1937_v41  ;;  %888 = vperm.xlu1 %1561, %v1937_v41  }
 0x372   : > { %v1045_v44 = vpop.xlane.xlu0 %1044 }
 0x373   : > { %v1947_v47 = vmax.f32 %v1939_v42, %v1045_v44 }
 0x375   : > { %751 = vrot.lane.b32.xlu1 %v1833_v36, %s1657_s29  ;;  %v1051_v49 = vsub.f32 %v1939_v42, %v1947_v47  ;;  %1163 = vst.msk [vmem:[#allocation2 + $0x30] sm:$0xff] %vm424_vm2, %v1947_v47 }
 0x376   : > { %v1048_v50 = vpop.xlane.xlu1 %1047 }
 0x377   : > { %v1958_v51 = vmax.f32 %v1949_v48, %v1048_v50 }
 0x379   : > { %1059 = vperm.xlu1 %1561, %v1947_v47   ;;  %v1052_v52 = vsub.f32 %v1949_v48, %v1958_v51  ;;  %1164 = vst.msk [vmem:[#allocation2 + $0x38] sm:$0xff] %vm424_vm2, %v1958_v51 }
 0x37d   : > { %1064 = vperm.xlu1 %1561, %v1958_v51  }
 0x381   : > { %927 = vrot.lane.b32.xlu1 %v1833_v36, %s1658_s5  ;;  %v555_v36 = vsel %vm520_vm4, %v1847_v45, 0.0 }
 0x388   : > { %559 = vadd.xlane.f32.xlu0 %v558_v53  ;;  %v551_v53 = vld [vmem:[#allocation3] sm:$0xff] }
 0x389   : > { %v553_v58 = vmul.f32 %v1973_v56, %v551_v53 }
 0x39e   : > { %570 = vperm.xlu0 %1562, %v1973_v56  }
 0x3a5   : > { %556 = vadd.xlane.f32.xlu1 %v555_v36 }
 0x3b6   : > { %575 = vperm.xlu1 %1561, %v1572_v46  }
 0x3e0   : > { %v708_v59 = vpop.permute.xlu0 %707 }
 0x3e1   : > { %v715_v28 = vsub.f32 %v1873_v60, %v708_v59 }
 0x3e3   : > { %v717_v30 = vmul.f32 1.442695, %v715_v28 }
 0x3e4   : > { %v713_v32 = vpop.permute.xlu1 %712 }
 0x3e5   : > { %1573 = vpow2.f32 %v717_v30  ;;  %v716_v61 = vsub.f32 %v1878_v0, %v713_v32 }
 0x3e7   : > { %v719_v62 = vmul.f32 1.442695, %v716_v61 }
 0x3e8   : > { %v884_v63 = vpop.permute.xlu1 %883 }
 0x3e9   : > { %1575 = vpow2.f32 %v719_v62  ;;  %v891_v31 = vsub.f32 %v1883_v5, %v884_v63  ;;  %v723_v62 = vld [vmem:[#allocation3 + $0x18] sm:$0xff] }
 0x3eb   : > { %v893_v34 = vmul.f32 1.442695, %v891_v31 }
 0x3ec   : > { %v889_v35 = vpop.permute.xlu1 %888 }
 0x3ed   : > { %v892_v45 = vsub.f32 %v1888_v9, %v889_v35  ;;  %1577 = vpow2.f32 %v893_v34  ;;  %v877_v35 = vmul.f32 1.442695, %v875_v39 }
 0x3ef   : > { %v895_v1 = vmul.f32 1.442695, %v892_v45 }
 0x3f0   : > { %v752_v2 = vpop.permute.xlu1 %751 }
 0x3f1   : > { %1579 = vpow2.f32 %v895_v1  ;;  %1485 = vmatpush3.bf16.msra.mxu0 %v752_v2  ;;  %v898_v2 = vld [vmem:[#allocation3 + $0x20] sm:$0xff] }
 0x3f2   : > { %v1574_v60 = vpop.eup %1573  ;;  %1496 = vmatprep.subr.bf16.mxu0 %v1653_v4  ;;  %1581 = vpow2.f32 %v703_v3 }
 0x3f3   : > { %v726_v0 = vsel %vm520_vm4, %v1574_v60, 0.0 }
 0x3f4   : > { %727 = vadd.xlane.f32.xlu1 %v726_v0  ;;  %v1060_v6 = vpop.permute.xlu1 %1059 }
 0x3f5   : > { %v1067_v7 = vsub.f32 %v1893_v13, %v1060_v6  ;;  %v701_v13 = vmul.f32 1.442695, %v699_v25 }
 0x3f6   : > { %v1576_v5 = vpop.eup %1575 }
 0x3f7   : > { %v729_v8 = vsel %vm520_vm4, %v1576_v5, 0.0  ;;  %v750_v9 = vpack.c.bf16 %v1576_v5, %v1574_v60  ;;  %v1069_v10 = vmul.f32 1.442695, %v1067_v7  ;;  %v899_v7 = vld [vmem:[#allocation3 + $0x28] sm:$0xff] }
 0x3f8   : > { %730 = vadd.xlane.f32.xlu0 %v729_v8  ;;  %v1065_v11 = vpop.permute.xlu1 %1064 }
 0x3f9   : > { %v1068_v12 = vsub.f32 %v1898_v17, %v1065_v11  ;;  %1487 = vmatmul.mubr.msk.bf16.vlgmr.msra.gmra.mxu0 %vm520_vm4, %v750_v9  ;;  %1583 = vpow2.f32 %v1069_v10  ;;  %v1104_v17 = vpop.permute.xlu0 %1103 }
 0x3fa   : > { %1498 = vmatprep.mubr.msk.bf16.mxu0 %vm1654_vm0, %v1653_v4  ;;  %v1578_v16 = vpop.eup %1577 }
 0x3fb   : > { %v1071_v14 = vmul.f32 1.442695, %v1068_v12  ;;  %v902_v50 = vsel %vm520_vm4, %v1578_v16, 0.0 }
 0x3fc   : > { %v928_v15 = vpop.permute.xlu1 %927 }
 0x3fd   : > { %1585 = vpow2.f32 %v1071_v14  ;;  %1497 = vmatpush3.bf16.msra.mxu0 %v928_v15 }
 0x3fe   : > { %v1580_v19 = vpop.eup %1579  ;;  %1508 = vmatprep.subr.bf16.mxu0 %v1653_v4  ;;  %1587 = vpow2.f32 %v701_v13 }
 0x3ff   : > { %v926_v20 = vpack.c.bf16 %v1580_v19, %v1578_v16  ;;  %v1582_v22 = vpop.eup %1581  ;;  %v905_v54 = vsel %vm520_vm4, %v1580_v19, 0.0  ;;  %1589 = vpow2.f32 %v877_v35 }
 0x400   : > { %v725_v31 = vmul.f32 %v1582_v22, %v723_v62 }
 0x401   : > { %1499 = vmatmul.mubr.msk.bf16.vlgmr.msra.gmra.mxu0 %vm520_vm4, %v926_v20 }
 0x402   : > { %1509 = vmatpush3.bf16.msra.mxu0 %v1104_v17  ;;  %1510 = vmatprep.mubr.msk.bf16.mxu0 %vm1654_vm0, %v1653_v4 }
 0x405   : > { %745 = vperm.xlu1 %1561, %v1582_v22  }
 0x406   : > { %v2000_v21 = vpop.eup %1583 }
 0x40a   : > { %v2002_v23 = vpop.eup %1585 }
 0x40b   : > { %v1102_v24 = vpack.c.bf16 %v2002_v23, %v2000_v21  ;;  %v1588_v25 = vpop.eup %1587  ;;  %v1081_v18 = vsel %vm520_vm4, %v2002_v23, 0.0 }
 0x40c   : > { %v1590_v45 = vpop.eup %1589 }
 0x40d   : > { %1511 = vmatmul.mubr.msk.bf16.vlgmr.msra.gmra.mxu0 %vm520_vm4, %v1102_v24  ;;  %v900_v60 = vmul.f32 %v1590_v45, %v898_v2 }
 0x40e   : > { %740 = vperm.xlu0 %1562, %v1588_v25  }
 0x411   : > { %v560_v29 = vpop.xlane.xlu0 %559 }
 0x412   : > { %v562_v33 = vadd.f32 %v560_v29, %v554_v26  ;;  %v1053_v26 = vmul.f32 1.442695, %v1051_v49 }
 0x414   : > { %565 = vst.msk [vmem:[#allocation3 + $0x8] sm:$0xff] %vm424_vm2, %v562_v33 }
 0x419   : > { %v571_v4 = vpop.permute.xlu0 %570 }
 0x41a   : > { %v578_v40 = vmul.f32 0.0, %v571_v4 }
 0x41b   : > { %v1171_v14 = vld [vmem:[#allocation3 + $0x8] sm:$0xff] }
 0x41c   : > { %v631_v44 = vadd.f32 %v1868_v55, %v578_v40  ;;  %v722_v55 = vld [vmem:[#allocation3 + $0x10] sm:$0xff] }
 0x41d   : > { %v724_v32 = vmul.f32 %v1588_v25, %v722_v55  ;;  %v1078_v25 = vsel %vm520_vm4, %v2000_v21, 0.0 }
 0x41e   : > { %633 = vst.msk [vmem:[#allocation4] sm:$0xff] %vm470_vm1, %v631_v44 }
 0x425   : > { %v736_v42 = vld [vmem:[#allocation4] sm:$0xff] }
 0x429   : > { %903 = vadd.xlane.f32.xlu1 %v902_v50 }
 0x42d   : > { %906 = vadd.xlane.f32.xlu0 %v905_v54 }
 0x42e   : > { %v557_v36 = vpop.xlane.xlu1 %556 }
 0x42f   : > { %v561_v46 = vadd.f32 %v557_v36, %v553_v58 }
 0x431   : > { %564 = vst.msk [vmem:[#allocation3] sm:$0xff] %vm424_vm2, %v561_v46 }
 0x432   : > { %v576_v59 = vpop.permute.xlu1 %575 }
 0x433   : > { %v579_v28 = vmul.f32 0.0, %v576_v59 }
 0x435   : > { %v632_v30 = vadd.f32 %v1870_v57, %v579_v28  ;;  %v879_v57 = vmul.f32 1.442695, %v876_v43  ;;  %v1055_v43 = vmul.f32 1.442695, %v1052_v52 }
 0x437   : > { %634 = vst.msk [vmem:[#allocation4 + $0x8] sm:$0xff] %vm470_vm1, %v632_v30  ;;  %1591 = vpow2.f32 %v879_v57 }
 0x438   : > { %1593 = vpow2.f32 %v1055_v43  ;;  %v1170_v29 = vld [vmem:[#allocation3] sm:$0xff] }
 0x439   : > { %1595 = vrcp.f32 %v1171_v14 }
 0x43e   : > { %v737_v53 = vld [vmem:[#allocation4 + $0x8] sm:$0xff] }
 0x444   : > { %v1592_v3 = vpop.eup %1591 }
 0x445   : > { %v901_v27 = vmul.f32 %v1592_v3, %v899_v7  ;;  %v1594_v48 = vpop.eup %1593 }
 0x446   : > { %v1596_v17 = vpop.eup %1595 }
 0x47d   : > { %v728_v61 = vpop.xlane.xlu1 %727 }
 0x47e   : > { %v732_v63 = vadd.f32 %v728_v61, %v724_v32  ;;  %v1074_v32 = vld [vmem:[#allocation3 + $0x30] sm:$0xff] }
 0x480   : > { %734 = vst.msk [vmem:[#allocation3 + $0x10] sm:$0xff] %vm424_vm2, %v732_v63  ;;  %v1075_v63 = vld [vmem:[#allocation3 + $0x38] sm:$0xff] }
 0x481   : > { %v731_v34 = vpop.xlane.xlu0 %730  ;;  %v2024_v1 = vpop.permute.xlu1 %745 }
 0x482   : > { %v733_v56 = vadd.f32 %v731_v34, %v725_v31  ;;  %v749_v54 = vmul.f32 %v2024_v1, %v737_v53  ;;  %v1077_v34 = vmul.f32 %v1594_v48, %v1075_v63 }
 0x484   : > { %735 = vst.msk [vmem:[#allocation3 + $0x18] sm:$0xff] %vm424_vm2, %v733_v56 }
 0x487   : > { %v1190_v33 = vld [vmem:[#allocation3 + $0x10] sm:$0xff] }
 0x489   : > { %v2026_v0 = vpop.permute.xlu0 %740 }
 0x48a   : > { %v748_v47 = vmul.f32 %v2026_v0, %v736_v42 }
 0x48b   : > { %v1191_v15 = vld [vmem:[#allocation3 + $0x18] sm:$0xff] }
 0x48c   : > { %1597 = vrcp.f32 %v1191_v15 }
 0x499   : > { %v1598_v22 = vpop.eup %1597 }
 0x4b2   : > { %v904_v6 = vpop.xlane.xlu1 %903 }
 0x4b3   : > { %v908_v5 = vadd.f32 %v904_v6, %v900_v60 }
 0x4b5   : > { %910 = vst.msk [vmem:[#allocation3 + $0x20] sm:$0xff] %vm424_vm2, %v908_v5 }
 0x4b6   : > { %v907_v37 = vpop.xlane.xlu0 %906 }
 0x4b7   : > { %v909_v39 = vadd.f32 %v907_v37, %v901_v27 }
 0x4b9   : > { %911 = vst.msk [vmem:[#allocation3 + $0x28] sm:$0xff] %vm424_vm2, %v909_v39  ;;  %v791_v38 = vpop.f32.mrf.mxu0 }
 0x4ba   : > { %800 = vrot.lane.b32.xlu1 %v791_v38, %s1659_s6 }
 0x4bb   : > { %v1488_v41 = vpop.f32.mrf.mxu0 }
 0x4bc   : > { %v1210_v40 = vld [vmem:[#allocation3 + $0x20] sm:$0xff] }
 0x4bd   : > { %v794_v8 = vpop.f32.mrf.mxu0 }
 0x4be   : > { %802 = vrot.lane.b32.xlu0 %v794_v8, %s1659_s6 }
 0x4bf   : > { %v1489_v9 = vpop.f32.mrf.mxu0 }
 0x4c0   : > { %v1211_v52 = vld [vmem:[#allocation3 + $0x28] sm:$0xff] }
 0x4c1   : > { %v967_v10 = vpop.f32.mrf.mxu0  ;;  %1599 = vrcp.f32 %v1211_v52 }
 0x4c2   : > { %916 = vperm.xlu0 %1562, %v1590_v45   ;;  %1601 = vpow2.f32 %v1053_v26 }
 0x4c3   : > { %v1500_v11 = vpop.f32.mrf.mxu0  ;;  %1603 = vrcp.f32 %v1170_v29 }
 0x4c4   : > { %1605 = vrcp.f32 %v1190_v33 }
 0x4c5   : > { %v970_v12 = vpop.f32.mrf.mxu0  ;;  %1607 = vrcp.f32 %v1210_v40 }
 0x4c6   : > { %976 = vrot.lane.b32.xlu0 %v967_v10, %s1658_s5 }
 0x4c7   : > { %v1501_v13 = vpop.f32.mrf.mxu0 }
 0x4ca   : > { %978 = vrot.lane.b32.xlu0 %v970_v12, %s1658_s5 }
 0x4cd   : > { %v1143_v51 = vpop.f32.mrf.mxu0 }
 0x4ce   : > { %1097 = vperm.xlu0 %1562, %v1594_v48   ;;  %v1600_v24 = vpop.eup %1599 }
 0x4cf   : > { %v1512_v16 = vpop.f32.mrf.mxu0  ;;  %v1602_v4 = vpop.eup %1601 }
 0x4d0   : > { %v1604_v21 = vpop.eup %1603  ;;  %v1076_v61 = vmul.f32 %v1602_v4, %v1074_v32 }
 0x4d1   : > { %v1146_v19 = vpop.f32.mrf.mxu0  ;;  %v1606_v23 = vpop.eup %1605 }
 0x4d2   : > { %1154 = vrot.lane.b32.xlu0 %v1146_v19, %s1657_s29  ;;  %v1608_v44 = vpop.eup %1607 }
 0x4d3   : > { %v1513_v20 = vpop.f32.mrf.mxu0 }
 0x4d6   : > { %1181 = vperm.xlu0 %1562, %v1596_v17  }
 0x4da   : > { %1201 = vperm.xlu0 %1562, %v1598_v22  }
 0x4de   : > { %1079 = vadd.xlane.f32.xlu1 %v1078_v25  ;;  %1221 = vperm.xlu0 %1562, %v1600_v24  }
 0x4e2   : > { %1082 = vadd.xlane.f32.xlu1 %v1081_v18 }
 0x4f3   : > { %921 = vperm.xlu1 %1561, %v1592_v3  }
 0x4f7   : > { %1092 = vperm.xlu1 %1561, %v1602_v4  }
 0x4fb   : > { %1152 = vrot.lane.b32.xlu1 %v1143_v51, %s1657_s29 }
 0x4ff   : > { %1176 = vperm.xlu1 %1561, %v1604_v21  }
 0x503   : > { %1196 = vperm.xlu1 %1561, %v1606_v23  }
 0x507   : > { %1216 = vperm.xlu1 %1561, %v1608_v44  }
 0x52c   : > { %v801_v49 = vpop.permute.xlu1 %800 }
 0x52d   : > { %v806_v50 = vadd.f32 %v801_v49, %v748_v47 }
 0x52f   : > { %809 = vst.msk [vmem:[#allocation4] sm:$0xff] %vm808_vm5, %v806_v50 }
 0x530   : > { %v803_v58 = vpop.permute.xlu0 %802 }
 0x531   : > { %v807_v36 = vadd.f32 %v803_v58, %v749_v54 }
 0x533   : > { %810 = vst.msk [vmem:[#allocation4 + $0x8] sm:$0xff] %vm808_vm5, %v807_v36 }
 0x536   : > { %v912_v59 = vld [vmem:[#allocation4] sm:$0xff] }
 0x53a   : > { %v913_v45 = vld [vmem:[#allocation4 + $0x8] sm:$0xff] }
 0x53d   : > { %v917_v46 = vpop.permute.xlu0 %916 }
 0x53e   : > { %v924_v28 = vmul.f32 %v917_v46, %v912_v59 }
 0x541   : > { %v977_v30 = vpop.permute.xlu0 %976 }
 0x542   : > { %v982_v55 = vadd.f32 %v977_v30, %v924_v28 }
 0x544   : > { %985 = vst.msk [vmem:[#allocation4] sm:$0xff] %vm984_vm6, %v982_v55 }
 0x545   : > { %v979_v2 = vpop.permute.xlu0 %978 }
 0x549   : > { %v1098_v27 = vpop.permute.xlu0 %1097 }
 0x54b   : > { %v1088_v6 = vld [vmem:[#allocation4] sm:$0xff] }
 0x54d   : > { %v1155_v43 = vpop.permute.xlu0 %1154 }
 0x551   : > { %v1182_v13 = vpop.permute.xlu0 %1181 }
 0x555   : > { %v1202_v19 = vpop.permute.xlu0 %1201 }
 0x559   : > { %v1222_v18 = vpop.permute.xlu0 %1221 }
 0x567   : > { %v1080_v62 = vpop.xlane.xlu1 %1079 }
 0x568   : > { %v1084_v31 = vadd.f32 %v1080_v62, %v1076_v61 }
 0x56a   : > { %1086 = vst.msk [vmem:[#allocation3 + $0x30] sm:$0xff] %vm424_vm2, %v1084_v31 }
 0x56b   : > { %v1083_v56 = vpop.xlane.xlu1 %1082 }
 0x56c   : > { %v1085_v35 = vadd.f32 %v1083_v56, %v1077_v34 }
 0x56e   : > { %1087 = vst.msk [vmem:[#allocation3 + $0x38] sm:$0xff] %vm424_vm2, %v1085_v35 }
 0x56f   : > { %v922_v57 = vpop.permute.xlu1 %921 }
 0x570   : > { %v925_v1 = vmul.f32 %v922_v57, %v913_v45 }
 0x571   : > { %v1230_v60 = vld [vmem:[#allocation3 + $0x30] sm:$0xff] }
 0x572   : > { %v983_v3 = vadd.f32 %v979_v2, %v925_v1  ;;  %1609 = vrcp.f32 %v1230_v60 }
 0x573   : > { %v1093_v0 = vpop.permute.xlu1 %1092 }
 0x574   : > { %986 = vst.msk [vmem:[#allocation4 + $0x8] sm:$0xff] %vm984_vm6, %v983_v3  ;;  %v1100_v5 = vmul.f32 %v1093_v0, %v1088_v6 }
 0x575   : > { %v1231_v7 = vld [vmem:[#allocation3 + $0x38] sm:$0xff] }
 0x576   : > { %1611 = vrcp.f32 %v1231_v7 }
 0x577   : > { %v1153_v37 = vpop.permute.xlu1 %1152 }
 0x578   : > { %v1158_v39 = vadd.f32 %v1153_v37, %v1100_v5 }
 0x57a   : > { %1161 = vst.msk [vmem:[#allocation4] sm:$0xff] %vm1160_vm7, %v1158_v39 }
 0x57b   : > { %v1089_v38 = vld [vmem:[#allocation4 + $0x8] sm:$0xff]  ;;  %v1177_v11 = vpop.permute.xlu1 %1176 }
 0x57c   : > { %v1101_v41 = vmul.f32 %v1098_v27, %v1089_v38 }
 0x57e   : > { %v1159_v8 = vadd.f32 %v1155_v43, %v1101_v41 }
 0x57f   : > { %v1610_v9 = vpop.eup %1609  ;;  %v1197_v52 = vpop.permute.xlu1 %1196 }
 0x580   : > { %1162 = vst.msk [vmem:[#allocation4 + $0x8] sm:$0xff] %vm1160_vm7, %v1159_v8  ;;  %1236 = vperm.xlu1 %1561, %v1610_v9  }
 0x581   : > { %v1168_v10 = vld [vmem:[#allocation4] sm:$0xff] }
 0x582   : > { %v1184_v12 = vmul.f32 %v1177_v11, %v1168_v10 }
 0x583   : > { %v1612_v14 = vpop.eup %1611  ;;  %v1217_v24 = vpop.permute.xlu1 %1216 }
 0x584   : > { %1186 = vst.msk [vmem:[#allocation4] sm:$0xff] %vm470_vm1, %v1184_v12  ;;  %1241 = vperm.xlu0 %1562, %v1612_v14  }
 0x587   : > { %v1169_v15 = vld [vmem:[#allocation4 + $0x8] sm:$0xff] }
 0x588   : > { %v1185_v48 = vmul.f32 %v1182_v13, %v1169_v15 }
 0x58a   : > { %1187 = vst.msk [vmem:[#allocation4 + $0x8] sm:$0xff] %vm470_vm1, %v1185_v48 }
 0x58b   : > { %v1188_v51 = vld [vmem:[#allocation4] sm:$0xff] }
 0x58c   : > { %v1204_v16 = vmul.f32 %v1197_v52, %v1188_v51 }
 0x58e   : > { %1206 = vst.msk [vmem:[#allocation4] sm:$0xff] %vm808_vm5, %v1204_v16 }
 0x591   : > { %v1189_v20 = vld [vmem:[#allocation4 + $0x8] sm:$0xff] }
 0x592   : > { %v1205_v17 = vmul.f32 %v1202_v19, %v1189_v20 }
 0x594   : > { %1207 = vst.msk [vmem:[#allocation4 + $0x8] sm:$0xff] %vm808_vm5, %v1205_v17 }
 0x595   : > { %v1208_v22 = vld [vmem:[#allocation4] sm:$0xff] }
 0x596   : > { %v1224_v25 = vmul.f32 %v1217_v24, %v1208_v22 }
 0x598   : > { %1226 = vst.msk [vmem:[#allocation4] sm:$0xff] %vm984_vm6, %v1224_v25 }
 0x59b   : > { %v1209_v26 = vld [vmem:[#allocation4 + $0x8] sm:$0xff] }
 0x59c   : > { %v1225_v29 = vmul.f32 %v1222_v18, %v1209_v26 }
 0x59e   : > { %1227 = vst.msk [vmem:[#allocation4 + $0x8] sm:$0xff] %vm984_vm6, %v1225_v29 }
 0x59f   : > { %v1228_v33 = vld [vmem:[#allocation4] sm:$0xff] }
 0x5a5   : > { %v1229_v21 = vld [vmem:[#allocation4 + $0x8] sm:$0xff] }
 0x5fb   : > { %v1237_v4 = vpop.permute.xlu1 %1236 }
 0x5fc   : > { %v1244_v40 = vmul.f32 %v1237_v4, %v1228_v33 }
 0x5fe   : > { %1246 = vst.msk [vmem:[#allocation4] sm:$0xff] %vm1160_vm7, %v1244_v40 }
 0x5ff   : > { %v1242_v23 = vpop.permute.xlu0 %1241 }
 0x600   : > { %v1245_v44 = vmul.f32 %v1242_v23, %v1229_v21 }
 0x602   : > { %1247 = vst.msk [vmem:[#allocation4 + $0x8] sm:$0xff] %vm1160_vm7, %v1245_v44 }
 0x605   : > { %v1248_v42 = vld [vmem:[#allocation4] sm:$0xff] }
 0x609   : > { %v1249_v47 = vld [vmem:[#allocation4 + $0x8] sm:$0xff] }
 0x60a   : > { %v1448_v49 = vpack.c.bf16 %v1249_v47, %v1248_v42 }
 0x60c   : > { %1449 = vst [vmem:[%s416_s9] sm:$0xff] %v1448_v49  }
 0x60d PF: > { %s14_s19 = sadd.s32 1, %s1651_s19   ;;  %s2090_s15 = smov %s1639_s16 }
 0x60e   : > { %p11_p10 = scmp.ge.s32.totalorder %s14_s19, 4   ;;  %s2091_s16 = smov %s1724_s24 }
 0x60f   : > { %s2092_s17 = smov %s1647_s18  ;;  %s2093_s18 = smov %s2095_s20 }
 0x610   :  { %13 = sbr.rel (!%p11_p10) target bundleno = 3 (0x3), region = 181 }

</bundles_post_ra>
